<compile_context>
chip_gen: v7x
topology: tpu7x:2x2x1
jax: 0.10.0
libtpu: 0.0.40
codegen_flags: <defaults>
</compile_context>

<pallas_src>
import functools

import jax
import jax.numpy as jnp
from jax import lax
from jax.experimental import pallas as pl
from jax.experimental.pallas import tpu as pltpu


def _res2net_stage_kernel(xc_ref, w_ref, scale_ref, shift_ref, y_ref,
                          pin_ref, acc_ref, *, H, W, wch):
    """One (batch-sample, stage) pair per grid step.

    Grid = (N, split-1); axis 0 (batch) is "parallel", axis 1 (stage) is
    "arbitrary" and innermost, so the carry held in `pin_ref` is valid.

    xc_ref    : (H, W, wch)        chunk i+1 of sample n (bf16)
    w_ref     : (9, wch, wch)      shared conv weight, tap-major (in, out) (bf16)
    scale_ref : (1, wch)           folded BN scale  (gamma / sqrt(var+eps)), f32
    shift_ref : (1, wch)           folded BN shift  (beta - mean*scale), f32
    y_ref     : (H, W, wch)        stage output (f32)
    pin_ref   : (H+2, W+2, wch)    padded stage input; interior carries the
                                   previous stage's output (VMEM, bf16)
    acc_ref   : (H*W, wch)         f32 matmul accumulator (VMEM)
    """
    i = pl.program_id(1)  # stage index (sequential per sample)

    @pl.when(i == 0)
    def _():
        # Zero halo (stays zero for all stages of this sample), then interior.
        pin_ref[...] = jnp.zeros_like(pin_ref)
        pin_ref[1:1 + H, 1:1 + W, :] = xc_ref[...]

    @pl.when(i > 0)
    def _():
        # stage input = chunk_{i+1} + previous stage output (carried interior).
        pin_ref[1:1 + H, 1:1 + W, :] = pin_ref[1:1 + H, 1:1 + W, :] + xc_ref[...]

    # 3x3 'SAME' conv as 9 accumulating MXU matmuls.
    acc_ref[...] = jnp.zeros_like(acc_ref)
    for t in range(9):
        di, dj = t // 3, t % 3
        patch = pin_ref[di:di + H, dj:dj + W, :].reshape(H * W, wch)
        acc_ref[...] += jnp.dot(patch, w_ref[t],
                                preferred_element_type=jnp.float32)

    # Folded (inference) BatchNorm + ReLU in f32.
    out2d = jnp.maximum(acc_ref[...] * scale_ref[...] + shift_ref[...], 0.0)
    out3d = out2d.reshape(H, W, wch)

    y_ref[...] = out3d.astype(y_ref.dtype)
    # Carry this stage's output (bf16) to the next stage via the pin interior.
    pin_ref[1:1 + H, 1:1 + W, :] = out3d.astype(pin_ref.dtype)


def res2net_layer(x, conv_w_oihw, gamma, beta, run_mean, run_var,
                  split=4, eps=1e-5, compute_dtype=jnp.bfloat16):
    """Pallas implementation of Res2NetLayer.forward. x is NCHW float32."""
    N, C, H, W = x.shape
    assert C % split == 0
    wch = C // split
    Hp, Wp = H + 2, W + 2

    # Chunk-major NHWC; only chunks 1..split-1 feed the kernel (chunk0 is a
    # pure passthrough and is stitched back from x directly).
    xc = x.reshape(N, split, wch, H, W).transpose(1, 0, 3, 4, 2)   # (s,N,H,W,w)
    xc_in = xc[1:].astype(compute_dtype)                           # (s-1,N,H,W,w)

    # Shared weight: OIHW -> HWIO -> (tap, in, out), tap = di*3 + dj.
    w9 = conv_w_oihw.transpose(2, 3, 1, 0).reshape(9, wch, wch).astype(compute_dtype)
    scale = (gamma / jnp.sqrt(run_var + eps)).astype(jnp.float32)
    shift = (beta - run_mean * scale).astype(jnp.float32)
    scale = scale.reshape(1, wch)
    shift = shift.reshape(1, wch)

    kernel = functools.partial(_res2net_stage_kernel, H=H, W=W, wch=wch)

    stages = pl.pallas_call(
        kernel,
        out_shape=jax.ShapeDtypeStruct((split - 1, N, H, W, wch), jnp.float32),
        grid_spec=pltpu.PrefetchScalarGridSpec(
            num_scalar_prefetch=0,
            grid=(N, split - 1),
            in_specs=[
                pl.BlockSpec((None, None, H, W, wch), lambda n, i: (i, n, 0, 0, 0)),
                pl.BlockSpec((9, wch, wch), lambda n, i: (0, 0, 0)),
                pl.BlockSpec((1, wch), lambda n, i: (0, 0)),
                pl.BlockSpec((1, wch), lambda n, i: (0, 0)),
            ],
            out_specs=pl.BlockSpec((None, None, H, W, wch),
                                   lambda n, i: (i, n, 0, 0, 0)),
            scratch_shapes=[
                pltpu.VMEM((Hp, Wp, wch), compute_dtype),   # padded input / carry
                pltpu.VMEM((H * W, wch), jnp.float32),      # matmul accumulator
            ],
        ),
        compiler_params=pltpu.CompilerParams(
            dimension_semantics=("parallel", "arbitrary"),
            vmem_limit_bytes=64 * 1024 * 1024,
        ),
    )(xc_in, w9, scale, shift)

    # Stitch: [chunk0 (untouched), stage0, stage1, ...] along channel, NCHW.
    rest = stages.transpose(1, 0, 4, 2, 3).reshape(N, (split - 1) * wch, H, W)
    return jnp.concatenate([x[:, :wch], rest], axis=1)


def res2net_layer_ref(x, conv_w_oihw, gamma, beta, run_mean, run_var,
                      split=4, eps=1e-5):
    """Pure-JAX f32 reference (lax.conv) mirroring the PyTorch forward."""
    N, C, H, W = x.shape
    wch = C // split
    w_hwio = conv_w_oihw.transpose(2, 3, 1, 0)
    scale = gamma / jnp.sqrt(run_var + eps)
    shift = beta - run_mean * scale
    feats = [x[:, c * wch:(c + 1) * wch].transpose(0, 2, 3, 1) for c in range(split)]
    outs = [feats[0]]
    next_y = None
    for i in range(split - 1):
        inp = feats[i + 1] if i == 0 else next_y + feats[i + 1]
        conv = lax.conv_general_dilated(
            inp, w_hwio, window_strides=(1, 1), padding='SAME',
            dimension_numbers=('NHWC', 'HWIO', 'NHWC'))
        next_y = jnp.maximum(conv * scale + shift, 0.0)
        outs.append(next_y)
    return jnp.concatenate([o.transpose(0, 3, 1, 2) for o in outs], axis=1)


if __name__ == "__main__":
    N, C, H, W, split = 2, 16, 16, 16, 4
    wch = C // split

    key = jax.random.PRNGKey(0)
    kx, kw, kg, kb, km, kv = jax.random.split(key, 6)
    x = jax.random.normal(kx, (N, C, H, W), jnp.float32)
    conv_w = 0.2 * jax.random.normal(kw, (wch, wch, 3, 3), jnp.float32)   # OIHW
    gamma = 1.0 + 0.1 * jax.random.normal(kg, (wch,), jnp.float32)
    beta = 0.1 * jax.random.normal(kb, (wch,), jnp.float32)
    run_mean = 0.1 * jax.random.normal(km, (wch,), jnp.float32)
    run_var = 0.5 + jnp.abs(jax.random.normal(kv, (wch,), jnp.float32))

    y = res2net_layer(x, conv_w, gamma, beta, run_mean, run_var, split=split)
    y = jax.block_until_ready(y)

    y_ref = res2net_layer_ref(x, conv_w, gamma, beta, run_mean, run_var, split=split)
    assert y.shape == (N, C, H, W)
    err = float(jnp.max(jnp.abs(y - y_ref)))
    # bf16 matmul inputs (f32 accumulate) -> loosened tolerance vs the f32 ref.
    assert jnp.allclose(y, y_ref, rtol=5e-2, atol=5e-2), f"max abs err = {err}"
    print("KERNEL_OK")
</pallas_src>

<mosaic_0001>
module attributes {stable_mosaic.version = 11 : i64} {
  func.func @_res2net_stage_kernel(%arg0: i32, %arg1: i32, %arg2: memref<1x1x16x16x4xbf16, #tpu.memory_space<vmem>>, %arg3: memref<9x4x4xbf16, #tpu.memory_space<vmem>>, %arg4: memref<1x4xf32, #tpu.memory_space<vmem>>, %arg5: memref<1x4xf32, #tpu.memory_space<vmem>>, %arg6: memref<1x1x16x16x4xf32, #tpu.memory_space<vmem>>, %arg7: memref<18x18x4xbf16, #tpu.memory_space<vmem>>, %arg8: memref<256x4xf32, #tpu.memory_space<vmem>>) attributes {dimension_semantics = [#tpu.dimension_semantics<parallel>, #tpu.dimension_semantics<arbitrary>], iteration_bounds = array<i64: 2, 3>, scalar_prefetch = 0 : i64, scratch_operands = 2 : i64, tpu.core_type = #tpu.core_type<tc>, window_params = [{transform_indices = @transform_0, window_bounds = array<i64: 1, 1, 16, 16, 4>}, {pipeline_mode = #tpu.pipeline_mode<synchronous>, transform_indices = @transform_1, window_bounds = array<i64: 9, 4, 4>}, {pipeline_mode = #tpu.pipeline_mode<synchronous>, transform_indices = @transform_2, window_bounds = array<i64: 1, 4>}, {pipeline_mode = #tpu.pipeline_mode<synchronous>, transform_indices = @transform_3, window_bounds = array<i64: 1, 4>}, {transform_indices = @transform_4, window_bounds = array<i64: 1, 1, 16, 16, 4>}]} {
    %c0_i32 = arith.constant 0 : i32
    %0 = arith.cmpi eq, %arg1, %c0_i32 : i32
    %1 = arith.extui %0 : i1 to i32
    %c0_i32_0 = arith.constant 0 : i32
    %2 = arith.cmpi ne, %1, %c0_i32_0 : i32
    scf.if %2 {
      %cst_110 = arith.constant 0.000000e+00 : bf16
      %95 = vector.broadcast %cst_110 : bf16 to vector<18x18x4xbf16>
      %c0_111 = arith.constant 0 : index
      %c0_112 = arith.constant 0 : index
      %c0_113 = arith.constant 0 : index
      %96 = vector.load %arg7[%c0_111, %c0_112, %c0_113] : memref<18x18x4xbf16, #tpu.memory_space<vmem>>, vector<18x18x4xbf16>
      tpu.vector_store %arg7[%c0_111, %c0_112, %c0_113], %95 {strides = array<i32>} : memref<18x18x4xbf16, #tpu.memory_space<vmem>>, vector<18x18x4xbf16>,
      %c0_114 = arith.constant 0 : index
      %c0_115 = arith.constant 0 : index
      %c0_116 = arith.constant 0 : index
      %c0_117 = arith.constant 0 : index
      %c0_118 = arith.constant 0 : index
      %97 = vector.load %arg2[%c0_114, %c0_115, %c0_116, %c0_117, %c0_118] : memref<1x1x16x16x4xbf16, #tpu.memory_space<vmem>>, vector<1x1x16x16x4xbf16>
      %98 = vector.shape_cast %97 : vector<1x1x16x16x4xbf16> to vector<16x16x4xbf16>
      %c1_119 = arith.constant 1 : index
      %c1_120 = arith.constant 1 : index
      %c0_121 = arith.constant 0 : index
      %99 = vector.load %arg7[%c1_119, %c1_120, %c0_121] : memref<18x18x4xbf16, #tpu.memory_space<vmem>>, vector<16x16x4xbf16>
      tpu.vector_store %arg7[%c1_119, %c1_120, %c0_121], %98 {strides = array<i32>} : memref<18x18x4xbf16, #tpu.memory_space<vmem>>, vector<16x16x4xbf16>,
    } else {
    }
    %c0_i32_1 = arith.constant 0 : i32
    %3 = arith.cmpi sgt, %arg1, %c0_i32_1 : i32
    %4 = arith.extui %3 : i1 to i32
    %c0_i32_2 = arith.constant 0 : i32
    %5 = arith.cmpi ne, %4, %c0_i32_2 : i32
    scf.if %5 {
      %c1_110 = arith.constant 1 : index
      %c1_111 = arith.constant 1 : index
      %c0_112 = arith.constant 0 : index
      %95 = vector.load %arg7[%c1_110, %c1_111, %c0_112] : memref<18x18x4xbf16, #tpu.memory_space<vmem>>, vector<16x16x4xbf16>
      %c0_113 = arith.constant 0 : index
      %c0_114 = arith.constant 0 : index
      %c0_115 = arith.constant 0 : index
      %c0_116 = arith.constant 0 : index
      %c0_117 = arith.constant 0 : index
      %96 = vector.load %arg2[%c0_113, %c0_114, %c0_115, %c0_116, %c0_117] : memref<1x1x16x16x4xbf16, #tpu.memory_space<vmem>>, vector<1x1x16x16x4xbf16>
      %97 = vector.shape_cast %96 : vector<1x1x16x16x4xbf16> to vector<16x16x4xbf16>
      %98 = arith.addf %95, %97 : vector<16x16x4xbf16>
      %c1_118 = arith.constant 1 : index
      %c1_119 = arith.constant 1 : index
      %c0_120 = arith.constant 0 : index
      %99 = vector.load %arg7[%c1_118, %c1_119, %c0_120] : memref<18x18x4xbf16, #tpu.memory_space<vmem>>, vector<16x16x4xbf16>
      tpu.vector_store %arg7[%c1_118, %c1_119, %c0_120], %98 {strides = array<i32>} : memref<18x18x4xbf16, #tpu.memory_space<vmem>>, vector<16x16x4xbf16>,
    } else {
    }
    %cst = arith.constant 0.000000e+00 : f32
    %6 = vector.broadcast %cst : f32 to vector<256x4xf32>
    %c0 = arith.constant 0 : index
    %c0_3 = arith.constant 0 : index
    %7 = vector.load %arg8[%c0, %c0_3] : memref<256x4xf32, #tpu.memory_space<vmem>>, vector<256x4xf32>
    tpu.vector_store %arg8[%c0, %c0_3], %6 {strides = array<i32>} : memref<256x4xf32, #tpu.memory_space<vmem>>, vector<256x4xf32>,
    %c0_4 = arith.constant 0 : index
    %c0_5 = arith.constant 0 : index
    %c0_6 = arith.constant 0 : index
    %8 = vector.load %arg7[%c0_4, %c0_5, %c0_6] : memref<18x18x4xbf16, #tpu.memory_space<vmem>>, vector<16x16x4xbf16>
    %9 = vector.shape_cast %8 : vector<16x16x4xbf16> to vector<256x4xbf16>
    %c0_7 = arith.constant 0 : index
    %c0_8 = arith.constant 0 : index
    %10 = vector.load %arg8[%c0_7, %c0_8] : memref<256x4xf32, #tpu.memory_space<vmem>>, vector<256x4xf32>
    %c0_9 = arith.constant 0 : index
    %c0_10 = arith.constant 0 : index
    %c0_11 = arith.constant 0 : index
    %11 = vector.load %arg3[%c0_9, %c0_10, %c0_11] : memref<9x4x4xbf16, #tpu.memory_space<vmem>>, vector<1x4x4xbf16>
    %12 = vector.shape_cast %11 : vector<1x4x4xbf16> to vector<4x4xbf16>
    %cst_12 = arith.constant dense<0.000000e+00> : vector<256x4xf32>
    %13 = tpu.matmul %9, %12, %cst_12 {dimension_numbers = #tpu.dot_dimension_numbers<[1], [0], [0], [1], [0, 0, 1, 1], [], []>} : vector<256x4xbf16>, vector<4x4xbf16>, vector<256x4xf32> -> vector<256x4xf32>
    %14 = arith.addf %10, %13 : vector<256x4xf32>
    %c0_13 = arith.constant 0 : index
    %c0_14 = arith.constant 0 : index
    %15 = vector.load %arg8[%c0_13, %c0_14] : memref<256x4xf32, #tpu.memory_space<vmem>>, vector<256x4xf32>
    tpu.vector_store %arg8[%c0_13, %c0_14], %14 {strides = array<i32>} : memref<256x4xf32, #tpu.memory_space<vmem>>, vector<256x4xf32>,
    %c0_15 = arith.constant 0 : index
    %c1 = arith.constant 1 : index
    %c0_16 = arith.constant 0 : index
    %16 = vector.load %arg7[%c0_15, %c1, %c0_16] : memref<18x18x4xbf16, #tpu.memory_space<vmem>>, vector<16x16x4xbf16>
    %17 = vector.shape_cast %16 : vector<16x16x4xbf16> to vector<256x4xbf16>
    %c0_17 = arith.constant 0 : index
    %c0_18 = arith.constant 0 : index
    %18 = vector.load %arg8[%c0_17, %c0_18] : memref<256x4xf32, #tpu.memory_space<vmem>>, vector<256x4xf32>
    %c1_19 = arith.constant 1 : index
    %c0_20 = arith.constant 0 : index
    %c0_21 = arith.constant 0 : index
    %19 = vector.load %arg3[%c1_19, %c0_20, %c0_21] : memref<9x4x4xbf16, #tpu.memory_space<vmem>>, vector<1x4x4xbf16>
    %20 = vector.shape_cast %19 : vector<1x4x4xbf16> to vector<4x4xbf16>
    %cst_22 = arith.constant dense<0.000000e+00> : vector<256x4xf32>
    %21 = tpu.matmul %17, %20, %cst_22 {dimension_numbers = #tpu.dot_dimension_numbers<[1], [0], [0], [1], [0, 0, 1, 1], [], []>} : vector<256x4xbf16>, vector<4x4xbf16>, vector<256x4xf32> -> vector<256x4xf32>
    %22 = arith.addf %18, %21 : vector<256x4xf32>
    %c0_23 = arith.constant 0 : index
    %c0_24 = arith.constant 0 : index
    %23 = vector.load %arg8[%c0_23, %c0_24] : memref<256x4xf32, #tpu.memory_space<vmem>>, vector<256x4xf32>
    tpu.vector_store %arg8[%c0_23, %c0_24], %22 {strides = array<i32>} : memref<256x4xf32, #tpu.memory_space<vmem>>, vector<256x4xf32>,
    %c0_25 = arith.constant 0 : index
    %c2 = arith.constant 2 : index
    %c0_26 = arith.constant 0 : index
    %24 = vector.load %arg7[%c0_25, %c2, %c0_26] : memref<18x18x4xbf16, #tpu.memory_space<vmem>>, vector<16x16x4xbf16>
    %25 = vector.shape_cast %24 : vector<16x16x4xbf16> to vector<256x4xbf16>
    %c0_27 = arith.constant 0 : index
    %c0_28 = arith.constant 0 : index
    %26 = vector.load %arg8[%c0_27, %c0_28] : memref<256x4xf32, #tpu.memory_space<vmem>>, vector<256x4xf32>
    %c2_29 = arith.constant 2 : index
    %c0_30 = arith.constant 0 : index
    %c0_31 = arith.constant 0 : index
    %27 = vector.load %arg3[%c2_29, %c0_30, %c0_31] : memref<9x4x4xbf16, #tpu.memory_space<vmem>>, vector<1x4x4xbf16>
    %28 = vector.shape_cast %27 : vector<1x4x4xbf16> to vector<4x4xbf16>
    %cst_32 = arith.constant dense<0.000000e+00> : vector<256x4xf32>
    %29 = tpu.matmul %25, %28, %cst_32 {dimension_numbers = #tpu.dot_dimension_numbers<[1], [0], [0], [1], [0, 0, 1, 1], [], []>} : vector<256x4xbf16>, vector<4x4xbf16>, vector<256x4xf32> -> vector<256x4xf32>
    %30 = arith.addf %26, %29 : vector<256x4xf32>
    %c0_33 = arith.constant 0 : index
    %c0_34 = arith.constant 0 : index
    %31 = vector.load %arg8[%c0_33, %c0_34] : memref<256x4xf32, #tpu.memory_space<vmem>>, vector<256x4xf32>
    tpu.vector_store %arg8[%c0_33, %c0_34], %30 {strides = array<i32>} : memref<256x4xf32, #tpu.memory_space<vmem>>, vector<256x4xf32>,
    %c1_35 = arith.constant 1 : index
    %c0_36 = arith.constant 0 : index
    %c0_37 = arith.constant 0 : index
    %32 = vector.load %arg7[%c1_35, %c0_36, %c0_37] : memref<18x18x4xbf16, #tpu.memory_space<vmem>>, vector<16x16x4xbf16>
    %33 = vector.shape_cast %32 : vector<16x16x4xbf16> to vector<256x4xbf16>
    %c0_38 = arith.constant 0 : index
    %c0_39 = arith.constant 0 : index
    %34 = vector.load %arg8[%c0_38, %c0_39] : memref<256x4xf32, #tpu.memory_space<vmem>>, vector<256x4xf32>
    %c3 = arith.constant 3 : index
    %c0_40 = arith.constant 0 : index
    %c0_41 = arith.constant 0 : index
    %35 = vector.load %arg3[%c3, %c0_40, %c0_41] : memref<9x4x4xbf16, #tpu.memory_space<vmem>>, vector<1x4x4xbf16>
    %36 = vector.shape_cast %35 : vector<1x4x4xbf16> to vector<4x4xbf16>
    %cst_42 = arith.constant dense<0.000000e+00> : vector<256x4xf32>
    %37 = tpu.matmul %33, %36, %cst_42 {dimension_numbers = #tpu.dot_dimension_numbers<[1], [0], [0], [1], [0, 0, 1, 1], [], []>} : vector<256x4xbf16>, vector<4x4xbf16>, vector<256x4xf32> -> vector<256x4xf32>
    %38 = arith.addf %34, %37 : vector<256x4xf32>
    %c0_43 = arith.constant 0 : index
    %c0_44 = arith.constant 0 : index
    %39 = vector.load %arg8[%c0_43, %c0_44] : memref<256x4xf32, #tpu.memory_space<vmem>>, vector<256x4xf32>
    tpu.vector_store %arg8[%c0_43, %c0_44], %38 {strides = array<i32>} : memref<256x4xf32, #tpu.memory_space<vmem>>, vector<256x4xf32>,
    %c1_45 = arith.constant 1 : index
    %c1_46 = arith.constant 1 : index
    %c0_47 = arith.constant 0 : index
    %40 = vector.load %arg7[%c1_45, %c1_46, %c0_47] : memref<18x18x4xbf16, #tpu.memory_space<vmem>>, vector<16x16x4xbf16>
    %41 = vector.shape_cast %40 : vector<16x16x4xbf16> to vector<256x4xbf16>
    %c0_48 = arith.constant 0 : index
    %c0_49 = arith.constant 0 : index
    %42 = vector.load %arg8[%c0_48, %c0_49] : memref<256x4xf32, #tpu.memory_space<vmem>>, vector<256x4xf32>
    %c4 = arith.constant 4 : index
    %c0_50 = arith.constant 0 : index
    %c0_51 = arith.constant 0 : index
    %43 = vector.load %arg3[%c4, %c0_50, %c0_51] : memref<9x4x4xbf16, #tpu.memory_space<vmem>>, vector<1x4x4xbf16>
    %44 = vector.shape_cast %43 : vector<1x4x4xbf16> to vector<4x4xbf16>
    %cst_52 = arith.constant dense<0.000000e+00> : vector<256x4xf32>
    %45 = tpu.matmul %41, %44, %cst_52 {dimension_numbers = #tpu.dot_dimension_numbers<[1], [0], [0], [1], [0, 0, 1, 1], [], []>} : vector<256x4xbf16>, vector<4x4xbf16>, vector<256x4xf32> -> vector<256x4xf32>
    %46 = arith.addf %42, %45 : vector<256x4xf32>
    %c0_53 = arith.constant 0 : index
    %c0_54 = arith.constant 0 : index
    %47 = vector.load %arg8[%c0_53, %c0_54] : memref<256x4xf32, #tpu.memory_space<vmem>>, vector<256x4xf32>
    tpu.vector_store %arg8[%c0_53, %c0_54], %46 {strides = array<i32>} : memref<256x4xf32, #tpu.memory_space<vmem>>, vector<256x4xf32>,
    %c1_55 = arith.constant 1 : index
    %c2_56 = arith.constant 2 : index
    %c0_57 = arith.constant 0 : index
    %48 = vector.load %arg7[%c1_55, %c2_56, %c0_57] : memref<18x18x4xbf16, #tpu.memory_space<vmem>>, vector<16x16x4xbf16>
    %49 = vector.shape_cast %48 : vector<16x16x4xbf16> to vector<256x4xbf16>
    %c0_58 = arith.constant 0 : index
    %c0_59 = arith.constant 0 : index
    %50 = vector.load %arg8[%c0_58, %c0_59] : memref<256x4xf32, #tpu.memory_space<vmem>>, vector<256x4xf32>
    %c5 = arith.constant 5 : index
    %c0_60 = arith.constant 0 : index
    %c0_61 = arith.constant 0 : index
    %51 = vector.load %arg3[%c5, %c0_60, %c0_61] : memref<9x4x4xbf16, #tpu.memory_space<vmem>>, vector<1x4x4xbf16>
    %52 = vector.shape_cast %51 : vector<1x4x4xbf16> to vector<4x4xbf16>
    %cst_62 = arith.constant dense<0.000000e+00> : vector<256x4xf32>
    %53 = tpu.matmul %49, %52, %cst_62 {dimension_numbers = #tpu.dot_dimension_numbers<[1], [0], [0], [1], [0, 0, 1, 1], [], []>} : vector<256x4xbf16>, vector<4x4xbf16>, vector<256x4xf32> -> vector<256x4xf32>
    %54 = arith.addf %50, %53 : vector<256x4xf32>
    %c0_63 = arith.constant 0 : index
    %c0_64 = arith.constant 0 : index
    %55 = vector.load %arg8[%c0_63, %c0_64] : memref<256x4xf32, #tpu.memory_space<vmem>>, vector<256x4xf32>
    tpu.vector_store %arg8[%c0_63, %c0_64], %54 {strides = array<i32>} : memref<256x4xf32, #tpu.memory_space<vmem>>, vector<256x4xf32>,
    %c2_65 = arith.constant 2 : index
    %c0_66 = arith.constant 0 : index
    %c0_67 = arith.constant 0 : index
    %56 = vector.load %arg7[%c2_65, %c0_66, %c0_67] : memref<18x18x4xbf16, #tpu.memory_space<vmem>>, vector<16x16x4xbf16>
    %57 = vector.shape_cast %56 : vector<16x16x4xbf16> to vector<256x4xbf16>
    %c0_68 = arith.constant 0 : index
    %c0_69 = arith.constant 0 : index
    %58 = vector.load %arg8[%c0_68, %c0_69] : memref<256x4xf32, #tpu.memory_space<vmem>>, vector<256x4xf32>
    %c6 = arith.constant 6 : index
    %c0_70 = arith.constant 0 : index
    %c0_71 = arith.constant 0 : index
    %59 = vector.load %arg3[%c6, %c0_70, %c0_71] : memref<9x4x4xbf16, #tpu.memory_space<vmem>>, vector<1x4x4xbf16>
    %60 = vector.shape_cast %59 : vector<1x4x4xbf16> to vector<4x4xbf16>
    %cst_72 = arith.constant dense<0.000000e+00> : vector<256x4xf32>
    %61 = tpu.matmul %57, %60, %cst_72 {dimension_numbers = #tpu.dot_dimension_numbers<[1], [0], [0], [1], [0, 0, 1, 1], [], []>} : vector<256x4xbf16>, vector<4x4xbf16>, vector<256x4xf32> -> vector<256x4xf32>
    %62 = arith.addf %58, %61 : vector<256x4xf32>
    %c0_73 = arith.constant 0 : index
    %c0_74 = arith.constant 0 : index
    %63 = vector.load %arg8[%c0_73, %c0_74] : memref<256x4xf32, #tpu.memory_space<vmem>>, vector<256x4xf32>
    tpu.vector_store %arg8[%c0_73, %c0_74], %62 {strides = array<i32>} : memref<256x4xf32, #tpu.memory_space<vmem>>, vector<256x4xf32>,
    %c2_75 = arith.constant 2 : index
    %c1_76 = arith.constant 1 : index
    %c0_77 = arith.constant 0 : index
    %64 = vector.load %arg7[%c2_75, %c1_76, %c0_77] : memref<18x18x4xbf16, #tpu.memory_space<vmem>>, vector<16x16x4xbf16>
    %65 = vector.shape_cast %64 : vector<16x16x4xbf16> to vector<256x4xbf16>
    %c0_78 = arith.constant 0 : index
    %c0_79 = arith.constant 0 : index
    %66 = vector.load %arg8[%c0_78, %c0_79] : memref<256x4xf32, #tpu.memory_space<vmem>>, vector<256x4xf32>
    %c7 = arith.constant 7 : index
    %c0_80 = arith.constant 0 : index
    %c0_81 = arith.constant 0 : index
    %67 = vector.load %arg3[%c7, %c0_80, %c0_81] : memref<9x4x4xbf16, #tpu.memory_space<vmem>>, vector<1x4x4xbf16>
    %68 = vector.shape_cast %67 : vector<1x4x4xbf16> to vector<4x4xbf16>
    %cst_82 = arith.constant dense<0.000000e+00> : vector<256x4xf32>
    %69 = tpu.matmul %65, %68, %cst_82 {dimension_numbers = #tpu.dot_dimension_numbers<[1], [0], [0], [1], [0, 0, 1, 1], [], []>} : vector<256x4xbf16>, vector<4x4xbf16>, vector<256x4xf32> -> vector<256x4xf32>
    %70 = arith.addf %66, %69 : vector<256x4xf32>
    %c0_83 = arith.constant 0 : index
    %c0_84 = arith.constant 0 : index
    %71 = vector.load %arg8[%c0_83, %c0_84] : memref<256x4xf32, #tpu.memory_space<vmem>>, vector<256x4xf32>
    tpu.vector_store %arg8[%c0_83, %c0_84], %70 {strides = array<i32>} : memref<256x4xf32, #tpu.memory_space<vmem>>, vector<256x4xf32>,
    %c2_85 = arith.constant 2 : index
    %c2_86 = arith.constant 2 : index
    %c0_87 = arith.constant 0 : index
    %72 = vector.load %arg7[%c2_85, %c2_86, %c0_87] : memref<18x18x4xbf16, #tpu.memory_space<vmem>>, vector<16x16x4xbf16>
    %73 = vector.shape_cast %72 : vector<16x16x4xbf16> to vector<256x4xbf16>
    %c0_88 = arith.constant 0 : index
    %c0_89 = arith.constant 0 : index
    %74 = vector.load %arg8[%c0_88, %c0_89] : memref<256x4xf32, #tpu.memory_space<vmem>>, vector<256x4xf32>
    %c8 = arith.constant 8 : index
    %c0_90 = arith.constant 0 : index
    %c0_91 = arith.constant 0 : index
    %75 = vector.load %arg3[%c8, %c0_90, %c0_91] : memref<9x4x4xbf16, #tpu.memory_space<vmem>>, vector<1x4x4xbf16>
    %76 = vector.shape_cast %75 : vector<1x4x4xbf16> to vector<4x4xbf16>
    %cst_92 = arith.constant dense<0.000000e+00> : vector<256x4xf32>
    %77 = tpu.matmul %73, %76, %cst_92 {dimension_numbers = #tpu.dot_dimension_numbers<[1], [0], [0], [1], [0, 0, 1, 1], [], []>} : vector<256x4xbf16>, vector<4x4xbf16>, vector<256x4xf32> -> vector<256x4xf32>
    %78 = arith.addf %74, %77 : vector<256x4xf32>
    %c0_93 = arith.constant 0 : index
    %c0_94 = arith.constant 0 : index
    %79 = vector.load %arg8[%c0_93, %c0_94] : memref<256x4xf32, #tpu.memory_space<vmem>>, vector<256x4xf32>
    tpu.vector_store %arg8[%c0_93, %c0_94], %78 {strides = array<i32>} : memref<256x4xf32, #tpu.memory_space<vmem>>, vector<256x4xf32>,
    %c0_95 = arith.constant 0 : index
    %c0_96 = arith.constant 0 : index
    %80 = vector.load %arg8[%c0_95, %c0_96] : memref<256x4xf32, #tpu.memory_space<vmem>>, vector<256x4xf32>
    %c0_97 = arith.constant 0 : index
    %c0_98 = arith.constant 0 : index
    %81 = vector.load %arg4[%c0_97, %c0_98] : memref<1x4xf32, #tpu.memory_space<vmem>>, vector<1x4xf32>
    %82 = vector.broadcast %81 : vector<1x4xf32> to vector<256x4xf32>
    %83 = arith.mulf %80, %82 : vector<256x4xf32>
    %c0_99 = arith.constant 0 : index
    %c0_100 = arith.constant 0 : index
    %84 = vector.load %arg5[%c0_99, %c0_100] : memref<1x4xf32, #tpu.memory_space<vmem>>, vector<1x4xf32>
    %85 = vector.broadcast %84 : vector<1x4xf32> to vector<256x4xf32>
    %86 = arith.addf %83, %85 : vector<256x4xf32>
    %cst_101 = arith.constant 0.000000e+00 : f32
    %87 = vector.broadcast %cst_101 : f32 to vector<256x4xf32>
    %88 = arith.maximumf %86, %87 : vector<256x4xf32>
    %89 = vector.shape_cast %88 : vector<256x4xf32> to vector<16x16x4xf32>
    %c0_102 = arith.constant 0 : index
    %c0_103 = arith.constant 0 : index
    %c0_104 = arith.constant 0 : index
    %c0_105 = arith.constant 0 : index
    %c0_106 = arith.constant 0 : index
    %90 = vector.load %arg6[%c0_102, %c0_103, %c0_104, %c0_105, %c0_106] : memref<1x1x16x16x4xf32, #tpu.memory_space<vmem>>, vector<1x1x16x16x4xf32>
    %91 = vector.shape_cast %90 : vector<1x1x16x16x4xf32> to vector<16x16x4xf32>
    %92 = vector.shape_cast %89 : vector<16x16x4xf32> to vector<1x1x16x16x4xf32>
    tpu.vector_store %arg6[%c0_102, %c0_103, %c0_104, %c0_105, %c0_106], %92 {strides = array<i32>} : memref<1x1x16x16x4xf32, #tpu.memory_space<vmem>>, vector<1x1x16x16x4xf32>,
    %93 = arith.truncf %89 : vector<16x16x4xf32> to vector<16x16x4xbf16>
    %c1_107 = arith.constant 1 : index
    %c1_108 = arith.constant 1 : index
    %c0_109 = arith.constant 0 : index
    %94 = vector.load %arg7[%c1_107, %c1_108, %c0_109] : memref<18x18x4xbf16, #tpu.memory_space<vmem>>, vector<16x16x4xbf16>
    tpu.vector_store %arg7[%c1_107, %c1_108, %c0_109], %93 {strides = array<i32>} : memref<18x18x4xbf16, #tpu.memory_space<vmem>>, vector<16x16x4xbf16>,
    return
  }
  func.func @transform_0(%arg0: i32, %arg1: i32) -> (i32, i32, i32, i32, i32) {
    %c0_i32 = arith.constant 0 : i32
    %c0_i32_0 = arith.constant 0 : i32
    %c0_i32_1 = arith.constant 0 : i32
    %c0_i32_2 = arith.constant 0 : i32
    return %arg1, %arg0, %c0_i32, %c0_i32_0, %c0_i32_1 : i32, i32, i32, i32, i32
  }
  func.func @transform_1(%arg0: i32, %arg1: i32) -> (i32, i32, i32) {
    %c0_i32 = arith.constant 0 : i32
    %c0_i32_0 = arith.constant 0 : i32
    %c0_i32_1 = arith.constant 0 : i32
    %c0_i32_2 = arith.constant 0 : i32
    return %c0_i32, %c0_i32_0, %c0_i32_1 : i32, i32, i32
  }
  func.func @transform_2(%arg0: i32, %arg1: i32) -> (i32, i32) {
    %c0_i32 = arith.constant 0 : i32
    %c0_i32_0 = arith.constant 0 : i32
    %c0_i32_1 = arith.constant 0 : i32
    return %c0_i32, %c0_i32_0 : i32, i32
  }
  func.func @transform_3(%arg0: i32, %arg1: i32) -> (i32, i32) {
    %c0_i32 = arith.constant 0 : i32
    %c0_i32_0 = arith.constant 0 : i32
    %c0_i32_1 = arith.constant 0 : i32
    return %c0_i32, %c0_i32_0 : i32, i32
  }
  func.func @transform_4(%arg0: i32, %arg1: i32) -> (i32, i32, i32, i32, i32) {
    %c0_i32 = arith.constant 0 : i32
    %c0_i32_0 = arith.constant 0 : i32
    %c0_i32_1 = arith.constant 0 : i32
    %c0_i32_2 = arith.constant 0 : i32
    return %arg1, %arg0, %c0_i32, %c0_i32_0, %c0_i32_1 : i32, i32, i32, i32, i32
  }
}

</mosaic_0001>

<bundles_post_ra>
// kernel: tpu_custom_call.1
= control target key start
LH: loop header
LB: loop body
LE: loop exit
PB: predicated region body
PF: predicated region fallthrough
CT: control target
= control target key end

     0   :  { %s11296_s0 = inlined_call_operand.hbm [shape: bf16[3,2,16,16,4], index: 0, kind: input, shape index: {}]   ;;  %s11297_s1 = inlined_call_operand.hbm [shape: bf16[9,4,4], index: 1, kind: input, shape index: {}]   ;;  %s11298_s2 = inlined_call_operand.hbm [shape: f32[1,4], index: 2, kind: input, shape index: {}]   ;;  %s11299_s3 = inlined_call_operand.hbm [shape: f32[1,4], index: 3, kind: input, shape index: {}]   ;;  %s11300_s4 = inlined_call_operand.hbm [shape: f32[3,2,16,16,4], index: 4, kind: output, shape index: {}]  }
   0x1   :  { %11308 = sst [smem:[#allocation19_spill]] %s11297_s1 }
   0x2   :  { %11309 = sst [smem:[#allocation20_spill]] %s11298_s2 }
   0x3   :  { %11310 = sst [smem:[#allocation21_spill]] %s11299_s3 }
   0x4   :  { %11311 = sst [smem:[#allocation22_spill]] %s11300_s4 }
   0x5   :  { %9 = vsyncpa [#allocation5], 0 }
   0x6   :  { %11 = vsyncpa [#allocation5 + $0x1], 0 }
   0x7   :  { %12 = vsyncpa [#allocation8], 0 }
   0x8   :  { %13 = vsyncpa [#allocation11], 0 }
   0x9   :  { %14 = vsyncpa [#allocation6], 0 }
   0xa   :  { %16 = vsyncpa [#allocation6 + $0x1], 0  ;;  %s8927_s15 = smov 0   ;;  %s8929_s16 = smov 0  }
   0xb   :  { %s8931_s17 = smov 0   ;;  %s8933_s18 = smov 0  }
   0xc   :  { %s8935_s19 = smov 0   ;;  %s8937_s20 = smov 0  }
   0xd   :  { %s8939_s21 = smov 0   ;;  %s8941_s22 = smov 0  }
   0xe LB: > { %11312 = sst [smem:[#allocation17_spill]] %s8859_s15  ;;  %s7602_s23 = sadd.s32 4294967295, %s8887_s22   ;;  %s8887_s22 = sphi %s8941_s22, %s22_s22   ;;  %s8883_s21 = sphi %s8939_s21, %s11363_s21   ;;  %s8879_s20 = sphi %s8937_s20, %s11362_s20   ;;  %s8875_s19 = sphi %s8935_s19, %s11361_s19   ;;  %s8871_s18 = sphi %s8933_s18, %s11360_s18   ;;  %s8867_s17 = sphi %s8931_s17, %s11359_s17   ;;  %s8863_s16 = sphi %s8929_s16, %s11358_s16   ;;  %s8859_s15 = sphi %s8927_s15, %s11357_s15  }
   0xf   : > { %s7603_s24 = sadd.s32 4294967294, %s8887_s22   ;;  %p56_p0 = scmp.ne.s32.totalorder %s8863_s16, %s8859_s15 }
  0x10   : > { %p8971_p1 = scmp.eq.s32.totalorder %s7602_s23, 0  ;;  %p8975_p2 = scmp.eq.s32.totalorder %s7602_s23, 5 }
  0x11   : > { %p151_p3 = scmp.eq.s32.totalorder %s7603_s24, 5  ;;  %p7604_p5 = scmp.ge.s32.totalorder %s8887_s22, 1 }
  0x12   : > { %s11313_s25 = scalar_select %p8971_p1, 1, 0 }
  0x13   : > { %s11314_s26 = scalar_select %p8975_p2, 1, 0 }
  0x14   : > { %p8981_p4 = por %p8971_p1, %p56_p0  ;;  %p8986_p6 = por %p151_p3, %p56_p0 }
  0x15   : > { %p158_p7 = scmp.lt.s32.totalorder %s8887_s22, 7  ;;  %s8889_s30 = smov [#allocation7]  }
  0x16   : > { %s11315_s27 = scalar_select %p8981_p4, 1, 0 }
  0x17   : > { %s11316_s28 = scalar_select %p8986_p6, 1, 0 }
  0x18   : > { %p8991_p8 = pnand %p7604_p5, %p158_p7  ;;  %s170_s5 = sshll.u32 %s8889_s30, 4  ;;  %s8995_s5 = int_to_ptr.vmem [resolvable:$true] %s170_s5 }
  0x19   : > { %11317 = sst [smem:[#allocation18_spill]] %s11316_s28  ;;  %s8890_s7 = smov [#allocation9]  }
  0x1a   : > { %s11318_s29 = scalar_select %p8991_p8, 1, 0 }
  0x1b   : > { %p8516_p9 = pneg %p8991_p8  ;;  %s184_s8 = sshll.u32 %s8890_s7, 4  ;;  %s9005_s8 = int_to_ptr.vmem [resolvable:$true] %s184_s8 }
  0x1c   : > { %s8891_s9 = smov [#allocation10]   ;;  %s11320_s1 = sld [smem:[#allocation19_spill]] }
  0x1d   : > { %p9001_p10 = pnand %p8516_p9, %p8971_p1  ;;  %s9007_s10 = sshll.u32 %s8891_s9, 4  ;;  %s196_s10 = int_to_ptr.vmem [resolvable:$true] %s9007_s10 }
  0x1f   : > { %p9017_p12 = pneg %p9001_p10 }
  0x22   : > { %s8667_s13 = scalar_lea.hbm %s11320_s1, 288 }
  0x23   : > { %p8668_p11 = scmp.ne.s32.totalorder %s11320_s1, %s8667_s13  ;;  %p8674_p3 = scmp.lt.u32.totalorder %s8667_s13, %s11320_s1 }
  0x25   : > { %p8670_p13 = pnand %p9017_p12, %p8668_p11 }
  0x27   : > { %p8671_p0 = pneg %p8670_p13 }
  0x29   : > { %p8676_p5 = pnand %p8674_p3, %p8671_p0 }
  0x2b   : > { %8679 = shalt.err (!%p8676_p5)
}
  0x2c   : > { %s8680_s9 = scalar_lea.vmem %s8995_s5, 288  ;;  %p8688_p1 = scmp.lt.s32.totalorder %s8995_s5, %s8995_s5 }
  0x2d   : > { %p8681_p7 = scmp.ne.s32.totalorder %s8995_s5, %s8680_s9  ;;  %p8689_p4 = scmp.lt.s32.totalorder %s8680_s9, %s8680_s9 }
  0x2f   : > { %p8683_p9 = pnand %p8681_p7, %p9017_p12  ;;  %p8690_p11 = por %p8689_p4, %p8688_p1 }
  0x31   : > { %p8684_p6 = pneg %p8683_p9 }
  0x33   : > { %p8691_p13 = pnand %p8690_p11, %p8684_p6 }
  0x35   : > { %8694 = shalt.err (!%p8691_p13)
}
  0x36   : > { %s8892_s11 = smov 32   ;;  %s8893_s12 = smov 2  }
  0x37   : > { %8519 = dma.hbm_to_vmem [thread:$0]  (!%p9001_p10), %s11320_s1, 288, %s8995_s5, [#allocation8], %s8892_s11, %s8892_s11, %s8893_s12  }
  0x38   : > { %s11322_s2 = sld [smem:[#allocation20_spill]] }
  0x3e   : > { %s8695_s7 = scalar_lea.hbm %s11322_s2, 16 }
  0x3f   : > { %p8696_p1 = scmp.ne.s32.totalorder %s11322_s2, %s8695_s7  ;;  %p8702_p0 = scmp.lt.u32.totalorder %s8695_s7, %s11322_s2 }
  0x41   : > { %p8698_p4 = pnand %p8696_p1, %p9017_p12 }
  0x43   : > { %p8699_p6 = pneg %p8698_p4 }
  0x45   : > { %p8704_p3 = pnand %p8702_p0, %p8699_p6 }
  0x47   : > { %8707 = shalt.err (!%p8704_p3)
}
  0x48   : > { %s8708_s5 = scalar_lea.vmem %s9005_s8, 16  ;;  %s8715_s15 = scalar_lea.vmem %s9005_s8, 32 }
  0x49   : > { %p8709_p5 = scmp.ne.s32.totalorder %s9005_s8, %s8708_s5  ;;  %p8716_p11 = scmp.lt.s32.totalorder %s9005_s8, %s9005_s8 }
  0x4a   : > { %p8717_p13 = scmp.lt.s32.totalorder %s8715_s15, %s8708_s5 }
  0x4b   : > { %p8711_p7 = pnand %p8709_p5, %p9017_p12 }
  0x4c   : > { %p8718_p1 = por %p8717_p13, %p8716_p11 }
  0x4d   : > { %p8712_p9 = pneg %p8711_p7 }
  0x4f   : > { %p8719_p4 = pnand %p8718_p1, %p8712_p9 }
  0x51   : > { %8722 = shalt.err (!%p8719_p4)
}
  0x52   : > { %8522 = dma.hbm_to_vmem [thread:$0]  (!%p9001_p10), %s11322_s2, 16, %s9005_s8, [#allocation8]  }
  0x53   : > { %s11323_s3 = sld [smem:[#allocation21_spill]] }
  0x59   : > { %s8723_s13 = scalar_lea.hbm %s11323_s3, 16 }
  0x5a   : > { %p8724_p6 = scmp.ne.s32.totalorder %s11323_s3, %s8723_s13  ;;  %p8730_p5 = scmp.lt.u32.totalorder %s8723_s13, %s11323_s3 }
  0x5c   : > { %p8726_p0 = pnand %p8724_p6, %p9017_p12 }
  0x5e   : > { %p8727_p3 = pneg %p8726_p0 }
  0x60   : > { %p8732_p7 = pnand %p8730_p5, %p8727_p3 }
  0x62   : > { %8735 = shalt.err (!%p8732_p7)
}
  0x63   : > { %s8736_s9 = scalar_lea.vmem %s196_s10, 16  ;;  %s8743_s8 = scalar_lea.vmem %s196_s10, 32 }
  0x64   : > { %p8737_p9 = scmp.ne.s32.totalorder %s196_s10, %s8736_s9  ;;  %p8744_p1 = scmp.lt.s32.totalorder %s196_s10, %s196_s10 }
  0x65   : > { %p8745_p4 = scmp.lt.s32.totalorder %s8743_s8, %s8736_s9 }
  0x66   : > { %p8739_p11 = pnand %p8737_p9, %p9017_p12 }
  0x67   : > { %p8746_p8 = por %p8745_p4, %p8744_p1 }
  0x68   : > { %p8740_p13 = pneg %p8739_p11 }
  0x6a   : > { %p8747_p2 = pnand %p8746_p8, %p8740_p13 }
  0x6c   : > { %8750 = shalt.err (!%p8747_p2)
}
  0x6d   : > { %8525 = dma.hbm_to_vmem [thread:$0]  (!%p9001_p10), %s11323_s3, 16, %s196_s10, [#allocation11]  }
  0x6e   : > { %s31_s24 = sadd.s32 1, %s8879_s20  ;;  %s34_s6 = sadd.s32 1, %s8883_s21 }
  0x6f   : > { %p32_p2 = scmp.ge.s32.totalorder %s31_s24, 3  ;;  %s43_s4 = sadd.s32 1, %s8867_s17 }
  0x70   : > { %p50_p8 = scmp.ne.s32.totalorder %s8867_s17, %s8863_s16  ;;  %p51_p12 = scmp.eq.s32.totalorder %s8887_s22, 0 }
  0x71   : > { %s11365_s24 = smov (%p32_p2, %s31_s24), 0  ;;  %s11367_s6 = smov (!%p32_p2, %s34_s6), %s8883_s21 }
  0x72   : > { %s38_s28 = ssub.s32 %s8879_s20, %s11365_s24  ;;  %p36_p6 = scmp.ge.s32.totalorder %s11367_s6, 2 }
  0x73   : > { %p11324_p0 = scmp.ne.s32.totalorder %s11314_s26, 0  ;;  %p9098_p10 = por %p51_p12, %p50_p8 }
  0x74   : > { %p8537_p5 = scmp.lt.s32.totalorder %s8887_s22, 6  ;;  %s11369_s6 = smov (%p36_p6, %s11367_s6), 0 }
  0x75   : > { %p9094_p3 = por %p11324_p0, %p50_p8  ;;  %s206_s12 = sand.u32 1, %s8867_s17  }
  0x76   : > { %s7610_s13 = sshll.u32 %s8883_s21, 5  ;;  %s39_s14 = ssub.s32 %s8883_s21, %s11369_s6 }
  0x77   : > { %s40_s23 = sor.u32 %s39_s14, %s38_s28  ;;  %s7609_s30 = sshll.u32 %s206_s12, 7 }
  0x78   : > { %p41_p7 = scmp.eq.s32.totalorder %s40_s23, 0  ;;  %s7611_s26 = sshll.u32 %s8879_s20, 6 }
  0x79   : > { %s210_s7 = scalar_lea.vmem [#allocation4], %s7609_s30  ;;  %s216_s5 = sadd.s32 %s7611_s26, %s7610_s13 }
  0x7a   : > { %s219_s9 = sshll.u32 %s210_s7, 4  ;;  %s7612_s15 = sshll.u32 %s216_s5, 6  ;;  %s9113_s9 = int_to_ptr.vmem [resolvable:$true] %s219_s9 }
  0x7b   : > { %s9111_s8 = scalar_select %p41_p7, %s8867_s17, %s43_s4  }
  0x7c   : > { %p9119_p9 = pnand %p8537_p5, %p9098_p10  ;;  %s9126_s28 = scalar_lea.hbm %s11296_s0, %s7612_s15 }
  0x7d   : > { %s9128_s4 = scalar_lea.sflag [#allocation5], %s206_s12  ;;  %s8751_s13 = scalar_lea.hbm %s9126_s28, 2048 }
  0x7e   : > { %p8752_p11 = scmp.ne.s32.totalorder %s9126_s28, %s8751_s13  ;;  %p8753_p13 = pneg %p9119_p9 }
  0x7f   : > { %s8756_s3 = scalar_lea.hbm %s11296_s0, 12288  ;;  %p8757_p2 = scmp.lt.u32.totalorder %s9126_s28, %s11296_s0 }
  0x80   : > { %p8754_p1 = pnand %p8753_p13, %p8752_p11  ;;  %p8758_p8 = scmp.lt.u32.totalorder %s8756_s3, %s8751_s13 }
  0x81   : > { %p8760_p6 = scmp.lt.u32.totalorder %s8751_s13, %s9126_s28 }
  0x82   : > { %p8755_p4 = pneg %p8754_p1  ;;  %p8759_p12 = por %p8758_p8, %p8757_p2 }
  0x84   : > { %p8761_p0 = por %p8760_p6, %p8759_p12 }
  0x86   : > { %p8762_p10 = pnand %p8761_p0, %p8755_p4 }
  0x88   : > { %8765 = shalt.err (!%p8762_p10)
}
  0x89   : > { %s8766_s12 = scalar_lea.vmem %s9113_s9, 2048  ;;  %s8894_s30 = smov [#allocation4]  }
  0x8a   : > { %p8767_p5 = scmp.ne.s32.totalorder %s9113_s9, %s8766_s12  ;;  %s8771_s26 = sshll.u32 %s8894_s30, 4  ;;  %s8772_s26 = int_to_ptr.vmem [resolvable:$false] %s8771_s26 }
  0x8b   : > { %s8773_s7 = scalar_lea.vmem %s8772_s26, 4096  ;;  %p8774_p1 = scmp.lt.s32.totalorder %s9113_s9, %s8772_s26 }
  0x8c   : > { %p8769_p7 = pnand %p8767_p5, %p8753_p13  ;;  %p8775_p2 = scmp.lt.s32.totalorder %s8773_s7, %s8766_s12 }
  0x8e   : > { %p8770_p11 = pneg %p8769_p7  ;;  %p8776_p8 = por %p8775_p2, %p8774_p1 }
  0x90   : > { %p8777_p12 = pnand %p8776_p8, %p8770_p11 }
  0x92   : > { %8780 = shalt.err (!%p8777_p12)
}
  0x93   : > { %s8895_s5 = smov 64   ;;  %s8896_s15 = smov 4  }
  0x94   : > { %8529 = dma.hbm_to_vmem [thread:$0]  (!%p9119_p9), %s9126_s28, 2048, %s9113_s9, %s9128_s4, %s8895_s5, %s8895_s5, %s8896_s15  }
  0x95   : > { %p11328_p13 = scmp.ne.s32.totalorder %s11318_s29, 0 }
  0x96   : > { %s9159_s13 = sand.u32 (!%p11328_p13), 1, %s8863_s16   ;;  %p11329_p4 = scmp.ne.s32.totalorder (!%p11328_p13), %s11315_s27, 0 }
  0x97   : > { %231 = sbr.rel (%p11328_p13) target bundleno = 941 (0x3ad), region = 36  ;;  %s7614_s10 = sshll.u32 (!%p11328_p13), %s9159_s13, 7 }
  0x98   : > { %s234_s2 = scalar_lea.sflag (!%p11328_p13), [#allocation5], %s9159_s13  ;;  %s9163_s3 = scalar_lea.vmem (!%p11328_p13), [#allocation4], %s7614_s10 }
  0x9e   : > { %8842 = dma.done.wait (%p11329_p4), %s234_s2, 2048  }
  0x9f   : > { %8844 = vsyncadd (%p11329_p4), %s234_s2, 4294965248  ;;  %p11330_p9 = scmp.ne.s32.totalorder %s11313_s25, 0 }
  0xa1   : > { %8846 = dma.done.wait (%p11330_p9), [#allocation8], 304  }
  0xa2   : > { %8848 = vsyncadd (%p11330_p9), [#allocation8], 4294966992 }
  0xa3   : > { %8850 = dma.done.wait (%p11330_p9), [#allocation11], 16  }
  0xa4   : > { %8852 = vsyncadd (%p11330_p9), [#allocation11], 4294967280  ;;  %s7618_s1 = sshll.u32 %s9159_s13, 8  ;;  %p7619_p6 = scmp.ne.s32.totalorder %s8871_s18, 0 }
  0xa5   : > { %s9178_s29 = scalar_lea.vmem [#allocation12], %s7618_s1  ;;  %vm279_vm0 = vcmask (!%p7619_p6), 27648   ;;  %vm282_vm1 = vcmask (!%p7619_p6), 24576   ;;  %v9182_v0 = vld [vmem:[%s9163_s3] sm:$0xf] (!%p7619_p6)  ;;  %v8897_v1 = vmov (!%p7619_p6), 0  }
  0xa6   : > { %278 = sbr.rel (%p7619_p6) target bundleno = 250 (0xfa), region = 56  ;;  %284 = vst.msk [vmem:[#allocation2 + $0xc] sm:$0xf] (!%p7619_p6), %vm279_vm0, %v8897_v1  ;;  %280 = vst.msk [vmem:[#allocation2] sm:$0xf] (!%p7619_p6), %vm279_vm0, %v8897_v1  ;;  %v371_v2 = vshrl.u32 (!%p7619_p6), %v9182_v0, 16 }
  0xa7   : > { %281 = vst.msk [vmem:[#allocation2 + $0x4] sm:$0xf] (!%p7619_p6), %vm279_vm0, %v8897_v1  ;;  %285 = vst.msk [vmem:[#allocation2 + $0x10] sm:$0xf] (!%p7619_p6), %vm279_vm0, %v8897_v1  ;;  %v374_v3 = vshll.u32 (!%p7619_p6), %v9182_v0, 16 }
  0xa8   : > { %287 = vst.msk [vmem:[#allocation2 + $0x18] sm:$0xf] (!%p7619_p6), %vm279_vm0, %v8897_v1  ;;  %288 = vst.msk [vmem:[#allocation2 + $0x1c] sm:$0xf] (!%p7619_p6), %vm279_vm0, %v8897_v1  ;;  %vm692_vm2 = vsmask.f32 (!%p7619_p6), 7938 }
  0xa9   : > { %290 = vst.msk [vmem:[#allocation2 + $0x24] sm:$0xf] (!%p7619_p6), %vm279_vm0, %v8897_v1  ;;  %291 = vst.msk [vmem:[#allocation2 + $0x28] sm:$0xf] (!%p7619_p6), %vm279_vm0, %v8897_v1  ;;  %v336_v4 = vld [vmem:[%s9163_s3 + $0x4] sm:$0xf] (!%p7619_p6) }
  0xaa   : > { %293 = vst.msk [vmem:[#allocation2 + $0x30] sm:$0xf] (!%p7619_p6), %vm279_vm0, %v8897_v1  ;;  %294 = vst.msk [vmem:[#allocation2 + $0x34] sm:$0xf] (!%p7619_p6), %vm279_vm0, %v8897_v1  ;;  %vm367_vm3 = vsmask.f32 (!%p7619_p6), 256 }
  0xab   : > { %296 = vst.msk [vmem:[#allocation2 + $0x3c] sm:$0xf] (!%p7619_p6), %vm279_vm0, %v8897_v1  ;;  %297 = vst.msk [vmem:[#allocation2 + $0x40] sm:$0xf] (!%p7619_p6), %vm279_vm0, %v8897_v1  ;;  %vm368_vm4 = vsmask.f32 (!%p7619_p6), 4368 }
  0xac   : > { %299 = vst.msk [vmem:[#allocation2 + $0x48] sm:$0xf] (!%p7619_p6), %vm279_vm0, %v8897_v1  ;;  %300 = vst.msk [vmem:[#allocation2 + $0x4c] sm:$0xf] (!%p7619_p6), %vm279_vm0, %v8897_v1  ;;  %v379_v5 = vshrl.u32 (!%p7619_p6), %v336_v4, 16  ;;  %v382_v6 = vshll.u32 (!%p7619_p6), %v336_v4, 16 }
  0xad   : > { %302 = vst.msk [vmem:[#allocation2 + $0x54] sm:$0xf] %vm279_vm0, %v8897_v1  ;;  %303 = vst.msk [vmem:[#allocation2 + $0x58] sm:$0xf] %vm279_vm0, %v8897_v1  ;;  %v373_v7 = vrot.slane %v371_v2, 7 }
  0xae   : > { %305 = vst.msk [vmem:[#allocation2 + $0x60] sm:$0xf] %vm279_vm0, %v8897_v1  ;;  %306 = vst.msk [vmem:[#allocation2 + $0x64] sm:$0xf] %vm279_vm0, %v8897_v1  ;;  %v337_v8 = vld [vmem:[%s9163_s3 + $0x8] sm:$0xf] }
  0xaf   : > { %308 = vst.msk [vmem:[#allocation2 + $0x6c] sm:$0xf] %vm279_vm0, %v8897_v1  ;;  %309 = vst.msk [vmem:[#allocation2 + $0x70] sm:$0xf] %vm279_vm0, %v8897_v1  ;;  %v338_v9 = vld [vmem:[%s9163_s3 + $0xc] sm:$0xf]  ;;  %v376_v16 = vor.u32 %v374_v3, %v373_v7 }
  0xb0   : > { %311 = vst.msk [vmem:[#allocation2 + $0x78] sm:$0xf] %vm279_vm0, %v8897_v1  ;;  %312 = vst.msk [vmem:[#allocation2 + $0x7c] sm:$0xf] %vm279_vm0, %v8897_v1  ;;  %v381_v11 = vrot.slane %v379_v5, 7  ;;  %v388_v12 = vshrl.u32 %v337_v8, 16 }
  0xb1   : > { %314 = vst.msk [vmem:[#allocation2 + $0x84] sm:$0xf] %vm279_vm0, %v8897_v1  ;;  %315 = vst.msk [vmem:[#allocation2 + $0x88] sm:$0xf] %vm279_vm0, %v8897_v1  ;;  %v391_v13 = vshll.u32 %v337_v8, 16  ;;  %v396_v14 = vshrl.u32 %v338_v9, 16 }
  0xb2   : > { %317 = vst.msk [vmem:[#allocation2 + $0x90] sm:$0xf] %vm279_vm0, %v8897_v1  ;;  %318 = vst.msk [vmem:[#allocation2 + $0x94] sm:$0xf] %vm279_vm0, %v8897_v1  ;;  %v339_v15 = vld [vmem:[%s9163_s3 + $0x10] sm:$0xf]  ;;  %v384_v22 = vor.u32 %v382_v6, %v381_v11 }
  0xb3   : > { %320 = vst.msk [vmem:[#allocation2 + $0x9c] sm:$0xf] %vm279_vm0, %v8897_v1  ;;  %321 = vst.msk [vmem:[#allocation2 + $0xa0] sm:$0xf] %vm279_vm0, %v8897_v1  ;;  %v377_v18 = vrot.slane %v373_v7, 4  ;;  %v399_v19 = vshll.u32 %v338_v9, 16 }
  0xb4   : > { %323 = vst.msk [vmem:[#allocation2 + $0xa8] sm:$0xf] %vm279_vm0, %v8897_v1  ;;  %324 = vst.msk [vmem:[#allocation2 + $0xac] sm:$0xf] %vm279_vm0, %v8897_v1  ;;  %v405_v20 = vshrl.u32 %v339_v15, 16  ;;  %v386_v23 = vrot.slane %v381_v11, 4 }
  0xb5   : > { %326 = vst.msk [vmem:[#allocation2 + $0xb4] sm:$0xf] %vm279_vm0, %v8897_v1  ;;  %327 = vst.msk [vmem:[#allocation2 + $0xb8] sm:$0xf] %vm279_vm0, %v8897_v1  ;;  %v340_v21 = vld [vmem:[%s9163_s3 + $0x14] sm:$0xf] }
  0xb6   : > { %329 = vst.msk [vmem:[#allocation2 + $0xc0] sm:$0xf] %vm279_vm0, %v8897_v1  ;;  %330 = vst.msk [vmem:[#allocation2 + $0xc4] sm:$0xf] %vm279_vm0, %v8897_v1  ;;  %v390_v25 = vrot.slane %v388_v12, 7  ;;  %v398_v26 = vrot.slane %v396_v14, 7 }
  0xb7   : > { %332 = vst.msk [vmem:[#allocation2 + $0xcc] sm:$0xf] %vm279_vm0, %v8897_v1  ;;  %333 = vst.msk [vmem:[#allocation2 + $0xd0] sm:$0xf] %vm279_vm0, %v8897_v1  ;;  %v341_v27 = vld [vmem:[%s9163_s3 + $0x18] sm:$0xf] }
  0xb8   : > { %286 = vst.msk [vmem:[#allocation2 + $0x14] sm:$0x1] %vm282_vm1, %v8897_v1  ;;  %283 = vst.msk [vmem:[#allocation2 + $0x8] sm:$0x1] %vm282_vm1, %v8897_v1  ;;  %v407_v28 = vrot.slane %v405_v20, 7  ;;  %v408_v29 = vshll.u32 %v339_v15, 16  ;;  %v393_v36 = vor.u32 %v391_v13, %v390_v25  ;;  %v401_v38 = vor.u32 %v399_v19, %v398_v26 }
  0xb9   : > { %289 = vst.msk [vmem:[#allocation2 + $0x20] sm:$0x1] %vm282_vm1, %v8897_v1  ;;  %292 = vst.msk [vmem:[#allocation2 + $0x2c] sm:$0x1] %vm282_vm1, %v8897_v1  ;;  %v413_v30 = vshrl.u32 %v340_v21, 16  ;;  %v416_v31 = vshll.u32 %v340_v21, 16 }
  0xba   : > { %295 = vst.msk [vmem:[#allocation2 + $0x38] sm:$0x1] %vm282_vm1, %v8897_v1  ;;  %298 = vst.msk [vmem:[#allocation2 + $0x44] sm:$0x1] %vm282_vm1, %v8897_v1  ;;  %v342_v32 = vld [vmem:[%s9163_s3 + $0x1c] sm:$0xf]  ;;  %v410_v46 = vor.u32 %v408_v29, %v407_v28 }
  0xbb   : > { %301 = vst.msk [vmem:[#allocation2 + $0x50] sm:$0x1] %vm282_vm1, %v8897_v1  ;;  %304 = vst.msk [vmem:[#allocation2 + $0x5c] sm:$0x1] %vm282_vm1, %v8897_v1  ;;  %v694_v33 = vld [vmem:[#allocation2 + $0xc] sm:$0xf] }
  0xbc   : > { %307 = vst.msk [vmem:[#allocation2 + $0x68] sm:$0x1] %vm282_vm1, %v8897_v1  ;;  %310 = vst.msk [vmem:[#allocation2 + $0x74] sm:$0x1] %vm282_vm1, %v8897_v1  ;;  %v703_v37 = vld [vmem:[#allocation2 + $0x18] sm:$0xf] }
  0xbd   : > { %313 = vst.msk [vmem:[#allocation2 + $0x80] sm:$0x1] %vm282_vm1, %v8897_v1  ;;  %316 = vst.msk [vmem:[#allocation2 + $0x8c] sm:$0x1] %vm282_vm1, %v8897_v1  ;;  %v394_v41 = vrot.slane %v390_v25, 4  ;;  %v403_v42 = vrot.slane %v398_v26, 4 }
  0xbe   : > { %319 = vst.msk [vmem:[#allocation2 + $0x98] sm:$0x1] %vm282_vm1, %v8897_v1  ;;  %322 = vst.msk [vmem:[#allocation2 + $0xa4] sm:$0x1] %vm282_vm1, %v8897_v1  ;;  %v710_v44 = vld [vmem:[#allocation2 + $0x24] sm:$0xf] }
  0xbf   : > { %325 = vst.msk [vmem:[#allocation2 + $0xb0] sm:$0x1] %vm282_vm1, %v8897_v1  ;;  %328 = vst.msk [vmem:[#allocation2 + $0xbc] sm:$0x1] %vm282_vm1, %v8897_v1  ;;  %v700_v35 = vld [vmem:[#allocation2 + $0x14] sm:$0x1] }
  0xc0   : > { %331 = vst.msk [vmem:[#allocation2 + $0xc8] sm:$0x1] %vm282_vm1, %v8897_v1  ;;  %334 = vst.msk [vmem:[#allocation2 + $0xd4] sm:$0x1] %vm282_vm1, %v8897_v1  ;;  %v707_v43 = vld [vmem:[#allocation2 + $0x20] sm:$0x1] }
  0xc1   : > { %vm9244_vm5 = vmand %vm279_vm0, %vm692_vm2  ;;  %v411_v47 = vrot.slane %v407_v28, 4  ;;  %v415_v48 = vrot.slane %v413_v30, 7  ;;  %v714_v51 = vld [vmem:[#allocation2 + $0x2c] sm:$0x1]  ;;  %v422_v52 = vshrl.u32 %v341_v27, 16  ;;  %v425_v53 = vshll.u32 %v341_v27, 16 }
  0xc2   : > { %vm9250_vm6 = vmor %vm367_vm3, %vm368_vm4  ;;  %v695_v39 = vsel %vm9244_vm5, %v376_v16, %v694_v33  ;;  %v704_v45 = vsel %vm9244_vm5, %v393_v36, %v703_v37  ;;  %v343_v54 = vld [vmem:[%s9163_s3 + $0x20] sm:$0xf]  ;;  %v711_v55 = vsel %vm9244_vm5, %v410_v46, %v710_v44  ;;  %v430_v58 = vshrl.u32 %v342_v32, 16  ;;  %v344_v59 = vld [vmem:[%s9163_s3 + $0x24] sm:$0xf] }
  0xc3   : > { %vm9257_vm7 = vmand %vm282_vm1, %vm367_vm3  ;;  %v385_v34 = vsel %vm9250_vm6, %v377_v18, %v384_v22  ;;  %696 = vst [vmem:[#allocation2 + $0xc] sm:$0xf] %v695_v39  ;;  %v402_v49 = vsel %vm9250_vm6, %v394_v41, %v401_v38  ;;  %v418_v56 = vor.u32 %v416_v31, %v415_v48  ;;  %v420_v57 = vrot.slane %v415_v48, 4  ;;  %v717_v61 = vld [vmem:[#allocation2 + $0x30] sm:$0xf] }
  0xc4   : > { %697 = vst.msk [vmem:[#allocation2 + $0x10] sm:$0xf] %vm279_vm0, %v385_v34  ;;  %v701_v40 = vsel %vm9257_vm7, %v386_v23, %v700_v35  ;;  %705 = vst [vmem:[#allocation2 + $0x18] sm:$0xf] %v704_v45  ;;  %v708_v50 = vsel %vm9257_vm7, %v403_v42, %v707_v43  ;;  %v424_v60 = vrot.slane %v422_v52, 7  ;;  %v433_v62 = vshll.u32 %v342_v32, 16 }
  0xc5   : > { %702 = vst [vmem:[#allocation2 + $0x14] sm:$0x1] %v701_v40  ;;  %706 = vst.msk [vmem:[#allocation2 + $0x1c] sm:$0xf] %vm279_vm0, %v402_v49  ;;  %v439_v63 = vshrl.u32 %v343_v54, 16  ;;  %v442_v0 = vshll.u32 %v343_v54, 16  ;;  %v419_v1 = vsel %vm9250_vm6, %v411_v47, %v418_v56  ;;  %v715_v2 = vsel %vm9257_vm7, %v420_v57, %v714_v51 }
  0xc6   : > { %709 = vst [vmem:[#allocation2 + $0x20] sm:$0x1] %v708_v50  ;;  %712 = vst [vmem:[#allocation2 + $0x24] sm:$0xf] %v711_v55  ;;  %v432_v3 = vrot.slane %v430_v58, 7  ;;  %v447_v5 = vshrl.u32 %v344_v59, 16  ;;  %v427_v7 = vor.u32 %v425_v53, %v424_v60 }
  0xc7   : > { %v721_v4 = vld [vmem:[#allocation2 + $0x38] sm:$0x1]  ;;  %v345_v6 = vld [vmem:[%s9163_s3 + $0x28] sm:$0xf]  ;;  %713 = vst.msk [vmem:[#allocation2 + $0x28] sm:$0xf] %vm279_vm0, %v419_v1 }
  0xc8   : > { %716 = vst [vmem:[#allocation2 + $0x2c] sm:$0x1] %v715_v2  ;;  %v428_v8 = vrot.slane %v424_v60, 4  ;;  %v441_v9 = vrot.slane %v439_v63, 7  ;;  %v724_v11 = vld [vmem:[#allocation2 + $0x3c] sm:$0xf]  ;;  %v435_v13 = vor.u32 %v433_v62, %v432_v3  ;;  %v718_v19 = vsel %vm9244_vm5, %v427_v7, %v717_v61 }
  0xc9   : > { %v450_v12 = vshll.u32 %v344_v59, 16  ;;  %v437_v14 = vrot.slane %v432_v3, 4  ;;  %v449_v15 = vrot.slane %v447_v5, 7  ;;  %v456_v16 = vshrl.u32 %v345_v6, 16  ;;  %v346_v18 = vld [vmem:[%s9163_s3 + $0x2c] sm:$0xf] }
  0xca   : > { %v444_v20 = vor.u32 %v442_v0, %v441_v9  ;;  %v445_v21 = vrot.slane %v441_v9, 4  ;;  %v728_v22 = vld [vmem:[#allocation2 + $0x44] sm:$0x1]  ;;  %v459_v23 = vshll.u32 %v345_v6, 16  ;;  %v347_v25 = vld [vmem:[%s9163_s3 + $0x30] sm:$0xf]  ;;  %v436_v26 = vsel %vm9250_vm6, %v428_v8, %v435_v13 }
  0xcb   : > { %719 = vst [vmem:[#allocation2 + $0x30] sm:$0xf] %v718_v19  ;;  %v722_v27 = vsel %vm9257_vm7, %v437_v14, %v721_v4  ;;  %v452_v28 = vor.u32 %v450_v12, %v449_v15  ;;  %v454_v29 = vrot.slane %v449_v15, 4  ;;  %v348_v30 = vld [vmem:[%s9163_s3 + $0x34] sm:$0xf]  ;;  %v458_v32 = vrot.slane %v456_v16, 7 }
  0xcc   : > { %720 = vst.msk [vmem:[#allocation2 + $0x34] sm:$0xf] %vm279_vm0, %v436_v26  ;;  %723 = vst [vmem:[#allocation2 + $0x38] sm:$0x1] %v722_v27  ;;  %v725_v31 = vsel %vm9244_vm5, %v444_v20, %v724_v11  ;;  %v464_v33 = vshrl.u32 %v346_v18, 16  ;;  %v467_v34 = vshll.u32 %v346_v18, 16 }
  0xcd   : > { %v349_v35 = vld [vmem:[%s9163_s3 + $0x38] sm:$0xf]  ;;  %726 = vst [vmem:[#allocation2 + $0x3c] sm:$0xf] %v725_v31  ;;  %v453_v36 = vsel %vm9250_vm6, %v445_v21, %v452_v28  ;;  %v729_v37 = vsel %vm9257_vm7, %v454_v29, %v728_v22  ;;  %v731_v38 = vld [vmem:[#allocation2 + $0x48] sm:$0xf]  ;;  %v461_v41 = vor.u32 %v459_v23, %v458_v32 }
  0xce   : > { %v473_v39 = vshrl.u32 %v347_v25, 16  ;;  %v476_v40 = vshll.u32 %v347_v25, 16  ;;  %727 = vst.msk [vmem:[#allocation2 + $0x40] sm:$0xf] %vm279_vm0, %v453_v36  ;;  %730 = vst [vmem:[#allocation2 + $0x44] sm:$0x1] %v729_v37 }
  0xcf   : > { %v462_v42 = vrot.slane %v458_v32, 4  ;;  %v466_v43 = vrot.slane %v464_v33, 7  ;;  %v481_v44 = vshrl.u32 %v348_v30, 16  ;;  %v350_v45 = vld [vmem:[%s9163_s3 + $0x3c] sm:$0xf]  ;;  %v484_v48 = vshll.u32 %v348_v30, 16 }
  0xd0   : > { %v735_v46 = vld [vmem:[#allocation2 + $0x50] sm:$0x1]  ;;  %v475_v47 = vrot.slane %v473_v39, 7  ;;  %v490_v49 = vshrl.u32 %v349_v35, 16  ;;  %v493_v50 = vshll.u32 %v349_v35, 16  ;;  %v732_v51 = vsel %vm9244_vm5, %v461_v41, %v731_v38 }
  0xd1   : > { %v469_v52 = vor.u32 %v467_v34, %v466_v43  ;;  %v471_v53 = vrot.slane %v466_v43, 4  ;;  %v738_v54 = vld [vmem:[#allocation2 + $0x54] sm:$0xf]  ;;  %v483_v55 = vrot.slane %v481_v44, 7  ;;  %v742_v56 = vld [vmem:[#allocation2 + $0x5c] sm:$0x1] }
  0xd2   : > { %733 = vst [vmem:[#allocation2 + $0x48] sm:$0xf] %v732_v51  ;;  %v478_v57 = vor.u32 %v476_v40, %v475_v47  ;;  %v479_v58 = vrot.slane %v475_v47, 4  ;;  %v492_v59 = vrot.slane %v490_v49, 7  ;;  %v498_v60 = vshrl.u32 %v350_v45, 16 }
  0xd3   : > { %v351_v61 = vld [vmem:[%s9163_s3 + $0x40] sm:$0xf]  ;;  %v470_v62 = vsel %vm9250_vm6, %v462_v42, %v469_v52  ;;  %v736_v63 = vsel %vm9257_vm7, %v471_v53, %v735_v46  ;;  %v486_v0 = vor.u32 %v484_v48, %v483_v55  ;;  %v488_v1 = vrot.slane %v483_v55, 4  ;;  %v745_v2 = vld [vmem:[#allocation2 + $0x60] sm:$0xf] }
  0xd4   : > { %v352_v3 = vld [vmem:[%s9163_s3 + $0x44] sm:$0xf]  ;;  %734 = vst.msk [vmem:[#allocation2 + $0x4c] sm:$0xf] %vm279_vm0, %v470_v62  ;;  %737 = vst [vmem:[#allocation2 + $0x50] sm:$0x1] %v736_v63  ;;  %v739_v4 = vsel %vm9244_vm5, %v478_v57, %v738_v54  ;;  %v495_v5 = vor.u32 %v493_v50, %v492_v59 }
  0xd5   : > { %v496_v6 = vrot.slane %v492_v59, 4  ;;  %v500_v7 = vrot.slane %v498_v60, 7  ;;  %v353_v8 = vld [vmem:[%s9163_s3 + $0x48] sm:$0xf]  ;;  %740 = vst [vmem:[#allocation2 + $0x54] sm:$0xf] %v739_v4  ;;  %v487_v9 = vsel %vm9250_vm6, %v479_v58, %v486_v0  ;;  %v743_v11 = vsel %vm9257_vm7, %v488_v1, %v742_v56 }
  0xd6   : > { %v501_v12 = vshll.u32 %v350_v45, 16  ;;  %v749_v13 = vld [vmem:[#allocation2 + $0x68] sm:$0x1]  ;;  %v507_v14 = vshrl.u32 %v351_v61, 16  ;;  %v354_v15 = vld [vmem:[%s9163_s3 + $0x4c] sm:$0xf]  ;;  %v746_v16 = vsel %vm9244_vm5, %v495_v5, %v745_v2 }
  0xd7   : > { %741 = vst.msk [vmem:[#allocation2 + $0x58] sm:$0xf] %vm279_vm0, %v487_v9  ;;  %744 = vst [vmem:[#allocation2 + $0x5c] sm:$0x1] %v743_v11  ;;  %v505_v18 = vrot.slane %v500_v7, 4  ;;  %v510_v19 = vshll.u32 %v351_v61, 16 }
  0xd8   : > { %v515_v20 = vshrl.u32 %v352_v3, 16  ;;  %747 = vst [vmem:[#allocation2 + $0x60] sm:$0xf] %v746_v16  ;;  %v503_v21 = vor.u32 %v501_v12, %v500_v7  ;;  %v509_v22 = vrot.slane %v507_v14, 7  ;;  %v752_v23 = vld [vmem:[#allocation2 + $0x6c] sm:$0xf] }
  0xd9   : > { %v518_v25 = vshll.u32 %v352_v3, 16  ;;  %v524_v26 = vshrl.u32 %v353_v8, 16  ;;  %v750_v27 = vsel %vm9257_vm7, %v505_v18, %v749_v13  ;;  %v527_v29 = vshll.u32 %v353_v8, 16  ;;  %v355_v31 = vld [vmem:[%s9163_s3 + $0x50] sm:$0xf] }
  0xda   : > { %v517_v28 = vrot.slane %v515_v20, 7  ;;  %v532_v30 = vshrl.u32 %v354_v15, 16  ;;  %v504_v32 = vsel %vm9250_vm6, %v496_v6, %v503_v21  ;;  %751 = vst [vmem:[#allocation2 + $0x68] sm:$0x1] %v750_v27  ;;  %v512_v33 = vor.u32 %v510_v19, %v509_v22  ;;  %v756_v35 = vld [vmem:[#allocation2 + $0x74] sm:$0x1] }
  0xdb   : > { %v513_v34 = vrot.slane %v509_v22, 4  ;;  %v526_v36 = vrot.slane %v524_v26, 7  ;;  %v759_v37 = vld [vmem:[#allocation2 + $0x78] sm:$0xf]  ;;  %748 = vst.msk [vmem:[#allocation2 + $0x64] sm:$0xf] %vm279_vm0, %v504_v32 }
  0xdc   : > { %v520_v38 = vor.u32 %v518_v25, %v517_v28  ;;  %v522_v39 = vrot.slane %v517_v28, 4  ;;  %v534_v40 = vrot.slane %v532_v30, 7  ;;  %v535_v41 = vshll.u32 %v354_v15, 16  ;;  %v356_v42 = vld [vmem:[%s9163_s3 + $0x54] sm:$0xf] }
  0xdd   : > { %v753_v43 = vsel %vm9244_vm5, %v512_v33, %v752_v23  ;;  %v529_v44 = vor.u32 %v527_v29, %v526_v36  ;;  %v530_v45 = vrot.slane %v526_v36, 4  ;;  %v763_v46 = vld [vmem:[#allocation2 + $0x80] sm:$0x1]  ;;  %v541_v47 = vshrl.u32 %v355_v31, 16  ;;  %v357_v48 = vld [vmem:[%s9163_s3 + $0x58] sm:$0xf] }
  0xde   : > { %754 = vst [vmem:[#allocation2 + $0x6c] sm:$0xf] %v753_v43  ;;  %v521_v49 = vsel %vm9250_vm6, %v513_v34, %v520_v38  ;;  %v757_v50 = vsel %vm9257_vm7, %v522_v39, %v756_v35  ;;  %v537_v51 = vor.u32 %v535_v41, %v534_v40  ;;  %v539_v52 = vrot.slane %v534_v40, 4  ;;  %v358_v53 = vld [vmem:[%s9163_s3 + $0x5c] sm:$0xf] }
  0xdf   : > { %755 = vst.msk [vmem:[#allocation2 + $0x70] sm:$0xf] %vm279_vm0, %v521_v49  ;;  %758 = vst [vmem:[#allocation2 + $0x74] sm:$0x1] %v757_v50  ;;  %v760_v54 = vsel %vm9244_vm5, %v529_v44, %v759_v37  ;;  %v543_v55 = vrot.slane %v541_v47, 7  ;;  %v544_v56 = vshll.u32 %v355_v31, 16 }
  0xe0   : > { %v549_v57 = vshrl.u32 %v356_v42, 16  ;;  %v359_v58 = vld [vmem:[%s9163_s3 + $0x60] sm:$0xf]  ;;  %761 = vst [vmem:[#allocation2 + $0x78] sm:$0xf] %v760_v54  ;;  %v538_v59 = vsel %vm9250_vm6, %v530_v45, %v537_v51  ;;  %v764_v60 = vsel %vm9257_vm7, %v539_v52, %v763_v46  ;;  %v552_v62 = vshll.u32 %v356_v42, 16 }
  0xe1   : > { %v766_v61 = vld [vmem:[#allocation2 + $0x84] sm:$0xf]  ;;  %v558_v63 = vshrl.u32 %v357_v48, 16  ;;  %762 = vst.msk [vmem:[#allocation2 + $0x7c] sm:$0xf] %vm279_vm0, %v538_v59  ;;  %v546_v0 = vor.u32 %v544_v56, %v543_v55  ;;  %v547_v1 = vrot.slane %v543_v55, 4 }
  0xe2   : > { %765 = vst [vmem:[#allocation2 + $0x80] sm:$0x1] %v764_v60  ;;  %v551_v2 = vrot.slane %v549_v57, 7  ;;  %v770_v3 = vld [vmem:[#allocation2 + $0x8c] sm:$0x1]  ;;  %v561_v4 = vshll.u32 %v357_v48, 16 }
  0xe3   : > { %v560_v5 = vrot.slane %v558_v63, 7  ;;  %v566_v6 = vshrl.u32 %v358_v53, 16  ;;  %v569_v7 = vshll.u32 %v358_v53, 16  ;;  %v575_v8 = vshrl.u32 %v359_v58, 16  ;;  %v360_v9 = vld [vmem:[%s9163_s3 + $0x64] sm:$0xf] }
  0xe4   : > { %v767_v11 = vsel %vm9244_vm5, %v546_v0, %v766_v61  ;;  %v554_v12 = vor.u32 %v552_v62, %v551_v2  ;;  %v556_v13 = vrot.slane %v551_v2, 4  ;;  %v773_v14 = vld [vmem:[#allocation2 + $0x90] sm:$0xf]  ;;  %v777_v15 = vld [vmem:[#allocation2 + $0x98] sm:$0x1]  ;;  %v578_v16 = vshll.u32 %v359_v58, 16 }
  0xe5   : > { %768 = vst [vmem:[#allocation2 + $0x84] sm:$0xf] %v767_v11  ;;  %v563_v18 = vor.u32 %v561_v4, %v560_v5  ;;  %v564_v19 = vrot.slane %v560_v5, 4  ;;  %v568_v20 = vrot.slane %v566_v6, 7  ;;  %v577_v21 = vrot.slane %v575_v8, 7 }
  0xe6   : > { %v361_v22 = vld [vmem:[%s9163_s3 + $0x68] sm:$0xf]  ;;  %v555_v23 = vsel %vm9250_vm6, %v547_v1, %v554_v12  ;;  %v771_v25 = vsel %vm9257_vm7, %v556_v13, %v770_v3  ;;  %v780_v26 = vld [vmem:[#allocation2 + $0x9c] sm:$0xf]  ;;  %v583_v27 = vshrl.u32 %v360_v9, 16  ;;  %v586_v28 = vshll.u32 %v360_v9, 16 }
  0xe7   : > { %v362_v29 = vld [vmem:[%s9163_s3 + $0x6c] sm:$0xf]  ;;  %769 = vst.msk [vmem:[#allocation2 + $0x88] sm:$0xf] %vm279_vm0, %v555_v23  ;;  %772 = vst [vmem:[#allocation2 + $0x8c] sm:$0x1] %v771_v25  ;;  %v774_v30 = vsel %vm9244_vm5, %v563_v18, %v773_v14  ;;  %v571_v31 = vor.u32 %v569_v7, %v568_v20  ;;  %v580_v33 = vor.u32 %v578_v16, %v577_v21 }
  0xe8   : > { %v573_v32 = vrot.slane %v568_v20, 4  ;;  %v363_v34 = vld [vmem:[%s9163_s3 + $0x70] sm:$0xf]  ;;  %775 = vst [vmem:[#allocation2 + $0x90] sm:$0xf] %v774_v30  ;;  %v581_v35 = vrot.slane %v577_v21, 4 }
  0xe9   : > { %v585_v36 = vrot.slane %v583_v27, 7  ;;  %v592_v37 = vshrl.u32 %v361_v22, 16  ;;  %v595_v38 = vshll.u32 %v361_v22, 16  ;;  %v364_v39 = vld [vmem:[%s9163_s3 + $0x74] sm:$0xf]  ;;  %v572_v40 = vsel %vm9250_vm6, %v564_v19, %v571_v31 }
  0xea   : > { %v778_v41 = vsel %vm9257_vm7, %v573_v32, %v777_v15  ;;  %v781_v42 = vsel %vm9244_vm5, %v580_v33, %v780_v26  ;;  %v784_v43 = vld [vmem:[#allocation2 + $0xa4] sm:$0x1]  ;;  %v600_v44 = vshrl.u32 %v362_v29, 16  ;;  %776 = vst.msk [vmem:[#allocation2 + $0x94] sm:$0xf] %vm279_vm0, %v572_v40  ;;  %v603_v49 = vshll.u32 %v362_v29, 16 }
  0xeb   : > { %779 = vst [vmem:[#allocation2 + $0x98] sm:$0x1] %v778_v41  ;;  %782 = vst [vmem:[#allocation2 + $0x9c] sm:$0xf] %v781_v42  ;;  %v588_v45 = vor.u32 %v586_v28, %v585_v36  ;;  %v590_v46 = vrot.slane %v585_v36, 4  ;;  %v594_v47 = vrot.slane %v592_v37, 7 }
  0xec   : > { %v787_v48 = vld [vmem:[#allocation2 + $0xa8] sm:$0xf]  ;;  %v602_v50 = vrot.slane %v600_v44, 7  ;;  %v609_v51 = vshrl.u32 %v363_v34, 16  ;;  %v612_v52 = vshll.u32 %v363_v34, 16  ;;  %v617_v53 = vshrl.u32 %v364_v39, 16 }
  0xed   : > { %v365_v54 = vld [vmem:[%s9163_s3 + $0x78] sm:$0xf]  ;;  %v589_v55 = vsel %vm9250_vm6, %v581_v35, %v588_v45  ;;  %v785_v56 = vsel %vm9257_vm7, %v590_v46, %v784_v43  ;;  %v597_v57 = vor.u32 %v595_v38, %v594_v47  ;;  %v598_v58 = vrot.slane %v594_v47, 4  ;;  %v366_v0 = vld [vmem:[%s9163_s3 + $0x7c] sm:$0xf] }
  0xee   : > { %v791_v59 = vld [vmem:[#allocation2 + $0xb0] sm:$0x1]  ;;  %783 = vst.msk [vmem:[#allocation2 + $0xa0] sm:$0xf] %vm279_vm0, %v589_v55  ;;  %786 = vst [vmem:[#allocation2 + $0xa4] sm:$0x1] %v785_v56  ;;  %v605_v60 = vor.u32 %v603_v49, %v602_v50 }
  0xef   : > { %v607_v61 = vrot.slane %v602_v50, 4  ;;  %v611_v62 = vrot.slane %v609_v51, 7  ;;  %v619_v63 = vrot.slane %v617_v53, 7  ;;  %v788_v1 = vsel %vm9244_vm5, %v597_v57, %v787_v48  ;;  %v794_v2 = vld [vmem:[#allocation2 + $0xb4] sm:$0xf] }
  0xf0   : > { %v620_v3 = vshll.u32 %v364_v39, 16  ;;  %v626_v4 = vshrl.u32 %v365_v54, 16  ;;  %v629_v5 = vshll.u32 %v365_v54, 16  ;;  %789 = vst [vmem:[#allocation2 + $0xa8] sm:$0xf] %v788_v1  ;;  %v606_v6 = vsel %vm9250_vm6, %v598_v58, %v605_v60 }
  0xf1   : > { %v792_v7 = vsel %vm9257_vm7, %v607_v61, %v791_v59  ;;  %v614_v8 = vor.u32 %v612_v52, %v611_v62  ;;  %v615_v9 = vrot.slane %v611_v62, 4  ;;  %v798_v11 = vld [vmem:[#allocation2 + $0xbc] sm:$0x1]  ;;  %790 = vst.msk [vmem:[#allocation2 + $0xac] sm:$0xf] %vm279_vm0, %v606_v6  ;;  %v624_v13 = vrot.slane %v619_v63, 4 }
  0xf2   : > { %793 = vst [vmem:[#allocation2 + $0xb0] sm:$0x1] %v792_v7  ;;  %v622_v12 = vor.u32 %v620_v3, %v619_v63  ;;  %v628_v14 = vrot.slane %v626_v4, 7  ;;  %v634_v15 = vshrl.u32 %v366_v0, 16  ;;  %v801_v18 = vld [vmem:[#allocation2 + $0xc0] sm:$0xf] }
  0xf3   : > { %v795_v16 = vsel %vm9244_vm5, %v614_v8, %v794_v2  ;;  %v637_v19 = vshll.u32 %v366_v0, 16  ;;  %v799_v21 = vsel %vm9257_vm7, %v624_v13, %v798_v11  ;;  %v805_v27 = vld [vmem:[#allocation2 + $0xc8] sm:$0x1] }
  0xf4   : > { %796 = vst [vmem:[#allocation2 + $0xb4] sm:$0xf] %v795_v16  ;;  %v623_v20 = vsel %vm9250_vm6, %v615_v9, %v622_v12  ;;  %v631_v22 = vor.u32 %v629_v5, %v628_v14  ;;  %800 = vst [vmem:[#allocation2 + $0xbc] sm:$0x1] %v799_v21  ;;  %v632_v23 = vrot.slane %v628_v14, 4  ;;  %v636_v25 = vrot.slane %v634_v15, 7 }
  0xf5   : > { %797 = vst.msk [vmem:[#allocation2 + $0xb8] sm:$0xf] %vm279_vm0, %v623_v20 }
  0xf6   : > { %v802_v26 = vsel %vm9244_vm5, %v631_v22, %v801_v18  ;;  %v639_v28 = vor.u32 %v637_v19, %v636_v25  ;;  %v641_v29 = vrot.slane %v636_v25, 4 }
  0xf7   : > { %803 = vst [vmem:[#allocation2 + $0xc0] sm:$0xf] %v802_v26 }
  0xf8   : > { %v640_v30 = vsel %vm9250_vm6, %v632_v23, %v639_v28  ;;  %v806_v31 = vsel %vm9257_vm7, %v641_v29, %v805_v27 }
  0xf9   : > { %804 = vst.msk [vmem:[#allocation2 + $0xc4] sm:$0xf] %vm279_vm0, %v640_v30  ;;  %807 = vst [vmem:[#allocation2 + $0xc8] sm:$0x1] %v806_v31 }
  0xfa PF: > { %p7620_p0 = scmp.le.s32.totalorder %s8871_s18, 0 }
  0xfb   : > { %v861_v10 = vld [vmem:[%s9163_s3] sm:$0xf] (!%p7620_p0)  ;;  %vm1264_vm8 = vcmask (!%p7620_p0), 27648   ;;  %vm1265_vm9 = vsmask.f32 (!%p7620_p0), 7938  ;;  %vm1271_vm13 = vcmask (!%p7620_p0), 24576  }
  0xfc   : > { %811 = sbr.rel (%p7620_p0) target bundleno = 334 (0x14e), region = 60  ;;  %v897_v32 = vshrl.u32 (!%p7620_p0), %v861_v10, 16  ;;  %v900_v33 = vshll.u32 (!%p7620_p0), %v861_v10, 16  ;;  %v862_v17 = vld [vmem:[%s9163_s3 + $0x4] sm:$0xf] (!%p7620_p0)  ;;  %vm9403_vm12 = vmand (!%p7620_p0), %vm1264_vm8, %vm1265_vm9 }
  0xfd   : > { %vm893_vm10 = vsmask.f32 (!%p7620_p0), 256  ;;  %vm894_vm11 = vsmask.f32 (!%p7620_p0), 4368  ;;  %v905_v34 = vshrl.u32 (!%p7620_p0), %v862_v17, 16  ;;  %v908_v35 = vshll.u32 (!%p7620_p0), %v862_v17, 16 }
  0xfe   : > { %v899_v24 = vrot.slane (!%p7620_p0), %v897_v32, 7  ;;  %v813_v36 = vld [vmem:[#allocation2 + $0xc] sm:$0xf] (!%p7620_p0)  ;;  %v863_v41 = vld [vmem:[%s9163_s3 + $0x8] sm:$0xf] (!%p7620_p0)  ;;  %vm9409_vm14 = vmor (!%p7620_p0), %vm893_vm10, %vm894_vm11 }
  0xff   : > { %v907_v40 = vrot.slane (!%p7620_p0), %v905_v34, 7  ;;  %v815_v43 = vld [vmem:[#allocation2 + $0x14] sm:$0x1] (!%p7620_p0)  ;;  %v914_v44 = vshrl.u32 (!%p7620_p0), %v863_v41, 16  ;;  %v917_v45 = vshll.u32 (!%p7620_p0), %v863_v41, 16  ;;  %vm9415_vm15 = vmand (!%p7620_p0), %vm1271_vm13, %vm893_vm10 }
 0x100   : > { %v902_v37 = vor.u32 (!%p7620_p0), %v900_v33, %v899_v24  ;;  %v903_v39 = vrot.slane (!%p7620_p0), %v899_v24, 4  ;;  %v864_v46 = vld [vmem:[%s9163_s3 + $0xc] sm:$0xf] (!%p7620_p0)  ;;  %v814_v48 = vld [vmem:[#allocation2 + $0x10] sm:$0xf] (!%p7620_p0) }
 0x101   : > { %v910_v49 = vor.u32 (!%p7620_p0), %v908_v35, %v907_v40  ;;  %v912_v50 = vrot.slane (!%p7620_p0), %v907_v40, 4  ;;  %v922_v51 = vshrl.u32 (!%p7620_p0), %v864_v46, 16  ;;  %v1273_v53 = vld [vmem:[#allocation2 + $0x14] sm:$0x1] (!%p7620_p0)  ;;  %v916_v54 = vrot.slane (!%p7620_p0), %v914_v44, 7 }
 0x102   : > { %v1216_v47 = vadd.bf16 (!%p7620_p0), %v902_v37, %v813_v36  ;;  %v925_v55 = vshll.u32 (!%p7620_p0), %v864_v46, 16  ;;  %v865_v56 = vld [vmem:[%s9163_s3 + $0x10] sm:$0xf] (!%p7620_p0)  ;;  %v816_v60 = vld [vmem:[#allocation2 + $0x18] sm:$0xf] (!%p7620_p0) }
 0x103   : > { %v911_v58 = vsel %vm9409_vm14, %v903_v39, %v910_v49  ;;  %v1218_v59 = vadd.bf16 %v912_v50, %v815_v43  ;;  %v1276_v61 = vld [vmem:[#allocation2 + $0x18] sm:$0xf]  ;;  %v924_v62 = vrot.slane %v922_v51, 7  ;;  %v919_v0 = vor.u32 %v917_v45, %v916_v54  ;;  %v818_v2 = vld [vmem:[#allocation2 + $0x20] sm:$0x1] }
 0x104   : > { %v1267_v57 = vsel %vm9403_vm12, %v1216_v47, %v813_v36  ;;  %v1217_v63 = vadd.bf16 %v911_v58, %v814_v48  ;;  %v920_v1 = vrot.slane %v916_v54, 4  ;;  %v931_v3 = vshrl.u32 %v865_v56, 16  ;;  %v866_v4 = vld [vmem:[%s9163_s3 + $0x14] sm:$0xf]  ;;  %v817_v6 = vld [vmem:[#allocation2 + $0x1c] sm:$0xf] }
 0x105   : > { %1268 = vst [vmem:[#allocation2 + $0xc] sm:$0xf] %v1267_v57  ;;  %v1274_v5 = vsel %vm9415_vm15, %v1218_v59, %v1273_v53  ;;  %v927_v7 = vor.u32 %v925_v55, %v924_v62  ;;  %v929_v8 = vrot.slane %v924_v62, 4  ;;  %v1280_v9 = vld [vmem:[#allocation2 + $0x20] sm:$0x1]  ;;  %v934_v11 = vshll.u32 %v865_v56, 16 }
 0x106   : > { %1270 = vst.msk [vmem:[#allocation2 + $0x10] sm:$0xf] %vm1264_vm8, %v1217_v63  ;;  %1275 = vst [vmem:[#allocation2 + $0x14] sm:$0x1] %v1274_v5  ;;  %v1219_v12 = vadd.bf16 %v919_v0, %v816_v60  ;;  %v933_v13 = vrot.slane %v931_v3, 7  ;;  %v939_v14 = vshrl.u32 %v866_v4, 16 }
 0x107   : > { %v942_v15 = vshll.u32 %v866_v4, 16  ;;  %v867_v16 = vld [vmem:[%s9163_s3 + $0x18] sm:$0xf]  ;;  %v928_v18 = vsel %vm9409_vm14, %v920_v1, %v927_v7  ;;  %v1221_v19 = vadd.bf16 %v929_v8, %v818_v2  ;;  %v819_v20 = vld [vmem:[#allocation2 + $0x24] sm:$0xf] }
 0x108   : > { %v948_v21 = vshrl.u32 %v867_v16, 16  ;;  %v951_v22 = vshll.u32 %v867_v16, 16  ;;  %v1277_v23 = vsel %vm9403_vm12, %v1219_v12, %v1276_v61  ;;  %v1220_v25 = vadd.bf16 %v928_v18, %v817_v6  ;;  %v1283_v27 = vld [vmem:[#allocation2 + $0x24] sm:$0xf]  ;;  %v868_v29 = vld [vmem:[%s9163_s3 + $0x1c] sm:$0xf] }
 0x109   : > { %v936_v26 = vor.u32 %v934_v11, %v933_v13  ;;  %v937_v28 = vrot.slane %v933_v13, 4  ;;  %1278 = vst [vmem:[#allocation2 + $0x18] sm:$0xf] %v1277_v23  ;;  %v1281_v30 = vsel %vm9415_vm15, %v1221_v19, %v1280_v9  ;;  %v820_v31 = vld [vmem:[#allocation2 + $0x28] sm:$0xf]  ;;  %v941_v10 = vrot.slane %v939_v14, 7 }
 0x10a   : > { %v821_v32 = vld [vmem:[#allocation2 + $0x2c] sm:$0x1]  ;;  %v950_v33 = vrot.slane %v948_v21, 7  ;;  %v956_v17 = vshrl.u32 %v868_v29, 16  ;;  %1279 = vst.msk [vmem:[#allocation2 + $0x1c] sm:$0xf] %vm1264_vm8, %v1220_v25 }
 0x10b   : > { %1282 = vst [vmem:[#allocation2 + $0x20] sm:$0x1] %v1281_v30  ;;  %v1222_v24 = vadd.bf16 %v936_v26, %v819_v20  ;;  %v822_v34 = vld [vmem:[#allocation2 + $0x30] sm:$0xf]  ;;  %v959_v35 = vshll.u32 %v868_v29, 16  ;;  %v944_v37 = vor.u32 %v942_v15, %v941_v10  ;;  %v946_v39 = vrot.slane %v941_v10, 4 }
 0x10c   : > { %v869_v36 = vld [vmem:[%s9163_s3 + $0x20] sm:$0xf]  ;;  %v1287_v40 = vld [vmem:[#allocation2 + $0x2c] sm:$0x1]  ;;  %v953_v41 = vor.u32 %v951_v22, %v950_v33  ;;  %v1290_v43 = vld [vmem:[#allocation2 + $0x30] sm:$0xf] }
 0x10d   : > { %v954_v44 = vrot.slane %v950_v33, 4  ;;  %v1284_v45 = vsel %vm9403_vm12, %v1222_v24, %v1283_v27  ;;  %v958_v46 = vrot.slane %v956_v17, 7  ;;  %v965_v47 = vshrl.u32 %v869_v36, 16  ;;  %v870_v49 = vld [vmem:[%s9163_s3 + $0x24] sm:$0xf] }
 0x10e   : > { %v968_v48 = vshll.u32 %v869_v36, 16  ;;  %1285 = vst [vmem:[#allocation2 + $0x24] sm:$0xf] %v1284_v45  ;;  %v945_v50 = vsel %vm9409_vm14, %v937_v28, %v944_v37  ;;  %v1224_v51 = vadd.bf16 %v946_v39, %v821_v32  ;;  %v1225_v53 = vadd.bf16 %v953_v41, %v822_v34  ;;  %v824_v54 = vld [vmem:[#allocation2 + $0x38] sm:$0x1] }
 0x10f   : > { %v973_v55 = vshrl.u32 %v870_v49, 16  ;;  %v1223_v56 = vadd.bf16 %v945_v50, %v820_v31  ;;  %v823_v57 = vld [vmem:[#allocation2 + $0x34] sm:$0xf]  ;;  %v961_v58 = vor.u32 %v959_v35, %v958_v46  ;;  %v963_v59 = vrot.slane %v958_v46, 4  ;;  %v871_v61 = vld [vmem:[%s9163_s3 + $0x28] sm:$0xf] }
 0x110   : > { %v967_v60 = vrot.slane %v965_v47, 7  ;;  %v1288_v62 = vsel %vm9415_vm15, %v1224_v51, %v1287_v40  ;;  %v1291_v63 = vsel %vm9403_vm12, %v1225_v53, %v1290_v43  ;;  %v1294_v0 = vld [vmem:[#allocation2 + $0x38] sm:$0x1]  ;;  %v825_v1 = vld [vmem:[#allocation2 + $0x3c] sm:$0xf]  ;;  %v976_v3 = vshll.u32 %v870_v49, 16 }
 0x111   : > { %v975_v2 = vrot.slane %v973_v55, 7  ;;  %1286 = vst.msk [vmem:[#allocation2 + $0x28] sm:$0xf] %vm1264_vm8, %v1223_v56  ;;  %1289 = vst [vmem:[#allocation2 + $0x2c] sm:$0x1] %v1288_v62  ;;  %v962_v4 = vsel %vm9409_vm14, %v954_v44, %v961_v58  ;;  %v1227_v5 = vadd.bf16 %v963_v59, %v824_v54  ;;  %v982_v16 = vshrl.u32 %v871_v61, 16 }
 0x112   : > { %1292 = vst [vmem:[#allocation2 + $0x30] sm:$0xf] %v1291_v63  ;;  %v970_v6 = vor.u32 %v968_v48, %v967_v60  ;;  %v971_v7 = vrot.slane %v967_v60, 4  ;;  %v827_v8 = vld [vmem:[#allocation2 + $0x44] sm:$0x1]  ;;  %v1226_v11 = vadd.bf16 %v962_v4, %v823_v57  ;;  %v985_v21 = vshll.u32 %v871_v61, 16 }
 0x113   : > { %v872_v9 = vld [vmem:[%s9163_s3 + $0x2c] sm:$0xf]  ;;  %v1297_v12 = vld [vmem:[#allocation2 + $0x3c] sm:$0xf]  ;;  %v826_v13 = vld [vmem:[#allocation2 + $0x40] sm:$0xf]  ;;  %v978_v14 = vor.u32 %v976_v3, %v975_v2  ;;  %v1295_v18 = vsel %vm9415_vm15, %v1227_v5, %v1294_v0 }
 0x114   : > { %v980_v15 = vrot.slane %v975_v2, 4  ;;  %v1228_v19 = vadd.bf16 %v970_v6, %v825_v1  ;;  %v1301_v20 = vld [vmem:[#allocation2 + $0x44] sm:$0x1]  ;;  %v990_v22 = vshrl.u32 %v872_v9, 16  ;;  %v873_v23 = vld [vmem:[%s9163_s3 + $0x30] sm:$0xf] }
 0x115   : > { %1293 = vst.msk [vmem:[#allocation2 + $0x34] sm:$0xf] %vm1264_vm8, %v1226_v11  ;;  %1296 = vst [vmem:[#allocation2 + $0x38] sm:$0x1] %v1295_v18  ;;  %v979_v25 = vsel %vm9409_vm14, %v971_v7, %v978_v14  ;;  %v828_v27 = vld [vmem:[#allocation2 + $0x48] sm:$0xf] }
 0x116   : > { %v1230_v26 = vadd.bf16 %v980_v15, %v827_v8  ;;  %v984_v28 = vrot.slane %v982_v16, 7  ;;  %v993_v29 = vshll.u32 %v872_v9, 16  ;;  %v874_v30 = vld [vmem:[%s9163_s3 + $0x34] sm:$0xf]  ;;  %v1298_v31 = vsel %vm9403_vm12, %v1228_v19, %v1297_v12  ;;  %v1304_v32 = vld [vmem:[#allocation2 + $0x48] sm:$0xf] }
 0x117   : > { %v1229_v10 = vadd.bf16 %v979_v25, %v826_v13  ;;  %v829_v33 = vld [vmem:[#allocation2 + $0x4c] sm:$0xf]  ;;  %v992_v17 = vrot.slane %v990_v22, 7  ;;  %v999_v24 = vshrl.u32 %v873_v23, 16  ;;  %1299 = vst [vmem:[#allocation2 + $0x3c] sm:$0xf] %v1298_v31 }
 0x118   : > { %v1302_v34 = vsel %vm9415_vm15, %v1230_v26, %v1301_v20  ;;  %v987_v35 = vor.u32 %v985_v21, %v984_v28  ;;  %v988_v36 = vrot.slane %v984_v28, 4  ;;  %v830_v37 = vld [vmem:[#allocation2 + $0x50] sm:$0x1]  ;;  %v1002_v39 = vshll.u32 %v873_v23, 16  ;;  %v831_v48 = vld [vmem:[#allocation2 + $0x54] sm:$0xf] }
 0x119   : > { %v875_v40 = vld [vmem:[%s9163_s3 + $0x38] sm:$0xf]  ;;  %1300 = vst.msk [vmem:[#allocation2 + $0x40] sm:$0xf] %vm1264_vm8, %v1229_v10  ;;  %1303 = vst [vmem:[#allocation2 + $0x44] sm:$0x1] %v1302_v34  ;;  %v995_v41 = vor.u32 %v993_v29, %v992_v17 }
 0x11a   : > { %v997_v43 = vrot.slane %v992_v17, 4  ;;  %v1308_v44 = vld [vmem:[#allocation2 + $0x50] sm:$0x1]  ;;  %v1001_v45 = vrot.slane %v999_v24, 7  ;;  %v1007_v46 = vshrl.u32 %v874_v30, 16  ;;  %v1231_v47 = vadd.bf16 %v987_v35, %v828_v27 }
 0x11b   : > { %v1010_v49 = vshll.u32 %v874_v30, 16  ;;  %v1016_v50 = vshrl.u32 %v875_v40, 16  ;;  %v1019_v51 = vshll.u32 %v875_v40, 16  ;;  %v996_v53 = vsel %vm9409_vm14, %v988_v36, %v995_v41  ;;  %v1311_v56 = vld [vmem:[#allocation2 + $0x54] sm:$0xf] }
 0x11c   : > { %v1233_v54 = vadd.bf16 %v997_v43, %v830_v37  ;;  %v1004_v55 = vor.u32 %v1002_v39, %v1001_v45  ;;  %v1005_v57 = vrot.slane %v1001_v45, 4  ;;  %v876_v58 = vld [vmem:[%s9163_s3 + $0x3c] sm:$0xf]  ;;  %v1305_v59 = vsel %vm9403_vm12, %v1231_v47, %v1304_v32  ;;  %v832_v61 = vld [vmem:[#allocation2 + $0x58] sm:$0xf] }
 0x11d   : > { %v1232_v60 = vadd.bf16 %v996_v53, %v829_v33  ;;  %v1009_v62 = vrot.slane %v1007_v46, 7  ;;  %v833_v63 = vld [vmem:[#allocation2 + $0x5c] sm:$0x1]  ;;  %v1018_v0 = vrot.slane %v1016_v50, 7  ;;  %1306 = vst [vmem:[#allocation2 + $0x48] sm:$0xf] %v1305_v59 }
 0x11e   : > { %v1309_v1 = vsel %vm9415_vm15, %v1233_v54, %v1308_v44  ;;  %v1234_v2 = vadd.bf16 %v1004_v55, %v831_v48  ;;  %v834_v3 = vld [vmem:[#allocation2 + $0x60] sm:$0xf]  ;;  %v1024_v4 = vshrl.u32 %v876_v58, 16  ;;  %v1027_v5 = vshll.u32 %v876_v58, 16  ;;  %v877_v6 = vld [vmem:[%s9163_s3 + $0x40] sm:$0xf] }
 0x11f   : > { %1307 = vst.msk [vmem:[#allocation2 + $0x4c] sm:$0xf] %vm1264_vm8, %v1232_v60  ;;  %1310 = vst [vmem:[#allocation2 + $0x50] sm:$0x1] %v1309_v1  ;;  %v1012_v7 = vor.u32 %v1010_v49, %v1009_v62  ;;  %v1014_v8 = vrot.slane %v1009_v62, 4  ;;  %v1021_v11 = vor.u32 %v1019_v51, %v1018_v0  ;;  %v1022_v12 = vrot.slane %v1018_v0, 4 }
 0x120   : > { %v1315_v9 = vld [vmem:[#allocation2 + $0x5c] sm:$0x1]  ;;  %v1312_v14 = vsel %vm9403_vm12, %v1234_v2, %v1311_v56  ;;  %v1318_v15 = vld [vmem:[#allocation2 + $0x60] sm:$0xf]  ;;  %v1026_v16 = vrot.slane %v1024_v4, 7  ;;  %v1033_v18 = vshrl.u32 %v877_v6, 16 }
 0x121   : > { %v878_v13 = vld [vmem:[%s9163_s3 + $0x44] sm:$0xf]  ;;  %v1036_v19 = vshll.u32 %v877_v6, 16  ;;  %1313 = vst [vmem:[#allocation2 + $0x54] sm:$0xf] %v1312_v14  ;;  %v1013_v20 = vsel %vm9409_vm14, %v1005_v57, %v1012_v7  ;;  %v1236_v21 = vadd.bf16 %v1014_v8, %v833_v63  ;;  %v1237_v22 = vadd.bf16 %v1021_v11, %v834_v3 }
 0x122   : > { %v835_v23 = vld [vmem:[#allocation2 + $0x64] sm:$0xf]  ;;  %v836_v25 = vld [vmem:[#allocation2 + $0x68] sm:$0x1]  ;;  %v1041_v26 = vshrl.u32 %v878_v13, 16  ;;  %v1235_v27 = vadd.bf16 %v1013_v20, %v832_v61  ;;  %v1029_v28 = vor.u32 %v1027_v5, %v1026_v16  ;;  %v1031_v29 = vrot.slane %v1026_v16, 4 }
 0x123   : > { %v1322_v30 = vld [vmem:[#allocation2 + $0x68] sm:$0x1]  ;;  %v1035_v31 = vrot.slane %v1033_v18, 7  ;;  %v879_v10 = vld [vmem:[%s9163_s3 + $0x48] sm:$0xf]  ;;  %v1316_v32 = vsel %vm9415_vm15, %v1236_v21, %v1315_v9  ;;  %v1319_v33 = vsel %vm9403_vm12, %v1237_v22, %v1318_v15  ;;  %v1044_v34 = vshll.u32 %v878_v13, 16 }
 0x124   : > { %v837_v17 = vld [vmem:[#allocation2 + $0x6c] sm:$0xf]  ;;  %v1043_v24 = vrot.slane %v1041_v26, 7  ;;  %v880_v35 = vld [vmem:[%s9163_s3 + $0x4c] sm:$0xf]  ;;  %v1030_v36 = vsel %vm9409_vm14, %v1022_v12, %v1029_v28  ;;  %v1239_v37 = vadd.bf16 %v1031_v29, %v836_v25  ;;  %v1050_v48 = vshrl.u32 %v879_v10, 16 }
 0x125   : > { %1314 = vst.msk [vmem:[#allocation2 + $0x58] sm:$0xf] %vm1264_vm8, %v1235_v27  ;;  %1317 = vst [vmem:[#allocation2 + $0x5c] sm:$0x1] %v1316_v32  ;;  %v1038_v39 = vor.u32 %v1036_v19, %v1035_v31  ;;  %v1325_v40 = vld [vmem:[#allocation2 + $0x6c] sm:$0xf]  ;;  %v1238_v44 = vadd.bf16 %v1030_v36, %v835_v23 }
 0x126   : > { %1320 = vst [vmem:[#allocation2 + $0x60] sm:$0xf] %v1319_v33  ;;  %v1039_v41 = vrot.slane %v1035_v31, 4  ;;  %v839_v43 = vld [vmem:[#allocation2 + $0x74] sm:$0x1]  ;;  %v1046_v46 = vor.u32 %v1044_v34, %v1043_v24  ;;  %v1048_v47 = vrot.slane %v1043_v24, 4  ;;  %v1323_v50 = vsel %vm9415_vm15, %v1239_v37, %v1322_v30 }
 0x127   : > { %v838_v45 = vld [vmem:[#allocation2 + $0x70] sm:$0xf]  ;;  %v881_v49 = vld [vmem:[%s9163_s3 + $0x50] sm:$0xf]  ;;  %v1240_v51 = vadd.bf16 %v1038_v39, %v837_v17  ;;  %v1329_v53 = vld [vmem:[#allocation2 + $0x74] sm:$0x1] }
 0x128   : > { %v1053_v54 = vshll.u32 %v879_v10, 16  ;;  %v1058_v55 = vshrl.u32 %v880_v35, 16  ;;  %1321 = vst.msk [vmem:[#allocation2 + $0x64] sm:$0xf] %vm1264_vm8, %v1238_v44  ;;  %1324 = vst [vmem:[#allocation2 + $0x68] sm:$0x1] %v1323_v50  ;;  %v1047_v56 = vsel %vm9409_vm14, %v1039_v41, %v1046_v46  ;;  %v1242_v57 = vadd.bf16 %v1048_v47, %v839_v43 }
 0x129   : > { %v840_v58 = vld [vmem:[#allocation2 + $0x78] sm:$0xf]  ;;  %v1052_v59 = vrot.slane %v1050_v48, 7  ;;  %v1061_v60 = vshll.u32 %v880_v35, 16  ;;  %v882_v61 = vld [vmem:[%s9163_s3 + $0x54] sm:$0xf]  ;;  %v1326_v62 = vsel %vm9403_vm12, %v1240_v51, %v1325_v40  ;;  %v1241_v63 = vadd.bf16 %v1047_v56, %v838_v45 }
 0x12a   : > { %v1332_v0 = vld [vmem:[#allocation2 + $0x78] sm:$0xf]  ;;  %v841_v1 = vld [vmem:[#allocation2 + $0x7c] sm:$0xf]  ;;  %v1060_v2 = vrot.slane %v1058_v55, 7  ;;  %v1067_v4 = vshrl.u32 %v881_v49, 16  ;;  %v1330_v5 = vsel %vm9415_vm15, %v1242_v57, %v1329_v53 }
 0x12b   : > { %v842_v3 = vld [vmem:[#allocation2 + $0x80] sm:$0x1]  ;;  %1327 = vst [vmem:[#allocation2 + $0x6c] sm:$0xf] %v1326_v62  ;;  %v1055_v6 = vor.u32 %v1053_v54, %v1052_v59  ;;  %v1056_v7 = vrot.slane %v1052_v59, 4  ;;  %v1070_v9 = vshll.u32 %v881_v49, 16 }
 0x12c   : > { %v1336_v8 = vld [vmem:[#allocation2 + $0x80] sm:$0x1]  ;;  %v883_v11 = vld [vmem:[%s9163_s3 + $0x58] sm:$0xf]  ;;  %1328 = vst.msk [vmem:[#allocation2 + $0x70] sm:$0xf] %vm1264_vm8, %v1241_v63  ;;  %v1063_v12 = vor.u32 %v1061_v60, %v1060_v2 }
 0x12d   : > { %1331 = vst [vmem:[#allocation2 + $0x74] sm:$0x1] %v1330_v5  ;;  %v1065_v13 = vrot.slane %v1060_v2, 4  ;;  %v843_v14 = vld [vmem:[#allocation2 + $0x84] sm:$0xf]  ;;  %v1069_v15 = vrot.slane %v1067_v4, 7  ;;  %v1243_v18 = vadd.bf16 %v1055_v6, %v840_v58 }
 0x12e   : > { %v1075_v16 = vshrl.u32 %v882_v61, 16  ;;  %v1078_v19 = vshll.u32 %v882_v61, 16  ;;  %v1084_v20 = vshrl.u32 %v883_v11, 16  ;;  %v1087_v21 = vshll.u32 %v883_v11, 16  ;;  %v884_v22 = vld [vmem:[%s9163_s3 + $0x5c] sm:$0xf] }
 0x12f   : > { %v1064_v23 = vsel %vm9409_vm14, %v1056_v7, %v1063_v12  ;;  %v1245_v25 = vadd.bf16 %v1065_v13, %v842_v3  ;;  %v1072_v26 = vor.u32 %v1070_v9, %v1069_v15  ;;  %v1339_v27 = vld [vmem:[#allocation2 + $0x84] sm:$0xf]  ;;  %v1073_v28 = vrot.slane %v1069_v15, 4  ;;  %v844_v31 = vld [vmem:[#allocation2 + $0x88] sm:$0xf] }
 0x130   : > { %v1333_v29 = vsel %vm9403_vm12, %v1243_v18, %v1332_v0  ;;  %v1244_v30 = vadd.bf16 %v1064_v23, %v841_v1  ;;  %v1077_v10 = vrot.slane %v1075_v16, 7  ;;  %v1086_v32 = vrot.slane %v1084_v20, 7  ;;  %v885_v33 = vld [vmem:[%s9163_s3 + $0x60] sm:$0xf]  ;;  %v845_v34 = vld [vmem:[#allocation2 + $0x8c] sm:$0x1] }
 0x131   : > { %1334 = vst [vmem:[#allocation2 + $0x78] sm:$0xf] %v1333_v29  ;;  %v1337_v17 = vsel %vm9415_vm15, %v1245_v25, %v1336_v8  ;;  %v1246_v24 = vadd.bf16 %v1072_v26, %v843_v14  ;;  %v846_v35 = vld [vmem:[#allocation2 + $0x90] sm:$0xf]  ;;  %v1092_v36 = vshrl.u32 %v884_v22, 16  ;;  %v1095_v37 = vshll.u32 %v884_v22, 16 }
 0x132   : > { %1335 = vst.msk [vmem:[#allocation2 + $0x7c] sm:$0xf] %vm1264_vm8, %v1244_v30  ;;  %1338 = vst [vmem:[#allocation2 + $0x80] sm:$0x1] %v1337_v17  ;;  %v1080_v39 = vor.u32 %v1078_v19, %v1077_v10  ;;  %v1082_v40 = vrot.slane %v1077_v10, 4  ;;  %v1089_v43 = vor.u32 %v1087_v21, %v1086_v32  ;;  %v1090_v44 = vrot.slane %v1086_v32, 4 }
 0x133   : > { %v1343_v41 = vld [vmem:[#allocation2 + $0x8c] sm:$0x1]  ;;  %v886_v45 = vld [vmem:[%s9163_s3 + $0x64] sm:$0xf]  ;;  %v1340_v46 = vsel %vm9403_vm12, %v1246_v24, %v1339_v27  ;;  %v1346_v47 = vld [vmem:[#allocation2 + $0x90] sm:$0xf] }
 0x134   : > { %v1094_v48 = vrot.slane %v1092_v36, 7  ;;  %v1101_v49 = vshrl.u32 %v885_v33, 16  ;;  %v1104_v50 = vshll.u32 %v885_v33, 16  ;;  %1341 = vst [vmem:[#allocation2 + $0x84] sm:$0xf] %v1340_v46  ;;  %v1081_v51 = vsel %vm9409_vm14, %v1073_v28, %v1080_v39 }
 0x135   : > { %v1248_v53 = vadd.bf16 %v1082_v40, %v845_v34  ;;  %v1249_v54 = vadd.bf16 %v1089_v43, %v846_v35  ;;  %v847_v55 = vld [vmem:[#allocation2 + $0x94] sm:$0xf]  ;;  %v848_v56 = vld [vmem:[#allocation2 + $0x98] sm:$0x1]  ;;  %v1109_v57 = vshrl.u32 %v886_v45, 16  ;;  %v1247_v58 = vadd.bf16 %v1081_v51, %v844_v31 }
 0x136   : > { %v1097_v59 = vor.u32 %v1095_v37, %v1094_v48  ;;  %v1099_v60 = vrot.slane %v1094_v48, 4  ;;  %v1350_v61 = vld [vmem:[#allocation2 + $0x98] sm:$0x1]  ;;  %v1103_v62 = vrot.slane %v1101_v49, 7  ;;  %v887_v63 = vld [vmem:[%s9163_s3 + $0x68] sm:$0xf] }
 0x137   : > { %v1344_v0 = vsel %vm9415_vm15, %v1248_v53, %v1343_v41  ;;  %v1347_v1 = vsel %vm9403_vm12, %v1249_v54, %v1346_v47  ;;  %v849_v2 = vld [vmem:[#allocation2 + $0x9c] sm:$0xf]  ;;  %v1111_v3 = vrot.slane %v1109_v57, 7  ;;  %v1112_v4 = vshll.u32 %v886_v45, 16  ;;  %v888_v5 = vld [vmem:[%s9163_s3 + $0x6c] sm:$0xf] }
 0x138   : > { %1342 = vst.msk [vmem:[#allocation2 + $0x88] sm:$0xf] %vm1264_vm8, %v1247_v58  ;;  %1345 = vst [vmem:[#allocation2 + $0x8c] sm:$0x1] %v1344_v0  ;;  %v1098_v6 = vsel %vm9409_vm14, %v1090_v44, %v1097_v59  ;;  %v1251_v7 = vadd.bf16 %v1099_v60, %v848_v56  ;;  %v1106_v8 = vor.u32 %v1104_v50, %v1103_v62  ;;  %v1353_v9 = vld [vmem:[#allocation2 + $0x9c] sm:$0xf] }
 0x139   : > { %1348 = vst [vmem:[#allocation2 + $0x90] sm:$0xf] %v1347_v1  ;;  %v1107_v11 = vrot.slane %v1103_v62, 4  ;;  %v851_v12 = vld [vmem:[#allocation2 + $0xa4] sm:$0x1]  ;;  %v1250_v13 = vadd.bf16 %v1098_v6, %v847_v55  ;;  %v1114_v15 = vor.u32 %v1112_v4, %v1111_v3  ;;  %v1116_v16 = vrot.slane %v1111_v3, 4 }
 0x13a   : > { %v850_v14 = vld [vmem:[#allocation2 + $0xa0] sm:$0xf]  ;;  %v1118_v18 = vshrl.u32 %v887_v63, 16  ;;  %v889_v19 = vld [vmem:[%s9163_s3 + $0x70] sm:$0xf]  ;;  %v1351_v20 = vsel %vm9415_vm15, %v1251_v7, %v1350_v61  ;;  %v1252_v21 = vadd.bf16 %v1106_v8, %v849_v2  ;;  %v1121_v23 = vshll.u32 %v887_v63, 16 }
 0x13b   : > { %v1357_v22 = vld [vmem:[#allocation2 + $0xa4] sm:$0x1]  ;;  %v1126_v25 = vshrl.u32 %v888_v5, 16  ;;  %1349 = vst.msk [vmem:[#allocation2 + $0x94] sm:$0xf] %vm1264_vm8, %v1250_v13  ;;  %v1115_v26 = vsel %vm9409_vm14, %v1107_v11, %v1114_v15  ;;  %v1254_v27 = vadd.bf16 %v1116_v16, %v851_v12  ;;  %v1129_v30 = vshll.u32 %v888_v5, 16 }
 0x13c   : > { %1352 = vst [vmem:[#allocation2 + $0x98] sm:$0x1] %v1351_v20  ;;  %v852_v28 = vld [vmem:[#allocation2 + $0xa8] sm:$0xf]  ;;  %v1120_v29 = vrot.slane %v1118_v18, 7  ;;  %v1354_v10 = vsel %vm9403_vm12, %v1252_v21, %v1353_v9  ;;  %v1253_v32 = vadd.bf16 %v1115_v26, %v850_v14  ;;  %v1135_v34 = vshrl.u32 %v889_v19, 16 }
 0x13d   : > { %v890_v31 = vld [vmem:[%s9163_s3 + $0x74] sm:$0xf]  ;;  %v1360_v33 = vld [vmem:[#allocation2 + $0xa8] sm:$0xf]  ;;  %v1128_v24 = vrot.slane %v1126_v25, 7  ;;  %v1358_v36 = vsel %vm9415_vm15, %v1254_v27, %v1357_v22  ;;  %v1138_v43 = vshll.u32 %v889_v19, 16 }
 0x13e   : > { %v853_v17 = vld [vmem:[#allocation2 + $0xac] sm:$0xf]  ;;  %v891_v35 = vld [vmem:[%s9163_s3 + $0x78] sm:$0xf]  ;;  %1355 = vst [vmem:[#allocation2 + $0x9c] sm:$0xf] %v1354_v10  ;;  %v1123_v37 = vor.u32 %v1121_v23, %v1120_v29 }
 0x13f   : > { %v1124_v39 = vrot.slane %v1120_v29, 4  ;;  %v854_v40 = vld [vmem:[#allocation2 + $0xb0] sm:$0x1]  ;;  %1356 = vst.msk [vmem:[#allocation2 + $0xa0] sm:$0xf] %vm1264_vm8, %v1253_v32  ;;  %v1131_v44 = vor.u32 %v1129_v30, %v1128_v24  ;;  %v1133_v45 = vrot.slane %v1128_v24, 4 }
 0x140   : > { %v1364_v41 = vld [vmem:[#allocation2 + $0xb0] sm:$0x1]  ;;  %1359 = vst [vmem:[#allocation2 + $0xa4] sm:$0x1] %v1358_v36  ;;  %v855_v46 = vld [vmem:[#allocation2 + $0xb4] sm:$0xf]  ;;  %v1255_v49 = vadd.bf16 %v1123_v37, %v852_v28 }
 0x141   : > { %v1137_v47 = vrot.slane %v1135_v34, 7  ;;  %v1143_v48 = vshrl.u32 %v890_v31, 16  ;;  %v1146_v50 = vshll.u32 %v890_v31, 16  ;;  %v1152_v51 = vshrl.u32 %v891_v35, 16  ;;  %v892_v54 = vld [vmem:[%s9163_s3 + $0x7c] sm:$0xf] }
 0x142   : > { %v1155_v53 = vshll.u32 %v891_v35, 16  ;;  %v1132_v55 = vsel %vm9409_vm14, %v1124_v39, %v1131_v44  ;;  %v1257_v56 = vadd.bf16 %v1133_v45, %v854_v40  ;;  %v1361_v59 = vsel %vm9403_vm12, %v1255_v49, %v1360_v33  ;;  %v1367_v61 = vld [vmem:[#allocation2 + $0xb4] sm:$0xf]  ;;  %v857_v2 = vld [vmem:[#allocation2 + $0xbc] sm:$0x1] }
 0x143   : > { %v1140_v57 = vor.u32 %v1138_v43, %v1137_v47  ;;  %v1141_v58 = vrot.slane %v1137_v47, 4  ;;  %v1256_v60 = vadd.bf16 %v1132_v55, %v853_v17  ;;  %v1145_v62 = vrot.slane %v1143_v48, 7  ;;  %1362 = vst [vmem:[#allocation2 + $0xa8] sm:$0xf] %v1361_v59  ;;  %v858_v3 = vld [vmem:[#allocation2 + $0xc0] sm:$0xf] }
 0x144   : > { %v1154_v63 = vrot.slane %v1152_v51, 7  ;;  %v1365_v0 = vsel %vm9415_vm15, %v1257_v56, %v1364_v41  ;;  %v1160_v4 = vshrl.u32 %v892_v54, 16  ;;  %v1163_v5 = vshll.u32 %v892_v54, 16  ;;  %v856_v6 = vld [vmem:[#allocation2 + $0xb8] sm:$0xf] }
 0x145   : > { %v1258_v1 = vadd.bf16 %v1140_v57, %v855_v46  ;;  %1363 = vst.msk [vmem:[#allocation2 + $0xac] sm:$0xf] %vm1264_vm8, %v1256_v60  ;;  %1366 = vst [vmem:[#allocation2 + $0xb0] sm:$0x1] %v1365_v0  ;;  %v1148_v7 = vor.u32 %v1146_v50, %v1145_v62  ;;  %v1150_v8 = vrot.slane %v1145_v62, 4 }
 0x146   : > { %v1157_v9 = vor.u32 %v1155_v53, %v1154_v63  ;;  %v1371_v12 = vld [vmem:[#allocation2 + $0xbc] sm:$0x1]  ;;  %v1374_v13 = vld [vmem:[#allocation2 + $0xc0] sm:$0xf]  ;;  %v1158_v14 = vrot.slane %v1154_v63, 4  ;;  %v1162_v15 = vrot.slane %v1160_v4, 7 }
 0x147   : > { %v1368_v11 = vsel %vm9403_vm12, %v1258_v1, %v1367_v61  ;;  %v1149_v16 = vsel %vm9409_vm14, %v1141_v58, %v1148_v7  ;;  %v1260_v18 = vadd.bf16 %v1150_v8, %v857_v2  ;;  %v860_v20 = vld [vmem:[#allocation2 + $0xc8] sm:$0x1]  ;;  %v859_v22 = vld [vmem:[#allocation2 + $0xc4] sm:$0xf] }
 0x148   : > { %1369 = vst [vmem:[#allocation2 + $0xb4] sm:$0xf] %v1368_v11  ;;  %v1261_v19 = vadd.bf16 %v1157_v9, %v858_v3  ;;  %v1259_v21 = vadd.bf16 %v1149_v16, %v856_v6  ;;  %v1165_v23 = vor.u32 %v1163_v5, %v1162_v15  ;;  %v1167_v25 = vrot.slane %v1162_v15, 4  ;;  %v1378_v28 = vld [vmem:[#allocation2 + $0xc8] sm:$0x1] }
 0x149   : > { %v1372_v26 = vsel %vm9415_vm15, %v1260_v18, %v1371_v12 }
 0x14a   : > { %v1375_v27 = vsel %vm9403_vm12, %v1261_v19, %v1374_v13  ;;  %1370 = vst.msk [vmem:[#allocation2 + $0xb8] sm:$0xf] %vm1264_vm8, %v1259_v21  ;;  %1373 = vst [vmem:[#allocation2 + $0xbc] sm:$0x1] %v1372_v26  ;;  %v1166_v29 = vsel %vm9409_vm14, %v1158_v14, %v1165_v23  ;;  %v1263_v30 = vadd.bf16 %v1167_v25, %v860_v20 }
 0x14b   : > { %1376 = vst [vmem:[#allocation2 + $0xc0] sm:$0xf] %v1375_v27  ;;  %v1262_v31 = vadd.bf16 %v1166_v29, %v859_v22 }
 0x14c   : > { %v1379_v10 = vsel %vm9415_vm15, %v1263_v30, %v1378_v28 }
 0x14d   : > { %1377 = vst.msk [vmem:[#allocation2 + $0xc4] sm:$0xf] %vm1264_vm8, %v1262_v31  ;;  %1380 = vst [vmem:[#allocation2 + $0xc8] sm:$0x1] %v1379_v10 }
 0x14e PF: > { %v1478_v32 = vld [vmem:[#allocation7] sm:$0x3]  ;;  %vm1607_vm0 = vcmask 1041408   ;;  %vm1381_vm1 = vcmask 31744   ;;  %v8617_v33 = vld [vmem:[#allocation2 + $0x60] sm:$0xff]   ;;  %v8618_v42 = vld [vmem:[#allocation2 + $0x6c] sm:$0xff]  }
 0x14f   : > { %8491 = vmatprep.subr.msk.bf16.mxu1 %vm1607_vm0, %v1478_v32  ;;  %v1609_v38 = vsel %vm1607_vm0, %v1478_v32, 0  ;;  %8490 = vmatprep.subr.msk.bf16.mxu0 %vm1607_vm0, %v1478_v32  ;;  %v2304_v17 = vld [vmem:[#allocation7 + $0x2] sm:$0x3]  ;;  %v8619_v24 = vld [vmem:[#allocation2] sm:$0xff]   ;;  %v8621_v35 = vld [vmem:[#allocation2 + $0xc] sm:$0xff]   ;;  %vm2725_vm4 = vcmask 1042432  }
 0x150   : > { %8489 = vmatpush3.bf16.msra.mxu1 %v1609_v38  ;;  %8183 = vmatpush3.bf16.msra.mxu0 %v1609_v38  ;;  %v2402_v52 = vsel %vm1607_vm0, %v2304_v17, 0  ;;  %v8620_v34 = vld [vmem:[#allocation2 + $0x78] sm:$0xff]   ;;  %v8622_v40 = vld [vmem:[#allocation2 + $0x84] sm:$0xff]   ;;  %v8624_v41 = vld [vmem:[#allocation2 + $0x90] sm:$0xff]   ;;  %vm1884_vm2 = vsmask.f32 3328 }
 0x151   : > { %8200 = vmatprep.mubr.msk.bf16.mxu1 %vm1381_vm1, %v8617_v33  ;;  %8492 = vmatprep.subr.msk.bf16.mxu1 %vm1607_vm0, %v2304_v17  ;;  %v2873_v36 = vld [vmem:[#allocation7 + $0x4] sm:$0x3]  ;;  %v8625_v43 = vld [vmem:[#allocation2 + $0x24] sm:$0xff]   ;;  %v8627_v44 = vld [vmem:[#allocation2 + $0x30] sm:$0xff]   ;;  %vm1885_vm3 = vsmask.f32 7440 }
 0x152   : > { %8184 = vmatprep.mubr.msk.bf16.mxu0 %vm1381_vm1, %v8619_v24  ;;  %8493 = vmatprep.subr.msk.bf16.mxu0 %vm1607_vm0, %v2873_v36  ;;  %v2971_v37 = vsel %vm1607_vm0, %v2873_v36, 0  ;;  %v8623_v39 = vld [vmem:[#allocation2 + $0x18] sm:$0xff]   ;;  %v8628_v46 = vld [vmem:[#allocation2 + $0xa8] sm:$0xff]   ;;  %v1836_v47 = vld [vmem:[#allocation2] sm:$0xf]  ;;  %vm2726_vm5 = vcmask 1046532  }
 0x153   : > { %8201 = vmatmul.mubr.msk.bf16.vlgmr.msra.gmra.mrb[0].mxu1 %vm1381_vm1, %v8618_v42  ;;  %8185 = vmatmul.mubr.msk.bf16.vlgmr.msra.gmra.mrb[0].mxu0 %vm1381_vm1, %v8621_v35  ;;  %v8626_v45 = vld [vmem:[#allocation2 + $0x9c] sm:$0xff]   ;;  %v1837_v48 = vld [vmem:[#allocation2 + $0x4] sm:$0xf]  ;;  %v1838_v50 = vld [vmem:[#allocation2 + $0x8] sm:$0x1]  ;;  %v1888_v51 = vshrl.u32 %v1836_v47, 16 }
 0x154   : > { %8217 = vmatpush3.bf16.msra.mxu1 %v2402_v52  ;;  %8204 = vmatprep.mubr.msk.bf16.mxu1 %vm1381_vm1, %v8620_v34  ;;  %v8629_v49 = vld [vmem:[#allocation2 + $0x3c] sm:$0xff]   ;;  %v1891_v53 = vshll.u32 %v1836_v47, 16  ;;  %v1897_v54 = vshll.u32 %v1837_v48, 16  ;;  %v1901_v55 = vshrl.u32 %v1837_v48, 16  ;;  %v8631_v56 = vld [vmem:[#allocation2 + $0x48] sm:$0xff]   ;;  %v1907_v57 = vshll.u32 %v1838_v50, 16  ;;  %vm9581_vm6 = vmor %vm1884_vm2, %vm1885_vm3 }
 0x155   : > { %8251 = vmatpush3.bf16.msra.mxu0 %v2971_v37  ;;  %8188 = vmatprep.mubr.msk.bf16.mxu0 %vm1381_vm1, %v8623_v39  ;;  %v1839_v58 = vld [vmem:[#allocation2 + $0xc] sm:$0xf]  ;;  %v1890_v59 = vrot.slane %v1888_v51, 4  ;;  %v1840_v63 = vld [vmem:[#allocation2 + $0x10] sm:$0xf]  ;;  %v8630_v23 = vld [vmem:[#allocation2 + $0xb4] sm:$0xff]  }
 0x156   : > { %v1893_v60 = vrot.slane %v1891_v53, 5  ;;  %v1899_v61 = vrot.slane %v1897_v54, 5  ;;  %v1903_v62 = vrot.slane %v1901_v55, 4  ;;  %v1909_v0 = vrot.slane %v1907_v57, 5  ;;  %v1841_v1 = vld [vmem:[#allocation2 + $0x14] sm:$0x1]  ;;  %vm9596_vm7 = vmor %vm2725_vm4, %vm2726_vm5 }
 0x157   : > { %v1912_v2 = vshrl.u32 %v1839_v58, 16  ;;  %v1915_v3 = vshll.u32 %v1839_v58, 16  ;;  %v1921_v4 = vshll.u32 %v1840_v63, 16  ;;  %v1925_v7 = vshrl.u32 %v1840_v63, 16  ;;  %v3264_v9 = vld [vmem:[#allocation7 + $0x6] sm:$0x3] }
 0x158   : > { %v1894_v5 = vor.u32 %v1893_v60, %v1890_v59  ;;  %v1904_v6 = vor.u32 %v1903_v62, %v1899_v61  ;;  %v1931_v8 = vshll.u32 %v1841_v1, 16  ;;  %v1842_v11 = vld [vmem:[#allocation2 + $0x18] sm:$0xf]  ;;  %8494 = vmatprep.subr.msk.bf16.mxu1 %vm1607_vm0, %v3264_v9  ;;  %v9587_v16 = vsel %vm1607_vm0, %v3264_v9, 0  ;;  %v1843_v18 = vld [vmem:[#allocation2 + $0x1c] sm:$0xf] }
 0x159   : > { %v1914_v13 = vrot.slane %v1912_v2, 4  ;;  %v1917_v14 = vrot.slane %v1915_v3, 5  ;;  %v1923_v15 = vrot.slane %v1921_v4, 5  ;;  %v1927_v21 = vrot.slane %v1925_v7, 4  ;;  %v1844_v26 = vld [vmem:[#allocation2 + $0x20] sm:$0x1] }
 0x15a   : > { %v1895_v19 = vrot.slane %v1894_v5, 4  ;;  %v1905_v20 = vrot.slane %v1904_v6, 4  ;;  %v1933_v22 = vrot.slane %v1931_v8, 5  ;;  %v1936_v27 = vshrl.u32 %v1842_v11, 16  ;;  %v2629_v38 = vld [vmem:[#allocation2] sm:$0xe] }
 0x15b   : > { %8205 = vmatmul.mubr.msk.bf16.gmra.mrb[4].mxu1 %vm1381_vm1, %v8622_v40  ;;  %8189 = vmatmul.mubr.msk.bf16.gmra.mrb[4].mxu0 %vm1381_vm1, %v8625_v43  ;;  %v1918_v25 = vor.u32 %v1917_v14, %v1914_v13  ;;  %v1939_v28 = vshll.u32 %v1842_v11, 16  ;;  %v1945_v29 = vshll.u32 %v1843_v18, 16  ;;  %v1928_v10 = vor.u32 %v1927_v21, %v1923_v15  ;;  %v2630_v33 = vld [vmem:[#allocation2 + $0x4] sm:$0xf]  ;;  %v8632_v17 = vld [vmem:[#allocation2 + $0x54] sm:$0xff]   ;;  %s7992_s25 = sshll.u32 %s8875_s19, 5 }
 0x15c   : > { %8208 = vmatprep.mubr.msk.bf16.mxu1 %vm1381_vm1, %v8624_v41  ;;  %8192 = vmatprep.mubr.msk.bf16.mxu0 %vm1381_vm1, %v8627_v44  ;;  %v1900_v30 = vsel %vm9581_vm6, %v1895_v19, %v1899_v61  ;;  %v1910_v31 = vsel %vm9581_vm6, %v1905_v20, %v1909_v0  ;;  %v1949_v32 = vshrl.u32 %v1843_v18, 16  ;;  %v1938_v24 = vrot.slane %v1936_v27, 4  ;;  %v2631_v35 = vld [vmem:[#allocation2 + $0x8] sm:$0x1]  ;;  %v1845_v47 = vld [vmem:[#allocation2 + $0x24] sm:$0xf] }
 0x15d   : > { %v7653_v42 = vcombine.low %v1900_v30, %v1910_v31  ;;  %v1919_v52 = vrot.slane %v1918_v25, 4  ;;  %v1941_v34 = vrot.slane %v1939_v28, 5  ;;  %v1929_v36 = vrot.slane %v1928_v10, 4  ;;  %v1846_v48 = vld [vmem:[#allocation2 + $0x28] sm:$0xf]  ;;  %s7993_s27 = sshll.u32 %s8871_s18, 6 }
 0x15e   : > { %v1947_v37 = vrot.slane %v1945_v29, 5  ;;  %v1951_v39 = vrot.slane %v1949_v32, 4  ;;  %v1955_v40 = vshll.u32 %v1844_v26, 16  ;;  %v2733_v53 = vrot.slane %v2631_v35, 5  ;;  %v1847_v54 = vld [vmem:[#allocation2 + $0x2c] sm:$0x1]  ;;  %s7480_s18 = sadd.s32 %s7993_s27, %s7992_s25 }
 0x15f   : > { %v1924_v43 = vsel %vm9581_vm6, %v1919_v52, %v1923_v15  ;;  %v1942_v44 = vor.u32 %v1941_v34, %v1938_v24  ;;  %v4086_v59 = vld [vmem:[#allocation7 + $0x8] sm:$0x3]  ;;  %v1960_v61 = vshrl.u32 %v1845_v47, 16  ;;  %v1963_v62 = vshll.u32 %v1845_v47, 16  ;;  %v2632_v0 = vld [vmem:[#allocation2 + $0xc] sm:$0xe] }
 0x160   : > { %v1952_v50 = vor.u32 %v1951_v39, %v1947_v37  ;;  %v1957_v51 = vrot.slane %v1955_v40, 5  ;;  %v1969_v63 = vshll.u32 %v1846_v48, 16  ;;  %8495 = vmatprep.subr.msk.bf16.mxu0 %vm1607_vm0, %v4086_v59  ;;  %v1973_v3 = vshrl.u32 %v1846_v48, 16  ;;  %v2633_v5 = vld [vmem:[#allocation2 + $0x10] sm:$0xf]  ;;  %s7994_s19 = sshll.u32 %s7480_s18, 7 }
 0x161   : > { %v1979_v4 = vshll.u32 %v1847_v54, 16  ;;  %v2634_v6 = vld [vmem:[#allocation2 + $0x14] sm:$0x1]  ;;  %v1962_v9 = vrot.slane %v1960_v61, 4  ;;  %v1965_v11 = vrot.slane %v1963_v62, 5  ;;  %v4184_v27 = vsel %vm1607_vm0, %v4086_v59, 0 }
 0x162   : > { %v1953_v60 = vrot.slane %v1952_v50, 4  ;;  %v1848_v13 = vld [vmem:[#allocation2 + $0x30] sm:$0xf]  ;;  %v1971_v15 = vrot.slane %v1969_v63, 5  ;;  %v1975_v18 = vrot.slane %v1973_v3, 4  ;;  %v2740_v25 = vrot.slane %v2634_v6, 5 }
 0x163   : > { %8209 = vmatmul.mubr.msk.bf16.gmra.mrb[8].mxu1 %vm1381_vm1, %v8626_v45  ;;  %8193 = vmatmul.mubr.msk.bf16.gmra.mrb[8].mxu0 %vm1381_vm1, %v8629_v49  ;;  %v7685_v45 = vrot.slane %v2629_v38, 9  ;;  %v1934_v49 = vsel %vm9581_vm6, %v1929_v36, %v1933_v22  ;;  %v1981_v19 = vrot.slane %v1979_v4, 5  ;;  %v1849_v20 = vld [vmem:[#allocation2 + $0x34] sm:$0xf]  ;;  %v1966_v21 = vor.u32 %v1965_v11, %v1962_v9  ;;  %v1850_v28 = vld [vmem:[#allocation2 + $0x38] sm:$0x1] }
 0x164   : > { %8212 = vmatprep.mubr.msk.bf16.mxu1 %vm1381_vm1, %v8628_v46  ;;  %8196 = vmatprep.mubr.msk.bf16.mxu0 %vm1381_vm1, %v8631_v56  ;;  %v2730_v46 = vrot.slane %v2630_v33, 5  ;;  %v7654_v55 = vcombine.low %v1924_v43, %v1934_v49  ;;  %v1943_v56 = vrot.slane %v1942_v44, 4  ;;  %v1958_v7 = vsel %vm9581_vm6, %v1953_v60, %v1957_v51  ;;  %v2635_v33 = vld [vmem:[#allocation2 + $0x18] sm:$0xe]  ;;  %v2636_v34 = vld [vmem:[#allocation2 + $0x1c] sm:$0xf] }
 0x165   : > { %v7686_v22 = vrot.slane %v2632_v0, 9  ;;  %v1976_v26 = vor.u32 %v1975_v18, %v1971_v15  ;;  %v1984_v29 = vshrl.u32 %v1848_v13, 16  ;;  %v1987_v30 = vshll.u32 %v1848_v13, 16  ;;  %v2637_v39 = vld [vmem:[#allocation2 + $0x20] sm:$0x1]  ;;  %s7483_s9 = sshll.u32 %s9178_s29, 4  ;;  %s11229_s9 = int_to_ptr.vmem [resolvable:$true] %s7483_s9 }
 0x166   : > { %v2731_v57 = vsel %vm9596_vm7, %v7685_v45, %v2730_v46  ;;  %v2732_v58 = vrot.slane %v2730_v46, 4  ;;  %v1948_v1 = vsel %vm9581_vm6, %v1943_v56, %v1947_v37  ;;  %v1967_v31 = vrot.slane %v1966_v21, 4  ;;  %v1851_v40 = vld [vmem:[#allocation2 + $0x3c] sm:$0xf]  ;;  %v1852_v47 = vld [vmem:[#allocation2 + $0x40] sm:$0xf] }
 0x167   : > { %v7655_v14 = vcombine.low %v1948_v1, %v1958_v7  ;;  %v1993_v38 = vshll.u32 %v1849_v20, 16  ;;  %v1989_v52 = vrot.slane %v1987_v30, 5  ;;  %v1997_v24 = vshrl.u32 %v1849_v20, 16  ;;  %v2639_v63 = vld [vmem:[#allocation2 + $0x28] sm:$0xf]  ;;  %s11353_s14 = sld [smem:[#allocation22_spill]] }
 0x168   : > { %v2734_v2 = vsel %vm9596_vm7, %v2732_v58, %v2733_v53  ;;  %v1972_v35 = vsel %vm9581_vm6, %v1967_v31, %v1971_v15  ;;  %v2003_v37 = vshll.u32 %v1850_v28, 16  ;;  %v7687_v50 = vrot.slane %v2635_v33, 9  ;;  %v1853_v53 = vld [vmem:[#allocation2 + $0x44] sm:$0x1]  ;;  %v2638_v58 = vld [vmem:[#allocation2 + $0x24] sm:$0xe] }
 0x169   : > { %v7701_v8 = vcombine.low %v2731_v57, %v2734_v2  ;;  %v1995_v36 = vrot.slane %v1993_v38, 5  ;;  %v1999_v46 = vrot.slane %v1997_v24, 4  ;;  %v2744_v51 = vrot.slane %v2636_v34, 5  ;;  %v2640_v4 = vld [vmem:[#allocation2 + $0x2c] sm:$0x1]  ;;  %s7468_s12 = scalar_lea.sflag [#allocation6], %s9159_s13 }
 0x16a   : > { %v2005_v49 = vrot.slane %v2003_v37, 5  ;;  %v2747_v56 = vrot.slane %v2637_v39, 5  ;;  %v2008_v57 = vshrl.u32 %v1851_v40, 16  ;;  %v2011_v61 = vshll.u32 %v1851_v40, 16  ;;  %v1854_v9 = vld [vmem:[#allocation2 + $0x48] sm:$0xf] }
 0x16b   : > { %8213 = vmatmul.mubr.msk.bf16.gmra.mrb[12].mxu1 %vm1381_vm1, %v8630_v23  ;;  %8197 = vmatmul.mubr.msk.bf16.gmra.mrb[12].mxu0 %vm1381_vm1, %v8632_v17  ;;  %v2737_v23 = vrot.slane %v2633_v5, 5  ;;  %v1986_v17 = vrot.slane %v1984_v29, 4  ;;  %v2745_v59 = vsel %vm9596_vm7, %v7687_v50, %v2744_v51  ;;  %v2746_v60 = vrot.slane %v2744_v51, 4  ;;  %v1855_v18 = vld [vmem:[#allocation2 + $0x4c] sm:$0xf]  ;;  %s8781_s30 = scalar_lea.vmem %s11229_s9, 4096 }
 0x16c   : > { %8218 = vmatprep.mubr.msk.bf16.mxu1 %vm1381_vm1, %v7653_v42  ;;  %8252 = vmatprep.mubr.msk.bf16.mxu0 %vm1381_vm1, %v7701_v8  ;;  %v1977_v42 = vrot.slane %v1976_v26, 4  ;;  %v2017_v62 = vshll.u32 %v1852_v47, 16  ;;  %v2010_v2 = vrot.slane %v2008_v57, 4  ;;  %v2021_v3 = vshrl.u32 %v1852_v47, 16  ;;  %v1856_v26 = vld [vmem:[#allocation2 + $0x50] sm:$0x1]  ;;  %p8782_p10 = scmp.ne.s32.totalorder %s11229_s9, %s8781_s30 }
 0x16d   : > { %v2738_v10 = vsel %vm9596_vm7, %v7686_v22, %v2737_v23  ;;  %v2739_v32 = vrot.slane %v2737_v23, 4  ;;  %v1990_v45 = vor.u32 %v1989_v52, %v1986_v17  ;;  %v2748_v5 = vsel %vm9596_vm7, %v2746_v60, %v2747_v56  ;;  %v2642_v52 = vld [vmem:[#allocation2 + $0x34] sm:$0xf]  ;;  %v1859_v50 = vld [vmem:[#allocation2 + $0x5c] sm:$0x1]  ;;  %s11227_s23 = scalar_lea.hbm %s11353_s14, %s7994_s19  ;;  %s8899_s26 = smov [#allocation12]  }
 0x16e   : > { %v1982_v43 = vsel %vm9581_vm6, %v1977_v42, %v1981_v19  ;;  %v2013_v6 = vrot.slane %v2011_v61, 5  ;;  %v2019_v7 = vrot.slane %v2017_v62, 5  ;;  %v2027_v8 = vshll.u32 %v1853_v53, 16  ;;  %v1857_v37 = vld [vmem:[#allocation2 + $0x54] sm:$0xf]  ;;  %p8783_p5 = pnand %p8782_p10, %p9094_p3  ;;  %s8785_s7 = sshll.u32 %s8899_s26, 4  ;;  %s8786_s7 = int_to_ptr.vmem [resolvable:$false] %s8785_s7 }
 0x16f   : > { %v7656_v48 = vcombine.low %v1972_v35, %v1982_v43  ;;  %v1991_v54 = vrot.slane %v1990_v45, 4  ;;  %v7703_v13 = vcombine.low %v2745_v59, %v2748_v5  ;;  %v7688_v15 = vrot.slane %v2638_v58, 9  ;;  %v1858_v45 = vld [vmem:[#allocation2 + $0x58] sm:$0xf]  ;;  %v2644_v56 = vld [vmem:[#allocation2 + $0x3c] sm:$0xe]  ;;  %p8788_p11 = scmp.lt.s32.totalorder %s11229_s9, %s8786_s7 }
 0x170   : > { %v2014_v20 = vor.u32 %v2013_v6, %v2010_v2  ;;  %v2029_v21 = vrot.slane %v2027_v8, 5  ;;  %v2751_v22 = vrot.slane %v2639_v63, 5  ;;  %v2035_v28 = vshll.u32 %v1854_v9, 16  ;;  %v2645_v61 = vld [vmem:[#allocation2 + $0x40] sm:$0xf]  ;;  %p8784_p7 = pneg %p8783_p5  ;;  %s8787_s5 = scalar_lea.vmem %s8786_s7, 8192 }
 0x171   : > { %v1996_v0 = vsel %vm9581_vm6, %v1991_v54, %v1995_v36  ;;  %v2045_v17 = vshrl.u32 %v1855_v18, 16  ;;  %v2059_v59 = vshll.u32 %v1857_v37, 16  ;;  %v2065_v60 = vshll.u32 %v1858_v45, 16  ;;  %v2646_v2 = vld [vmem:[#allocation2 + $0x44] sm:$0x1]  ;;  %p8789_p1 = scmp.lt.s32.totalorder %s8787_s5, %s8781_s30 }
 0x172   : > { %v2015_v29 = vrot.slane %v2014_v20, 4  ;;  %v2752_v30 = vsel %vm9596_vm7, %v7688_v15, %v2751_v22  ;;  %v2753_v31 = vrot.slane %v2751_v22, 4  ;;  %v2037_v42 = vrot.slane %v2035_v28, 5 }
 0x173   : > { %8219 = vmatmul.mubr.msk.bf16.vlgmr.msra.gmra.mrb[16].mxu1 %vm1381_vm1, %v7654_v55  ;;  %v2000_v55 = vor.u32 %v1999_v46, %v1995_v36  ;;  %v2643_v36 = vld [vmem:[#allocation2 + $0x38] sm:$0x1]  ;;  %v2067_v5 = vrot.slane %v2065_v60, 5  ;;  %v2075_v6 = vshll.u32 %v1859_v50, 16  ;;  %v2765_v20 = vrot.slane %v2645_v61, 5  ;;  %p8790_p2 = por %p8789_p1, %p8788_p11 }
 0x174   : > { %8285 = vmatpush3.bf16.msra.mxu1 %v9587_v16  ;;  %8222 = vmatprep.mubr.msk.bf16.mxu1 %vm1381_vm1, %v7655_v14  ;;  %v2741_v16 = vsel %vm9596_vm7, %v2739_v32, %v2740_v25  ;;  %v2023_v14 = vrot.slane %v2021_v3, 4  ;;  %v2754_v25 = vrot.slane %v2640_v4, 5  ;;  %v2641_v32 = vld [vmem:[#allocation2 + $0x30] sm:$0xe]  ;;  %v2020_v24 = vsel %vm9581_vm6, %v2015_v29, %v2019_v7 }
 0x175   : > { %v7702_v44 = vcombine.low %v2738_v10, %v2741_v16  ;;  %v2001_v1 = vrot.slane %v2000_v55, 4  ;;  %v2041_v10 = vshll.u32 %v1855_v18, 16  ;;  %v2051_v16 = vshll.u32 %v1856_v26, 16  ;;  %p8791_p8 = pnand %p8790_p2, %p8784_p7 }
 0x176   : > { %v2024_v23 = vor.u32 %v2023_v14, %v2019_v7  ;;  %v2755_v34 = vsel %vm9596_vm7, %v2753_v31, %v2754_v25  ;;  %v2761_v54 = vrot.slane %v2643_v36, 5  ;;  %v2056_v55 = vshrl.u32 %v1857_v37, 16  ;;  %v1860_v7 = vld [vmem:[#allocation2 + $0x60] sm:$0xf]  ;;  %v1861_v14 = vld [vmem:[#allocation2 + $0x64] sm:$0xf] }
 0x177   : > { %8253 = vmatmul.mubr.msk.bf16.vlgmr.msra.gmra.mrb[16].mxu0 %vm1381_vm1, %v7702_v44  ;;  %v2006_v11 = vsel %vm9581_vm6, %v2001_v1, %v2005_v49  ;;  %v2043_v35 = vrot.slane %v2041_v10, 5  ;;  %v7704_v40 = vcombine.low %v2752_v30, %v2755_v34  ;;  %v2047_v44 = vrot.slane %v2045_v17, 4  ;;  %v2647_v31 = vld [vmem:[#allocation2 + $0x48] sm:$0xe] }
 0x178   : > { %8319 = vmatpush3.bf16.msra.mxu0 %v4184_v27  ;;  %v7657_v19 = vcombine.low %v1996_v0, %v2006_v11  ;;  %8256 = vmatprep.mubr.msk.bf16.mxu0 %vm1381_vm1, %v7703_v13  ;;  %v2032_v27 = vshrl.u32 %v1854_v9, 16  ;;  %v2025_v38 = vrot.slane %v2024_v23, 4  ;;  %v2053_v47 = vrot.slane %v2051_v16, 5  ;;  %v1862_v23 = vld [vmem:[#allocation2 + $0x68] sm:$0x1] }
 0x179   : > { %v2758_v49 = vrot.slane %v2642_v52, 5  ;;  %v2048_v53 = vor.u32 %v2047_v44, %v2043_v35  ;;  %v2058_v0 = vrot.slane %v2056_v55, 4  ;;  %v2069_v1 = vshrl.u32 %v1858_v45, 16  ;;  %v1863_v16 = vld [vmem:[#allocation2 + $0x6c] sm:$0xf] }
 0x17a   : > { %v2034_v33 = vrot.slane %v2032_v27, 4  ;;  %v2030_v39 = vsel %vm9581_vm6, %v2025_v38, %v2029_v21  ;;  %v2061_v4 = vrot.slane %v2059_v59, 5  ;;  %v7690_v13 = vrot.slane %v2644_v56, 9  ;;  %v2651_v59 = vld [vmem:[#allocation2 + $0x58] sm:$0xf] }
 0x17b   : > { %8223 = vmatmul.mubr.msk.bf16.gmra.mrb[20].mxu1 %vm1381_vm1, %v7656_v48  ;;  %v7658_v46 = vcombine.low %v2020_v24, %v2030_v39  ;;  %v7689_v48 = vrot.slane %v2641_v32, 9  ;;  %v2760_v58 = vrot.slane %v2758_v49, 4  ;;  %v2049_v63 = vrot.slane %v2048_v53, 4 }
 0x17c   : > { %8226 = vmatprep.mubr.msk.bf16.mxu1 %vm1381_vm1, %v7657_v19  ;;  %v2038_v43 = vor.u32 %v2037_v42, %v2034_v33  ;;  %v2071_v11 = vrot.slane %v2069_v1, 4  ;;  %v2062_v18 = vor.u32 %v2061_v4, %v2058_v0  ;;  %v2077_v19 = vrot.slane %v2075_v6, 5  ;;  %v2648_v42 = vld [vmem:[#allocation2 + $0x4c] sm:$0xf]  ;;  %v2652_v0 = vld [vmem:[#allocation2 + $0x5c] sm:$0x1] }
 0x17d   : > { %v2759_v57 = vsel %vm9596_vm7, %v7689_v48, %v2758_v49  ;;  %v2762_v3 = vsel %vm9596_vm7, %v2760_v58, %v2761_v54  ;;  %v2054_v8 = vsel %vm9581_vm6, %v2049_v63, %v2053_v47  ;;  %v2768_v22 = vrot.slane %v2646_v2, 5  ;;  %v1865_v48 = vld [vmem:[#allocation2 + $0x74] sm:$0x1]  ;;  %v2650_v54 = vld [vmem:[#allocation2 + $0x54] sm:$0xe] }
 0x17e   : > { %v2039_v51 = vrot.slane %v2038_v43, 4  ;;  %v7705_v9 = vcombine.low %v2759_v57, %v2762_v3  ;;  %v2072_v21 = vor.u32 %v2071_v11, %v2067_v5  ;;  %v2080_v25 = vshrl.u32 %v1860_v7, 16  ;;  %v1864_v43 = vld [vmem:[#allocation2 + $0x70] sm:$0xf]  ;;  %v1867_v11 = vld [vmem:[#allocation2 + $0x7c] sm:$0xf] }
 0x17f   : > { %8257 = vmatmul.mubr.msk.bf16.gmra.mrb[20].mxu0 %vm1381_vm1, %v7704_v40  ;;  %v2083_v26 = vshll.u32 %v1860_v7, 16  ;;  %v2063_v27 = vrot.slane %v2062_v18, 4  ;;  %v2766_v28 = vsel %vm9596_vm7, %v7690_v13, %v2765_v20  ;;  %v2767_v29 = vrot.slane %v2765_v20, 4 }
 0x180   : > { %v2044_v62 = vsel %vm9581_vm6, %v2039_v51, %v2043_v35  ;;  %8260 = vmatprep.mubr.msk.bf16.mxu0 %vm1381_vm1, %v7705_v9  ;;  %v2089_v30 = vshll.u32 %v1861_v14, 16  ;;  %v2073_v10 = vrot.slane %v2072_v21, 4  ;;  %v2082_v32 = vrot.slane %v2080_v25, 4  ;;  %v2649_v35 = vld [vmem:[#allocation2 + $0x50] sm:$0x1] }
 0x181   : > { %v7659_v15 = vcombine.low %v2044_v62, %v2054_v8  ;;  %v2085_v38 = vrot.slane %v2083_v26, 5  ;;  %v2093_v33 = vshrl.u32 %v1861_v14, 16  ;;  %v2068_v17 = vsel %vm9581_vm6, %v2063_v27, %v2067_v5  ;;  %v1866_v5 = vld [vmem:[#allocation2 + $0x78] sm:$0xf]  ;;  %v1868_v21 = vld [vmem:[#allocation2 + $0x80] sm:$0x1] }
 0x182   : > { %v2769_v52 = vsel %vm9596_vm7, %v2767_v29, %v2768_v22  ;;  %v2091_v24 = vrot.slane %v2089_v30, 5  ;;  %v2099_v34 = vshll.u32 %v1862_v23, 16  ;;  %v2078_v36 = vsel %vm9581_vm6, %v2073_v10, %v2077_v19  ;;  %v2653_v29 = vld [vmem:[#allocation2 + $0x60] sm:$0xe] }
 0x183   : > { %8227 = vmatmul.mubr.msk.bf16.gmra.mrb[24].mxu1 %vm1381_vm1, %v7658_v46  ;;  %v7706_v37 = vcombine.low %v2766_v28, %v2769_v52  ;;  %v2086_v39 = vor.u32 %v2085_v38, %v2082_v32  ;;  %v2095_v40 = vrot.slane %v2093_v33, 4  ;;  %v7660_v44 = vcombine.low %v2068_v17, %v2078_v36  ;;  %v2654_v38 = vld [vmem:[#allocation2 + $0x64] sm:$0xf] }
 0x184   : > { %8230 = vmatprep.mubr.msk.bf16.mxu1 %vm1381_vm1, %v7659_v15  ;;  %v2101_v45 = vrot.slane %v2099_v34, 5  ;;  %v7691_v46 = vrot.slane %v2647_v31, 9  ;;  %v2772_v47 = vrot.slane %v2648_v42, 5  ;;  %v2775_v51 = vrot.slane %v2649_v35, 5  ;;  %v1869_v34 = vld [vmem:[#allocation2 + $0x84] sm:$0xf] }
 0x185   : > { %v2087_v49 = vrot.slane %v2086_v39, 4  ;;  %v2096_v50 = vor.u32 %v2095_v40, %v2091_v24  ;;  %v2104_v53 = vshrl.u32 %v1863_v16, 16  ;;  %v2107_v57 = vshll.u32 %v1863_v16, 16  ;;  %v1870_v39 = vld [vmem:[#allocation2 + $0x88] sm:$0xf] }
 0x186   : > { %v2773_v55 = vsel %vm9596_vm7, %v7691_v46, %v2772_v47  ;;  %v2774_v56 = vrot.slane %v2772_v47, 4  ;;  %v2113_v58 = vshll.u32 %v1864_v43, 16  ;;  %v2117_v63 = vshrl.u32 %v1864_v43, 16  ;;  %v1871_v46 = vld [vmem:[#allocation2 + $0x8c] sm:$0x1] }
 0x187   : > { %8261 = vmatmul.mubr.msk.bf16.gmra.mrb[24].mxu0 %vm1381_vm1, %v7706_v37  ;;  %v2092_v60 = vsel %vm9581_vm6, %v2087_v49, %v2091_v24  ;;  %v2097_v61 = vrot.slane %v2096_v50, 4  ;;  %v2106_v62 = vrot.slane %v2104_v53, 4  ;;  %v2109_v2 = vrot.slane %v2107_v57, 5  ;;  %v2655_v24 = vld [vmem:[#allocation2 + $0x68] sm:$0x1] }
 0x188   : > { %v2776_v1 = vsel %vm9596_vm7, %v2774_v56, %v2775_v51  ;;  %v2115_v3 = vrot.slane %v2113_v58, 5  ;;  %v2123_v4 = vshll.u32 %v1865_v48, 16  ;;  %v2119_v8 = vrot.slane %v2117_v63, 4  ;;  %v2656_v51 = vld [vmem:[#allocation2 + $0x6c] sm:$0xe] }
 0x189   : > { %v2102_v6 = vsel %vm9581_vm6, %v2097_v61, %v2101_v45  ;;  %v7707_v7 = vcombine.low %v2773_v55, %v2776_v1  ;;  %v7692_v9 = vrot.slane %v2650_v54, 9  ;;  %v2110_v14 = vor.u32 %v2109_v2, %v2106_v62  ;;  %v2657_v57 = vld [vmem:[#allocation2 + $0x70] sm:$0xf]  ;;  %v2658_v62 = vld [vmem:[#allocation2 + $0x74] sm:$0x1] }
 0x18a   : > { %v7661_v13 = vcombine.low %v2092_v60, %v2102_v6  ;;  %v2125_v15 = vrot.slane %v2123_v4, 5  ;;  %v2779_v18 = vrot.slane %v2651_v59, 5  ;;  %v2120_v19 = vor.u32 %v2119_v8, %v2115_v3  ;;  %v1873_v8 = vld [vmem:[#allocation2 + $0x94] sm:$0xf] }
 0x18b   : > { %8231 = vmatmul.mubr.msk.bf16.gmra.mrb[28].mxu1 %vm1381_vm1, %v7660_v44  ;;  %8264 = vmatprep.mubr.msk.bf16.mxu0 %vm1381_vm1, %v7707_v7  ;;  %v2782_v20 = vrot.slane %v2652_v0, 5  ;;  %v2128_v22 = vshrl.u32 %v1866_v5, 16  ;;  %v2131_v23 = vshll.u32 %v1866_v5, 16  ;;  %v2111_v25 = vrot.slane %v2110_v14, 4 }
 0x18c   : > { %8234 = vmatprep.mubr.msk.bf16.mxu1 %vm1381_vm1, %v7661_v13  ;;  %v2780_v26 = vsel %vm9596_vm7, %v7692_v9, %v2779_v18  ;;  %v2781_v27 = vrot.slane %v2779_v18, 4  ;;  %v2137_v28 = vshll.u32 %v1867_v11, 16  ;;  %v2121_v30 = vrot.slane %v2120_v19, 4 }
 0x18d   : > { %v2130_v31 = vrot.slane %v2128_v22, 4  ;;  %v2133_v10 = vrot.slane %v2131_v23, 5  ;;  %v2141_v32 = vshrl.u32 %v1867_v11, 16  ;;  %v2116_v33 = vsel %vm9581_vm6, %v2111_v25, %v2115_v3  ;;  %v1872_v3 = vld [vmem:[#allocation2 + $0x90] sm:$0xf] }
 0x18e   : > { %v2783_v42 = vsel %vm9596_vm7, %v2781_v27, %v2782_v20  ;;  %v2139_v17 = vrot.slane %v2137_v28, 5  ;;  %v2147_v52 = vshll.u32 %v1868_v21, 16  ;;  %v2126_v35 = vsel %vm9581_vm6, %v2121_v30, %v2125_v15  ;;  %v1874_v15 = vld [vmem:[#allocation2 + $0x98] sm:$0x1]  ;;  %v2659_v22 = vld [vmem:[#allocation2 + $0x78] sm:$0xe] }
 0x18f   : > { %v7708_v16 = vcombine.low %v2780_v26, %v2783_v42  ;;  %v2134_v36 = vor.u32 %v2133_v10, %v2130_v31  ;;  %v2143_v37 = vrot.slane %v2141_v32, 4  ;;  %v7662_v40 = vcombine.low %v2116_v33, %v2126_v35  ;;  %v2660_v23 = vld [vmem:[#allocation2 + $0x7c] sm:$0xf] }
 0x190   : > { %v2149_v43 = vrot.slane %v2147_v52, 5  ;;  %v7693_v44 = vrot.slane %v2653_v29, 9  ;;  %v2786_v45 = vrot.slane %v2654_v38, 5  ;;  %v2789_v49 = vrot.slane %v2655_v24, 5  ;;  %v2661_v29 = vld [vmem:[#allocation2 + $0x80] sm:$0x1] }
 0x191   : > { %8265 = vmatmul.mubr.msk.bf16.gmra.mrb[28].mxu0 %vm1381_vm1, %v7708_v16  ;;  %v2135_v47 = vrot.slane %v2134_v36, 4  ;;  %v2144_v48 = vor.u32 %v2143_v37, %v2139_v17  ;;  %v2152_v50 = vshrl.u32 %v1869_v34, 16  ;;  %v2155_v55 = vshll.u32 %v1869_v34, 16  ;;  %v1875_v38 = vld [vmem:[#allocation2 + $0x9c] sm:$0xf] }
 0x192   : > { %v2787_v53 = vsel %vm9596_vm7, %v7693_v44, %v2786_v45  ;;  %v2788_v54 = vrot.slane %v2786_v45, 4  ;;  %v2161_v56 = vshll.u32 %v1870_v39, 16  ;;  %v2165_v61 = vshrl.u32 %v1870_v39, 16  ;;  %v1876_v36 = vld [vmem:[#allocation2 + $0xa0] sm:$0xf] }
 0x193   : > { %8235 = vmatmul.mubr.msk.bf16.gmra.mrb[32].mxu1 %vm1381_vm1, %v7662_v40  ;;  %v2140_v58 = vsel %vm9581_vm6, %v2135_v47, %v2139_v17  ;;  %v2145_v59 = vrot.slane %v2144_v48, 4  ;;  %v2154_v60 = vrot.slane %v2152_v50, 4  ;;  %v2157_v0 = vrot.slane %v2155_v55, 5  ;;  %v1877_v37 = vld [vmem:[#allocation2 + $0xa4] sm:$0x1] }
 0x194   : > { %v2790_v63 = vsel %vm9596_vm7, %v2788_v54, %v2789_v49  ;;  %v2163_v1 = vrot.slane %v2161_v56, 5  ;;  %v2171_v2 = vshll.u32 %v1871_v46, 16  ;;  %v2167_v6 = vrot.slane %v2165_v61, 4  ;;  %v2662_v45 = vld [vmem:[#allocation2 + $0x84] sm:$0xe] }
 0x195   : > { %v2150_v4 = vsel %vm9581_vm6, %v2145_v59, %v2149_v43  ;;  %v7709_v5 = vcombine.low %v2787_v53, %v2790_v63  ;;  %v7694_v7 = vrot.slane %v2656_v51, 9  ;;  %v2158_v11 = vor.u32 %v2157_v0, %v2154_v60  ;;  %v2663_v50 = vld [vmem:[#allocation2 + $0x88] sm:$0xf]  ;;  %v2664_v56 = vld [vmem:[#allocation2 + $0x8c] sm:$0x1] }
 0x196   : > { %v7663_v9 = vcombine.low %v2140_v58, %v2150_v4  ;;  %v2173_v13 = vrot.slane %v2171_v2, 5  ;;  %v2793_v14 = vrot.slane %v2657_v57, 5  ;;  %v2168_v18 = vor.u32 %v2167_v6, %v2163_v1  ;;  %v1878_v57 = vld [vmem:[#allocation2 + $0xa8] sm:$0xf] }
 0x197   : > { %8268 = vmatprep.mubr.msk.bf16.mxu0 %vm1381_vm1, %v7709_v5  ;;  %v2796_v19 = vrot.slane %v2658_v62, 5  ;;  %v2176_v20 = vshrl.u32 %v1872_v3, 16  ;;  %v2179_v21 = vshll.u32 %v1872_v3, 16  ;;  %v2159_v25 = vrot.slane %v2158_v11, 4  ;;  %v9715_v62 = vld [vmem:[#allocation7 + $0xa] sm:$0x3] }
 0x198   : > { %8238 = vmatprep.mubr.msk.bf16.mxu1 %vm1381_vm1, %v7663_v9  ;;  %v2794_v26 = vsel %vm9596_vm7, %v7694_v7, %v2793_v14  ;;  %v2795_v27 = vrot.slane %v2793_v14, 4  ;;  %v2185_v28 = vshll.u32 %v1873_v8, 16  ;;  %v2169_v30 = vrot.slane %v2168_v18, 4  ;;  %8496 = vmatprep.subr.msk.bf16.mxu1 %vm1607_vm0, %v9715_v62  ;;  %v1879_v7 = vld [vmem:[#allocation2 + $0xac] sm:$0xf] }
 0x199   : > { %v2178_v31 = vrot.slane %v2176_v20, 4  ;;  %v2181_v10 = vrot.slane %v2179_v21, 5  ;;  %v2189_v32 = vshrl.u32 %v1873_v8, 16  ;;  %v2164_v33 = vsel %vm9581_vm6, %v2159_v25, %v2163_v1  ;;  %v1880_v14 = vld [vmem:[#allocation2 + $0xb0] sm:$0x1] }
 0x19a   : > { %v2797_v42 = vsel %vm9596_vm7, %v2795_v27, %v2796_v19  ;;  %v2187_v17 = vrot.slane %v2185_v28, 5  ;;  %v2195_v52 = vshll.u32 %v1874_v15, 16  ;;  %v2174_v24 = vsel %vm9581_vm6, %v2169_v30, %v2173_v13  ;;  %v2665_v21 = vld [vmem:[#allocation2 + $0x90] sm:$0xe] }
 0x19b   : > { %v7710_v34 = vcombine.low %v2794_v26, %v2797_v42  ;;  %v2182_v35 = vor.u32 %v2181_v10, %v2178_v31  ;;  %v2191_v16 = vrot.slane %v2189_v32, 4  ;;  %v7664_v39 = vcombine.low %v2164_v33, %v2174_v24  ;;  %v2667_v10 = vld [vmem:[#allocation2 + $0x98] sm:$0x1] }
 0x19c   : > { %v2197_v40 = vrot.slane %v2195_v52, 5  ;;  %v7695_v43 = vrot.slane %v2659_v22, 9  ;;  %v2800_v44 = vrot.slane %v2660_v23, 5  ;;  %v2803_v48 = vrot.slane %v2661_v29, 5  ;;  %v2666_v22 = vld [vmem:[#allocation2 + $0x94] sm:$0xf] }
 0x19d   : > { %8269 = vmatmul.mubr.msk.bf16.gmra.mrb[32].mxu0 %vm1381_vm1, %v7710_v34  ;;  %v2183_v46 = vrot.slane %v2182_v35, 4  ;;  %v2192_v47 = vor.u32 %v2191_v16, %v2187_v17  ;;  %v2200_v49 = vshrl.u32 %v1875_v38, 16  ;;  %8239 = vmatmul.mubr.msk.bf16.gmra.mrb[36].mxu1 %vm1381_vm1, %v7664_v39  ;;  %v2203_v54 = vshll.u32 %v1875_v38, 16  ;;  %v1882_v52 = vld [vmem:[#allocation2 + $0xb8] sm:$0xf] }
 0x19e   : > { %v2801_v51 = vsel %vm9596_vm7, %v7695_v43, %v2800_v44  ;;  %v2802_v53 = vrot.slane %v2800_v44, 4  ;;  %v2209_v55 = vshll.u32 %v1876_v36, 16  ;;  %v2213_v61 = vshrl.u32 %v1876_v36, 16  ;;  %v1883_v36 = vld [vmem:[#allocation2 + $0xbc] sm:$0x1] }
 0x19f   : > { %v2188_v58 = vsel %vm9581_vm6, %v2183_v46, %v2187_v17  ;;  %v2193_v59 = vrot.slane %v2192_v47, 4  ;;  %v2202_v60 = vrot.slane %v2200_v49, 4  ;;  %v2205_v0 = vrot.slane %v2203_v54, 5  ;;  %v1881_v17 = vld [vmem:[#allocation2 + $0xb4] sm:$0xf] }
 0x1a0   : > { %v2804_v63 = vsel %vm9596_vm7, %v2802_v53, %v2803_v48  ;;  %v2211_v1 = vrot.slane %v2209_v55, 5  ;;  %v2219_v2 = vshll.u32 %v1877_v37, 16  ;;  %v2215_v5 = vrot.slane %v2213_v61, 4  ;;  %v9733_v37 = vld [vmem:[#allocation7 + $0xc] sm:$0x3] }
 0x1a1   : > { %v2198_v3 = vsel %vm9581_vm6, %v2193_v59, %v2197_v40  ;;  %v7711_v4 = vcombine.low %v2801_v51, %v2804_v63  ;;  %v7696_v6 = vrot.slane %v2662_v45, 9  ;;  %v2206_v9 = vor.u32 %v2205_v0, %v2202_v60  ;;  %v2668_v45 = vld [vmem:[#allocation2 + $0x9c] sm:$0xe]  ;;  %8497 = vmatprep.subr.msk.bf16.mxu0 %vm1607_vm0, %v9733_v37  ;;  %v2673_v0 = vld [vmem:[#allocation2 + $0xb0] sm:$0x1] }
 0x1a2   : > { %v7665_v8 = vcombine.low %v2188_v58, %v2198_v3  ;;  %v2221_v11 = vrot.slane %v2219_v2, 5  ;;  %v2807_v13 = vrot.slane %v2663_v50, 5  ;;  %v2216_v15 = vor.u32 %v2215_v5, %v2211_v1  ;;  %v2669_v50 = vld [vmem:[#allocation2 + $0xa0] sm:$0xf]  ;;  %v2672_v58 = vld [vmem:[#allocation2 + $0xac] sm:$0xf] }
 0x1a3   : > { %8272 = vmatprep.mubr.msk.bf16.mxu0 %vm1381_vm1, %v7711_v4  ;;  %v2810_v18 = vrot.slane %v2664_v56, 5  ;;  %v2224_v19 = vshrl.u32 %v1878_v57, 16  ;;  %v2227_v20 = vshll.u32 %v1878_v57, 16  ;;  %v2207_v23 = vrot.slane %v2206_v9, 4  ;;  %v2670_v56 = vld [vmem:[#allocation2 + $0xa4] sm:$0x1] }
 0x1a4   : > { %8242 = vmatprep.mubr.msk.bf16.mxu1 %vm1381_vm1, %v7665_v8  ;;  %v2808_v25 = vsel %vm9596_vm7, %v7696_v6, %v2807_v13  ;;  %v2809_v26 = vrot.slane %v2807_v13, 4  ;;  %v2233_v27 = vshll.u32 %v1879_v7, 16  ;;  %v2217_v28 = vrot.slane %v2216_v15, 4  ;;  %v2671_v57 = vld [vmem:[#allocation2 + $0xa8] sm:$0xe] }
 0x1a5   : > { %v2226_v29 = vrot.slane %v2224_v19, 4  ;;  %v2229_v30 = vrot.slane %v2227_v20, 5  ;;  %v2237_v31 = vshrl.u32 %v1879_v7, 16  ;;  %v2212_v32 = vsel %vm9581_vm6, %v2207_v23, %v2211_v1  ;;  %v2674_v9 = vld [vmem:[#allocation2 + $0xb4] sm:$0xe] }
 0x1a6   : > { %v2811_v38 = vsel %vm9596_vm7, %v2809_v26, %v2810_v18  ;;  %v2235_v33 = vrot.slane %v2233_v27, 5  ;;  %v2243_v42 = vshll.u32 %v1880_v14, 16  ;;  %v2222_v24 = vsel %vm9581_vm6, %v2217_v28, %v2221_v11  ;;  %v2675_v18 = vld [vmem:[#allocation2 + $0xb8] sm:$0xf]  ;;  %v2676_v19 = vld [vmem:[#allocation2 + $0xbc] sm:$0x1] }
 0x1a7   : > { %v7712_v34 = vcombine.low %v2808_v25, %v2811_v38  ;;  %v2230_v35 = vor.u32 %v2229_v30, %v2226_v29  ;;  %v2239_v16 = vrot.slane %v2237_v31, 4  ;;  %v7666_v39 = vcombine.low %v2212_v32, %v2222_v24  ;;  %v3621_v29 = vld [vmem:[#allocation2 + $0xc] sm:$0xf]  ;;  %v3622_v38 = vld [vmem:[#allocation2 + $0x10] sm:$0xf] }
 0x1a8   : > { %v2245_v40 = vrot.slane %v2243_v42, 5  ;;  %v7697_v43 = vrot.slane %v2665_v21, 9  ;;  %v2814_v44 = vrot.slane %v2666_v22, 5  ;;  %v2817_v48 = vrot.slane %v2667_v10, 5  ;;  %v3623_v24 = vld [vmem:[#allocation2 + $0x14] sm:$0x1] }
 0x1a9   : > { %8273 = vmatmul.mubr.msk.bf16.gmra.mrb[36].mxu0 %vm1381_vm1, %v7712_v34  ;;  %v2231_v46 = vrot.slane %v2230_v35, 4  ;;  %v2240_v47 = vor.u32 %v2239_v16, %v2235_v33  ;;  %v2248_v49 = vshrl.u32 %v1881_v17, 16  ;;  %8243 = vmatmul.mubr.msk.bf16.gmra.mrb[40].mxu1 %vm1381_vm1, %v7666_v39  ;;  %v2251_v54 = vshll.u32 %v1881_v17, 16  ;;  %v3624_v34 = vld [vmem:[#allocation2 + $0x18] sm:$0xf]  ;;  %v8633_v39 = vld [vmem:[#allocation2 + $0xc] sm:$0xff]  }
 0x1aa   : > { %v2815_v51 = vsel %vm9596_vm7, %v7697_v43, %v2814_v44  ;;  %v2816_v53 = vrot.slane %v2814_v44, 4  ;;  %v2257_v55 = vshll.u32 %v1882_v52, 16  ;;  %v2261_v63 = vshrl.u32 %v1882_v52, 16 }
 0x1ab   : > { %v2236_v59 = vsel %vm9581_vm6, %v2231_v46, %v2235_v33  ;;  %v2241_v60 = vrot.slane %v2240_v47, 4  ;;  %v2250_v61 = vrot.slane %v2248_v49, 4  ;;  %v2253_v2 = vrot.slane %v2251_v54, 5  ;;  %v3625_v47 = vld [vmem:[#allocation2 + $0x1c] sm:$0xf] }
 0x1ac   : > { %v2818_v1 = vsel %vm9596_vm7, %v2816_v53, %v2817_v48  ;;  %v2259_v3 = vrot.slane %v2257_v55, 5  ;;  %v2267_v4 = vshll.u32 %v1883_v36, 16  ;;  %v2263_v7 = vrot.slane %v2261_v63, 4  ;;  %v3626_v48 = vld [vmem:[#allocation2 + $0x20] sm:$0x1]  ;;  %v8634_v63 = vld [vmem:[#allocation2 + $0x18] sm:$0xff]  }
 0x1ad   : > { %v2246_v5 = vsel %vm9581_vm6, %v2241_v60, %v2245_v40  ;;  %v7713_v6 = vcombine.low %v2815_v51, %v2818_v1  ;;  %v7698_v8 = vrot.slane %v2668_v45, 9  ;;  %v2254_v13 = vor.u32 %v2253_v2, %v2250_v61  ;;  %v3627_v54 = vld [vmem:[#allocation2 + $0x24] sm:$0xf] }
 0x1ae   : > { %v7667_v11 = vcombine.low %v2236_v59, %v2246_v5  ;;  %v2269_v14 = vrot.slane %v2267_v4, 5  ;;  %v2821_v15 = vrot.slane %v2669_v50, 5  ;;  %v2264_v20 = vor.u32 %v2263_v7, %v2259_v3  ;;  %v8635_v4 = vld [vmem:[#allocation2 + $0x24] sm:$0xff]  }
 0x1af   : > { %8276 = vmatprep.mubr.msk.bf16.mxu0 %vm1381_vm1, %v7713_v6  ;;  %v2824_v21 = vrot.slane %v2670_v56, 5  ;;  %v7699_v22 = vrot.slane %v2671_v57, 9  ;;  %v2828_v23 = vrot.slane %v2672_v58, 5  ;;  %v2255_v25 = vrot.slane %v2254_v13, 4 }
 0x1b0   : > { %8246 = vmatprep.mubr.msk.bf16.mxu1 %vm1381_vm1, %v7667_v11  ;;  %v2822_v26 = vsel %vm9596_vm7, %v7698_v8, %v2821_v15  ;;  %v2823_v27 = vrot.slane %v2821_v15, 4  ;;  %v2831_v28 = vrot.slane %v2673_v0, 5  ;;  %v2265_v30 = vrot.slane %v2264_v20, 4  ;;  %v3629_v15 = vld [vmem:[#allocation2 + $0x2c] sm:$0x1] }
 0x1b1   : > { %v2829_v31 = vsel %vm9596_vm7, %v7699_v22, %v2828_v23  ;;  %v2830_v10 = vrot.slane %v2828_v23, 4  ;;  %v7700_v32 = vrot.slane %v2674_v9, 9  ;;  %v2260_v33 = vsel %vm9581_vm6, %v2255_v25, %v2259_v3  ;;  %v3628_v9 = vld [vmem:[#allocation2 + $0x28] sm:$0xf] }
 0x1b2   : > { %v2825_v42 = vsel %vm9596_vm7, %v2823_v27, %v2824_v21  ;;  %v2835_v17 = vrot.slane %v2675_v18, 5  ;;  %v2838_v52 = vrot.slane %v2676_v19, 5  ;;  %v2270_v35 = vsel %vm9581_vm6, %v2265_v30, %v2269_v14 }
 0x1b3   : > { %v7714_v16 = vcombine.low %v2822_v26, %v2825_v42  ;;  %v2832_v36 = vsel %vm9596_vm7, %v2830_v10, %v2831_v28  ;;  %v4750_v40 = vsel %vm1607_vm0, %v9715_v62, 0  ;;  %v7668_v43 = vcombine.low %v2260_v33, %v2270_v35  ;;  %v3631_v10 = vld [vmem:[#allocation2 + $0x34] sm:$0xf]  ;;  %v3632_v35 = vld [vmem:[#allocation2 + $0x38] sm:$0x1] }
 0x1b4   : > { %v7715_v44 = vcombine.low %v2829_v31, %v2832_v36  ;;  %v2836_v45 = vsel %vm9596_vm7, %v7700_v32, %v2835_v17  ;;  %v2837_v46 = vrot.slane %v2835_v17, 4  ;;  %v3670_v49 = vshrl.u32 %v3621_v29, 16 }
 0x1b5   : > { %8277 = vmatmul.mubr.msk.bf16.gmra.mrb[40].mxu0 %vm1381_vm1, %v7714_v16  ;;  %v3673_v50 = vshll.u32 %v3621_v29, 16  ;;  %v3679_v51 = vshll.u32 %v3622_v38, 16  ;;  %v3683_v53 = vshrl.u32 %v3622_v38, 16  ;;  %8247 = vmatmul.mubr.msk.bf16.gmra.mrb[44].mxu1 %vm1381_vm1, %v7668_v43  ;;  %v3689_v55 = vshll.u32 %v3623_v24, 16 }
 0x1b6   : > { %8280 = vmatprep.mubr.msk.bf16.mxu0 %vm1381_vm1, %v7715_v44  ;;  %v2839_v62 = vsel %vm9596_vm7, %v2837_v46, %v2838_v52  ;;  %v3694_v56 = vshrl.u32 %v3624_v34, 16  ;;  %v3697_v57 = vshll.u32 %v3624_v34, 16  ;;  %8286 = vmatprep.mubr.msk.bf16.mxu1 %vm1381_vm1, %v8633_v39  ;;  %v3672_v59 = vrot.slane %v3670_v49, 4  ;;  %v3633_v44 = vld [vmem:[#allocation2 + $0x3c] sm:$0xf]  ;;  %v8636_v49 = vld [vmem:[#allocation2 + $0x30] sm:$0xff]  }
 0x1b7   : > { %v7716_v58 = vcombine.low %v2836_v45, %v2839_v62  ;;  %v3675_v60 = vrot.slane %v3673_v50, 5  ;;  %v3681_v61 = vrot.slane %v3679_v51, 5  ;;  %v3685_v0 = vrot.slane %v3683_v53, 4  ;;  %v8637_v62 = vld [vmem:[#allocation2 + $0x3c] sm:$0xff]  }
 0x1b8   : > { %v3691_v1 = vrot.slane %v3689_v55, 5  ;;  %v3696_v2 = vrot.slane %v3694_v56, 4  ;;  %v3699_v3 = vrot.slane %v3697_v57, 5  ;;  %v3703_v6 = vshll.u32 %v3625_v47, 16 }
 0x1b9   : > { %v3676_v5 = vor.u32 %v3675_v60, %v3672_v59  ;;  %v3707_v7 = vshrl.u32 %v3625_v47, 16  ;;  %v3713_v8 = vshll.u32 %v3626_v48, 16  ;;  %v3686_v11 = vor.u32 %v3685_v0, %v3681_v61  ;;  %v3634_v48 = vld [vmem:[#allocation2 + $0x40] sm:$0xf] }
 0x1ba   : > { %v3700_v13 = vor.u32 %v3699_v3, %v3696_v2  ;;  %v9773_v14 = vsel %vm1607_vm0, %v9733_v37, 0  ;;  %v3718_v18 = vshrl.u32 %v3627_v54, 16  ;;  %v3705_v20 = vrot.slane %v3703_v6, 5  ;;  %v3630_v37 = vld [vmem:[#allocation2 + $0x30] sm:$0xf] }
 0x1bb   : > { %v3677_v19 = vrot.slane %v3676_v5, 4  ;;  %v3709_v21 = vrot.slane %v3707_v7, 4  ;;  %v3715_v22 = vrot.slane %v3713_v8, 5  ;;  %v3687_v23 = vrot.slane %v3686_v11, 4  ;;  %v3637_v11 = vld [vmem:[#allocation2 + $0x4c] sm:$0xf] }
 0x1bc   : > { %v3701_v25 = vrot.slane %v3700_v13, 4  ;;  %v3720_v26 = vrot.slane %v3718_v18, 4  ;;  %v3721_v27 = vshll.u32 %v3627_v54, 16  ;;  %v3727_v30 = vshll.u32 %v3628_v9, 16 }
 0x1bd   : > { %8281 = vmatmul.mubr.msk.bf16.gmra.mrb[44].mxu0 %vm1381_vm1, %v7716_v58  ;;  %v3682_v28 = vsel %vm9581_vm6, %v3677_v19, %v3681_v61  ;;  %v3710_v29 = vor.u32 %v3709_v21, %v3705_v20  ;;  %v3731_v31 = vshrl.u32 %v3628_v9, 16  ;;  %8287 = vmatmul.mubr.msk.bf16.vlgmr.msra.gmra.mrb[48].mxu1 %vm1381_vm1, %v8634_v63  ;;  %v3692_v32 = vsel %vm9581_vm6, %v3687_v23, %v3691_v1  ;;  %v3635_v61 = vld [vmem:[#allocation2 + $0x44] sm:$0x1]  ;;  %v3636_v1 = vld [vmem:[#allocation2 + $0x48] sm:$0xf] }
 0x1be   : > { %v3706_v38 = vsel %vm9581_vm6, %v3701_v25, %v3705_v20  ;;  %v3723_v33 = vrot.slane %v3721_v27, 5  ;;  %v3737_v42 = vshll.u32 %v3629_v15, 16  ;;  %8353 = vmatpush3.bf16.msra.mxu1 %v4750_v40  ;;  %8290 = vmatprep.mubr.msk.bf16.mxu1 %vm1381_vm1, %v8635_v4  ;;  %v7765_v17 = vcombine.low %v3682_v28, %v3692_v32  ;;  %v3638_v20 = vld [vmem:[#allocation2 + $0x50] sm:$0x1]  ;;  %v3639_v25 = vld [vmem:[#allocation2 + $0x54] sm:$0xf] }
 0x1bf   : > { %v3711_v52 = vrot.slane %v3710_v29, 4  ;;  %v3729_v24 = vrot.slane %v3727_v30, 5  ;;  %v3733_v34 = vrot.slane %v3731_v31, 4  ;;  %v3742_v39 = vshrl.u32 %v3630_v37, 16  ;;  %v8638_v30 = vld [vmem:[#allocation2 + $0x48] sm:$0xff]  }
 0x1c0   : > { %v3724_v16 = vor.u32 %v3723_v33, %v3720_v26  ;;  %v3739_v36 = vrot.slane %v3737_v42, 5  ;;  %v3745_v43 = vshll.u32 %v3630_v37, 16  ;;  %8320 = vmatprep.mubr.msk.bf16.mxu0 %vm1381_vm1, %v7765_v17  ;;  %v3751_v47 = vshll.u32 %v3631_v10, 16  ;;  %v8639_v33 = vld [vmem:[#allocation2 + $0x54] sm:$0xff]  }
 0x1c1   : > { %v3716_v45 = vsel %vm9581_vm6, %v3711_v52, %v3715_v22  ;;  %v3734_v46 = vor.u32 %v3733_v34, %v3729_v24  ;;  %v3755_v40 = vshrl.u32 %v3631_v10, 16  ;;  %v3744_v53 = vrot.slane %v3742_v39, 4 }
 0x1c2   : > { %v7766_v50 = vcombine.low %v3706_v38, %v3716_v45  ;;  %v3725_v51 = vrot.slane %v3724_v16, 4  ;;  %v3747_v54 = vrot.slane %v3745_v43, 5  ;;  %v3753_v56 = vrot.slane %v3751_v47, 5  ;;  %v3640_v38 = vld [vmem:[#allocation2 + $0x58] sm:$0xf] }
 0x1c3   : > { %v3735_v55 = vrot.slane %v3734_v46, 4  ;;  %v3757_v57 = vrot.slane %v3755_v40, 4  ;;  %v3761_v58 = vshll.u32 %v3632_v35, 16  ;;  %v3766_v63 = vshrl.u32 %v3633_v44, 16  ;;  %v3641_v16 = vld [vmem:[#allocation2 + $0x5c] sm:$0x1] }
 0x1c4   : > { %v3730_v59 = vsel %vm9581_vm6, %v3725_v51, %v3729_v24  ;;  %v3748_v60 = vor.u32 %v3747_v54, %v3744_v53  ;;  %v3769_v0 = vshll.u32 %v3633_v44, 16  ;;  %v3775_v5 = vshll.u32 %v3634_v48, 16 }
 0x1c5   : > { %8321 = vmatmul.mubr.msk.bf16.vlgmr.msra.gmra.mrb[48].mxu0 %vm1381_vm1, %v7766_v50  ;;  %v3740_v2 = vsel %vm9581_vm6, %v3735_v55, %v3739_v36  ;;  %v3758_v3 = vor.u32 %v3757_v57, %v3753_v56  ;;  %v3763_v4 = vrot.slane %v3761_v58, 5  ;;  %8291 = vmatmul.mubr.msk.bf16.gmra.mrb[52].mxu1 %vm1381_vm1, %v8636_v49  ;;  %v3768_v8 = vrot.slane %v3766_v63, 4  ;;  %v3642_v50 = vld [vmem:[#allocation2 + $0x60] sm:$0xf]  ;;  %v3643_v55 = vld [vmem:[#allocation2 + $0x64] sm:$0xf] }
 0x1c6   : > { %8387 = vmatpush3.bf16.msra.mxu0 %v9773_v14  ;;  %v7767_v6 = vcombine.low %v3730_v59, %v3740_v2  ;;  %v3749_v7 = vrot.slane %v3748_v60, 4  ;;  %v3771_v9 = vrot.slane %v3769_v0, 5  ;;  %8294 = vmatprep.mubr.msk.bf16.mxu1 %vm1381_vm1, %v8637_v62  ;;  %v3777_v15 = vrot.slane %v3775_v5, 5  ;;  %v8640_v2 = vld [vmem:[#allocation2 + $0x60] sm:$0xff]  }
 0x1c7   : > { %v3759_v13 = vrot.slane %v3758_v3, 4  ;;  %v3779_v18 = vshrl.u32 %v3634_v48, 16  ;;  %v3785_v19 = vshll.u32 %v3635_v61, 16  ;;  %v3790_v23 = vshrl.u32 %v3636_v1, 16 }
 0x1c8   : > { %8324 = vmatprep.mubr.msk.bf16.mxu0 %vm1381_vm1, %v7767_v6  ;;  %v3754_v21 = vsel %vm9581_vm6, %v3749_v7, %v3753_v56  ;;  %v3772_v22 = vor.u32 %v3771_v9, %v3768_v8  ;;  %v3793_v14 = vshll.u32 %v3636_v1, 16  ;;  %v3799_v29 = vshll.u32 %v3637_v11, 16  ;;  %v3644_v56 = vld [vmem:[#allocation2 + $0x68] sm:$0x1]  ;;  %v3645_v7 = vld [vmem:[#allocation2 + $0x6c] sm:$0xf] }
 0x1c9   : > { %v3764_v26 = vsel %vm9581_vm6, %v3759_v13, %v3763_v4  ;;  %v3781_v27 = vrot.slane %v3779_v18, 4  ;;  %v3787_v28 = vrot.slane %v3785_v19, 5  ;;  %v3792_v10 = vrot.slane %v3790_v23, 4  ;;  %v8641_v9 = vld [vmem:[#allocation2 + $0x6c] sm:$0xff]  }
 0x1ca   : > { %v7768_v31 = vcombine.low %v3754_v21, %v3764_v26  ;;  %v3773_v37 = vrot.slane %v3772_v22, 4  ;;  %v3795_v32 = vrot.slane %v3793_v14, 5  ;;  %v3801_v17 = vrot.slane %v3799_v29, 5  ;;  %v3646_v18 = vld [vmem:[#allocation2 + $0x70] sm:$0xf] }
 0x1cb   : > { %v3782_v42 = vor.u32 %v3781_v27, %v3777_v15  ;;  %v3803_v52 = vshrl.u32 %v3637_v11, 16  ;;  %v3809_v24 = vshll.u32 %v3638_v20, 16  ;;  %v3814_v36 = vshrl.u32 %v3639_v25, 16  ;;  %v3647_v26 = vld [vmem:[#allocation2 + $0x74] sm:$0x1] }
 0x1cc   : > { %v3778_v34 = vsel %vm9581_vm6, %v3773_v37, %v3777_v15  ;;  %v3796_v35 = vor.u32 %v3795_v32, %v3792_v10  ;;  %v3817_v39 = vshll.u32 %v3639_v25, 16  ;;  %v3823_v46 = vshll.u32 %v3640_v38, 16  ;;  %v3648_v37 = vld [vmem:[#allocation2 + $0x78] sm:$0xf] }
 0x1cd   : > { %8325 = vmatmul.mubr.msk.bf16.gmra.mrb[52].mxu0 %vm1381_vm1, %v7768_v31  ;;  %v3783_v43 = vrot.slane %v3782_v42, 4  ;;  %v3805_v44 = vrot.slane %v3803_v52, 4  ;;  %v3811_v45 = vrot.slane %v3809_v24, 5  ;;  %8295 = vmatmul.mubr.msk.bf16.gmra.mrb[56].mxu1 %vm1381_vm1, %v8638_v30  ;;  %v3816_v40 = vrot.slane %v3814_v36, 4  ;;  %v3649_v42 = vld [vmem:[#allocation2 + $0x7c] sm:$0xf] }
 0x1ce   : > { %v3797_v47 = vrot.slane %v3796_v35, 4  ;;  %v3819_v48 = vrot.slane %v3817_v39, 5  ;;  %v3827_v49 = vshrl.u32 %v3640_v38, 16  ;;  %8298 = vmatprep.mubr.msk.bf16.mxu1 %vm1381_vm1, %v8639_v33  ;;  %v3825_v54 = vrot.slane %v3823_v46, 5  ;;  %v8642_v35 = vld [vmem:[#allocation2 + $0x78] sm:$0xff]  }
 0x1cf   : > { %v3788_v51 = vsel %vm9581_vm6, %v3783_v43, %v3787_v28  ;;  %v3806_v53 = vor.u32 %v3805_v44, %v3801_v17  ;;  %v3833_v62 = vshll.u32 %v3641_v16, 16  ;;  %v3838_v0 = vshrl.u32 %v3642_v50, 16 }
 0x1d0   : > { %v7769_v57 = vcombine.low %v3778_v34, %v3788_v51  ;;  %v3802_v58 = vsel %vm9581_vm6, %v3797_v47, %v3801_v17  ;;  %v3820_v59 = vor.u32 %v3819_v48, %v3816_v40  ;;  %v3829_v60 = vrot.slane %v3827_v49, 4  ;;  %v3650_v47 = vld [vmem:[#allocation2 + $0x80] sm:$0x1]  ;;  %v3651_v48 = vld [vmem:[#allocation2 + $0x84] sm:$0xf] }
 0x1d1   : > { %v3807_v61 = vrot.slane %v3806_v53, 4  ;;  %v3835_v63 = vrot.slane %v3833_v62, 5  ;;  %v3841_v1 = vshll.u32 %v3642_v50, 16  ;;  %v3847_v5 = vshll.u32 %v3643_v55, 16  ;;  %v8643_v50 = vld [vmem:[#allocation2 + $0x84] sm:$0xff]  }
 0x1d2   : > { %8328 = vmatprep.mubr.msk.bf16.mxu0 %vm1381_vm1, %v7769_v57  ;;  %v3821_v3 = vrot.slane %v3820_v59, 4  ;;  %v3830_v4 = vor.u32 %v3829_v60, %v3825_v54  ;;  %v3851_v6 = vshrl.u32 %v3643_v55, 16  ;;  %v3840_v11 = vrot.slane %v3838_v0, 4  ;;  %v3652_v62 = vld [vmem:[#allocation2 + $0x88] sm:$0xf] }
 0x1d3   : > { %v3812_v8 = vsel %vm9581_vm6, %v3807_v61, %v3811_v45  ;;  %v3843_v13 = vrot.slane %v3841_v1, 5  ;;  %v3857_v15 = vshll.u32 %v3644_v56, 16  ;;  %v3849_v22 = vrot.slane %v3847_v5, 5  ;;  %v9824_v0 = vld [vmem:[#allocation7 + $0xe] sm:$0x3] }
 0x1d4   : > { %v7770_v19 = vcombine.low %v3802_v58, %v3812_v8  ;;  %v3826_v20 = vsel %vm9581_vm6, %v3821_v3, %v3825_v54  ;;  %v3831_v21 = vrot.slane %v3830_v4, 4  ;;  %v3853_v14 = vrot.slane %v3851_v6, 4  ;;  %v3653_v3 = vld [vmem:[#allocation2 + $0x8c] sm:$0x1]  ;;  %v3654_v6 = vld [vmem:[#allocation2 + $0x90] sm:$0xf]  ;;  %8498 = vmatprep.subr.msk.bf16.mxu1 %vm1607_vm0, %v9824_v0 }
 0x1d5   : > { %v3844_v23 = vor.u32 %v3843_v13, %v3840_v11  ;;  %v3859_v25 = vrot.slane %v3857_v15, 5  ;;  %v3862_v27 = vshrl.u32 %v3645_v7, 16  ;;  %8299 = vmatmul.mubr.msk.bf16.gmra.mrb[60].mxu1 %vm1381_vm1, %v8640_v2  ;;  %v3865_v29 = vshll.u32 %v3645_v7, 16  ;;  %v3655_v13 = vld [vmem:[#allocation2 + $0x94] sm:$0xf] }
 0x1d6   : > { %8329 = vmatmul.mubr.msk.bf16.gmra.mrb[56].mxu0 %vm1381_vm1, %v7770_v19  ;;  %v3836_v28 = vsel %vm9581_vm6, %v3831_v21, %v3835_v63  ;;  %v3871_v30 = vshll.u32 %v3646_v18, 16  ;;  %v3875_v31 = vshrl.u32 %v3646_v18, 16  ;;  %8302 = vmatprep.mubr.msk.bf16.mxu1 %vm1381_vm1, %v8641_v9  ;;  %v3854_v38 = vor.u32 %v3853_v14, %v3849_v22  ;;  %v3656_v14 = vld [vmem:[#allocation2 + $0x98] sm:$0x1] }
 0x1d7   : > { %v7771_v10 = vcombine.low %v3826_v20, %v3836_v28  ;;  %v3845_v32 = vrot.slane %v3844_v23, 4  ;;  %v3864_v33 = vrot.slane %v3862_v27, 4  ;;  %v3867_v17 = vrot.slane %v3865_v29, 5 }
 0x1d8   : > { %v3873_v52 = vrot.slane %v3871_v30, 5  ;;  %v3877_v24 = vrot.slane %v3875_v31, 4  ;;  %v3881_v34 = vshll.u32 %v3647_v26, 16  ;;  %v3855_v36 = vrot.slane %v3854_v38, 4  ;;  %v8644_v26 = vld [vmem:[#allocation2 + $0x90] sm:$0xff]  }
 0x1d9   : > { %8332 = vmatprep.mubr.msk.bf16.mxu0 %vm1381_vm1, %v7771_v10  ;;  %v3850_v16 = vsel %vm9581_vm6, %v3845_v32, %v3849_v22  ;;  %v3886_v39 = vshrl.u32 %v3648_v37, 16  ;;  %v3889_v43 = vshll.u32 %v3648_v37, 16  ;;  %v3868_v44 = vor.u32 %v3867_v17, %v3864_v33  ;;  %v3657_v31 = vld [vmem:[#allocation2 + $0x9c] sm:$0xf] }
 0x1da   : > { %v3878_v45 = vor.u32 %v3877_v24, %v3873_v52  ;;  %v3883_v46 = vrot.slane %v3881_v34, 5  ;;  %v3895_v40 = vshll.u32 %v3649_v42, 16  ;;  %v3860_v49 = vsel %vm9581_vm6, %v3855_v36, %v3859_v25  ;;  %v8645_v10 = vld [vmem:[#allocation2 + $0x9c] sm:$0xff]  }
 0x1db   : > { %v3888_v51 = vrot.slane %v3886_v39, 4  ;;  %v3891_v53 = vrot.slane %v3889_v43, 5  ;;  %v3899_v54 = vshrl.u32 %v3649_v42, 16  ;;  %v7772_v55 = vcombine.low %v3850_v16, %v3860_v49  ;;  %v3658_v42 = vld [vmem:[#allocation2 + $0xa0] sm:$0xf] }
 0x1dc   : > { %v3869_v56 = vrot.slane %v3868_v44, 4  ;;  %v3879_v57 = vrot.slane %v3878_v45, 4  ;;  %v3897_v58 = vrot.slane %v3895_v40, 5  ;;  %v3905_v61 = vshll.u32 %v3650_v47, 16  ;;  %v9840_v43 = vld [vmem:[#allocation7 + $0x10] sm:$0x3] }
 0x1dd   : > { %v3892_v59 = vor.u32 %v3891_v53, %v3888_v51  ;;  %v3901_v60 = vrot.slane %v3899_v54, 4  ;;  %v3910_v63 = vshrl.u32 %v3651_v48, 16  ;;  %8303 = vmatmul.mubr.msk.bf16.gmra.mrb[64].mxu1 %vm1381_vm1, %v8642_v35  ;;  %v3913_v4 = vshll.u32 %v3651_v48, 16  ;;  %v3659_v47 = vld [vmem:[#allocation2 + $0xa4] sm:$0x1]  ;;  %8499 = vmatprep.subr.msk.bf16.mxu0 %vm1607_vm0, %v9840_v43 }
 0x1de   : > { %8333 = vmatmul.mubr.msk.bf16.gmra.mrb[60].mxu0 %vm1381_vm1, %v7772_v55  ;;  %v3874_v1 = vsel %vm9581_vm6, %v3869_v56, %v3873_v52  ;;  %v3884_v2 = vsel %vm9581_vm6, %v3879_v57, %v3883_v46  ;;  %v3919_v5 = vshll.u32 %v3652_v62, 16  ;;  %8306 = vmatprep.mubr.msk.bf16.mxu1 %vm1381_vm1, %v8643_v50  ;;  %v3907_v11 = vrot.slane %v3905_v61, 5  ;;  %v3660_v48 = vld [vmem:[#allocation2 + $0xa8] sm:$0xf]  ;;  %v3661_v54 = vld [vmem:[#allocation2 + $0xac] sm:$0xf] }
 0x1df   : > { %v7773_v7 = vcombine.low %v3874_v1, %v3884_v2  ;;  %v3893_v8 = vrot.slane %v3892_v59, 4  ;;  %v3902_v9 = vor.u32 %v3901_v60, %v3897_v58  ;;  %v3912_v15 = vrot.slane %v3910_v63, 4  ;;  %v8646_v59 = vld [vmem:[#allocation2 + $0xa8] sm:$0xff]  }
 0x1e0   : > { %v3915_v18 = vrot.slane %v3913_v4, 5  ;;  %v3921_v19 = vrot.slane %v3919_v5, 5  ;;  %v3923_v20 = vshrl.u32 %v3652_v62, 16  ;;  %v3929_v23 = vshll.u32 %v3653_v3, 16  ;;  %v3662_v4 = vld [vmem:[#allocation2 + $0xb0] sm:$0x1] }
 0x1e1   : > { %8336 = vmatprep.mubr.msk.bf16.mxu0 %vm1381_vm1, %v7773_v7  ;;  %v3898_v21 = vsel %vm9581_vm6, %v3893_v8, %v3897_v58  ;;  %v3903_v22 = vrot.slane %v3902_v9, 4  ;;  %v3934_v25 = vshrl.u32 %v3654_v6, 16  ;;  %v3937_v29 = vshll.u32 %v3654_v6, 16  ;;  %v3663_v6 = vld [vmem:[#allocation2 + $0xb4] sm:$0xf] }
 0x1e2   : > { %v3916_v27 = vor.u32 %v3915_v18, %v3912_v15  ;;  %v3925_v28 = vrot.slane %v3923_v20, 4  ;;  %v3943_v30 = vshll.u32 %v3655_v13, 16  ;;  %v3931_v32 = vrot.slane %v3929_v23, 5  ;;  %v8647_v8 = vld [vmem:[#allocation2 + $0xb4] sm:$0xff]  }
 0x1e3   : > { %v3908_v37 = vsel %vm9581_vm6, %v3903_v22, %v3907_v11  ;;  %v3936_v38 = vrot.slane %v3934_v25, 4  ;;  %v3947_v33 = vshrl.u32 %v3655_v13, 16  ;;  %v3939_v34 = vrot.slane %v3937_v29, 5  ;;  %v3664_v15 = vld [vmem:[#allocation2 + $0xb8] sm:$0xf] }
 0x1e4   : > { %v7774_v17 = vcombine.low %v3898_v21, %v3908_v37  ;;  %v3917_v52 = vrot.slane %v3916_v27, 4  ;;  %v3926_v24 = vor.u32 %v3925_v28, %v3921_v19  ;;  %v3945_v35 = vrot.slane %v3943_v30, 5  ;;  %v4411_v27 = vld [vmem:[#allocation2 + $0xc] sm:$0xe]  ;;  %v4412_v37 = vld [vmem:[#allocation2 + $0x10] sm:$0xf] }
 0x1e5   : > { %v3949_v16 = vrot.slane %v3947_v33, 4  ;;  %v3953_v36 = vshll.u32 %v3656_v14, 16  ;;  %v3958_v39 = vshrl.u32 %v3657_v31, 16  ;;  %8307 = vmatmul.mubr.msk.bf16.gmra.mrb[68].mxu1 %vm1381_vm1, %v8644_v26  ;;  %v3940_v46 = vor.u32 %v3939_v34, %v3936_v38  ;;  %v3665_v26 = vld [vmem:[#allocation2 + $0xbc] sm:$0x1] }
 0x1e6   : > { %8337 = vmatmul.mubr.msk.bf16.gmra.mrb[64].mxu0 %vm1381_vm1, %v7774_v17  ;;  %v3922_v44 = vsel %vm9581_vm6, %v3917_v52, %v3921_v19  ;;  %v3927_v45 = vrot.slane %v3926_v24, 4  ;;  %v3961_v40 = vshll.u32 %v3657_v31, 16  ;;  %8310 = vmatprep.mubr.msk.bf16.mxu1 %vm1381_vm1, %v8645_v10  ;;  %v3967_v53 = vshll.u32 %v3658_v42, 16 }
 0x1e7   : > { %v3950_v49 = vor.u32 %v3949_v16, %v3945_v35  ;;  %v3955_v50 = vrot.slane %v3953_v36, 5  ;;  %v3960_v51 = vrot.slane %v3958_v39, 4  ;;  %v3941_v55 = vrot.slane %v3940_v46, 4 }
 0x1e8   : > { %v3932_v62 = vsel %vm9581_vm6, %v3927_v45, %v3931_v32  ;;  %v3963_v56 = vrot.slane %v3961_v40, 5  ;;  %v3971_v57 = vshrl.u32 %v3658_v42, 16  ;;  %v3969_v61 = vrot.slane %v3967_v53, 5  ;;  %v4413_v42 = vld [vmem:[#allocation2 + $0x14] sm:$0x1]  ;;  %v8648_v45 = vld [vmem:[#allocation2 + $0xc0] sm:$0xff]  }
 0x1e9   : > { %v7775_v58 = vcombine.low %v3922_v44, %v3932_v62  ;;  %v3951_v60 = vrot.slane %v3950_v49, 4  ;;  %v3977_v63 = vshll.u32 %v3659_v47, 16  ;;  %v3946_v1 = vsel %vm9581_vm6, %v3941_v55, %v3945_v35  ;;  %v3666_v44 = vld [vmem:[#allocation2 + $0xc0] sm:$0xf]  ;;  %v3667_v49 = vld [vmem:[#allocation2 + $0xc4] sm:$0xf] }
 0x1ea   : > { %v3964_v2 = vor.u32 %v3963_v56, %v3960_v51  ;;  %v3973_v3 = vrot.slane %v3971_v57, 4  ;;  %v3982_v5 = vshrl.u32 %v3660_v48, 16  ;;  %v3985_v11 = vshll.u32 %v3660_v48, 16  ;;  %v3668_v62 = vld [vmem:[#allocation2 + $0xc8] sm:$0x1] }
 0x1eb   : > { %8340 = vmatprep.mubr.msk.bf16.mxu0 %vm1381_vm1, %v7775_v58  ;;  %v3956_v7 = vsel %vm9581_vm6, %v3951_v60, %v3955_v50  ;;  %v3979_v9 = vrot.slane %v3977_v63, 5  ;;  %v3991_v13 = vshll.u32 %v3661_v54, 16  ;;  %v3995_v14 = vshrl.u32 %v3661_v54, 16  ;;  %v4414_v55 = vld [vmem:[#allocation2 + $0x18] sm:$0xe] }
 0x1ec   : > { %v7776_v18 = vcombine.low %v3946_v1, %v3956_v7  ;;  %v3965_v19 = vrot.slane %v3964_v2, 4  ;;  %v3974_v20 = vor.u32 %v3973_v3, %v3969_v61  ;;  %v3984_v21 = vrot.slane %v3982_v5, 4  ;;  %v4415_v2 = vld [vmem:[#allocation2 + $0x1c] sm:$0xf]  ;;  %v4416_v3 = vld [vmem:[#allocation2 + $0x20] sm:$0x1] }
 0x1ed   : > { %v3987_v22 = vrot.slane %v3985_v11, 5  ;;  %v3993_v23 = vrot.slane %v3991_v13, 5  ;;  %v4001_v25 = vshll.u32 %v3662_v4, 16  ;;  %8311 = vmatmul.mubr.msk.bf16.gmra.mrb[72].mxu1 %vm1381_vm1, %v8646_v59  ;;  %v4006_v30 = vshrl.u32 %v3663_v6, 16 }
 0x1ee   : > { %8341 = vmatmul.mubr.msk.bf16.gmra.mrb[68].mxu0 %vm1381_vm1, %v7776_v18  ;;  %v3970_v28 = vsel %vm9581_vm6, %v3965_v19, %v3969_v61  ;;  %v3975_v29 = vrot.slane %v3974_v20, 4  ;;  %v4009_v31 = vshll.u32 %v3663_v6, 16  ;;  %8314 = vmatprep.mubr.msk.bf16.mxu1 %vm1381_vm1, %v8647_v8  ;;  %v3997_v32 = vrot.slane %v3995_v14, 4  ;;  %v4417_v8 = vld [vmem:[#allocation2 + $0x24] sm:$0xe] }
 0x1ef   : > { %v3988_v10 = vor.u32 %v3987_v22, %v3984_v21  ;;  %v4003_v38 = vrot.slane %v4001_v25, 5  ;;  %v4015_v33 = vshll.u32 %v3664_v15, 16  ;;  %v4008_v52 = vrot.slane %v4006_v30, 4  ;;  %v4419_v19 = vld [vmem:[#allocation2 + $0x2c] sm:$0x1] }
 0x1f0   : > { %v3980_v17 = vsel %vm9581_vm6, %v3975_v29, %v3979_v9  ;;  %v4011_v24 = vrot.slane %v4009_v31, 5  ;;  %v4019_v34 = vshrl.u32 %v3664_v15, 16  ;;  %v3998_v36 = vor.u32 %v3997_v32, %v3993_v23  ;;  %v4418_v9 = vld [vmem:[#allocation2 + $0x28] sm:$0xf]  ;;  %v4420_v14 = vld [vmem:[#allocation2 + $0x30] sm:$0xe] }
 0x1f1   : > { %v7777_v35 = vcombine.low %v3970_v28, %v3980_v17  ;;  %v3989_v16 = vrot.slane %v3988_v10, 4  ;;  %v4017_v39 = vrot.slane %v4015_v33, 5  ;;  %v4025_v40 = vshll.u32 %v3665_v26, 16  ;;  %v4421_v29 = vld [vmem:[#allocation2 + $0x34] sm:$0xf] }
 0x1f2   : > { %v4012_v46 = vor.u32 %v4011_v24, %v4008_v52  ;;  %v4021_v47 = vrot.slane %v4019_v34, 4  ;;  %v7797_v48 = vrot.slane %v4411_v27, 9  ;;  %v3999_v51 = vrot.slane %v3998_v36, 4  ;;  %v4422_v30 = vld [vmem:[#allocation2 + $0x38] sm:$0x1] }
 0x1f3   : > { %8344 = vmatprep.mubr.msk.bf16.mxu0 %vm1381_vm1, %v7777_v35  ;;  %v3994_v50 = vsel %vm9581_vm6, %v3989_v16, %v3993_v23  ;;  %v4509_v53 = vrot.slane %v4412_v37, 5  ;;  %v4512_v54 = vrot.slane %v4413_v42, 5  ;;  %v4027_v58 = vrot.slane %v4025_v40, 5  ;;  %v4423_v32 = vld [vmem:[#allocation2 + $0x3c] sm:$0xe] }
 0x1f4   : > { %v4013_v56 = vrot.slane %v4012_v46, 4  ;;  %v4022_v57 = vor.u32 %v4021_v47, %v4017_v39  ;;  %v4030_v59 = vshrl.u32 %v3666_v44, 16  ;;  %v4004_v60 = vsel %vm9581_vm6, %v3999_v51, %v4003_v38  ;;  %v4424_v16 = vld [vmem:[#allocation2 + $0x40] sm:$0xf]  ;;  %v4425_v36 = vld [vmem:[#allocation2 + $0x44] sm:$0x1] }
 0x1f5   : > { %v4510_v61 = vsel %vm9596_vm7, %v7797_v48, %v4509_v53  ;;  %v4511_v63 = vrot.slane %v4509_v53, 4  ;;  %v4033_v1 = vshll.u32 %v3666_v44, 16  ;;  %8315 = vmatmul.mubr.msk.bf16.gmra.mrb[76].mxu1 %vm1381_vm1, %v8648_v45  ;;  %v7778_v4 = vcombine.low %v3994_v50, %v4004_v60  ;;  %v4427_v44 = vld [vmem:[#allocation2 + $0x4c] sm:$0xf]  ;;  %v4428_v48 = vld [vmem:[#allocation2 + $0x50] sm:$0x1] }
 0x1f6   : > { %v4018_v5 = vsel %vm9581_vm6, %v4013_v56, %v4017_v39  ;;  %v4023_v6 = vrot.slane %v4022_v57, 4  ;;  %v4032_v7 = vrot.slane %v4030_v59, 4  ;;  %v4039_v15 = vshll.u32 %v3667_v49, 16  ;;  %v4426_v39 = vld [vmem:[#allocation2 + $0x48] sm:$0xe] }
 0x1f7   : > { %v4513_v11 = vsel %vm9596_vm7, %v4511_v63, %v4512_v54  ;;  %v4035_v13 = vrot.slane %v4033_v1, 5  ;;  %v4043_v18 = vshrl.u32 %v3667_v49, 16  ;;  %8345 = vmatmul.mubr.msk.bf16.gmra.mrb[72].mxu0 %vm1381_vm1, %v7778_v4  ;;  %v4049_v22 = vshll.u32 %v3668_v62, 16  ;;  %v4430_v49 = vld [vmem:[#allocation2 + $0x58] sm:$0xf] }
 0x1f8   : > { %v4028_v20 = vsel %vm9581_vm6, %v4023_v6, %v4027_v58  ;;  %v7813_v21 = vcombine.low %v4510_v61, %v4513_v11  ;;  %v7798_v23 = vrot.slane %v4414_v55, 9  ;;  %v4041_v27 = vrot.slane %v4039_v15, 5  ;;  %v4429_v62 = vld [vmem:[#allocation2 + $0x54] sm:$0xe]  ;;  %v8649_v58 = vld [vmem:[#allocation2 + $0x18] sm:$0xff]  }
 0x1f9   : > { %v7779_v25 = vcombine.low %v4018_v5, %v4028_v20  ;;  %v4036_v26 = vor.u32 %v4035_v13, %v4032_v7  ;;  %v4045_v28 = vrot.slane %v4043_v18, 4  ;;  %v4051_v31 = vrot.slane %v4049_v22, 5  ;;  %v4431_v60 = vld [vmem:[#allocation2 + $0x5c] sm:$0x1]  ;;  %v4435_v15 = vld [vmem:[#allocation2 + $0x6c] sm:$0xe] }
 0x1fa   : > { %8354 = vmatprep.mubr.msk.bf16.mxu1 %vm1381_vm1, %v7813_v21  ;;  %v4516_v37 = vrot.slane %v4415_v2, 5  ;;  %v4519_v10 = vrot.slane %v4416_v3, 5  ;;  %v7799_v42 = vrot.slane %v4417_v8, 9  ;;  %v4523_v17 = vrot.slane %v4418_v9, 5  ;;  %v4433_v3 = vld [vmem:[#allocation2 + $0x64] sm:$0xf] }
 0x1fb   : > { %8348 = vmatprep.mubr.msk.bf16.mxu0 %vm1381_vm1, %v7779_v25  ;;  %v4037_v38 = vrot.slane %v4036_v26, 4  ;;  %v4046_v33 = vor.u32 %v4045_v28, %v4041_v27  ;;  %v4526_v34 = vrot.slane %v4419_v19, 5  ;;  %v7800_v35 = vrot.slane %v4420_v14, 9  ;;  %v4434_v8 = vld [vmem:[#allocation2 + $0x68] sm:$0x1] }
 0x1fc   : > { %v4517_v52 = vsel %vm9596_vm7, %v7798_v23, %v4516_v37  ;;  %v4518_v24 = vrot.slane %v4516_v37, 4  ;;  %v4524_v47 = vsel %vm9596_vm7, %v7799_v42, %v4523_v17  ;;  %v4525_v40 = vrot.slane %v4523_v17, 4  ;;  %v4436_v21 = vld [vmem:[#allocation2 + $0x70] sm:$0xf]  ;;  %v4437_v22 = vld [vmem:[#allocation2 + $0x74] sm:$0x1] }
 0x1fd   : > { %v4042_v45 = vsel %vm9581_vm6, %v4037_v38, %v4041_v27  ;;  %v4047_v46 = vrot.slane %v4046_v33, 4  ;;  %v5963_v51 = vsel %vm1607_vm0, %v9824_v0, 0  ;;  %v4530_v53 = vrot.slane %v4421_v29, 5  ;;  %v4432_v0 = vld [vmem:[#allocation2 + $0x60] sm:$0xe]  ;;  %v8650_v25 = vld [vmem:[#allocation2 + $0x24] sm:$0xff]  }
 0x1fe   : > { %v4520_v50 = vsel %vm9596_vm7, %v4518_v24, %v4519_v10  ;;  %v4533_v54 = vrot.slane %v4422_v30, 5  ;;  %v4527_v57 = vsel %vm9596_vm7, %v4525_v40, %v4526_v34  ;;  %v7801_v59 = vrot.slane %v4423_v32, 9  ;;  %v9904_v23 = vld [vmem:[#allocation2 + $0x7c] sm:$0xf]  ;;  %v4438_v29 = vld [vmem:[#allocation2 + $0x78] sm:$0xe] }
 0x1ff   : > { %v4052_v55 = vsel %vm9581_vm6, %v4047_v46, %v4051_v31  ;;  %v7814_v56 = vcombine.low %v4517_v52, %v4520_v50  ;;  %v7815_v63 = vcombine.low %v4524_v47, %v4527_v57  ;;  %v4531_v1 = vsel %vm9596_vm7, %v7800_v35, %v4530_v53  ;;  %v4441_v30 = vld [vmem:[#allocation2 + $0x84] sm:$0xe]  ;;  %v8651_v37 = vld [vmem:[#allocation2 + $0x30] sm:$0xff]   ;;  %v4440_v33 = vld [vmem:[#allocation2 + $0x80] sm:$0x1] }
 0x200   : > { %v7780_v61 = vcombine.low %v4042_v45, %v4052_v55  ;;  %v4532_v2 = vrot.slane %v4530_v53, 4  ;;  %v4537_v4 = vrot.slane %v4424_v16, 5  ;;  %v4540_v5 = vrot.slane %v4425_v36, 5  ;;  %v4442_v42 = vld [vmem:[#allocation2 + $0x88] sm:$0xf] }
 0x201   : > { %8355 = vmatmul.mubr.msk.bf16.vlgmr.msra.gmra.mrb[80].mxu1 %vm1381_vm1, %v7814_v56  ;;  %v7802_v6 = vrot.slane %v4426_v39, 9  ;;  %v4544_v7 = vrot.slane %v4427_v44, 5  ;;  %v4547_v11 = vrot.slane %v4428_v48, 5  ;;  %v4551_v13 = vrot.slane %v4430_v49, 5  ;;  %v4443_v35 = vld [vmem:[#allocation2 + $0x8c] sm:$0x1] }
 0x202   : > { %8349 = vmatmul.mubr.msk.bf16.gmra.mrb[76].mxu0 %vm1381_vm1, %v7780_v61  ;;  %8421 = vmatpush3.bf16.msra.mxu1 %v5963_v51  ;;  %v4534_v9 = vsel %vm9596_vm7, %v4532_v2, %v4533_v54  ;;  %v4538_v18 = vsel %vm9596_vm7, %v7801_v59, %v4537_v4  ;;  %v4539_v19 = vrot.slane %v4537_v4, 4  ;;  %v7803_v20 = vrot.slane %v4429_v62, 9  ;;  %v4444_v45 = vld [vmem:[#allocation2 + $0x90] sm:$0xe]  ;;  %v4445_v46 = vld [vmem:[#allocation2 + $0x94] sm:$0xf] }
 0x203   : > { %8358 = vmatprep.mubr.msk.bf16.mxu1 %vm1381_vm1, %v7815_v63  ;;  %8388 = vmatprep.mubr.msk.bf16.mxu0 %vm1381_vm1, %v8649_v58  ;;  %v7816_v14 = vcombine.low %v4531_v1, %v4534_v9  ;;  %v4546_v26 = vrot.slane %v4544_v7, 4  ;;  %v4553_v27 = vrot.slane %v4551_v13, 4  ;;  %v4554_v28 = vrot.slane %v4431_v60, 5  ;;  %v4446_v47 = vld [vmem:[#allocation2 + $0x98] sm:$0x1] }
 0x204   : > { %v4541_v31 = vsel %vm9596_vm7, %v4539_v19, %v4540_v5  ;;  %v9910_v10 = vsel %vm9596_vm7, %v7802_v6, %v4544_v7  ;;  %v7804_v32 = vrot.slane %v4432_v0, 9  ;;  %v4558_v38 = vrot.slane %v4433_v3, 5  ;;  %v9934_v62 = vld [vmem:[#allocation2 + $0x9c] sm:$0xe]  ;;  %v9946_v59 = vld [vmem:[#allocation2 + $0xa0] sm:$0xf] }
 0x205   : > { %v7817_v17 = vcombine.low %v4538_v18, %v4541_v31  ;;  %v9914_v52 = vsel %vm9596_vm7, %v4546_v26, %v4547_v11  ;;  %v4561_v24 = vrot.slane %v4434_v8, 5  ;;  %v7805_v34 = vrot.slane %v4435_v15, 9  ;;  %v9948_v60 = vld [vmem:[#allocation2 + $0xa4] sm:$0x1]  ;;  %v9950_v61 = vld [vmem:[#allocation2 + $0xac] sm:$0xf] }
 0x206   : > { %v6529_v16 = vsel %vm1607_vm0, %v9840_v43, 0  ;;  %v9920_v36 = vsel %vm9596_vm7, %v7803_v20, %v4551_v13  ;;  %v9924_v39 = vsel %vm9596_vm7, %v4553_v27, %v4554_v28  ;;  %v4560_v44 = vrot.slane %v4558_v38, 4  ;;  %v9955_v3 = vld [vmem:[#allocation2 + $0xa8] sm:$0xe]  ;;  %v9957_v4 = vld [vmem:[#allocation2 + $0xb0] sm:$0x1] }
 0x207   : > { %v7818_v40 = vcombine.low %v9910_v10, %v9914_v52  ;;  %v4565_v48 = vrot.slane %v4436_v21, 5  ;;  %v4568_v49 = vrot.slane %v4437_v22, 5  ;;  %v4572_v50 = vrot.slane %v9904_v23, 5  ;;  %v9959_v5 = vld [vmem:[#allocation2 + $0x3c] sm:$0xff]   ;;  %v9965_v11 = vld [vmem:[#allocation2 + $0xb4] sm:$0xe] }
 0x208   : > { %v9932_v43 = vsel %vm9596_vm7, %v7804_v32, %v4558_v38  ;;  %v7806_v51 = vrot.slane %v4438_v29, 9  ;;  %v7807_v53 = vrot.slane %v4441_v30, 9  ;;  %v4579_v54 = vrot.slane %v4442_v42, 5  ;;  %v9979_v20 = vld [vmem:[#allocation2 + $0xb8] sm:$0xf]  ;;  %v8653_v28 = vld [vmem:[#allocation2 + $0x48] sm:$0xff]  }
 0x209   : > { %8359 = vmatmul.mubr.msk.bf16.gmra.mrb[84].mxu1 %vm1381_vm1, %v7816_v14  ;;  %v9940_v55 = vsel %vm9596_vm7, %v4560_v44, %v4561_v24  ;;  %v9944_v56 = vsel %vm9596_vm7, %v7805_v34, %v4565_v48  ;;  %v4567_v57 = vrot.slane %v4565_v48, 4  ;;  %v4575_v58 = vrot.slane %v4440_v33, 5  ;;  %v9981_v21 = vld [vmem:[#allocation2 + $0xbc] sm:$0x1]  ;;  %v9992_v26 = vld [vmem:[#allocation2 + $0xc0] sm:$0xe] }
 0x20a   : > { %8389 = vmatmul.mubr.msk.bf16.vlgmr.msra.gmra.mrb[80].mxu0 %vm1381_vm1, %v8650_v25  ;;  %8362 = vmatprep.mubr.msk.bf16.mxu1 %vm1381_vm1, %v7817_v17  ;;  %v7819_v63 = vcombine.low %v9920_v36, %v9924_v39  ;;  %v4574_v1 = vrot.slane %v4572_v50, 4  ;;  %v4581_v2 = vrot.slane %v4579_v54, 4  ;;  %v4582_v0 = vrot.slane %v4443_v35, 5  ;;  %v9994_v27 = vld [vmem:[#allocation2 + $0xc4] sm:$0xf] }
 0x20b   : > { %8455 = vmatpush3.bf16.msra.mxu0 %v6529_v16  ;;  %8392 = vmatprep.mubr.msk.bf16.mxu0 %vm1381_vm1, %v8651_v37  ;;  %v9963_v6 = vsel %vm9596_vm7, %v4567_v57, %v4568_v49  ;;  %v7808_v7 = vrot.slane %v4444_v45, 9  ;;  %v4586_v8 = vrot.slane %v4445_v46, 5  ;;  %v4589_v9 = vrot.slane %v4446_v47, 5  ;;  %v10003_v10 = vld [vmem:[#allocation2 + $0xc8] sm:$0x1] }
 0x20c   : > { %v7820_v13 = vcombine.low %v9932_v43, %v9940_v55  ;;  %v7821_v15 = vcombine.low %v9944_v56, %v9963_v6  ;;  %v9973_v18 = vsel %vm9596_vm7, %v7806_v51, %v4572_v50  ;;  %v9977_v19 = vsel %vm9596_vm7, %v7807_v53, %v4579_v54  ;;  %v5400_v46 = vld [vmem:[#allocation2 + $0x18] sm:$0xf]  ;;  %v5401_v48 = vld [vmem:[#allocation2 + $0x1c] sm:$0xf]  ;;  %v5402_v49 = vld [vmem:[#allocation2 + $0x20] sm:$0x1] }
 0x20d   : > { %v9985_v22 = vsel %vm9596_vm7, %v4574_v1, %v4575_v58  ;;  %v9989_v23 = vsel %vm9596_vm7, %v4581_v2, %v4582_v0  ;;  %v4588_v14 = vrot.slane %v4586_v8, 4  ;;  %v7809_v25 = vrot.slane %v9934_v62, 9  ;;  %v5403_v0 = vld [vmem:[#allocation2 + $0x24] sm:$0xf] }
 0x20e   : > { %v9998_v29 = vsel %vm9596_vm7, %v7808_v7, %v4586_v8  ;;  %v4593_v30 = vrot.slane %v9946_v59, 5  ;;  %v4596_v31 = vrot.slane %v9948_v60, 5  ;;  %v4600_v37 = vrot.slane %v9950_v61, 5  ;;  %v8654_v60 = vld [vmem:[#allocation2 + $0x54] sm:$0xff]  }
 0x20f   : > { %v10007_v32 = vsel %vm9596_vm7, %v4588_v14, %v4589_v9  ;;  %v7810_v38 = vrot.slane %v9955_v3, 9  ;;  %v4603_v33 = vrot.slane %v9957_v4, 5  ;;  %v7822_v42 = vcombine.low %v9973_v18, %v9985_v22  ;;  %v8655_v3 = vld [vmem:[#allocation2 + $0x60] sm:$0xff]   ;;  %v5404_v9 = vld [vmem:[#allocation2 + $0x28] sm:$0xf] }
 0x210   : > { %v7823_v17 = vcombine.low %v9977_v19, %v9989_v23  ;;  %v4595_v52 = vrot.slane %v4593_v30, 4  ;;  %v8898_v24 = vmov 0.0   ;;  %v7811_v34 = vrot.slane %v9965_v11, 9 }
 0x211   : > { %8363 = vmatmul.mubr.msk.bf16.gmra.mrb[88].mxu1 %vm1381_vm1, %v7818_v40  ;;  %1400 = vst.msk [vmem:[#allocation3 + $0x90] sm:$0xff] %vm1381_vm1, %v8898_v24  ;;  %1382 = vst.msk [vmem:[#allocation3] sm:$0xff] %vm1381_vm1, %v8898_v24  ;;  %v10057_v35 = vsel %vm9596_vm7, %v7809_v25, %v4593_v30  ;;  %v4602_v16 = vrot.slane %v4600_v37, 4  ;;  %v4607_v44 = vrot.slane %v9979_v20, 5  ;;  %v4610_v45 = vrot.slane %v9981_v21, 5 }
 0x212   : > { %1383 = vst.msk [vmem:[#allocation3 + $0x8] sm:$0xff] %vm1381_vm1, %v8898_v24  ;;  %1384 = vst.msk [vmem:[#allocation3 + $0x10] sm:$0xff] %vm1381_vm1, %v8898_v24  ;;  %8393 = vmatmul.mubr.msk.bf16.gmra.mrb[84].mxu0 %vm1381_vm1, %v9959_v5  ;;  %8366 = vmatprep.mubr.msk.bf16.mxu1 %vm1381_vm1, %v7819_v63  ;;  %v7824_v47 = vcombine.low %v9998_v29, %v10007_v32  ;;  %v10066_v36 = vsel %vm9596_vm7, %v4595_v52, %v4596_v31  ;;  %v7812_v39 = vrot.slane %v9992_v26, 9  ;;  %vm7349_vm8 = vcmask 27648  }
 0x213   : > { %1385 = vst.msk [vmem:[#allocation3 + $0x18] sm:$0xff] %vm1381_vm1, %v8898_v24  ;;  %1386 = vst.msk [vmem:[#allocation3 + $0x20] sm:$0xff] %vm1381_vm1, %v8898_v24  ;;  %8396 = vmatprep.mubr.msk.bf16.mxu0 %vm1381_vm1, %v8653_v28  ;;  %v4614_v40 = vrot.slane %v9994_v27, 5  ;;  %v10072_v50 = vsel %vm9596_vm7, %v7810_v38, %v4600_v37  ;;  %v10076_v51 = vsel %vm9596_vm7, %v4602_v16, %v4603_v33  ;;  %v4609_v53 = vrot.slane %v4607_v44, 4 }
 0x214   : > { %1387 = vst.msk [vmem:[#allocation3 + $0x28] sm:$0xff] %vm1381_vm1, %v8898_v24  ;;  %1388 = vst.msk [vmem:[#allocation3 + $0x30] sm:$0xff] %vm1381_vm1, %v8898_v24  ;;  %v4617_v54 = vrot.slane %v10003_v10, 5  ;;  %v7825_v62 = vcombine.low %v10057_v35, %v10066_v36  ;;  %v10083_v57 = vsel %vm9596_vm7, %v7811_v34, %v4607_v44  ;;  %v5449_v59 = vshrl.u32 %v5400_v46, 16 }
 0x215   : > { %1389 = vst.msk [vmem:[#allocation3 + $0x38] sm:$0xff] %vm1381_vm1, %v8898_v24  ;;  %1390 = vst.msk [vmem:[#allocation3 + $0x40] sm:$0xff] %vm1381_vm1, %v8898_v24  ;;  %v4616_v58 = vrot.slane %v4614_v40, 4  ;;  %v10087_v61 = vsel %vm9596_vm7, %v4609_v53, %v4610_v45  ;;  %v5452_v63 = vshll.u32 %v5400_v46, 16  ;;  %v5458_v1 = vshll.u32 %v5401_v48, 16 }
 0x216   : > { %1391 = vst.msk [vmem:[#allocation3 + $0x48] sm:$0xff] %vm1381_vm1, %v8898_v24  ;;  %1392 = vst.msk [vmem:[#allocation3 + $0x50] sm:$0xff] %vm1381_vm1, %v8898_v24  ;;  %v5462_v2 = vshrl.u32 %v5401_v48, 16  ;;  %v7826_v4 = vcombine.low %v10072_v50, %v10076_v51  ;;  %v10093_v5 = vsel %vm9596_vm7, %v7812_v39, %v4614_v40  ;;  %v5451_v7 = vrot.slane %v5449_v59, 4  ;;  %v5405_v45 = vld [vmem:[#allocation2 + $0x2c] sm:$0x1] }
 0x217   : > { %1393 = vst.msk [vmem:[#allocation3 + $0x58] sm:$0xff] %vm1381_vm1, %v8898_v24  ;;  %1394 = vst.msk [vmem:[#allocation3 + $0x60] sm:$0xff] %vm1381_vm1, %v8898_v24  ;;  %v5468_v8 = vshll.u32 %v5402_v49, 16  ;;  %v10097_v20 = vsel %vm9596_vm7, %v4616_v58, %v4617_v54  ;;  %v5454_v21 = vrot.slane %v5452_v63, 5  ;;  %v5460_v14 = vrot.slane %v5458_v1, 5 }
 0x218   : > { %1395 = vst.msk [vmem:[#allocation3 + $0x68] sm:$0xff] %vm1381_vm1, %v8898_v24  ;;  %1396 = vst.msk [vmem:[#allocation3 + $0x70] sm:$0xff] %vm1381_vm1, %v8898_v24  ;;  %v1464_v11 = vld [vmem:[#allocation3 + $0x90] sm:$0xff]  ;;  %v5464_v25 = vrot.slane %v5462_v2, 4  ;;  %v7827_v27 = vcombine.low %v10083_v57, %v10087_v61  ;;  %v5473_v30 = vshrl.u32 %v5403_v0, 16  ;;  %v5476_v31 = vshll.u32 %v5403_v0, 16 }
 0x219   : > { %1397 = vst.msk [vmem:[#allocation3 + $0x78] sm:$0xff] %vm1381_vm1, %v8898_v24  ;;  %1398 = vst.msk [vmem:[#allocation3 + $0x80] sm:$0xff] %vm1381_vm1, %v8898_v24  ;;  %8367 = vmatmul.mubr.msk.bf16.gmra.mrb[92].mxu1 %vm1381_vm1, %v7820_v13  ;;  %v5470_v28 = vrot.slane %v5468_v8, 5  ;;  %v1448_v38 = vld [vmem:[#allocation3 + $0x10] sm:$0xff]  ;;  %v5455_v43 = vor.u32 %v5454_v21, %v5451_v7  ;;  %v5482_v13 = vshll.u32 %v5404_v9, 16  ;;  %v5486_v33 = vshrl.u32 %v5404_v9, 16 }
 0x21a   : > { %1399 = vst.msk [vmem:[#allocation3 + $0x88] sm:$0xff] %vm1381_vm1, %v8898_v24  ;;  %1401 = vst.msk [vmem:[#allocation3 + $0x98] sm:$0xff] %vm1381_vm1, %v8898_v24  ;;  %8397 = vmatmul.mubr.msk.bf16.gmra.mrb[88].mxu0 %vm1381_vm1, %v8654_v60  ;;  %8370 = vmatprep.mubr.msk.bf16.mxu1 %vm1381_vm1, %v7821_v15  ;;  %v5465_v55 = vor.u32 %v5464_v25, %v5460_v14  ;;  %v7828_v16 = vcombine.low %v10093_v5, %v10097_v20  ;;  %v1446_v44 = vld [vmem:[#allocation3] sm:$0xff]  ;;  %v5475_v56 = vrot.slane %v5473_v30, 4  ;;  %v1449_v40 = vld [vmem:[#allocation3 + $0x18] sm:$0xff]  ;;  %vm7357_vm12 = vcmask 24576  }
 0x21b   : > { %1402 = vst.msk [vmem:[#allocation3 + $0xa0] sm:$0xff] %vm1381_vm1, %v8898_v24  ;;  %1403 = vst.msk [vmem:[#allocation3 + $0xa8] sm:$0xff] %vm1381_vm1, %v8898_v24  ;;  %8400 = vmatprep.mubr.msk.bf16.mxu0 %vm1381_vm1, %v8655_v3  ;;  %v5478_v6 = vrot.slane %v5476_v31, 5  ;;  %v5456_v48 = vrot.slane %v5455_v43, 4  ;;  %v10113_v53 = vrot.slane %v5482_v13, 5  ;;  %v1447_v63 = vld [vmem:[#allocation3 + $0x8] sm:$0xff] }
 0x21c   : > { %1404 = vst.msk [vmem:[#allocation3 + $0xb0] sm:$0xff] %vm1381_vm1, %v8898_v24  ;;  %1405 = vst.msk [vmem:[#allocation3 + $0xb8] sm:$0xff] %vm1381_vm1, %v8898_v24  ;;  %v5466_v49 = vrot.slane %v5465_v55, 4  ;;  %v5488_v2 = vrot.slane %v5486_v33, 4  ;;  %v5406_v0 = vld [vmem:[#allocation2 + $0x30] sm:$0xf] }
 0x21d   : > { %1406 = vst.msk [vmem:[#allocation3 + $0xc0] sm:$0xff] %vm1381_vm1, %v8898_v24  ;;  %1407 = vst.msk [vmem:[#allocation3 + $0xc8] sm:$0xff] %vm1381_vm1, %v8898_v24  ;;  %v5479_v1 = vor.u32 %v5478_v6, %v5475_v56  ;;  %v8656_v3 = vld [vmem:[#allocation2 + $0x6c] sm:$0xff]   ;;  %v8657_v7 = vld [vmem:[#allocation2 + $0x78] sm:$0xff]   ;;  %v5461_v21 = vsel %vm9581_vm6, %v5456_v48, %v5460_v14  ;;  %v5492_v33 = vshll.u32 %v5405_v45, 16 }
 0x21e   : > { %1408 = vst.msk [vmem:[#allocation3 + $0xd0] sm:$0xff] %vm1381_vm1, %v8898_v24  ;;  %1409 = vst.msk [vmem:[#allocation3 + $0xd8] sm:$0xff] %vm1381_vm1, %v8898_v24  ;;  %v5471_v25 = vsel %vm9581_vm6, %v5466_v49, %v5470_v28  ;;  %v5489_v55 = vor.u32 %v5488_v2, %v10113_v53  ;;  %v5408_v13 = vld [vmem:[#allocation2 + $0x38] sm:$0x1]  ;;  %v1453_v2 = vld [vmem:[#allocation3 + $0x38] sm:$0xff] }
 0x21f   : > { %1410 = vst.msk [vmem:[#allocation3 + $0xe0] sm:$0xff] %vm1381_vm1, %v8898_v24  ;;  %1411 = vst.msk [vmem:[#allocation3 + $0xe8] sm:$0xff] %vm1381_vm1, %v8898_v24  ;;  %v5480_v43 = vrot.slane %v5479_v1, 4  ;;  %v5494_v22 = vrot.slane %v5492_v33, 5  ;;  %v5516_v49 = vshll.u32 %v5408_v13, 16 }
 0x220   : > { %1412 = vst.msk [vmem:[#allocation3 + $0xf0] sm:$0xff] %vm1381_vm1, %v8898_v24  ;;  %1413 = vst.msk [vmem:[#allocation3 + $0xf8] sm:$0xff] %vm1381_vm1, %v8898_v24  ;;  %v1462_v26 = vld [vmem:[#allocation3 + $0x80] sm:$0xff]  ;;  %v5490_v6 = vrot.slane %v5489_v55, 4  ;;  %v5410_v33 = vld [vmem:[#allocation2 + $0x40] sm:$0xf] }
 0x221   : > { %v1465_v10 = vld [vmem:[#allocation3 + $0x98] sm:$0xff]  ;;  %v1463_v34 = vld [vmem:[#allocation3 + $0x88] sm:$0xff]  ;;  %8371 = vmatmul.mubr.msk.bf16.gmra.mrb[96].mxu1 %vm1381_vm1, %v7822_v42  ;;  %v5485_v56 = vsel %vm9581_vm6, %v5480_v43, %v10113_v53  ;;  %v1450_v42 = vld [vmem:[#allocation3 + $0x20] sm:$0xff]  ;;  %vm7350_vm9 = vsmask.f32 7938 }
 0x222   : > { %v1466_v31 = vld [vmem:[#allocation3 + $0xa0] sm:$0xff]  ;;  %8401 = vmatmul.mubr.msk.bf16.gmra.mrb[92].mxu0 %vm1381_vm1, %v8656_v3  ;;  %8374 = vmatprep.mubr.msk.bf16.mxu1 %vm1381_vm1, %v7823_v17  ;;  %v5495_v17 = vsel %vm9581_vm6, %v5490_v6, %v5494_v22  ;;  %v5518_v3 = vrot.slane %v5516_v49, 5  ;;  %v6193_v22 = vld [vmem:[#allocation2 + $0x24] sm:$0xe]  ;;  %vm7026_vm10 = vsmask.f32 256  ;;  %vm10814_vm13 = vmand %vm7349_vm8, %vm7350_vm9 }
 0x223   : > { %v1468_v30 = vld [vmem:[#allocation3 + $0xb0] sm:$0xff]  ;;  %v1469_v14 = vld [vmem:[#allocation3 + $0xb8] sm:$0xff]  ;;  %8404 = vmatprep.mubr.msk.bf16.mxu0 %vm1381_vm1, %v8657_v7  ;;  %vm7027_vm11 = vsmask.f32 4368  ;;  %vm10833_vm15 = vmand %vm7357_vm12, %vm7026_vm10 }
 0x224   : > { %v1471_v32 = vld [vmem:[#allocation3 + $0xc8] sm:$0xff]  ;;  %vm10823_vm14 = vmor %vm7026_vm10, %vm7027_vm11 }
 0x226   : > { %v8202_v37 = vpop.f32.mrb[0].mxu1  ;;  %v8186_v39 = vpop.f32.mrb[0].mxu0 }
 0x227   : > { %v1790_v52 = vadd.f32 %v8202_v37, %v1464_v11  ;;  %v1709_v24 = vpop.f32.mrb[1].mxu1  ;;  %v1774_v59 = vadd.f32 %v8186_v39, %v1448_v38  ;;  %v1645_v60 = vpop.f32.mrb[1].mxu0  ;;  %v10123_v38 = vcombine.low %v5461_v21, %v5471_v25  ;;  %v6191_v39 = vld [vmem:[#allocation2 + $0x1c] sm:$0xf]  ;;  %v10149_v21 = vcombine.low %v5485_v56, %v5495_v17  ;;  %v5411_v56 = vld [vmem:[#allocation2 + $0x44] sm:$0x1] }
 0x228   : > { %v1788_v15 = vadd.f32 %v1709_v24, %v1462_v26  ;;  %v8203_v46 = vpop.f32.mrb[2].mxu1  ;;  %v1772_v9 = vadd.f32 %v1645_v60, %v1446_v44  ;;  %v8187_v11 = vpop.f32.mrb[2].mxu0  ;;  %v5407_v26 = vld [vmem:[#allocation2 + $0x34] sm:$0xf]  ;;  %v5500_v24 = vshll.u32 %v5406_v0, 16  ;;  %v1467_v44 = vld [vmem:[#allocation3 + $0xa8] sm:$0xff] }
 0x229   : > { %1822 = vst.msk [vmem:[#allocation3 + $0x90] sm:$0xff] %vm1381_vm1, %v1790_v52  ;;  %v1791_v54 = vadd.f32 %v8203_v46, %v1465_v10  ;;  %v1712_v58 = vpop.f32.mrb[3].mxu1  ;;  %1806 = vst.msk [vmem:[#allocation3 + $0x10] sm:$0xff] %vm1381_vm1, %v1774_v59  ;;  %v1775_v37 = vadd.f32 %v8187_v11, %v1449_v40  ;;  %v1648_v10 = vpop.f32.mrb[3].mxu0  ;;  %v5497_v52 = vshrl.u32 %v5406_v0, 16  ;;  %v5506_v46 = vshll.u32 %v5407_v26, 16  ;;  %8375 = vmatmul.mubr.msk.bf16.gmra.mrb[100].mxu1 %vm1381_vm1, %v7824_v47 }
 0x22a   : > { %1820 = vst.msk [vmem:[#allocation3 + $0x80] sm:$0xff] %vm1381_vm1, %v1788_v15  ;;  %v1789_v8 = vadd.f32 %v1712_v58, %v1463_v34  ;;  %1804 = vst.msk [vmem:[#allocation3] sm:$0xff] %vm1381_vm1, %v1772_v9  ;;  %v1773_v28 = vadd.f32 %v1648_v10, %v1447_v63  ;;  %v10128_v34 = vld [vmem:[#allocation2 + $0x18] sm:$0xe]  ;;  %v1452_v15 = vld [vmem:[#allocation3 + $0x30] sm:$0xff]  ;;  %v5510_v45 = vshrl.u32 %v5407_v26, 16  ;;  %8378 = vmatprep.mubr.msk.bf16.mxu1 %vm1381_vm1, %v7825_v62 }
 0x22b   : > { %1823 = vst.msk [vmem:[#allocation3 + $0x98] sm:$0xff] %vm1381_vm1, %v1791_v54  ;;  %1807 = vst.msk [vmem:[#allocation3 + $0x18] sm:$0xff] %vm1381_vm1, %v1775_v37  ;;  %v5499_v40 = vrot.slane %v5497_v52, 4  ;;  %v5502_v48 = vrot.slane %v5500_v24, 5  ;;  %v5508_v58 = vrot.slane %v5506_v46, 5  ;;  %v7909_v63 = vrot.slane %v10128_v34, 9 }
 0x22c   : > { %1821 = vst.msk [vmem:[#allocation3 + $0x88] sm:$0xff] %vm1381_vm1, %v1789_v8  ;;  %1805 = vst.msk [vmem:[#allocation3 + $0x8] sm:$0xff] %vm1381_vm1, %v1773_v28  ;;  %v5512_v59 = vrot.slane %v5510_v45, 4  ;;  %v6192_v60 = vld [vmem:[#allocation2 + $0x20] sm:$0x1]  ;;  %v8658_v9 = vld [vmem:[#allocation2 + $0x84] sm:$0xff]  }
 0x22d   : > { %v5503_v0 = vor.u32 %v5502_v48, %v5499_v40  ;;  %v5409_v8 = vld [vmem:[#allocation2 + $0x3c] sm:$0xf]  ;;  %v8659_v37 = vld [vmem:[#allocation2 + $0x90] sm:$0xff]   ;;  %v6288_v28 = vrot.slane %v6191_v39, 5  ;;  %v6291_v34 = vrot.slane %v6192_v60, 5  ;;  %8405 = vmatmul.mubr.msk.bf16.gmra.mrb[96].mxu0 %vm1381_vm1, %v8658_v9  ;;  %v5540_v60 = vshll.u32 %v5411_v56, 16 }
 0x22e   : > { %v8206_v18 = vpop.f32.mrb[4].mxu1  ;;  %v8190_v1 = vpop.f32.mrb[4].mxu0  ;;  %v5521_v6 = vshrl.u32 %v5409_v8, 16  ;;  %v5524_v49 = vshll.u32 %v5409_v8, 16  ;;  %8408 = vmatprep.mubr.msk.bf16.mxu0 %vm1381_vm1, %v8659_v37  ;;  %v1456_v17 = vld [vmem:[#allocation3 + $0x50] sm:$0xff] }
 0x22f   : > { %v1794_v53 = vadd.f32 %v8206_v18, %v1468_v30  ;;  %v1725_v54 = vpop.f32.mrb[5].mxu1  ;;  %v1778_v25 = vadd.f32 %v8190_v1, %v1452_v15  ;;  %v1661_v26 = vpop.f32.mrb[5].mxu0  ;;  %v1451_v30 = vld [vmem:[#allocation3 + $0x28] sm:$0xff]  ;;  %v5504_v13 = vrot.slane %v5503_v0, 4  ;;  %v1472_v15 = vld [vmem:[#allocation3 + $0xd0] sm:$0xff]  ;;  %v10160_v39 = vsel %vm9596_vm7, %v7909_v63, %v6288_v28  ;;  %v1454_v1 = vld [vmem:[#allocation3 + $0x40] sm:$0xff] }
 0x230   : > { %v1792_v19 = vadd.f32 %v1725_v54, %v1466_v31  ;;  %v8207_v23 = vpop.f32.mrb[6].mxu1  ;;  %v5513_v31 = vor.u32 %v5512_v59, %v5508_v58  ;;  %v1776_v43 = vadd.f32 %v1661_v26, %v1450_v42  ;;  %v8191_v55 = vpop.f32.mrb[6].mxu0  ;;  %v6290_v18 = vrot.slane %v6288_v28, 4  ;;  %v1473_v42 = vld [vmem:[#allocation3 + $0xd8] sm:$0xff]  ;;  %v6194_v54 = vld [vmem:[#allocation2 + $0x28] sm:$0xf] }
 0x231   : > { %1826 = vst.msk [vmem:[#allocation3 + $0xb0] sm:$0xff] %vm1381_vm1, %v1794_v53  ;;  %v1795_v7 = vadd.f32 %v8207_v23, %v1469_v14  ;;  %v1728_v11 = vpop.f32.mrb[7].mxu1  ;;  %1810 = vst.msk [vmem:[#allocation3 + $0x30] sm:$0xff] %vm1381_vm1, %v1778_v25  ;;  %v1779_v14 = vadd.f32 %v8191_v55, %v1453_v2  ;;  %v1664_v52 = vpop.f32.mrb[7].mxu0  ;;  %v5509_v45 = vsel %vm9581_vm6, %v5504_v13, %v5508_v58  ;;  %v5523_v48 = vrot.slane %v5521_v6, 4  ;;  %v1457_v2 = vld [vmem:[#allocation3 + $0x58] sm:$0xff] }
 0x232   : > { %1824 = vst.msk [vmem:[#allocation3 + $0xa0] sm:$0xff] %vm1381_vm1, %v1792_v19  ;;  %v1793_v10 = vadd.f32 %v1728_v11, %v1467_v44  ;;  %v5514_v24 = vrot.slane %v5513_v31, 4  ;;  %1808 = vst.msk [vmem:[#allocation3 + $0x20] sm:$0xff] %vm1381_vm1, %v1776_v43  ;;  %v1470_v44 = vld [vmem:[#allocation3 + $0xc0] sm:$0xff]  ;;  %v1777_v46 = vadd.f32 %v1664_v52, %v1451_v30  ;;  %v5530_v53 = vshll.u32 %v5410_v33, 16  ;;  %v1455_v25 = vld [vmem:[#allocation3 + $0x48] sm:$0xff]  ;;  %8379 = vmatmul.mubr.msk.bf16.gmra.mrb[104].mxu1 %vm1381_vm1, %v7826_v4 }
 0x233   : > { %1827 = vst.msk [vmem:[#allocation3 + $0xb8] sm:$0xff] %vm1381_vm1, %v1795_v7  ;;  %1811 = vst.msk [vmem:[#allocation3 + $0x38] sm:$0xff] %vm1381_vm1, %v1779_v14  ;;  %v10179_v58 = vsel %vm9596_vm7, %v6290_v18, %v6291_v34  ;;  %v5534_v59 = vshrl.u32 %v5410_v33, 16  ;;  %v6195_v63 = vld [vmem:[#allocation2 + $0x2c] sm:$0x1]  ;;  %v5526_v36 = vrot.slane %v5524_v49, 5  ;;  %8382 = vmatprep.mubr.msk.bf16.mxu1 %vm1381_vm1, %v7827_v27 }
 0x234   : > { %1825 = vst.msk [vmem:[#allocation3 + $0xa8] sm:$0xff] %vm1381_vm1, %v1793_v10  ;;  %v5519_v40 = vsel %vm9581_vm6, %v5514_v24, %v5518_v3  ;;  %1809 = vst.msk [vmem:[#allocation3 + $0x28] sm:$0xff] %vm1381_vm1, %v1777_v46  ;;  %v7925_v35 = vcombine.low %v10160_v39, %v10179_v58  ;;  %v10184_v62 = vrot.slane %v5530_v53, 5  ;;  %v5542_v9 = vrot.slane %v5540_v60, 5  ;;  %v5412_v55 = vld [vmem:[#allocation2 + $0x48] sm:$0xf] }
 0x235   : > { %v10175_v47 = vcombine.low %v5509_v45, %v5519_v40  ;;  %v5536_v8 = vrot.slane %v5534_v59, 4  ;;  %v7910_v7 = vrot.slane %v6193_v22, 9  ;;  %v5527_v31 = vor.u32 %v5526_v36, %v5523_v48  ;;  %v8660_v13 = vld [vmem:[#allocation2 + $0x9c] sm:$0xff]   ;;  %v5413_v34 = vld [vmem:[#allocation2 + $0x4c] sm:$0xf] }
 0x236   : > { %v8210_v29 = vpop.f32.mrb[8].mxu1  ;;  %v8194_v11 = vpop.f32.mrb[8].mxu0  ;;  %v6295_v37 = vrot.slane %v6194_v54, 5  ;;  %v6298_v10 = vrot.slane %v6195_v63, 5  ;;  %v8661_v56 = vld [vmem:[#allocation2 + $0xa8] sm:$0xff]   ;;  %v5545_v49 = vshrl.u32 %v5412_v55, 16  ;;  %8409 = vmatmul.mubr.msk.bf16.gmra.mrb[100].mxu0 %vm1381_vm1, %v8660_v13 }
 0x237   : > { %v1798_v19 = vadd.f32 %v8210_v29, %v1472_v15  ;;  %v1741_v23 = vpop.f32.mrb[9].mxu1  ;;  %v1677_v43 = vpop.f32.mrb[9].mxu0  ;;  %v5537_v33 = vor.u32 %v5536_v8, %v10184_v62  ;;  %v1782_v14 = vadd.f32 %v8194_v11, %v1456_v17  ;;  %v5528_v6 = vrot.slane %v5527_v31, 4  ;;  %v1476_v46 = vld [vmem:[#allocation3 + $0xf0] sm:$0xff]  ;;  %v5414_v48 = vld [vmem:[#allocation2 + $0x50] sm:$0x1]  ;;  %8412 = vmatprep.mubr.msk.bf16.mxu0 %vm1381_vm1, %v8661_v56 }
 0x238   : > { %v1796_v0 = vadd.f32 %v1741_v23, %v1470_v44  ;;  %v8211_v3 = vpop.f32.mrb[10].mxu1  ;;  %v1780_v52 = vadd.f32 %v1677_v43, %v1454_v1  ;;  %v8195_v24 = vpop.f32.mrb[10].mxu0  ;;  %v10192_v15 = vsel %vm9596_vm7, %v7910_v7, %v6295_v37  ;;  %v6297_v44 = vrot.slane %v6295_v37, 4  ;;  %v6196_v60 = vld [vmem:[#allocation2 + $0x30] sm:$0xe]  ;;  %v1475_v27 = vld [vmem:[#allocation3 + $0xe8] sm:$0xff] }
 0x239   : > { %1830 = vst.msk [vmem:[#allocation3 + $0xd0] sm:$0xff] %vm1381_vm1, %v1798_v19  ;;  %v1799_v26 = vadd.f32 %v8211_v3, %v1473_v42  ;;  %v1744_v30 = vpop.f32.mrb[11].mxu1  ;;  %v1783_v45 = vadd.f32 %v8195_v24, %v1457_v2  ;;  %v1680_v18 = vpop.f32.mrb[11].mxu0  ;;  %v5538_v22 = vrot.slane %v5537_v33, 4  ;;  %1814 = vst.msk [vmem:[#allocation3 + $0x50] sm:$0xff] %vm1381_vm1, %v1782_v14  ;;  %v1474_v42 = vld [vmem:[#allocation3 + $0xe0] sm:$0xff]  ;;  %v5533_v54 = vsel %vm9581_vm6, %v5528_v6, %v10184_v62 }
 0x23a   : > { %1828 = vst.msk [vmem:[#allocation3 + $0xc0] sm:$0xff] %vm1381_vm1, %v1796_v0  ;;  %v1797_v28 = vadd.f32 %v1744_v30, %v1471_v32  ;;  %1812 = vst.msk [vmem:[#allocation3 + $0x40] sm:$0xff] %vm1381_vm1, %v1780_v52  ;;  %v1781_v40 = vadd.f32 %v1680_v18, %v1455_v25  ;;  %v5548_v53 = vshll.u32 %v5412_v55, 16  ;;  %v10206_v29 = vsel %vm9596_vm7, %v6297_v44, %v6298_v10  ;;  %v6197_v63 = vld [vmem:[#allocation2 + $0x34] sm:$0xf]  ;;  %v8663_v30 = vld [vmem:[#allocation2 + $0xc0] sm:$0xff]  }
 0x23b   : > { %1831 = vst.msk [vmem:[#allocation3 + $0xd8] sm:$0xff] %vm1381_vm1, %v1799_v26  ;;  %1815 = vst.msk [vmem:[#allocation3 + $0x58] sm:$0xff] %vm1381_vm1, %v1783_v45  ;;  %v5554_v32 = vshll.u32 %v5413_v34, 16  ;;  %v5558_v59 = vshrl.u32 %v5413_v34, 16  ;;  %v5543_v50 = vsel %vm9581_vm6, %v5538_v22, %v5542_v9  ;;  %v7926_v51 = vcombine.low %v10192_v15, %v10206_v29  ;;  %v1477_v19 = vld [vmem:[#allocation3 + $0xf8] sm:$0xff]  ;;  %8383 = vmatmul.mubr.msk.bf16.gmra.mrb[108].mxu1 %vm1381_vm1, %v7828_v16 }
 0x23c   : > { %1829 = vst.msk [vmem:[#allocation3 + $0xc8] sm:$0xff] %vm1381_vm1, %v1797_v28  ;;  %1813 = vst.msk [vmem:[#allocation3 + $0x48] sm:$0xff] %vm1381_vm1, %v1781_v40  ;;  %v5547_v23 = vrot.slane %v5545_v49, 4  ;;  %v5550_v36 = vrot.slane %v5548_v53, 5  ;;  %v6198_v62 = vld [vmem:[#allocation2 + $0x38] sm:$0x1]  ;;  %v10220_v17 = vcombine.low %v5533_v54, %v5543_v50  ;;  %8422 = vmatprep.mubr.msk.bf16.mxu1 %vm1381_vm1, %v10123_v38 }
 0x23d   : > { %v5556_v1 = vrot.slane %v5554_v32, 5  ;;  %v5560_v2 = vrot.slane %v5558_v59, 4  ;;  %v5415_v0 = vld [vmem:[#allocation2 + $0x54] sm:$0xf]  ;;  %v5564_v11 = vshll.u32 %v5414_v48, 16  ;;  %v7911_v25 = vrot.slane %v6196_v60, 9 }
 0x23e   : > { %v8214_v4 = vpop.f32.mrb[12].mxu1  ;;  %v8662_v3 = vld [vmem:[#allocation2 + $0xb4] sm:$0xff]   ;;  %v5551_v7 = vor.u32 %v5550_v36, %v5547_v23  ;;  %v8198_v26 = vpop.f32.mrb[12].mxu0  ;;  %v6302_v43 = vrot.slane %v6197_v63, 5  ;;  %v6305_v55 = vrot.slane %v6198_v62, 5  ;;  %v5569_v34 = vshrl.u32 %v5415_v0, 16 }
 0x23f   : > { %v1802_v57 = vadd.f32 %v8214_v4, %v1476_v46  ;;  %v1757_v61 = vpop.f32.mrb[13].mxu1  ;;  %v5561_v10 = vor.u32 %v5560_v2, %v5556_v1  ;;  %v5416_v13 = vld [vmem:[#allocation2 + $0x58] sm:$0xf]  ;;  %v1693_v28 = vpop.f32.mrb[13].mxu0  ;;  %v5566_v52 = vrot.slane %v5564_v11, 5  ;;  %v5572_v45 = vshll.u32 %v5415_v0, 16  ;;  %8413 = vmatmul.mubr.msk.bf16.gmra.mrb[104].mxu0 %vm1381_vm1, %v8662_v3 }
 0x240   : > { %v1800_v8 = vadd.f32 %v1757_v61, %v1474_v42  ;;  %v8215_v9 = vpop.f32.mrb[14].mxu1  ;;  %v5552_v14 = vrot.slane %v5551_v7, 4  ;;  %v5417_v24 = vld [vmem:[#allocation2 + $0x5c] sm:$0x1]  ;;  %v8199_v56 = vpop.f32.mrb[14].mxu0  ;;  %v10227_v44 = vsel %vm9596_vm7, %v7911_v25, %v6302_v43  ;;  %v6304_v46 = vrot.slane %v6302_v43, 4  ;;  %8416 = vmatprep.mubr.msk.bf16.mxu0 %vm1381_vm1, %v8663_v30 }
 0x241   : > { %1834 = vst.msk [vmem:[#allocation3 + $0xf0] sm:$0xff] %vm1381_vm1, %v1802_v57  ;;  %v1803_v31 = vadd.f32 %v8215_v9, %v1477_v19  ;;  %v1760_v37 = vpop.f32.mrb[15].mxu1  ;;  %v5562_v6 = vrot.slane %v5561_v10, 4  ;;  %v6199_v18 = vld [vmem:[#allocation2 + $0x3c] sm:$0xe]  ;;  %v1696_v22 = vpop.f32.mrb[15].mxu0 }
 0x242   : > { %1832 = vst.msk [vmem:[#allocation3 + $0xe0] sm:$0xff] %vm1381_vm1, %v1800_v8  ;;  %v1801_v33 = vadd.f32 %v1760_v37, %v1475_v27  ;;  %v5557_v42 = vsel %vm9581_vm6, %v5552_v14, %v5556_v1  ;;  %v5571_v40 = vrot.slane %v5569_v34, 4  ;;  %v5578_v48 = vshll.u32 %v5416_v13, 16  ;;  %v6200_v53 = vld [vmem:[#allocation2 + $0x40] sm:$0xf]  ;;  %v1460_v50 = vld [vmem:[#allocation3 + $0x70] sm:$0xff] }
 0x243   : > { %1835 = vst.msk [vmem:[#allocation3 + $0xf8] sm:$0xff] %vm1381_vm1, %v1803_v31  ;;  %v5582_v49 = vshrl.u32 %v5416_v13, 16  ;;  %v5567_v54 = vsel %vm9581_vm6, %v5562_v6, %v5566_v52  ;;  %v10240_v32 = vsel %vm9596_vm7, %v6304_v46, %v6305_v55  ;;  %v5574_v59 = vrot.slane %v5572_v45, 5  ;;  %v6201_v63 = vld [vmem:[#allocation2 + $0x44] sm:$0x1]  ;;  %v1458_v23 = vld [vmem:[#allocation3 + $0x60] sm:$0xff]  ;;  %8423 = vmatmul.mubr.msk.bf16.vlgmr.msra.gmra.mrb[112].mxu1 %vm1381_vm1, %v10149_v21 }
 0x244   : > { %1833 = vst.msk [vmem:[#allocation3 + $0xe8] sm:$0xff] %vm1381_vm1, %v1801_v33  ;;  %v5588_v60 = vshll.u32 %v5417_v24, 16  ;;  %v10245_v4 = vcombine.low %v5557_v42, %v5567_v54  ;;  %v7927_v5 = vcombine.low %v10227_v44, %v10240_v32  ;;  %v5580_v20 = vrot.slane %v5578_v48, 5  ;;  %v2273_v27 = vld [vmem:[#allocation3 + $0x10] sm:$0xff]  ;;  %v1461_v2 = vld [vmem:[#allocation3 + $0x78] sm:$0xff]  ;;  %v2271_v7 = vld [vmem:[#allocation3] sm:$0xff]  ;;  %8426 = vmatprep.mubr.msk.bf16.mxu1 %vm1381_vm1, %v10175_v47 }
 0x245   : > { %v5584_v16 = vrot.slane %v5582_v49, 4  ;;  %v5575_v36 = vor.u32 %v5574_v59, %v5571_v40  ;;  %v7912_v57 = vrot.slane %v6199_v18, 9  ;;  %v6309_v61 = vrot.slane %v6200_v53, 5  ;;  %v8664_v0 = vld [vmem:[#allocation2 + $0xcc] sm:$0xff]   ;;  %v1459_v25 = vld [vmem:[#allocation3 + $0x68] sm:$0xff] }
 0x246   : > { %v8220_v19 = vpop.f32.mrb[16].mxu1  ;;  %v5590_v62 = vrot.slane %v5588_v60, 5  ;;  %v6312_v3 = vrot.slane %v6201_v63, 5  ;;  %v1786_v8 = vadd.f32 %v8198_v26, %v1460_v50  ;;  %v5418_v31 = vld [vmem:[#allocation2 + $0x60] sm:$0xf]  ;;  %v1784_v43 = vadd.f32 %v1693_v28, %v1458_v23  ;;  %v2274_v55 = vld [vmem:[#allocation3 + $0x18] sm:$0xff] }
 0x247   : > { %v2438_v1 = vpop.f32.mrb[17].mxu1  ;;  %v5585_v38 = vor.u32 %v5584_v16, %v5580_v20  ;;  %v2567_v9 = vadd.f32 %v8220_v19, %v2273_v27  ;;  %v5576_v37 = vrot.slane %v5575_v36, 4  ;;  %v10252_v30 = vsel %vm9596_vm7, %v7912_v57, %v6309_v61  ;;  %v5419_v33 = vld [vmem:[#allocation2 + $0x64] sm:$0xf]  ;;  %v5420_v6 = vld [vmem:[#allocation2 + $0x68] sm:$0x1]  ;;  %8417 = vmatmul.mubr.msk.bf16.gmra.mrb[108].mxu0 %vm1381_vm1, %v8664_v0 }
 0x248   : > { %v8221_v11 = vpop.f32.mrb[18].mxu1  ;;  %v6311_v10 = vrot.slane %v6309_v61, 4  ;;  %1818 = vst.msk [vmem:[#allocation3 + $0x70] sm:$0xff] %vm1381_vm1, %v1786_v8  ;;  %v2565_v26 = vadd.f32 %v2438_v1, %v2271_v7  ;;  %v1787_v52 = vadd.f32 %v8199_v56, %v1461_v2  ;;  %v2272_v34 = vld [vmem:[#allocation3 + $0x8] sm:$0xff]  ;;  %v6202_v46 = vld [vmem:[#allocation2 + $0x48] sm:$0xe]  ;;  %v1785_v18 = vadd.f32 %v1696_v22, %v1459_v25  ;;  %8456 = vmatprep.mubr.msk.bf16.mxu0 %vm1381_vm1, %v7925_v35 }
 0x249   : > { %v2441_v13 = vpop.f32.mrb[19].mxu1  ;;  %v5586_v14 = vrot.slane %v5585_v38, 4  ;;  %2599 = vst.msk [vmem:[#allocation3 + $0x10] sm:$0xff] %vm1381_vm1, %v2567_v9  ;;  %v2568_v24 = vadd.f32 %v8221_v11, %v2274_v55  ;;  %v5581_v45 = vsel %vm9581_vm6, %v5576_v37, %v5580_v20  ;;  %1816 = vst.msk [vmem:[#allocation3 + $0x60] sm:$0xff] %vm1381_vm1, %v1784_v43  ;;  %v6203_v40 = vld [vmem:[#allocation2 + $0x4c] sm:$0xf] }
 0x24a   : > { %v10260_v28 = vsel %vm9596_vm7, %v6311_v10, %v6312_v3  ;;  %v2566_v42 = vadd.f32 %v2441_v13, %v2272_v34  ;;  %v6204_v48 = vld [vmem:[#allocation2 + $0x50] sm:$0x1]  ;;  %v5421_v49 = vld [vmem:[#allocation2 + $0x6c] sm:$0xf]  ;;  %2597 = vst.msk [vmem:[#allocation3] sm:$0xff] %vm1381_vm1, %v2565_v26  ;;  %1819 = vst.msk [vmem:[#allocation3 + $0x78] sm:$0xff] %vm1381_vm1, %v1787_v52 }
 0x24b   : > { %v5591_v56 = vsel %vm9581_vm6, %v5586_v14, %v5590_v62  ;;  %v7928_v53 = vcombine.low %v10252_v30, %v10260_v28  ;;  %2600 = vst.msk [vmem:[#allocation3 + $0x18] sm:$0xff] %vm1381_vm1, %v2568_v24  ;;  %v5593_v54 = vshrl.u32 %v5418_v31, 16  ;;  %v5596_v59 = vshll.u32 %v5418_v31, 16  ;;  %v5422_v60 = vld [vmem:[#allocation2 + $0x70] sm:$0xf]  ;;  %v10270_v22 = vpop.f32.mrb[16].mxu0  ;;  %8427 = vmatmul.mubr.msk.bf16.gmra.mrb[116].mxu1 %vm1381_vm1, %v10220_v17 }
 0x24c   : > { %v10274_v63 = vcombine.low %v5581_v45, %v5591_v56  ;;  %1817 = vst.msk [vmem:[#allocation3 + $0x68] sm:$0xff] %vm1381_vm1, %v1785_v18  ;;  %2598 = vst.msk [vmem:[#allocation3 + $0x8] sm:$0xff] %vm1381_vm1, %v2566_v42  ;;  %v5602_v50 = vshll.u32 %v5419_v33, 16  ;;  %v5606_v20 = vshrl.u32 %v5419_v33, 16  ;;  %v5612_v16 = vshll.u32 %v5420_v6, 16  ;;  %v10278_v23 = vpop.f32.mrb[17].mxu0  ;;  %8430 = vmatprep.mubr.msk.bf16.mxu1 %vm1381_vm1, %v10245_v4 }
 0x24d   : > { %v5423_v19 = vld [vmem:[#allocation2 + $0x74] sm:$0x1]  ;;  %v5595_v36 = vrot.slane %v5593_v54, 4  ;;  %v5598_v62 = vrot.slane %v5596_v59, 5  ;;  %v7913_v21 = vrot.slane %v6202_v46, 9  ;;  %v6316_v57 = vrot.slane %v6203_v40, 5 }
 0x24e   : > { %v8224_v61 = vpop.f32.mrb[20].mxu1  ;;  %v10283_v27 = vpop.f32.mrb[18].mxu0  ;;  %v5604_v1 = vrot.slane %v5602_v50, 5  ;;  %v5608_v2 = vrot.slane %v5606_v20, 4  ;;  %v5614_v38 = vrot.slane %v5612_v16, 5  ;;  %v6319_v3 = vrot.slane %v6204_v48, 5 }
 0x24f   : > { %v2454_v0 = vpop.f32.mrb[21].mxu1  ;;  %v10289_v8 = vpop.f32.mrb[19].mxu0  ;;  %v5599_v47 = vor.u32 %v5598_v62, %v5595_v36  ;;  %v10293_v9 = vsel %vm9596_vm7, %v7913_v21, %v6316_v57  ;;  %v6318_v7 = vrot.slane %v6316_v57, 4  ;;  %v5617_v11 = vshrl.u32 %v5421_v49, 16  ;;  %v6205_v25 = vld [vmem:[#allocation2 + $0x54] sm:$0xe]  ;;  %8457 = vmatmul.mubr.msk.bf16.vlgmr.msra.gmra.mrb[112].mxu0 %vm1381_vm1, %v7926_v51 }
 0x250   : > { %v8225_v31 = vpop.f32.mrb[22].mxu1  ;;  %v5609_v37 = vor.u32 %v5608_v2, %v5604_v1  ;;  %v5620_v39 = vshll.u32 %v5421_v49, 16  ;;  %v5626_v58 = vshll.u32 %v5422_v60, 16  ;;  %v5630_v35 = vshrl.u32 %v5422_v60, 16  ;;  %v6206_v10 = vld [vmem:[#allocation2 + $0x58] sm:$0xf]  ;;  %8460 = vmatprep.mubr.msk.bf16.mxu0 %vm1381_vm1, %v7927_v5 }
 0x251   : > { %v2457_v43 = vpop.f32.mrb[23].mxu1  ;;  %v5600_v55 = vrot.slane %v5599_v47, 4  ;;  %v10297_v13 = vsel %vm9596_vm7, %v6318_v7, %v6319_v3  ;;  %v5619_v33 = vrot.slane %v5617_v11, 4  ;;  %v5636_v14 = vshll.u32 %v5423_v19, 16  ;;  %v6207_v26 = vld [vmem:[#allocation2 + $0x5c] sm:$0x1] }
 0x252   : > { %v5610_v52 = vrot.slane %v5609_v37, 4  ;;  %v7929_v24 = vcombine.low %v10293_v9, %v10297_v13  ;;  %v5622_v34 = vrot.slane %v5620_v39, 5  ;;  %v5628_v6 = vrot.slane %v5626_v58, 5  ;;  %v10301_v46 = vld [vmem:[#allocation2 + $0x78] sm:$0xf]  ;;  %v2842_v48 = vld [vmem:[#allocation3 + $0x10] sm:$0xff] }
 0x253   : > { %v5605_v45 = vsel %vm9581_vm6, %v5600_v55, %v5604_v1  ;;  %v5632_v18 = vrot.slane %v5630_v35, 4  ;;  %v5638_v42 = vrot.slane %v5636_v14, 5  ;;  %v7914_v40 = vrot.slane %v6205_v25, 9  ;;  %v2277_v60 = vld [vmem:[#allocation3 + $0x30] sm:$0xff]  ;;  %v2275_v50 = vld [vmem:[#allocation3 + $0x20] sm:$0xff]  ;;  %v2278_v36 = vld [vmem:[#allocation3 + $0x38] sm:$0xff]  ;;  %8431 = vmatmul.mubr.msk.bf16.gmra.mrb[120].mxu1 %vm1381_vm1, %v10274_v63 }
 0x254   : > { %v5615_v49 = vsel %vm9581_vm6, %v5610_v52, %v5614_v38  ;;  %v5623_v56 = vor.u32 %v5622_v34, %v5619_v33  ;;  %v6323_v54 = vrot.slane %v6206_v10, 5  ;;  %v6326_v59 = vrot.slane %v6207_v26, 5  ;;  %v2840_v20 = vld [vmem:[#allocation3] sm:$0xff]  ;;  %v2843_v62 = vld [vmem:[#allocation3 + $0x18] sm:$0xff]  ;;  %v2276_v1 = vld [vmem:[#allocation3 + $0x28] sm:$0xff]  ;;  %v10329_v7 = vpop.f32.mrb[20].mxu0 }
 0x255   : > { %v10315_v16 = vcombine.low %v5605_v45, %v5615_v49  ;;  %v5633_v17 = vor.u32 %v5632_v18, %v5628_v6  ;;  %v2571_v19 = vadd.f32 %v8224_v61, %v2277_v60  ;;  %v5425_v21 = vld [vmem:[#allocation2 + $0x7c] sm:$0xf]  ;;  %v5641_v57 = vshrl.u32 %v10301_v46, 16  ;;  %v2841_v61 = vld [vmem:[#allocation3 + $0x8] sm:$0xff]  ;;  %v6211_v28 = vld [vmem:[#allocation2 + $0x6c] sm:$0xe] }
 0x256   : > { %v5624_v15 = vrot.slane %v5623_v56, 4  ;;  %v10324_v29 = vsel %vm9596_vm7, %v7914_v40, %v6323_v54  ;;  %v6325_v51 = vrot.slane %v6323_v54, 4  ;;  %v3136_v4 = vadd.f32 %v10270_v22, %v2842_v48  ;;  %v5426_v2 = vld [vmem:[#allocation2 + $0x80] sm:$0x1]  ;;  %v6208_v32 = vld [vmem:[#allocation2 + $0x60] sm:$0xe] }
 0x257   : > { %v5634_v38 = vrot.slane %v5633_v17, 4  ;;  %2603 = vst.msk [vmem:[#allocation3 + $0x30] sm:$0xff] %vm1381_vm1, %v2571_v19  ;;  %v2569_v3 = vadd.f32 %v2454_v0, %v2275_v50  ;;  %v3134_v47 = vadd.f32 %v10278_v23, %v2840_v20  ;;  %v2572_v44 = vadd.f32 %v8225_v31, %v2278_v36  ;;  %v6209_v5 = vld [vmem:[#allocation2 + $0x64] sm:$0xf]  ;;  %v6210_v0 = vld [vmem:[#allocation2 + $0x68] sm:$0x1]  ;;  %8461 = vmatmul.mubr.msk.bf16.gmra.mrb[116].mxu0 %vm1381_vm1, %v7928_v53 }
 0x258   : > { %v5629_v11 = vsel %vm9581_vm6, %v5624_v15, %v5628_v6  ;;  %v10335_v22 = vsel %vm9596_vm7, %v6325_v51, %v6326_v59  ;;  %3168 = vst.msk [vmem:[#allocation3 + $0x10] sm:$0xff] %vm1381_vm1, %v3136_v4  ;;  %v3137_v25 = vadd.f32 %v10283_v27, %v2843_v62  ;;  %v2570_v37 = vadd.f32 %v2457_v43, %v2276_v1  ;;  %v5427_v39 = vld [vmem:[#allocation2 + $0x84] sm:$0xf]  ;;  %v10339_v23 = vpop.f32.mrb[24].mxu1  ;;  %v10341_v31 = vpop.f32.mrb[21].mxu0 }
 0x259   : > { %v5639_v58 = vsel %vm9581_vm6, %v5634_v38, %v5638_v42  ;;  %v7930_v35 = vcombine.low %v10324_v29, %v10335_v22  ;;  %2601 = vst.msk [vmem:[#allocation3 + $0x20] sm:$0xff] %vm1381_vm1, %v2569_v3  ;;  %3166 = vst.msk [vmem:[#allocation3] sm:$0xff] %vm1381_vm1, %v3134_v47  ;;  %v3135_v27 = vadd.f32 %v10289_v8, %v2841_v61  ;;  %v5643_v10 = vrot.slane %v5641_v57, 4  ;;  %v5428_v43 = vld [vmem:[#allocation2 + $0x88] sm:$0xf]  ;;  %v10351_v55 = vpop.f32.mrb[25].mxu1 }
 0x25a   : > { %2604 = vst.msk [vmem:[#allocation3 + $0x38] sm:$0xff] %vm1381_vm1, %v2572_v44  ;;  %v10353_v33 = vpop.f32.mrb[22].mxu0  ;;  %v7884_v14 = vcombine.low %v5629_v11, %v5639_v58  ;;  %3169 = vst.msk [vmem:[#allocation3 + $0x18] sm:$0xff] %vm1381_vm1, %v3137_v25  ;;  %v5644_v26 = vshll.u32 %v10301_v46, 16  ;;  %v5650_v52 = vshll.u32 %v5425_v21, 16  ;;  %v5654_v34 = vshrl.u32 %v5425_v21, 16  ;;  %8434 = vmatprep.mubr.msk.bf16.mxu1 %vm1381_vm1, %v10315_v16  ;;  %8464 = vmatprep.mubr.msk.bf16.mxu0 %vm1381_vm1, %v7929_v24 }
 0x25b   : > { %2602 = vst.msk [vmem:[#allocation3 + $0x28] sm:$0xff] %vm1381_vm1, %v2570_v37  ;;  %v10358_v6 = vpop.f32.mrb[26].mxu1  ;;  %v10360_v45 = vpop.f32.mrb[23].mxu0  ;;  %3167 = vst.msk [vmem:[#allocation3 + $0x8] sm:$0xff] %vm1381_vm1, %v3135_v27  ;;  %v5660_v8 = vshll.u32 %v5426_v2, 16  ;;  %v7915_v18 = vrot.slane %v6208_v32, 9 }
 0x25c   : > { %v6330_v42 = vrot.slane %v6209_v5, 5  ;;  %v6333_v40 = vrot.slane %v6210_v0, 5  ;;  %v10363_v48 = vpop.f32.mrb[27].mxu1  ;;  %v5646_v49 = vrot.slane %v5644_v26, 5  ;;  %v5652_v56 = vrot.slane %v5650_v52, 5  ;;  %v2281_v5 = vld [vmem:[#allocation3 + $0x50] sm:$0xff]  ;;  %8435 = vmatmul.mubr.msk.bf16.gmra.mrb[124].mxu1 %vm1381_vm1, %v7884_v14 }
 0x25d   : > { %v5656_v46 = vrot.slane %v5654_v34, 4  ;;  %v5429_v54 = vld [vmem:[#allocation2 + $0x8c] sm:$0x1]  ;;  %v5665_v59 = vshrl.u32 %v5427_v39, 16  ;;  %v5662_v60 = vrot.slane %v5660_v8, 5  ;;  %v5668_v17 = vshll.u32 %v5427_v39, 16 }
 0x25e   : > { %v6331_v50 = vsel %vm9596_vm7, %v7915_v18, %v6330_v42  ;;  %v6332_v20 = vrot.slane %v6330_v42, 4  ;;  %v5647_v63 = vor.u32 %v5646_v49, %v5643_v10  ;;  %v5674_v30 = vshll.u32 %v5428_v43, 16  ;;  %v6212_v53 = vld [vmem:[#allocation2 + $0x70] sm:$0xf]  ;;  %v6213_v15 = vld [vmem:[#allocation2 + $0x74] sm:$0x1] }
 0x25f   : > { %v5657_v19 = vor.u32 %v5656_v46, %v5652_v56  ;;  %v5667_v36 = vrot.slane %v5665_v59, 4  ;;  %v5670_v62 = vrot.slane %v5668_v17, 5  ;;  %v5678_v21 = vshrl.u32 %v5428_v43, 16  ;;  %v2846_v38 = vld [vmem:[#allocation3 + $0x30] sm:$0xff]  ;;  %v2279_v11 = vld [vmem:[#allocation3 + $0x40] sm:$0xff]  ;;  %v10386_v26 = vpop.f32.mrb[24].mxu0  ;;  %8465 = vmatmul.mubr.msk.bf16.gmra.mrb[120].mxu0 %vm1381_vm1, %v7930_v35 }
 0x260   : > { %v6334_v16 = vsel %vm9596_vm7, %v6332_v20, %v6333_v40  ;;  %v5684_v57 = vshll.u32 %v5429_v54, 16  ;;  %v5648_v51 = vrot.slane %v5647_v63, 4  ;;  %v5676_v61 = vrot.slane %v5674_v30, 5  ;;  %v2844_v25 = vld [vmem:[#allocation3 + $0x20] sm:$0xff]  ;;  %v5430_v43 = vld [vmem:[#allocation2 + $0x90] sm:$0xf] }
 0x261   : > { %v5658_v4 = vrot.slane %v5657_v19, 4  ;;  %v7931_v1 = vcombine.low %v6331_v50, %v6334_v16  ;;  %v5671_v9 = vor.u32 %v5670_v62, %v5667_v36  ;;  %v5680_v13 = vrot.slane %v5678_v21, 4  ;;  %v2847_v27 = vld [vmem:[#allocation3 + $0x38] sm:$0xff]  ;;  %v10395_v49 = vpop.f32.mrb[28].mxu1  ;;  %v2280_v46 = vld [vmem:[#allocation3 + $0x48] sm:$0xff] }
 0x262   : > { %v5686_v24 = vrot.slane %v5684_v57, 5  ;;  %v7916_v2 = vrot.slane %v6211_v28, 9  ;;  %v5653_v3 = vsel %vm9581_vm6, %v5648_v51, %v5652_v56  ;;  %v6337_v44 = vrot.slane %v6212_v53, 5  ;;  %v2845_v10 = vld [vmem:[#allocation3 + $0x28] sm:$0xff]  ;;  %v2282_v42 = vld [vmem:[#allocation3 + $0x58] sm:$0xff]  ;;  %v10409_v59 = vpop.f32.mrb[29].mxu1 }
 0x263   : > { %v5663_v47 = vsel %vm9581_vm6, %v5658_v4, %v5662_v60  ;;  %v6340_v32 = vrot.slane %v6213_v15, 5  ;;  %v5672_v0 = vrot.slane %v5671_v9, 4  ;;  %v5681_v39 = vor.u32 %v5680_v13, %v5676_v61  ;;  %v5431_v40 = vld [vmem:[#allocation2 + $0x94] sm:$0xf]  ;;  %v5432_v54 = vld [vmem:[#allocation2 + $0x98] sm:$0x1]  ;;  %8468 = vmatprep.mubr.msk.bf16.mxu0 %vm1381_vm1, %v7931_v1 }
 0x264   : > { %v7885_v37 = vcombine.low %v5653_v3, %v5663_v47  ;;  %v2575_v58 = vadd.f32 %v10339_v23, %v2281_v5  ;;  %v10391_v52 = vsel %vm9596_vm7, %v7916_v2, %v6337_v44  ;;  %v6339_v34 = vrot.slane %v6337_v44, 4  ;;  %v10397_v23 = vpop.f32.mrb[25].mxu0  ;;  %v6215_v50 = vld [vmem:[#allocation2 + $0x7c] sm:$0xf]  ;;  %v10421_v20 = vpop.f32.mrb[30].mxu1  ;;  %v2300_v41 = vld [vmem:[#allocation3 + $0xe8] sm:$0xff] }
 0x265   : > { %v3140_v8 = vadd.f32 %v10329_v7, %v2846_v38  ;;  %v2573_v18 = vadd.f32 %v10351_v55, %v2279_v11  ;;  %v5677_v14 = vsel %vm9581_vm6, %v5672_v0, %v5676_v61  ;;  %v5682_v56 = vrot.slane %v5681_v39, 4  ;;  %v10411_v60 = vpop.f32.mrb[26].mxu0  ;;  %v10430_v30 = vpop.f32.mrb[31].mxu1  ;;  %v5433_v62 = vld [vmem:[#allocation2 + $0x9c] sm:$0xf] }
 0x266   : > { %8438 = vmatprep.mubr.msk.bf16.mxu1 %vm1381_vm1, %v7885_v37  ;;  %2607 = vst.msk [vmem:[#allocation3 + $0x50] sm:$0xff] %vm1381_vm1, %v2575_v58  ;;  %v3138_v7 = vadd.f32 %v10341_v31, %v2844_v25  ;;  %v2576_v55 = vadd.f32 %v10358_v6, %v2282_v42  ;;  %v6341_v29 = vsel %vm9596_vm7, %v6339_v34, %v6340_v32  ;;  %v6214_v6 = vld [vmem:[#allocation2 + $0x78] sm:$0xe]  ;;  %v10423_v17 = vpop.f32.mrb[27].mxu0  ;;  %v5692_v36 = vshll.u32 %v5430_v43, 16 }
 0x267   : > { %3172 = vst.msk [vmem:[#allocation3 + $0x30] sm:$0xff] %vm1381_vm1, %v3140_v8  ;;  %2605 = vst.msk [vmem:[#allocation3 + $0x40] sm:$0xff] %vm1381_vm1, %v2573_v18  ;;  %v3141_v22 = vadd.f32 %v10353_v33, %v2847_v27  ;;  %v2574_v31 = vadd.f32 %v10363_v48, %v2280_v46  ;;  %v3139_v35 = vadd.f32 %v10360_v45, %v2845_v10  ;;  %v5689_v33 = vshrl.u32 %v5430_v43, 16  ;;  %v6216_v48 = vld [vmem:[#allocation2 + $0x80] sm:$0x1]  ;;  %v10443_v46 = vpop.f32.mrb[28].mxu0 }
 0x268   : > { %v5687_v63 = vsel %vm9581_vm6, %v5682_v56, %v5686_v24  ;;  %v7932_v19 = vcombine.low %v10391_v52, %v6341_v29  ;;  %3170 = vst.msk [vmem:[#allocation3 + $0x20] sm:$0xff] %vm1381_vm1, %v3138_v7  ;;  %2608 = vst.msk [vmem:[#allocation3 + $0x58] sm:$0xff] %vm1381_vm1, %v2576_v55  ;;  %v5698_v28 = vshll.u32 %v5431_v40, 16  ;;  %v5702_v53 = vshrl.u32 %v5431_v40, 16  ;;  %v5434_v4 = vld [vmem:[#allocation2 + $0xa0] sm:$0xf] }
 0x269   : > { %v7886_v45 = vcombine.low %v5677_v14, %v5687_v63  ;;  %3173 = vst.msk [vmem:[#allocation3 + $0x38] sm:$0xff] %vm1381_vm1, %v3141_v22  ;;  %2606 = vst.msk [vmem:[#allocation3 + $0x48] sm:$0xff] %vm1381_vm1, %v2574_v31  ;;  %v5708_v16 = vshll.u32 %v5432_v54, 16  ;;  %v5691_v21 = vrot.slane %v5689_v33, 4  ;;  %v5694_v57 = vrot.slane %v5692_v36, 5  ;;  %v2285_v7 = vld [vmem:[#allocation3 + $0x70] sm:$0xff] }
 0x26a   : > { %3171 = vst.msk [vmem:[#allocation3 + $0x28] sm:$0xff] %vm1381_vm1, %v3139_v35  ;;  %v7917_v15 = vrot.slane %v6214_v6, 9  ;;  %v6344_v51 = vrot.slane %v6215_v50, 5  ;;  %v5700_v1 = vrot.slane %v5698_v28, 5  ;;  %v5704_v61 = vrot.slane %v5702_v53, 4  ;;  %8469 = vmatmul.mubr.msk.bf16.gmra.mrb[124].mxu0 %vm1381_vm1, %v7932_v19  ;;  %v2283_v55 = vld [vmem:[#allocation3 + $0x60] sm:$0xff] }
 0x26b   : > { %v5710_v9 = vrot.slane %v5708_v16, 5  ;;  %v6347_v13 = vrot.slane %v6216_v48, 5  ;;  %v5435_v24 = vld [vmem:[#allocation2 + $0xa4] sm:$0x1]  ;;  %v5695_v2 = vor.u32 %v5694_v57, %v5691_v21  ;;  %v5713_v47 = vshrl.u32 %v5433_v62, 16  ;;  %8439 = vmatmul.mubr.msk.bf16.gmra.mrb[128].mxu1 %vm1381_vm1, %v7886_v45  ;;  %v10448_v50 = vpop.f32.mrb[32].mxu1 }
 0x26c   : > { %v6345_v38 = vsel %vm9596_vm7, %v7917_v15, %v6344_v51  ;;  %v6346_v3 = vrot.slane %v6344_v51, 4  ;;  %v6217_v44 = vld [vmem:[#allocation2 + $0x84] sm:$0xe]  ;;  %v5705_v32 = vor.u32 %v5704_v61, %v5700_v1  ;;  %v5716_v5 = vshll.u32 %v5433_v62, 16  ;;  %v6218_v37 = vld [vmem:[#allocation2 + $0x88] sm:$0xf] }
 0x26d   : > { %v5722_v11 = vshll.u32 %v5434_v4, 16  ;;  %v5726_v25 = vshrl.u32 %v5434_v4, 16  ;;  %v5696_v0 = vrot.slane %v5695_v2, 4  ;;  %v5715_v58 = vrot.slane %v5713_v47, 4  ;;  %v6219_v10 = vld [vmem:[#allocation2 + $0x8c] sm:$0x1] }
 0x26e   : > { %v6348_v39 = vsel %vm9596_vm7, %v6346_v3, %v6347_v13  ;;  %v5732_v27 = vshll.u32 %v5435_v24, 16  ;;  %v5706_v43 = vrot.slane %v5705_v32, 4  ;;  %v5718_v34 = vrot.slane %v5716_v5, 5  ;;  %v2850_v18 = vld [vmem:[#allocation3 + $0x50] sm:$0xff]  ;;  %v2848_v35 = vld [vmem:[#allocation3 + $0x40] sm:$0xff]  ;;  %v10450_v63 = vpop.f32.mrb[29].mxu0 }
 0x26f   : > { %v7933_v52 = vcombine.low %v6345_v38, %v6348_v39  ;;  %v5724_v8 = vrot.slane %v5722_v11, 5  ;;  %v5701_v42 = vsel %vm9581_vm6, %v5696_v0, %v5700_v1  ;;  %v5728_v40 = vrot.slane %v5726_v25, 4  ;;  %v2851_v6 = vld [vmem:[#allocation3 + $0x58] sm:$0xff]  ;;  %v2284_v28 = vld [vmem:[#allocation3 + $0x68] sm:$0xff]  ;;  %v10454_v16 = vpop.f32.mrb[33].mxu1  ;;  %v10456_v62 = vpop.f32.mrb[30].mxu0 }
 0x270   : > { %v5734_v14 = vrot.slane %v5732_v27, 5  ;;  %v7918_v56 = vrot.slane %v6217_v44, 9  ;;  %v5711_v54 = vsel %vm9581_vm6, %v5706_v43, %v5710_v9  ;;  %v5719_v29 = vor.u32 %v5718_v34, %v5715_v58  ;;  %v2286_v45 = vld [vmem:[#allocation3 + $0x78] sm:$0xff]  ;;  %v2849_v53 = vld [vmem:[#allocation3 + $0x48] sm:$0xff]  ;;  %v5436_v4 = vld [vmem:[#allocation2 + $0xa8] sm:$0xf] }
 0x271   : > { %8472 = vmatprep.mubr.msk.bf16.mxu0 %vm1381_vm1, %v7933_v52  ;;  %v6351_v22 = vrot.slane %v6218_v37, 5  ;;  %v6354_v31 = vrot.slane %v6219_v10, 5  ;;  %v7887_v19 = vcombine.low %v5701_v42, %v5711_v54  ;;  %v5729_v33 = vor.u32 %v5728_v40, %v5724_v8  ;;  %v10461_v1 = vpop.f32.mrb[34].mxu1  ;;  %v5437_v24 = vld [vmem:[#allocation2 + $0xac] sm:$0xf] }
 0x272   : > { %v2579_v36 = vadd.f32 %v10395_v49, %v2285_v7  ;;  %v3144_v48 = vadd.f32 %v10386_v26, %v2850_v18  ;;  %v5720_v21 = vrot.slane %v5719_v29, 4  ;;  %v2577_v51 = vadd.f32 %v10409_v59, %v2283_v55  ;;  %v10463_v49 = vpop.f32.mrb[31].mxu0  ;;  %v5438_v59 = vld [vmem:[#allocation2 + $0xb0] sm:$0x1]  ;;  %v10471_v2 = vpop.f32.mrb[35].mxu1 }
 0x273   : > { %v6352_v57 = vsel %vm9596_vm7, %v7918_v56, %v6351_v22  ;;  %v6353_v15 = vrot.slane %v6351_v22, 4  ;;  %8442 = vmatprep.mubr.msk.bf16.mxu1 %vm1381_vm1, %v7887_v19  ;;  %v5730_v26 = vrot.slane %v5729_v33, 4  ;;  %v3142_v61 = vadd.f32 %v10397_v23, %v2848_v35  ;;  %v6220_v44 = vld [vmem:[#allocation2 + $0x90] sm:$0xe]  ;;  %v6222_v25 = vld [vmem:[#allocation2 + $0x98] sm:$0x1] }
 0x274   : > { %2611 = vst.msk [vmem:[#allocation3 + $0x70] sm:$0xff] %vm1381_vm1, %v2579_v36  ;;  %3176 = vst.msk [vmem:[#allocation3 + $0x50] sm:$0xff] %vm1381_vm1, %v3144_v48  ;;  %v2580_v9 = vadd.f32 %v10421_v20, %v2286_v45  ;;  %v3145_v13 = vadd.f32 %v10411_v60, %v2851_v6  ;;  %v5725_v38 = vsel %vm9581_vm6, %v5720_v21, %v5724_v8  ;;  %v6221_v20 = vld [vmem:[#allocation2 + $0x94] sm:$0xf]  ;;  %v5737_v5 = vshrl.u32 %v5436_v4, 16 }
 0x275   : > { %v6355_v3 = vsel %vm9596_vm7, %v6353_v15, %v6354_v31  ;;  %2609 = vst.msk [vmem:[#allocation3 + $0x60] sm:$0xff] %vm1381_vm1, %v2577_v51  ;;  %v2578_v47 = vadd.f32 %v10430_v30, %v2284_v28  ;;  %v3143_v23 = vadd.f32 %v10423_v17, %v2849_v53  ;;  %v5735_v60 = vsel %vm9581_vm6, %v5730_v26, %v5734_v14  ;;  %v5439_v39 = vld [vmem:[#allocation2 + $0xb4] sm:$0xf]  ;;  %v5440_v52 = vld [vmem:[#allocation2 + $0xb8] sm:$0xf]  ;;  %v10493_v28 = vpop.f32.mrb[32].mxu0 }
 0x276   : > { %v7934_v32 = vcombine.low %v6352_v57, %v6355_v3  ;;  %3174 = vst.msk [vmem:[#allocation3 + $0x40] sm:$0xff] %vm1381_vm1, %v3142_v61  ;;  %2612 = vst.msk [vmem:[#allocation3 + $0x78] sm:$0xff] %vm1381_vm1, %v2580_v9  ;;  %v5740_v11 = vshll.u32 %v5436_v4, 16  ;;  %v7888_v37 = vcombine.low %v5725_v38, %v5735_v60  ;;  %v5746_v17 = vshll.u32 %v5437_v24, 16  ;;  %v5441_v40 = vld [vmem:[#allocation2 + $0xbc] sm:$0x1] }
 0x277   : > { %3177 = vst.msk [vmem:[#allocation3 + $0x58] sm:$0xff] %vm1381_vm1, %v3145_v13  ;;  %2610 = vst.msk [vmem:[#allocation3 + $0x68] sm:$0xff] %vm1381_vm1, %v2578_v47  ;;  %v5750_v30 = vshrl.u32 %v5437_v24, 16  ;;  %v5756_v0 = vshll.u32 %v5438_v59, 16  ;;  %v5739_v58 = vrot.slane %v5737_v5, 4  ;;  %v7919_v10 = vrot.slane %v6220_v44, 9 }
 0x278   : > { %3175 = vst.msk [vmem:[#allocation3 + $0x48] sm:$0xff] %vm1381_vm1, %v3143_v23  ;;  %8473 = vmatmul.mubr.msk.bf16.gmra.mrb[128].mxu0 %vm1381_vm1, %v7934_v32  ;;  %v5742_v27 = vrot.slane %v5740_v11, 5  ;;  %v6358_v43 = vrot.slane %v6221_v20, 5  ;;  %8443 = vmatmul.mubr.msk.bf16.gmra.mrb[132].mxu1 %vm1381_vm1, %v7888_v37  ;;  %v5748_v34 = vrot.slane %v5746_v17, 5  ;;  %v6361_v42 = vrot.slane %v6222_v25, 5  ;;  %v10495_v4 = vpop.f32.mrb[36].mxu1 }
 0x279   : > { %v5752_v8 = vrot.slane %v5750_v30, 4  ;;  %v5758_v18 = vrot.slane %v5756_v0, 5  ;;  %v5761_v55 = vshrl.u32 %v5439_v39, 16  ;;  %v6223_v54 = vld [vmem:[#allocation2 + $0x9c] sm:$0xe]  ;;  %v5764_v22 = vshll.u32 %v5439_v39, 16 }
 0x27a   : > { %v5743_v14 = vor.u32 %v5742_v27, %v5739_v58  ;;  %v6359_v56 = vsel %vm9596_vm7, %v7919_v10, %v6358_v43  ;;  %v6360_v7 = vrot.slane %v6358_v43, 4  ;;  %v5770_v31 = vshll.u32 %v5440_v52, 16  ;;  %v6224_v6 = vld [vmem:[#allocation2 + $0xa0] sm:$0xf]  ;;  %v6225_v45 = vld [vmem:[#allocation2 + $0xa4] sm:$0x1] }
 0x27b   : > { %v5753_v29 = vor.u32 %v5752_v8, %v5748_v34  ;;  %v5774_v35 = vshrl.u32 %v5440_v52, 16  ;;  %v5763_v36 = vrot.slane %v5761_v55, 4  ;;  %v5780_v48 = vshll.u32 %v5441_v40, 16  ;;  %v2854_v51 = vld [vmem:[#allocation3 + $0x70] sm:$0xff]  ;;  %v10497_v26 = vpop.f32.mrb[33].mxu0  ;;  %v10501_v38 = vpop.f32.mrb[37].mxu1 }
 0x27c   : > { %v5744_v19 = vrot.slane %v5743_v14, 4  ;;  %v6362_v33 = vsel %vm9596_vm7, %v6360_v7, %v6361_v42  ;;  %v5766_v57 = vrot.slane %v5764_v22, 5  ;;  %v5772_v15 = vrot.slane %v5770_v31, 5  ;;  %v2289_v59 = vld [vmem:[#allocation3 + $0x90] sm:$0xff]  ;;  %v10503_v3 = vpop.f32.mrb[34].mxu0  ;;  %v2852_v60 = vld [vmem:[#allocation3 + $0x60] sm:$0xff] }
 0x27d   : > { %v5754_v53 = vrot.slane %v5753_v29, 4  ;;  %v7935_v21 = vcombine.low %v6359_v56, %v6362_v33  ;;  %v5776_v9 = vrot.slane %v5774_v35, 4  ;;  %v5782_v13 = vrot.slane %v5780_v48, 5  ;;  %v2855_v32 = vld [vmem:[#allocation3 + $0x78] sm:$0xff]  ;;  %v10508_v5 = vpop.f32.mrb[38].mxu1  ;;  %v10510_v11 = vpop.f32.mrb[35].mxu0 }
 0x27e   : > { %v5749_v61 = vsel %vm9581_vm6, %v5744_v19, %v5748_v34  ;;  %v7920_v24 = vrot.slane %v6223_v54, 9  ;;  %v5767_v23 = vor.u32 %v5766_v57, %v5763_v36  ;;  %v6365_v44 = vrot.slane %v6224_v6, 5  ;;  %v2287_v0 = vld [vmem:[#allocation3 + $0x80] sm:$0xff]  ;;  %v2853_v39 = vld [vmem:[#allocation3 + $0x68] sm:$0xff]  ;;  %v10514_v58 = vpop.f32.mrb[39].mxu1  ;;  %v2290_v34 = vld [vmem:[#allocation3 + $0x98] sm:$0xff] }
 0x27f   : > { %v5759_v47 = vsel %vm9581_vm6, %v5754_v53, %v5758_v18  ;;  %8476 = vmatprep.mubr.msk.bf16.mxu0 %vm1381_vm1, %v7935_v21  ;;  %v6368_v20 = vrot.slane %v6225_v45, 5  ;;  %v5777_v37 = vor.u32 %v5776_v9, %v5772_v15  ;;  %v2583_v17 = vadd.f32 %v10448_v50, %v2289_v59  ;;  %v5442_v8 = vld [vmem:[#allocation2 + $0xc0] sm:$0xf]  ;;  %v5443_v14 = vld [vmem:[#allocation2 + $0xc4] sm:$0xf] }
 0x280   : > { %v7889_v25 = vcombine.low %v5749_v61, %v5759_v47  ;;  %v3148_v30 = vadd.f32 %v10443_v46, %v2854_v51  ;;  %v5768_v27 = vrot.slane %v5767_v23, 4  ;;  %v6366_v10 = vsel %vm9596_vm7, %v7920_v24, %v6365_v44  ;;  %v2288_v40 = vld [vmem:[#allocation3 + $0x88] sm:$0xff]  ;;  %v5444_v56 = vld [vmem:[#allocation2 + $0xc8] sm:$0x1]  ;;  %v6227_v29 = vld [vmem:[#allocation2 + $0xac] sm:$0xf] }
 0x281   : > { %v6367_v43 = vrot.slane %v6365_v44, 4  ;;  %v2581_v52 = vadd.f32 %v10454_v16, %v2287_v0  ;;  %v5778_v18 = vrot.slane %v5777_v37, 4  ;;  %2615 = vst.msk [vmem:[#allocation3 + $0x90] sm:$0xff] %vm1381_vm1, %v2583_v17  ;;  %v3146_v46 = vadd.f32 %v10450_v63, %v2852_v60  ;;  %v6226_v63 = vld [vmem:[#allocation2 + $0xa8] sm:$0xe]  ;;  %v10543_v60 = vpop.f32.mrb[36].mxu0 }
 0x282   : > { %8446 = vmatprep.mubr.msk.bf16.mxu1 %vm1381_vm1, %v7889_v25  ;;  %3180 = vst.msk [vmem:[#allocation3 + $0x70] sm:$0xff] %vm1381_vm1, %v3148_v30  ;;  %v2584_v50 = vadd.f32 %v10461_v1, %v2290_v34  ;;  %v3149_v42 = vadd.f32 %v10456_v62, %v2855_v32  ;;  %v5773_v16 = vsel %vm9581_vm6, %v5768_v27, %v5772_v15  ;;  %v5785_v22 = vshrl.u32 %v5442_v8, 16  ;;  %v6228_v35 = vld [vmem:[#allocation2 + $0xb0] sm:$0x1]  ;;  %v5445_v6 = vld [vmem:[#allocation2 + $0xcc] sm:$0xf] }
 0x283   : > { %v6369_v7 = vsel %vm9596_vm7, %v6367_v43, %v6368_v20  ;;  %2613 = vst.msk [vmem:[#allocation3 + $0x80] sm:$0xff] %vm1381_vm1, %v2581_v52  ;;  %v2582_v55 = vadd.f32 %v10471_v2, %v2288_v40  ;;  %v3147_v54 = vadd.f32 %v10463_v49, %v2853_v39  ;;  %v5783_v62 = vsel %vm9581_vm6, %v5778_v18, %v5782_v13  ;;  %v5446_v36 = vld [vmem:[#allocation2 + $0xd0] sm:$0xf]  ;;  %v5447_v57 = vld [vmem:[#allocation2 + $0xd4] sm:$0x1]  ;;  %v10545_v30 = vpop.f32.mrb[40].mxu1 }
 0x284   : > { %v7936_v1 = vcombine.low %v6366_v10, %v6369_v7  ;;  %3178 = vst.msk [vmem:[#allocation3 + $0x60] sm:$0xff] %vm1381_vm1, %v3146_v46  ;;  %2616 = vst.msk [vmem:[#allocation3 + $0x98] sm:$0xff] %vm1381_vm1, %v2584_v50  ;;  %v5788_v31 = vshll.u32 %v5442_v8, 16  ;;  %v7890_v19 = vcombine.low %v5773_v16, %v5783_v62  ;;  %v5794_v49 = vshll.u32 %v5443_v14, 16  ;;  %v6229_v13 = vld [vmem:[#allocation2 + $0xb4] sm:$0xe] }
 0x285   : > { %3181 = vst.msk [vmem:[#allocation3 + $0x78] sm:$0xff] %vm1381_vm1, %v3149_v42  ;;  %2614 = vst.msk [vmem:[#allocation3 + $0x88] sm:$0xff] %vm1381_vm1, %v2582_v55  ;;  %v5798_v2 = vshrl.u32 %v5443_v14, 16  ;;  %v5804_v33 = vshll.u32 %v5444_v56, 16  ;;  %v5787_v48 = vrot.slane %v5785_v22, 4  ;;  %v7921_v53 = vrot.slane %v6226_v63, 9 }
 0x286   : > { %3179 = vst.msk [vmem:[#allocation3 + $0x68] sm:$0xff] %vm1381_vm1, %v3147_v54  ;;  %8477 = vmatmul.mubr.msk.bf16.gmra.mrb[132].mxu0 %vm1381_vm1, %v7936_v1  ;;  %v5790_v45 = vrot.slane %v5788_v31, 5  ;;  %v6372_v21 = vrot.slane %v6227_v29, 5  ;;  %8447 = vmatmul.mubr.msk.bf16.gmra.mrb[136].mxu1 %vm1381_vm1, %v7890_v19  ;;  %v5796_v15 = vrot.slane %v5794_v49, 5  ;;  %v6375_v9 = vrot.slane %v6228_v35, 5  ;;  %v10547_v0 = vpop.f32.mrb[37].mxu0 }
 0x287   : > { %v5800_v51 = vrot.slane %v5798_v2, 4  ;;  %v5806_v61 = vrot.slane %v5804_v33, 5  ;;  %v5809_v23 = vshrl.u32 %v5445_v6, 16  ;;  %v6230_v44 = vld [vmem:[#allocation2 + $0xb8] sm:$0xf]  ;;  %v5812_v25 = vshll.u32 %v5445_v6, 16 }
 0x288   : > { %v5791_v24 = vor.u32 %v5790_v45, %v5787_v48  ;;  %v6373_v59 = vsel %vm9596_vm7, %v7921_v53, %v6372_v21  ;;  %v6374_v47 = vrot.slane %v6372_v21, 4  ;;  %v6231_v20 = vld [vmem:[#allocation2 + $0xbc] sm:$0x1]  ;;  %v5818_v37 = vshll.u32 %v5446_v36, 16  ;;  %v10551_v52 = vpop.f32.mrb[41].mxu1  ;;  %v10553_v34 = vpop.f32.mrb[38].mxu0 }
 0x289   : > { %v5801_v32 = vor.u32 %v5800_v51, %v5796_v15  ;;  %v5822_v17 = vshrl.u32 %v5446_v36, 16  ;;  %v5811_v10 = vrot.slane %v5809_v23, 4  ;;  %v5828_v43 = vshll.u32 %v5447_v57, 16  ;;  %v2858_v42 = vld [vmem:[#allocation3 + $0x90] sm:$0xff]  ;;  %v10555_v40 = vpop.f32.mrb[42].mxu1  ;;  %v10557_v14 = vpop.f32.mrb[39].mxu0 }
 0x28a   : > { %v5792_v39 = vrot.slane %v5791_v24, 4  ;;  %v6376_v27 = vsel %vm9596_vm7, %v6374_v47, %v6375_v9  ;;  %v5814_v46 = vrot.slane %v5812_v25, 5  ;;  %v5820_v50 = vrot.slane %v5818_v37, 5  ;;  %v2293_v54 = vld [vmem:[#allocation3 + $0xb0] sm:$0xff]  ;;  %v10561_v63 = vpop.f32.mrb[43].mxu1  ;;  %v2291_v31 = vld [vmem:[#allocation3 + $0xa0] sm:$0xff] }
 0x28b   : > { %v5802_v8 = vrot.slane %v5801_v32, 4  ;;  %v7937_v18 = vcombine.low %v6373_v59, %v6376_v27  ;;  %v5824_v16 = vrot.slane %v5822_v17, 4  ;;  %v5830_v7 = vrot.slane %v5828_v43, 5  ;;  %v2856_v35 = vld [vmem:[#allocation3 + $0x80] sm:$0xff]  ;;  %v2859_v6 = vld [vmem:[#allocation3 + $0x98] sm:$0xff]  ;;  %v2292_v24 = vld [vmem:[#allocation3 + $0xa8] sm:$0xff] }
 0x28c   : > { %v5797_v56 = vsel %vm9581_vm6, %v5792_v39, %v5796_v15  ;;  %v7922_v55 = vrot.slane %v6229_v13, 9  ;;  %v5815_v62 = vor.u32 %v5814_v46, %v5811_v10  ;;  %v6379_v1 = vrot.slane %v6230_v44, 5  ;;  %v2294_v36 = vld [vmem:[#allocation3 + $0xb8] sm:$0xff]  ;;  %v2857_v48 = vld [vmem:[#allocation3 + $0x88] sm:$0xff]  ;;  %v6235_v59 = vld [vmem:[#allocation2 + $0xcc] sm:$0xe] }
 0x28d   : > { %v5807_v29 = vsel %vm9581_vm6, %v5802_v8, %v5806_v61  ;;  %8480 = vmatprep.mubr.msk.bf16.mxu0 %vm1381_vm1, %v7937_v18  ;;  %v6382_v22 = vrot.slane %v6231_v20, 5  ;;  %v5825_v49 = vor.u32 %v5824_v16, %v5820_v50  ;;  %v2587_v2 = vadd.f32 %v10495_v4, %v2293_v54  ;;  %v6232_v45 = vld [vmem:[#allocation2 + $0xc0] sm:$0xe]  ;;  %v6233_v51 = vld [vmem:[#allocation2 + $0xc4] sm:$0xf]  ;;  %v2297_v39 = vld [vmem:[#allocation3 + $0xd0] sm:$0xff] }
 0x28e   : > { %v7891_v19 = vcombine.low %v5797_v56, %v5807_v29  ;;  %v3152_v33 = vadd.f32 %v10493_v28, %v2858_v42  ;;  %v5816_v53 = vrot.slane %v5815_v62, 4  ;;  %v6380_v21 = vsel %vm9596_vm7, %v7922_v55, %v6379_v1  ;;  %v6234_v61 = vld [vmem:[#allocation2 + $0xc8] sm:$0x1]  ;;  %v6236_v47 = vld [vmem:[#allocation2 + $0xd0] sm:$0xf]  ;;  %v2295_v8 = vld [vmem:[#allocation3 + $0xc0] sm:$0xff] }
 0x28f   : > { %v6381_v57 = vrot.slane %v6379_v1, 4  ;;  %v2585_v15 = vadd.f32 %v10501_v38, %v2291_v31  ;;  %v5826_v9 = vrot.slane %v5825_v49, 4  ;;  %2619 = vst.msk [vmem:[#allocation3 + $0xb0] sm:$0xff] %vm1381_vm1, %v2587_v2  ;;  %v3150_v28 = vadd.f32 %v10497_v26, %v2856_v35  ;;  %v6237_v26 = vld [vmem:[#allocation2 + $0xd4] sm:$0x1]  ;;  %v8278_v46 = vpop.f32.mrb[40].mxu0 }
 0x290   : > { %8450 = vmatprep.mubr.msk.bf16.mxu1 %vm1381_vm1, %v7891_v19  ;;  %3184 = vst.msk [vmem:[#allocation3 + $0x90] sm:$0xff] %vm1381_vm1, %v3152_v33  ;;  %v2588_v4 = vadd.f32 %v10508_v5, %v2294_v36  ;;  %v3153_v13 = vadd.f32 %v10503_v3, %v2859_v6  ;;  %v5821_v38 = vsel %vm9581_vm6, %v5816_v53, %v5820_v50  ;;  %v7923_v32 = vrot.slane %v6232_v45, 9  ;;  %v2298_v18 = vld [vmem:[#allocation3 + $0xd8] sm:$0xff]  ;;  %v2301_v55 = vld [vmem:[#allocation3 + $0xf0] sm:$0xff]  ;;  %v8248_v54 = vpop.f32.mrb[44].mxu1  ;;  %v3103_v29 = vpop.f32.mrb[41].mxu0 }
 0x291   : > { %v6383_v23 = vsel %vm9596_vm7, %v6381_v57, %v6382_v22  ;;  %2617 = vst.msk [vmem:[#allocation3 + $0xa0] sm:$0xff] %vm1381_vm1, %v2585_v15  ;;  %v2586_v44 = vadd.f32 %v10514_v58, %v2292_v24  ;;  %v3151_v20 = vadd.f32 %v10510_v11, %v2857_v48  ;;  %v5831_v5 = vsel %vm9581_vm6, %v5826_v9, %v5830_v7  ;;  %v2296_v7 = vld [vmem:[#allocation3 + $0xc8] sm:$0xff]  ;;  %v2299_v22 = vld [vmem:[#allocation3 + $0xe0] sm:$0xff]  ;;  %v2550_v31 = vpop.f32.mrb[45].mxu1  ;;  %v8279_v35 = vpop.f32.mrb[42].mxu0  ;;  %v2302_v49 = vld [vmem:[#allocation3 + $0xf8] sm:$0xff] }
 0x292   : > { %v7938_v3 = vcombine.low %v6380_v21, %v6383_v23  ;;  %3182 = vst.msk [vmem:[#allocation3 + $0x80] sm:$0xff] %vm1381_vm1, %v3150_v28  ;;  %2620 = vst.msk [vmem:[#allocation3 + $0xb8] sm:$0xff] %vm1381_vm1, %v2588_v4  ;;  %v6386_v25 = vrot.slane %v6233_v51, 5  ;;  %v7892_v37 = vcombine.low %v5821_v38, %v5831_v5  ;;  %v6389_v58 = vrot.slane %v6234_v61, 5  ;;  %v8249_v2 = vpop.f32.mrb[46].mxu1  ;;  %v3106_v33 = vpop.f32.mrb[43].mxu0 }
 0x293   : > { %3185 = vst.msk [vmem:[#allocation3 + $0x98] sm:$0xff] %vm1381_vm1, %v3153_v13  ;;  %2618 = vst.msk [vmem:[#allocation3 + $0xa8] sm:$0xff] %vm1381_vm1, %v2586_v44  ;;  %v7924_v11 = vrot.slane %v6235_v59, 9  ;;  %v6393_v17 = vrot.slane %v6236_v47, 5  ;;  %v6396_v10 = vrot.slane %v6237_v26, 5  ;;  %v2591_v43 = vadd.f32 %v10545_v30, %v2297_v39  ;;  %v2553_v53 = vpop.f32.mrb[47].mxu1 }
 0x294   : > { %3183 = vst.msk [vmem:[#allocation3 + $0x88] sm:$0xff] %vm1381_vm1, %v3151_v20  ;;  %8481 = vmatmul.mubr.msk.bf16.gmra.mrb[136].mxu0 %vm1381_vm1, %v7938_v3  ;;  %v6387_v12 = vsel %vm9596_vm7, %v7923_v32, %v6386_v25  ;;  %v6388_v27 = vrot.slane %v6386_v25, 4  ;;  %8451 = vmatmul.mubr.msk.bf16.gmra.mrb[140].mxu1 %vm1381_vm1, %v7892_v37  ;;  %v2589_v56 = vadd.f32 %v10551_v52, %v2295_v8  ;;  %v3233_v28 = vld [vmem:[#allocation3 + $0x10] sm:$0xff]  ;;  %v8288_v4 = vpop.f32.mrb[48].mxu1  ;;  %v3231_v38 = vld [vmem:[#allocation3] sm:$0xff]  ;;  %v3234_v32 = vld [vmem:[#allocation3 + $0x18] sm:$0xff] }
 0x295   : > { %v6394_v50 = vsel %vm9596_vm7, %v7924_v11, %v6393_v17  ;;  %v6395_v42 = vrot.slane %v6393_v17, 4  ;;  %v2592_v16 = vadd.f32 %v10555_v40, %v2298_v18  ;;  %2623 = vst.msk [vmem:[#allocation3 + $0xd0] sm:$0xff] %vm1381_vm1, %v2591_v43  ;;  %v2590_v62 = vadd.f32 %v10561_v63, %v2296_v7  ;;  %v3430_v23 = vpop.f32.mrb[49].mxu1 }
 0x296   : > { %v6390_v30 = vsel %vm9596_vm7, %v6388_v27, %v6389_v58  ;;  %v2595_v1 = vadd.f32 %v8248_v54, %v2301_v55  ;;  %v2862_v40 = vld [vmem:[#allocation3 + $0xb0] sm:$0xff]  ;;  %2621 = vst.msk [vmem:[#allocation3 + $0xc0] sm:$0xff] %vm1381_vm1, %v2589_v56  ;;  %v2593_v19 = vadd.f32 %v2550_v31, %v2299_v22  ;;  %v2596_v45 = vadd.f32 %v8249_v2, %v2302_v49  ;;  %v8289_v25 = vpop.f32.mrb[50].mxu1  ;;  %v3235_v54 = vld [vmem:[#allocation3 + $0x20] sm:$0xff]  ;;  %v3238_v22 = vld [vmem:[#allocation3 + $0x38] sm:$0xff] }
 0x297   : > { %v7939_v6 = vcombine.low %v6387_v12, %v6390_v30  ;;  %v6397_v52 = vsel %vm9596_vm7, %v6395_v42, %v6396_v10  ;;  %2624 = vst.msk [vmem:[#allocation3 + $0xd8] sm:$0xff] %vm1381_vm1, %v2592_v16  ;;  %v3156_v63 = vadd.f32 %v10543_v60, %v2862_v40  ;;  %2622 = vst.msk [vmem:[#allocation3 + $0xc8] sm:$0xff] %vm1381_vm1, %v2590_v62  ;;  %v3232_v12 = vld [vmem:[#allocation3 + $0x8] sm:$0xff]  ;;  %v3433_v27 = vpop.f32.mrb[51].mxu1  ;;  %v3237_v56 = vld [vmem:[#allocation3 + $0x30] sm:$0xff] }
 0x298   : > { %v7940_v36 = vcombine.low %v6394_v50, %v6397_v52  ;;  %v2860_v48 = vld [vmem:[#allocation3 + $0xa0] sm:$0xff]  ;;  %2627 = vst.msk [vmem:[#allocation3 + $0xf0] sm:$0xff] %vm1381_vm1, %v2595_v1  ;;  %2625 = vst.msk [vmem:[#allocation3 + $0xe0] sm:$0xff] %vm1381_vm1, %v2593_v19  ;;  %v2594_v15 = vadd.f32 %v2553_v53, %v2300_v41  ;;  %v3559_v47 = vadd.f32 %v8288_v4, %v3233_v28  ;;  %v8292_v16 = vpop.f32.mrb[52].mxu1  ;;  %v3236_v19 = vld [vmem:[#allocation3 + $0x28] sm:$0xff] }
 0x299   : > { %8484 = vmatprep.mubr.msk.bf16.mxu0 %vm1381_vm1, %v7939_v6  ;;  %v3154_v21 = vadd.f32 %v10547_v0, %v2860_v48  ;;  %v2863_v57 = vld [vmem:[#allocation3 + $0xb8] sm:$0xff]  ;;  %3188 = vst.msk [vmem:[#allocation3 + $0xb0] sm:$0xff] %vm1381_vm1, %v3156_v63  ;;  %2628 = vst.msk [vmem:[#allocation3 + $0xf8] sm:$0xff] %vm1381_vm1, %v2596_v45  ;;  %v8282_v0 = vpop.f32.mrb[44].mxu0  ;;  %v3557_v3 = vadd.f32 %v3430_v23, %v3231_v38  ;;  %v3560_v39 = vadd.f32 %v8289_v25, %v3234_v32  ;;  %v3241_v53 = vld [vmem:[#allocation3 + $0x50] sm:$0xff] }
 0x29a   : > { %v3157_v60 = vadd.f32 %v10553_v34, %v2863_v57  ;;  %v2861_v51 = vld [vmem:[#allocation3 + $0xa8] sm:$0xff]  ;;  %2626 = vst.msk [vmem:[#allocation3 + $0xe8] sm:$0xff] %vm1381_vm1, %v2594_v15  ;;  %v3119_v34 = vpop.f32.mrb[45].mxu0  ;;  %3591 = vst.msk [vmem:[#allocation3 + $0x10] sm:$0xff] %vm1381_vm1, %v3559_v47  ;;  %v3558_v8 = vadd.f32 %v3433_v27, %v3232_v12  ;;  %v3563_v55 = vadd.f32 %v8292_v16, %v3237_v56  ;;  %v3242_v28 = vld [vmem:[#allocation3 + $0x58] sm:$0xff] }
 0x29b   : > { %3186 = vst.msk [vmem:[#allocation3 + $0xa0] sm:$0xff] %vm1381_vm1, %v3154_v21  ;;  %v3155_v61 = vadd.f32 %v10557_v14, %v2861_v51  ;;  %v8283_v14 = vpop.f32.mrb[46].mxu0  ;;  %3589 = vst.msk [vmem:[#allocation3] sm:$0xff] %vm1381_vm1, %v3557_v3  ;;  %v3240_v47 = vld [vmem:[#allocation3 + $0x48] sm:$0xff]  ;;  %v3245_v3 = vld [vmem:[#allocation3 + $0x70] sm:$0xff] }
 0x29c   : > { %8485 = vmatmul.mubr.msk.bf16.gmra.mrb[140].mxu0 %vm1381_vm1, %v7940_v36  ;;  %3189 = vst.msk [vmem:[#allocation3 + $0xb8] sm:$0xff] %vm1381_vm1, %v3157_v60  ;;  %v2866_v9 = vld [vmem:[#allocation3 + $0xd0] sm:$0xff]  ;;  %v3122_v37 = vpop.f32.mrb[47].mxu0  ;;  %3592 = vst.msk [vmem:[#allocation3 + $0x18] sm:$0xff] %vm1381_vm1, %v3560_v39  ;;  %v3239_v60 = vld [vmem:[#allocation3 + $0x40] sm:$0xff] }
 0x29d   : > { %3187 = vst.msk [vmem:[#allocation3 + $0xa8] sm:$0xff] %vm1381_vm1, %v3155_v61  ;;  %v3160_v13 = vadd.f32 %v8278_v46, %v2866_v9  ;;  %v2864_v24 = vld [vmem:[#allocation3 + $0xc0] sm:$0xff]  ;;  %3590 = vst.msk [vmem:[#allocation3 + $0x8] sm:$0xff] %vm1381_vm1, %v3558_v8  ;;  %v8322_v42 = vpop.f32.mrb[48].mxu0  ;;  %v3246_v27 = vld [vmem:[#allocation3 + $0x78] sm:$0xff] }
 0x29e   : > { %v2867_v59 = vld [vmem:[#allocation3 + $0xd8] sm:$0xff]  ;;  %v3158_v44 = vadd.f32 %v3103_v29, %v2864_v24  ;;  %v2865_v26 = vld [vmem:[#allocation3 + $0xc8] sm:$0xff]  ;;  %v4220_v7 = vpop.f32.mrb[49].mxu0  ;;  %v3446_v29 = vpop.f32.mrb[53].mxu1  ;;  %3595 = vst.msk [vmem:[#allocation3 + $0x30] sm:$0xff] %vm1381_vm1, %v3563_v55 }
 0x29f   : > { %v3161_v20 = vadd.f32 %v8279_v35, %v2867_v59  ;;  %v2870_v5 = vld [vmem:[#allocation3 + $0xf0] sm:$0xff]  ;;  %3192 = vst.msk [vmem:[#allocation3 + $0xd0] sm:$0xff] %vm1381_vm1, %v3160_v13  ;;  %v3159_v58 = vadd.f32 %v3106_v33, %v2865_v26  ;;  %v2868_v17 = vld [vmem:[#allocation3 + $0xe0] sm:$0xff]  ;;  %v8323_v30 = vpop.f32.mrb[50].mxu0  ;;  %v3561_v1 = vadd.f32 %v3446_v29, %v3235_v54  ;;  %v8293_v31 = vpop.f32.mrb[54].mxu1 }
 0x2a0   : > { %v3164_v11 = vadd.f32 %v8282_v0, %v2870_v5  ;;  %3190 = vst.msk [vmem:[#allocation3 + $0xc0] sm:$0xff] %vm1381_vm1, %v3158_v44  ;;  %v3162_v10 = vadd.f32 %v3119_v34, %v2868_v17  ;;  %v2871_v43 = vld [vmem:[#allocation3 + $0xf8] sm:$0xff]  ;;  %v4223_v35 = vpop.f32.mrb[51].mxu0  ;;  %v3564_v40 = vadd.f32 %v8293_v31, %v3238_v22  ;;  %v3449_v49 = vpop.f32.mrb[55].mxu1 }
 0x2a1   : > { %3193 = vst.msk [vmem:[#allocation3 + $0xd8] sm:$0xff] %vm1381_vm1, %v3161_v20  ;;  %3191 = vst.msk [vmem:[#allocation3 + $0xc8] sm:$0xff] %vm1381_vm1, %v3159_v58  ;;  %v3165_v18 = vadd.f32 %v8283_v14, %v2871_v43  ;;  %v2869_v46 = vld [vmem:[#allocation3 + $0xe8] sm:$0xff]  ;;  %v4055_v62 = vld [vmem:[#allocation3 + $0x10] sm:$0xff]  ;;  %v3562_v36 = vadd.f32 %v3449_v49, %v3236_v19  ;;  %v8326_v41 = vpop.f32.mrb[52].mxu0  ;;  %v8296_v21 = vpop.f32.mrb[56].mxu1 }
 0x2a2   : > { %3196 = vst.msk [vmem:[#allocation3 + $0xf0] sm:$0xff] %vm1381_vm1, %v3164_v11  ;;  %3194 = vst.msk [vmem:[#allocation3 + $0xe0] sm:$0xff] %vm1381_vm1, %v3162_v10  ;;  %v3163_v50 = vadd.f32 %v3122_v37, %v2869_v46  ;;  %v4349_v6 = vadd.f32 %v8322_v42, %v4055_v62  ;;  %v4053_v52 = vld [vmem:[#allocation3] sm:$0xff]  ;;  %v4236_v57 = vpop.f32.mrb[53].mxu0  ;;  %v3567_v15 = vadd.f32 %v8296_v21, %v3241_v53  ;;  %v3462_v51 = vpop.f32.mrb[57].mxu1  ;;  %v3249_v62 = vld [vmem:[#allocation3 + $0x90] sm:$0xff] }
 0x2a3   : > { %3197 = vst.msk [vmem:[#allocation3 + $0xf8] sm:$0xff] %vm1381_vm1, %v3165_v18  ;;  %3593 = vst.msk [vmem:[#allocation3 + $0x20] sm:$0xff] %vm1381_vm1, %v3561_v1  ;;  %v4347_v2 = vadd.f32 %v4220_v7, %v4053_v52  ;;  %v4056_v33 = vld [vmem:[#allocation3 + $0x18] sm:$0xff]  ;;  %v8327_v61 = vpop.f32.mrb[54].mxu0  ;;  %v3565_v9 = vadd.f32 %v3462_v51, %v3239_v60  ;;  %v8297_v4 = vpop.f32.mrb[58].mxu1  ;;  %v3243_v58 = vld [vmem:[#allocation3 + $0x60] sm:$0xff] }
 0x2a4   : > { %3195 = vst.msk [vmem:[#allocation3 + $0xe8] sm:$0xff] %vm1381_vm1, %v3163_v50  ;;  %4381 = vst.msk [vmem:[#allocation3 + $0x10] sm:$0xff] %vm1381_vm1, %v4349_v6  ;;  %v4350_v63 = vadd.f32 %v8323_v30, %v4056_v33  ;;  %v4054_v48 = vld [vmem:[#allocation3 + $0x8] sm:$0xff]  ;;  %v4239_v34 = vpop.f32.mrb[55].mxu0  ;;  %v3568_v59 = vadd.f32 %v8297_v4, %v3242_v28  ;;  %v3465_v38 = vpop.f32.mrb[59].mxu1  ;;  %v3250_v49 = vld [vmem:[#allocation3 + $0x98] sm:$0xff] }
 0x2a5   : > { %3596 = vst.msk [vmem:[#allocation3 + $0x38] sm:$0xff] %vm1381_vm1, %v3564_v40  ;;  %4379 = vst.msk [vmem:[#allocation3] sm:$0xff] %vm1381_vm1, %v4347_v2  ;;  %v4348_v45 = vadd.f32 %v4223_v35, %v4054_v48  ;;  %v4059_v0 = vld [vmem:[#allocation3 + $0x30] sm:$0xff]  ;;  %v3566_v44 = vadd.f32 %v3465_v38, %v3240_v47  ;;  %v3244_v50 = vld [vmem:[#allocation3 + $0x68] sm:$0xff] }
 0x2a6   : > { %3594 = vst.msk [vmem:[#allocation3 + $0x28] sm:$0xff] %vm1381_vm1, %v3562_v36  ;;  %4382 = vst.msk [vmem:[#allocation3 + $0x18] sm:$0xff] %vm1381_vm1, %v4350_v63  ;;  %v4353_v13 = vadd.f32 %v8326_v41, %v4059_v0  ;;  %v3247_v35 = vld [vmem:[#allocation3 + $0x80] sm:$0xff]  ;;  %v3253_v0 = vld [vmem:[#allocation3 + $0xb0] sm:$0xff] }
 0x2a7   : > { %4380 = vst.msk [vmem:[#allocation3 + $0x8] sm:$0xff] %vm1381_vm1, %v4348_v45  ;;  %3599 = vst.msk [vmem:[#allocation3 + $0x50] sm:$0xff] %vm1381_vm1, %v3567_v15  ;;  %v3248_v45 = vld [vmem:[#allocation3 + $0x88] sm:$0xff]  ;;  %v3254_v38 = vld [vmem:[#allocation3 + $0xb8] sm:$0xff] }
 0x2a8   : > { %3597 = vst.msk [vmem:[#allocation3 + $0x40] sm:$0xff] %vm1381_vm1, %v3565_v9  ;;  %4385 = vst.msk [vmem:[#allocation3 + $0x30] sm:$0xff] %vm1381_vm1, %v4353_v13  ;;  %v8300_v32 = vpop.f32.mrb[60].mxu1 }
 0x2a9   : > { %3600 = vst.msk [vmem:[#allocation3 + $0x58] sm:$0xff] %vm1381_vm1, %v3568_v59  ;;  %3598 = vst.msk [vmem:[#allocation3 + $0x48] sm:$0xff] %vm1381_vm1, %v3566_v44  ;;  %v8330_v25 = vpop.f32.mrb[56].mxu0  ;;  %v3571_v37 = vadd.f32 %v8300_v32, %v3245_v3  ;;  %v3478_v11 = vpop.f32.mrb[61].mxu1 }
 0x2aa   : > { %v4057_v24 = vld [vmem:[#allocation3 + $0x20] sm:$0xff]  ;;  %v4252_v17 = vpop.f32.mrb[57].mxu0  ;;  %v3569_v12 = vadd.f32 %v3478_v11, %v3243_v58  ;;  %v8301_v10 = vpop.f32.mrb[62].mxu1 }
 0x2ab   : > { %v4351_v23 = vadd.f32 %v4236_v57, %v4057_v24  ;;  %v8331_v43 = vpop.f32.mrb[58].mxu0  ;;  %3603 = vst.msk [vmem:[#allocation3 + $0x70] sm:$0xff] %vm1381_vm1, %v3571_v37  ;;  %v3572_v46 = vadd.f32 %v8301_v10, %v3246_v27  ;;  %v3481_v42 = vpop.f32.mrb[63].mxu1 }
 0x2ac   : > { %v4060_v14 = vld [vmem:[#allocation3 + $0x38] sm:$0xff]  ;;  %v4255_v56 = vpop.f32.mrb[59].mxu0  ;;  %3601 = vst.msk [vmem:[#allocation3 + $0x60] sm:$0xff] %vm1381_vm1, %v3569_v12  ;;  %v3570_v55 = vadd.f32 %v3481_v42, %v3244_v50  ;;  %v3257_v12 = vld [vmem:[#allocation3 + $0xd0] sm:$0xff] }
 0x2ad   : > { %v4354_v20 = vadd.f32 %v8327_v61, %v4060_v14  ;;  %v4058_v26 = vld [vmem:[#allocation3 + $0x28] sm:$0xff]  ;;  %4383 = vst.msk [vmem:[#allocation3 + $0x20] sm:$0xff] %vm1381_vm1, %v4351_v23  ;;  %3604 = vst.msk [vmem:[#allocation3 + $0x78] sm:$0xff] %vm1381_vm1, %v3572_v46 }
 0x2ae   : > { %v4352_v5 = vadd.f32 %v4239_v34, %v4058_v26  ;;  %v4063_v39 = vld [vmem:[#allocation3 + $0x50] sm:$0xff]  ;;  %3602 = vst.msk [vmem:[#allocation3 + $0x68] sm:$0xff] %vm1381_vm1, %v3570_v55  ;;  %v3251_v34 = vld [vmem:[#allocation3 + $0xa0] sm:$0xff] }
 0x2af   : > { %4386 = vst.msk [vmem:[#allocation3 + $0x38] sm:$0xff] %vm1381_vm1, %v4354_v20  ;;  %v4357_v8 = vadd.f32 %v8330_v25, %v4063_v39  ;;  %v4061_v18 = vld [vmem:[#allocation3 + $0x40] sm:$0xff] }
 0x2b0   : > { %4384 = vst.msk [vmem:[#allocation3 + $0x28] sm:$0xff] %vm1381_vm1, %v4352_v5  ;;  %v4355_v16 = vadd.f32 %v4252_v17, %v4061_v18  ;;  %v4064_v7 = vld [vmem:[#allocation3 + $0x58] sm:$0xff]  ;;  %v4062_v29 = vld [vmem:[#allocation3 + $0x48] sm:$0xff]  ;;  %v8304_v1 = vpop.f32.mrb[64].mxu1 }
 0x2b1   : > { %4389 = vst.msk [vmem:[#allocation3 + $0x50] sm:$0xff] %vm1381_vm1, %v4357_v8  ;;  %v4358_v54 = vadd.f32 %v8331_v43, %v4064_v7  ;;  %v4356_v30 = vadd.f32 %v4255_v56, %v4062_v29  ;;  %v8334_v22 = vpop.f32.mrb[60].mxu0  ;;  %v3575_v31 = vadd.f32 %v8304_v1, %v3249_v62  ;;  %v3494_v6 = vpop.f32.mrb[65].mxu1  ;;  %v3252_v5 = vld [vmem:[#allocation3 + $0xa8] sm:$0xff]  ;;  %v3255_v8 = vld [vmem:[#allocation3 + $0xc0] sm:$0xff]  ;;  %v3258_v56 = vld [vmem:[#allocation3 + $0xd8] sm:$0xff] }
 0x2b2   : > { %4387 = vst.msk [vmem:[#allocation3 + $0x40] sm:$0xff] %vm1381_vm1, %v4355_v16  ;;  %v4268_v52 = vpop.f32.mrb[61].mxu0  ;;  %v4067_v40 = vld [vmem:[#allocation3 + $0x70] sm:$0xff]  ;;  %v3573_v19 = vadd.f32 %v3494_v6, %v3247_v35  ;;  %v8305_v2 = vpop.f32.mrb[66].mxu1 }
 0x2b3   : > { %4390 = vst.msk [vmem:[#allocation3 + $0x58] sm:$0xff] %vm1381_vm1, %v4358_v54  ;;  %4388 = vst.msk [vmem:[#allocation3 + $0x48] sm:$0xff] %vm1381_vm1, %v4356_v30  ;;  %v8335_v33 = vpop.f32.mrb[62].mxu0  ;;  %v4361_v36 = vadd.f32 %v8334_v22, %v4067_v40  ;;  %v4065_v63 = vld [vmem:[#allocation3 + $0x60] sm:$0xff]  ;;  %v3576_v48 = vadd.f32 %v8305_v2, %v3250_v49  ;;  %v3497_v41 = vpop.f32.mrb[67].mxu1  ;;  %v3256_v30 = vld [vmem:[#allocation3 + $0xc8] sm:$0xff] }
 0x2b4   : > { %3607 = vst.msk [vmem:[#allocation3 + $0x90] sm:$0xff] %vm1381_vm1, %v3575_v31  ;;  %v4271_v53 = vpop.f32.mrb[63].mxu0  ;;  %3605 = vst.msk [vmem:[#allocation3 + $0x80] sm:$0xff] %vm1381_vm1, %v3573_v19  ;;  %v4359_v21 = vadd.f32 %v4268_v52, %v4065_v63  ;;  %v4068_v57 = vld [vmem:[#allocation3 + $0x78] sm:$0xff]  ;;  %v3574_v15 = vadd.f32 %v3497_v41, %v3248_v45  ;;  %v3261_v19 = vld [vmem:[#allocation3 + $0xf0] sm:$0xff] }
 0x2b5   : > { %4393 = vst.msk [vmem:[#allocation3 + $0x70] sm:$0xff] %vm1381_vm1, %v4361_v36  ;;  %3608 = vst.msk [vmem:[#allocation3 + $0x98] sm:$0xff] %vm1381_vm1, %v3576_v48  ;;  %v4362_v60 = vadd.f32 %v8335_v33, %v4068_v57  ;;  %v4066_v51 = vld [vmem:[#allocation3 + $0x68] sm:$0xff]  ;;  %v3259_v33 = vld [vmem:[#allocation3 + $0xe0] sm:$0xff] }
 0x2b6   : > { %4391 = vst.msk [vmem:[#allocation3 + $0x60] sm:$0xff] %vm1381_vm1, %v4359_v21  ;;  %3606 = vst.msk [vmem:[#allocation3 + $0x88] sm:$0xff] %vm1381_vm1, %v3574_v15  ;;  %v4360_v61 = vadd.f32 %v4271_v53, %v4066_v51  ;;  %v3262_v41 = vld [vmem:[#allocation3 + $0xf8] sm:$0xff]  ;;  %v3260_v51 = vld [vmem:[#allocation3 + $0xe8] sm:$0xff] }
 0x2b7   : > { %4394 = vst.msk [vmem:[#allocation3 + $0x78] sm:$0xff] %vm1381_vm1, %v4362_v60 }
 0x2b8   : > { %4392 = vst.msk [vmem:[#allocation3 + $0x68] sm:$0xff] %vm1381_vm1, %v4360_v61  ;;  %v8308_v9 = vpop.f32.mrb[68].mxu1 }
 0x2b9   : > { %v8338_v28 = vpop.f32.mrb[64].mxu0  ;;  %v3579_v4 = vadd.f32 %v8308_v9, %v3253_v0  ;;  %v3510_v13 = vpop.f32.mrb[69].mxu1 }
 0x2ba   : > { %v4284_v24 = vpop.f32.mrb[65].mxu0  ;;  %v3577_v47 = vadd.f32 %v3510_v13, %v3251_v34  ;;  %v8309_v23 = vpop.f32.mrb[70].mxu1 }
 0x2bb   : > { %v4071_v59 = vld [vmem:[#allocation3 + $0x90] sm:$0xff]  ;;  %v8339_v14 = vpop.f32.mrb[66].mxu0  ;;  %3611 = vst.msk [vmem:[#allocation3 + $0xb0] sm:$0xff] %vm1381_vm1, %v3579_v4  ;;  %v4069_v20 = vld [vmem:[#allocation3 + $0x80] sm:$0xff]  ;;  %v3580_v26 = vadd.f32 %v8309_v23, %v3254_v38  ;;  %v3513_v3 = vpop.f32.mrb[71].mxu1 }
 0x2bc   : > { %v4365_v44 = vadd.f32 %v8338_v28, %v4071_v59  ;;  %v4287_v32 = vpop.f32.mrb[67].mxu0  ;;  %3609 = vst.msk [vmem:[#allocation3 + $0xa0] sm:$0xff] %vm1381_vm1, %v3577_v47  ;;  %v4363_v25 = vadd.f32 %v4284_v24, %v4069_v20  ;;  %v4072_v37 = vld [vmem:[#allocation3 + $0x98] sm:$0xff]  ;;  %v3578_v58 = vadd.f32 %v3513_v3, %v3252_v5  ;;  %v4621_v38 = vld [vmem:[#allocation3 + $0x10] sm:$0xff] }
 0x2bd   : > { %3612 = vst.msk [vmem:[#allocation3 + $0xb8] sm:$0xff] %vm1381_vm1, %v3580_v26  ;;  %v4366_v11 = vadd.f32 %v8339_v14, %v4072_v37  ;;  %v4070_v17 = vld [vmem:[#allocation3 + $0x88] sm:$0xff]  ;;  %v4619_v26 = vld [vmem:[#allocation3] sm:$0xff] }
 0x2be   : > { %4397 = vst.msk [vmem:[#allocation3 + $0x90] sm:$0xff] %vm1381_vm1, %v4365_v44  ;;  %4395 = vst.msk [vmem:[#allocation3 + $0x80] sm:$0xff] %vm1381_vm1, %v4363_v25  ;;  %v4364_v39 = vadd.f32 %v4287_v32, %v4070_v17 }
 0x2bf   : > { %3610 = vst.msk [vmem:[#allocation3 + $0xa8] sm:$0xff] %vm1381_vm1, %v3578_v58  ;;  %4398 = vst.msk [vmem:[#allocation3 + $0x98] sm:$0xff] %vm1381_vm1, %v4366_v11  ;;  %v4622_v58 = vld [vmem:[#allocation3 + $0x18] sm:$0xff] }
 0x2c0   : > { %4396 = vst.msk [vmem:[#allocation3 + $0x88] sm:$0xff] %vm1381_vm1, %v4364_v39  ;;  %v8312_v27 = vpop.f32.mrb[72].mxu1 }
 0x2c1   : > { %v8342_v10 = vpop.f32.mrb[68].mxu0  ;;  %v3583_v43 = vadd.f32 %v8312_v27, %v3257_v12  ;;  %v3526_v18 = vpop.f32.mrb[73].mxu1 }
 0x2c2   : > { %v4300_v46 = vpop.f32.mrb[69].mxu0  ;;  %v4075_v50 = vld [vmem:[#allocation3 + $0xb0] sm:$0xff]  ;;  %v3581_v42 = vadd.f32 %v3526_v18, %v3255_v8  ;;  %v8313_v16 = vpop.f32.mrb[74].mxu1 }
 0x2c3   : > { %v8343_v7 = vpop.f32.mrb[70].mxu0  ;;  %3615 = vst.msk [vmem:[#allocation3 + $0xd0] sm:$0xff] %vm1381_vm1, %v3583_v43  ;;  %v4369_v55 = vadd.f32 %v8342_v10, %v4075_v50  ;;  %v4073_v54 = vld [vmem:[#allocation3 + $0xa0] sm:$0xff]  ;;  %v3584_v29 = vadd.f32 %v8313_v16, %v3258_v56  ;;  %v3529_v62 = vpop.f32.mrb[75].mxu1  ;;  %v4620_v10 = vld [vmem:[#allocation3 + $0x8] sm:$0xff] }
 0x2c4   : > { %v4303_v1 = vpop.f32.mrb[71].mxu0  ;;  %3613 = vst.msk [vmem:[#allocation3 + $0xc0] sm:$0xff] %vm1381_vm1, %v3581_v42  ;;  %v4367_v22 = vadd.f32 %v4300_v46, %v4073_v54  ;;  %v4076_v31 = vld [vmem:[#allocation3 + $0xb8] sm:$0xff]  ;;  %v3582_v35 = vadd.f32 %v3529_v62, %v3256_v30  ;;  %v4625_v42 = vld [vmem:[#allocation3 + $0x30] sm:$0xff] }
 0x2c5   : > { %4401 = vst.msk [vmem:[#allocation3 + $0xb0] sm:$0xff] %vm1381_vm1, %v4369_v55  ;;  %3616 = vst.msk [vmem:[#allocation3 + $0xd8] sm:$0xff] %vm1381_vm1, %v3584_v29  ;;  %v4370_v6 = vadd.f32 %v8343_v7, %v4076_v31  ;;  %v4623_v55 = vld [vmem:[#allocation3 + $0x20] sm:$0xff] }
 0x2c6   : > { %v4074_v52 = vld [vmem:[#allocation3 + $0xa8] sm:$0xff]  ;;  %4399 = vst.msk [vmem:[#allocation3 + $0xa0] sm:$0xff] %vm1381_vm1, %v4367_v22  ;;  %3614 = vst.msk [vmem:[#allocation3 + $0xc8] sm:$0xff] %vm1381_vm1, %v3582_v35 }
 0x2c7   : > { %v4368_v40 = vadd.f32 %v4303_v1, %v4074_v52  ;;  %4402 = vst.msk [vmem:[#allocation3 + $0xb8] sm:$0xff] %vm1381_vm1, %v4370_v6  ;;  %v4626_v1 = vld [vmem:[#allocation3 + $0x38] sm:$0xff] }
 0x2c8   : > { %v8316_v49 = vpop.f32.mrb[76].mxu1 }
 0x2c9   : > { %4400 = vst.msk [vmem:[#allocation3 + $0xa8] sm:$0xff] %vm1381_vm1, %v4368_v40  ;;  %v3587_v2 = vadd.f32 %v8316_v49, %v3261_v19  ;;  %v3542_v36 = vpop.f32.mrb[77].mxu1  ;;  %v4624_v40 = vld [vmem:[#allocation3 + $0x28] sm:$0xff] }
 0x2ca   : > { %v4079_v63 = vld [vmem:[#allocation3 + $0xd0] sm:$0xff]  ;;  %v8346_v48 = vpop.f32.mrb[72].mxu0  ;;  %v3585_v45 = vadd.f32 %v3542_v36, %v3259_v33  ;;  %v8317_v53 = vpop.f32.mrb[78].mxu1 }
 0x2cb   : > { %3619 = vst.msk [vmem:[#allocation3 + $0xf0] sm:$0xff] %vm1381_vm1, %v3587_v2  ;;  %v4373_v21 = vadd.f32 %v8346_v48, %v4079_v63  ;;  %v4077_v57 = vld [vmem:[#allocation3 + $0xc0] sm:$0xff]  ;;  %v4316_v15 = vpop.f32.mrb[73].mxu0  ;;  %v3588_v60 = vadd.f32 %v8317_v53, %v3262_v41  ;;  %v3545_v61 = vpop.f32.mrb[79].mxu1  ;;  %v4629_v41 = vld [vmem:[#allocation3 + $0x50] sm:$0xff] }
 0x2cc   : > { %3617 = vst.msk [vmem:[#allocation3 + $0xe0] sm:$0xff] %vm1381_vm1, %v3585_v45  ;;  %v4371_v0 = vadd.f32 %v4316_v15, %v4077_v57  ;;  %v4080_v9 = vld [vmem:[#allocation3 + $0xd8] sm:$0xff]  ;;  %v8347_v28 = vpop.f32.mrb[74].mxu0  ;;  %v3586_v4 = vadd.f32 %v3545_v61, %v3260_v51  ;;  %v4627_v15 = vld [vmem:[#allocation3 + $0x40] sm:$0xff] }
 0x2cd   : > { %4405 = vst.msk [vmem:[#allocation3 + $0xd0] sm:$0xff] %vm1381_vm1, %v4373_v21  ;;  %3620 = vst.msk [vmem:[#allocation3 + $0xf8] sm:$0xff] %vm1381_vm1, %v3588_v60  ;;  %v4374_v34 = vadd.f32 %v8347_v28, %v4080_v9  ;;  %v4078_v13 = vld [vmem:[#allocation3 + $0xc8] sm:$0xff]  ;;  %v4319_v24 = vpop.f32.mrb[75].mxu0  ;;  %v4630_v9 = vld [vmem:[#allocation3 + $0x58] sm:$0xff] }
 0x2ce   : > { %4403 = vst.msk [vmem:[#allocation3 + $0xc0] sm:$0xff] %vm1381_vm1, %v4371_v0  ;;  %3618 = vst.msk [vmem:[#allocation3 + $0xe8] sm:$0xff] %vm1381_vm1, %v3586_v4  ;;  %v4372_v59 = vadd.f32 %v4319_v24, %v4078_v13 }
 0x2cf   : > { %4406 = vst.msk [vmem:[#allocation3 + $0xd8] sm:$0xff] %vm1381_vm1, %v4374_v34 }
 0x2d0   : > { %4404 = vst.msk [vmem:[#allocation3 + $0xc8] sm:$0xff] %vm1381_vm1, %v4372_v59  ;;  %v4628_v59 = vld [vmem:[#allocation3 + $0x48] sm:$0xff] }
 0x2d2   : > { %v4083_v47 = vld [vmem:[#allocation3 + $0xf0] sm:$0xff] }
 0x2d3   : > { %v4081_v14 = vld [vmem:[#allocation3 + $0xe0] sm:$0xff] }
 0x2d4   : > { %v8356_v23 = vpop.f32.mrb[80].mxu1  ;;  %v4084_v3 = vld [vmem:[#allocation3 + $0xf8] sm:$0xff] }
 0x2d5   : > { %v8350_v44 = vpop.f32.mrb[76].mxu0  ;;  %v4915_v20 = vadd.f32 %v8356_v23, %v4621_v38  ;;  %v4786_v5 = vpop.f32.mrb[81].mxu1  ;;  %v4082_v17 = vld [vmem:[#allocation3 + $0xe8] sm:$0xff] }
 0x2d6   : > { %v4377_v32 = vadd.f32 %v8350_v44, %v4083_v47  ;;  %v4332_v25 = vpop.f32.mrb[77].mxu0  ;;  %v4913_v37 = vadd.f32 %v4786_v5, %v4619_v26  ;;  %v8357_v11 = vpop.f32.mrb[82].mxu1 }
 0x2d7   : > { %4947 = vst.msk [vmem:[#allocation3 + $0x10] sm:$0xff] %vm1381_vm1, %v4915_v20  ;;  %v4375_v39 = vadd.f32 %v4332_v25, %v4081_v14  ;;  %v8351_v12 = vpop.f32.mrb[78].mxu0  ;;  %v4916_v27 = vadd.f32 %v8357_v11, %v4622_v58  ;;  %v4789_v43 = vpop.f32.mrb[83].mxu1  ;;  %v4631_v58 = vld [vmem:[#allocation3 + $0x60] sm:$0xff] }
 0x2d8   : > { %4409 = vst.msk [vmem:[#allocation3 + $0xf0] sm:$0xff] %vm1381_vm1, %v4377_v32  ;;  %4945 = vst.msk [vmem:[#allocation3] sm:$0xff] %vm1381_vm1, %v4913_v37  ;;  %v4378_v8 = vadd.f32 %v8351_v12, %v4084_v3  ;;  %v4335_v18 = vpop.f32.mrb[79].mxu0  ;;  %v4914_v46 = vadd.f32 %v4789_v43, %v4620_v10  ;;  %v4633_v3 = vld [vmem:[#allocation3 + $0x70] sm:$0xff] }
 0x2d9   : > { %4407 = vst.msk [vmem:[#allocation3 + $0xe0] sm:$0xff] %vm1381_vm1, %v4375_v39  ;;  %4948 = vst.msk [vmem:[#allocation3 + $0x18] sm:$0xff] %vm1381_vm1, %v4916_v27  ;;  %v4376_v50 = vadd.f32 %v4335_v18, %v4082_v17  ;;  %v4634_v27 = vld [vmem:[#allocation3 + $0x78] sm:$0xff] }
 0x2da   : > { %4410 = vst.msk [vmem:[#allocation3 + $0xf8] sm:$0xff] %vm1381_vm1, %v4378_v8  ;;  %4946 = vst.msk [vmem:[#allocation3 + $0x8] sm:$0xff] %vm1381_vm1, %v4914_v46 }
 0x2db   : > { %4408 = vst.msk [vmem:[#allocation3 + $0xe8] sm:$0xff] %vm1381_vm1, %v4376_v50  ;;  %v4632_v50 = vld [vmem:[#allocation3 + $0x68] sm:$0xff] }
 0x2dc   : > { %v8360_v56 = vpop.f32.mrb[84].mxu1 }
 0x2dd   : > { %v4919_v16 = vadd.f32 %v8360_v56, %v4625_v42  ;;  %v8390_v7 = vpop.f32.mrb[80].mxu0  ;;  %v4802_v54 = vpop.f32.mrb[85].mxu1 }
 0x2de   : > { %v5012_v29 = vld [vmem:[#allocation3 + $0x10] sm:$0xff]  ;;  %v4917_v30 = vadd.f32 %v4802_v54, %v4623_v55  ;;  %v5209_v62 = vpop.f32.mrb[81].mxu0  ;;  %v8361_v22 = vpop.f32.mrb[86].mxu1 }
 0x2df   : > { %4951 = vst.msk [vmem:[#allocation3 + $0x30] sm:$0xff] %vm1381_vm1, %v4919_v16  ;;  %v5338_v31 = vadd.f32 %v8390_v7, %v5012_v29  ;;  %v5010_v35 = vld [vmem:[#allocation3] sm:$0xff]  ;;  %v4920_v6 = vadd.f32 %v8361_v22, %v4626_v1  ;;  %v8391_v52 = vpop.f32.mrb[82].mxu0  ;;  %v4805_v19 = vpop.f32.mrb[87].mxu1 }
 0x2e0   : > { %4949 = vst.msk [vmem:[#allocation3 + $0x20] sm:$0xff] %vm1381_vm1, %v4917_v30  ;;  %v5336_v49 = vadd.f32 %v5209_v62, %v5010_v35  ;;  %v5013_v2 = vld [vmem:[#allocation3 + $0x18] sm:$0xff]  ;;  %v4918_v33 = vadd.f32 %v4805_v19, %v4624_v40  ;;  %v5212_v36 = vpop.f32.mrb[83].mxu0  ;;  %v4637_v62 = vld [vmem:[#allocation3 + $0x90] sm:$0xff]  ;;  %v4635_v35 = vld [vmem:[#allocation3 + $0x80] sm:$0xff] }
 0x2e1   : > { %5370 = vst.msk [vmem:[#allocation3 + $0x10] sm:$0xff] %vm1381_vm1, %v5338_v31  ;;  %4952 = vst.msk [vmem:[#allocation3 + $0x38] sm:$0xff] %vm1381_vm1, %v4920_v6  ;;  %v5339_v63 = vadd.f32 %v8391_v52, %v5013_v2  ;;  %v5011_v48 = vld [vmem:[#allocation3 + $0x8] sm:$0xff] }
 0x2e2   : > { %5368 = vst.msk [vmem:[#allocation3] sm:$0xff] %vm1381_vm1, %v5336_v49  ;;  %4950 = vst.msk [vmem:[#allocation3 + $0x28] sm:$0xff] %vm1381_vm1, %v4918_v33  ;;  %v5337_v45 = vadd.f32 %v5212_v36, %v5011_v48  ;;  %v4638_v49 = vld [vmem:[#allocation3 + $0x98] sm:$0xff] }
 0x2e3   : > { %5371 = vst.msk [vmem:[#allocation3 + $0x18] sm:$0xff] %vm1381_vm1, %v5339_v63 }
 0x2e4   : > { %5369 = vst.msk [vmem:[#allocation3 + $0x8] sm:$0xff] %vm1381_vm1, %v5337_v45  ;;  %v8364_v53 = vpop.f32.mrb[88].mxu1  ;;  %v4636_v45 = vld [vmem:[#allocation3 + $0x88] sm:$0xff] }
 0x2e5   : > { %v4923_v21 = vadd.f32 %v8364_v53, %v4629_v41  ;;  %v8394_v57 = vpop.f32.mrb[84].mxu0  ;;  %v4818_v60 = vpop.f32.mrb[89].mxu1 }
 0x2e6   : > { %v5016_v51 = vld [vmem:[#allocation3 + $0x30] sm:$0xff]  ;;  %v4921_v61 = vadd.f32 %v4818_v60, %v4627_v15  ;;  %v5225_v0 = vpop.f32.mrb[85].mxu0  ;;  %v8365_v28 = vpop.f32.mrb[90].mxu1 }
 0x2e7   : > { %4955 = vst.msk [vmem:[#allocation3 + $0x50] sm:$0xff] %vm1381_vm1, %v4923_v21  ;;  %v5342_v4 = vadd.f32 %v8394_v57, %v5016_v51  ;;  %v5014_v34 = vld [vmem:[#allocation3 + $0x20] sm:$0xff]  ;;  %v4924_v13 = vadd.f32 %v8365_v28, %v4630_v9  ;;  %v8395_v24 = vpop.f32.mrb[86].mxu0  ;;  %v4821_v47 = vpop.f32.mrb[91].mxu1 }
 0x2e8   : > { %4953 = vst.msk [vmem:[#allocation3 + $0x40] sm:$0xff] %vm1381_vm1, %v4921_v61  ;;  %v5340_v38 = vadd.f32 %v5225_v0, %v5014_v34  ;;  %v5017_v23 = vld [vmem:[#allocation3 + $0x38] sm:$0xff]  ;;  %v4922_v14 = vadd.f32 %v4821_v47, %v4628_v59  ;;  %v5228_v44 = vpop.f32.mrb[87].mxu0  ;;  %v4641_v0 = vld [vmem:[#allocation3 + $0xb0] sm:$0xff]  ;;  %v4639_v34 = vld [vmem:[#allocation3 + $0xa0] sm:$0xff] }
 0x2e9   : > { %5374 = vst.msk [vmem:[#allocation3 + $0x30] sm:$0xff] %vm1381_vm1, %v5342_v4  ;;  %4956 = vst.msk [vmem:[#allocation3 + $0x58] sm:$0xff] %vm1381_vm1, %v4924_v13  ;;  %v5343_v20 = vadd.f32 %v8395_v24, %v5017_v23  ;;  %v5015_v26 = vld [vmem:[#allocation3 + $0x28] sm:$0xff] }
 0x2ea   : > { %5372 = vst.msk [vmem:[#allocation3 + $0x20] sm:$0xff] %vm1381_vm1, %v5340_v38  ;;  %4954 = vst.msk [vmem:[#allocation3 + $0x48] sm:$0xff] %vm1381_vm1, %v4922_v14  ;;  %v5341_v5 = vadd.f32 %v5228_v44, %v5015_v26  ;;  %v4642_v38 = vld [vmem:[#allocation3 + $0xb8] sm:$0xff] }
 0x2eb   : > { %5375 = vst.msk [vmem:[#allocation3 + $0x38] sm:$0xff] %vm1381_vm1, %v5343_v20 }
 0x2ec   : > { %5373 = vst.msk [vmem:[#allocation3 + $0x28] sm:$0xff] %vm1381_vm1, %v5341_v5  ;;  %v8368_v32 = vpop.f32.mrb[92].mxu1  ;;  %v4640_v5 = vld [vmem:[#allocation3 + $0xa8] sm:$0xff] }
 0x2ed   : > { %v4927_v25 = vadd.f32 %v8368_v32, %v4633_v3  ;;  %v8398_v37 = vpop.f32.mrb[88].mxu0  ;;  %v4834_v11 = vpop.f32.mrb[93].mxu1 }
 0x2ee   : > { %v5020_v17 = vld [vmem:[#allocation3 + $0x50] sm:$0xff]  ;;  %v4925_v39 = vadd.f32 %v4834_v11, %v4631_v58  ;;  %v5241_v12 = vpop.f32.mrb[89].mxu0  ;;  %v8369_v10 = vpop.f32.mrb[94].mxu1 }
 0x2ef   : > { %4959 = vst.msk [vmem:[#allocation3 + $0x70] sm:$0xff] %vm1381_vm1, %v4927_v25  ;;  %v5346_v43 = vadd.f32 %v8398_v37, %v5020_v17  ;;  %v5018_v8 = vld [vmem:[#allocation3 + $0x40] sm:$0xff]  ;;  %v4928_v18 = vadd.f32 %v8369_v10, %v4634_v27  ;;  %v8399_v46 = vpop.f32.mrb[90].mxu0  ;;  %v4837_v42 = vpop.f32.mrb[95].mxu1 }
 0x2f0   : > { %4957 = vst.msk [vmem:[#allocation3 + $0x60] sm:$0xff] %vm1381_vm1, %v4925_v39  ;;  %v5344_v56 = vadd.f32 %v5241_v12, %v5018_v8  ;;  %v5021_v16 = vld [vmem:[#allocation3 + $0x58] sm:$0xff]  ;;  %v4926_v7 = vadd.f32 %v4837_v42, %v4632_v50  ;;  %v5244_v55 = vpop.f32.mrb[91].mxu0  ;;  %v4645_v12 = vld [vmem:[#allocation3 + $0xd0] sm:$0xff]  ;;  %v4643_v8 = vld [vmem:[#allocation3 + $0xc0] sm:$0xff] }
 0x2f1   : > { %5378 = vst.msk [vmem:[#allocation3 + $0x50] sm:$0xff] %vm1381_vm1, %v5346_v43  ;;  %4960 = vst.msk [vmem:[#allocation3 + $0x78] sm:$0xff] %vm1381_vm1, %v4928_v18  ;;  %v5347_v54 = vadd.f32 %v8399_v46, %v5021_v16  ;;  %v5019_v29 = vld [vmem:[#allocation3 + $0x48] sm:$0xff] }
 0x2f2   : > { %5376 = vst.msk [vmem:[#allocation3 + $0x40] sm:$0xff] %vm1381_vm1, %v5344_v56  ;;  %4958 = vst.msk [vmem:[#allocation3 + $0x68] sm:$0xff] %vm1381_vm1, %v4926_v7  ;;  %v5345_v30 = vadd.f32 %v5244_v55, %v5019_v29  ;;  %v4646_v56 = vld [vmem:[#allocation3 + $0xd8] sm:$0xff] }
 0x2f3   : > { %5379 = vst.msk [vmem:[#allocation3 + $0x58] sm:$0xff] %vm1381_vm1, %v5347_v54 }
 0x2f4   : > { %5377 = vst.msk [vmem:[#allocation3 + $0x48] sm:$0xff] %vm1381_vm1, %v5345_v30  ;;  %v8372_v1 = vpop.f32.mrb[96].mxu1  ;;  %v4644_v30 = vld [vmem:[#allocation3 + $0xc8] sm:$0xff] }
 0x2f5   : > { %v4931_v22 = vadd.f32 %v8372_v1, %v4637_v62  ;;  %v8402_v31 = vpop.f32.mrb[92].mxu0  ;;  %v4850_v6 = vpop.f32.mrb[97].mxu1 }
 0x2f6   : > { %v5024_v52 = vld [vmem:[#allocation3 + $0x70] sm:$0xff]  ;;  %v4929_v40 = vadd.f32 %v4850_v6, %v4635_v35  ;;  %v5257_v19 = vpop.f32.mrb[93].mxu0  ;;  %v8373_v2 = vpop.f32.mrb[98].mxu1 }
 0x2f7   : > { %4963 = vst.msk [vmem:[#allocation3 + $0x90] sm:$0xff] %vm1381_vm1, %v4931_v22  ;;  %v5350_v33 = vadd.f32 %v8402_v31, %v5024_v52  ;;  %v5022_v36 = vld [vmem:[#allocation3 + $0x60] sm:$0xff]  ;;  %v4932_v63 = vadd.f32 %v8373_v2, %v4638_v49  ;;  %v8403_v48 = vpop.f32.mrb[94].mxu0  ;;  %v4853_v41 = vpop.f32.mrb[99].mxu1 }
 0x2f8   : > { %4961 = vst.msk [vmem:[#allocation3 + $0x80] sm:$0xff] %vm1381_vm1, %v4929_v40  ;;  %v5348_v53 = vadd.f32 %v5257_v19, %v5022_v36  ;;  %v5025_v21 = vld [vmem:[#allocation3 + $0x78] sm:$0xff]  ;;  %v4930_v57 = vadd.f32 %v4853_v41, %v4636_v45  ;;  %v5260_v15 = vpop.f32.mrb[95].mxu0  ;;  %v4649_v19 = vld [vmem:[#allocation3 + $0xf0] sm:$0xff]  ;;  %v4647_v36 = vld [vmem:[#allocation3 + $0xe0] sm:$0xff] }
 0x2f9   : > { %5382 = vst.msk [vmem:[#allocation3 + $0x70] sm:$0xff] %vm1381_vm1, %v5350_v33  ;;  %4964 = vst.msk [vmem:[#allocation3 + $0x98] sm:$0xff] %vm1381_vm1, %v4932_v63  ;;  %v5351_v60 = vadd.f32 %v8403_v48, %v5025_v21  ;;  %v5023_v51 = vld [vmem:[#allocation3 + $0x68] sm:$0xff] }
 0x2fa   : > { %5380 = vst.msk [vmem:[#allocation3 + $0x60] sm:$0xff] %vm1381_vm1, %v5348_v53  ;;  %4962 = vst.msk [vmem:[#allocation3 + $0x88] sm:$0xff] %vm1381_vm1, %v4930_v57  ;;  %v5349_v61 = vadd.f32 %v5260_v15, %v5023_v51  ;;  %v4650_v53 = vld [vmem:[#allocation3 + $0xf8] sm:$0xff] }
 0x2fb   : > { %5383 = vst.msk [vmem:[#allocation3 + $0x78] sm:$0xff] %vm1381_vm1, %v5351_v60 }
 0x2fc   : > { %5381 = vst.msk [vmem:[#allocation3 + $0x68] sm:$0xff] %vm1381_vm1, %v5349_v61  ;;  %v8376_v9 = vpop.f32.mrb[100].mxu1  ;;  %v4648_v61 = vld [vmem:[#allocation3 + $0xe8] sm:$0xff] }
 0x2fd   : > { %v4935_v28 = vadd.f32 %v8376_v9, %v4641_v0  ;;  %v4866_v13 = vpop.f32.mrb[101].mxu1 }
 0x2fe   : > { %v5028_v24 = vld [vmem:[#allocation3 + $0x90] sm:$0xff]  ;;  %v4933_v59 = vadd.f32 %v4866_v13, %v4639_v34  ;;  %v8377_v23 = vpop.f32.mrb[102].mxu1 }
 0x2ff   : > { %4967 = vst.msk [vmem:[#allocation3 + $0xb0] sm:$0xff] %vm1381_vm1, %v4935_v28  ;;  %v5026_v44 = vld [vmem:[#allocation3 + $0x80] sm:$0xff]  ;;  %v4936_v20 = vadd.f32 %v8377_v23, %v4642_v38  ;;  %v4869_v3 = vpop.f32.mrb[103].mxu1 }
 0x300   : > { %v8406_v4 = vpop.f32.mrb[96].mxu0  ;;  %4965 = vst.msk [vmem:[#allocation3 + $0xa0] sm:$0xff] %vm1381_vm1, %v4933_v59  ;;  %v5029_v25 = vld [vmem:[#allocation3 + $0x98] sm:$0xff]  ;;  %v4934_v37 = vadd.f32 %v4869_v3, %v4640_v5 }
 0x301   : > { %v5273_v47 = vpop.f32.mrb[97].mxu0  ;;  %v5354_v14 = vadd.f32 %v8406_v4, %v5028_v24  ;;  %4968 = vst.msk [vmem:[#allocation3 + $0xb8] sm:$0xff] %vm1381_vm1, %v4936_v20  ;;  %v5027_v17 = vld [vmem:[#allocation3 + $0x88] sm:$0xff] }
 0x302   : > { %v8407_v26 = vpop.f32.mrb[98].mxu0  ;;  %v5352_v32 = vadd.f32 %v5273_v47, %v5026_v44  ;;  %4966 = vst.msk [vmem:[#allocation3 + $0xa8] sm:$0xff] %vm1381_vm1, %v4934_v37  ;;  %v5834_v47 = vld [vmem:[#allocation3 + $0x10] sm:$0xff]  ;;  %v5832_v44 = vld [vmem:[#allocation3] sm:$0xff] }
 0x303   : > { %v5276_v58 = vpop.f32.mrb[99].mxu0  ;;  %5386 = vst.msk [vmem:[#allocation3 + $0x90] sm:$0xff] %vm1381_vm1, %v5354_v14  ;;  %v5355_v11 = vadd.f32 %v8407_v26, %v5029_v25 }
 0x304   : > { %5384 = vst.msk [vmem:[#allocation3 + $0x80] sm:$0xff] %vm1381_vm1, %v5352_v32  ;;  %v5353_v39 = vadd.f32 %v5276_v58, %v5027_v17  ;;  %v5835_v32 = vld [vmem:[#allocation3 + $0x18] sm:$0xff] }
 0x305   : > { %5387 = vst.msk [vmem:[#allocation3 + $0x98] sm:$0xff] %vm1381_vm1, %v5355_v11  ;;  %v8380_v27 = vpop.f32.mrb[104].mxu1 }
 0x306   : > { %5385 = vst.msk [vmem:[#allocation3 + $0x88] sm:$0xff] %vm1381_vm1, %v5353_v39  ;;  %v4939_v10 = vadd.f32 %v8380_v27, %v4645_v12  ;;  %v4882_v18 = vpop.f32.mrb[105].mxu1  ;;  %v5032_v46 = vld [vmem:[#allocation3 + $0xb0] sm:$0xff]  ;;  %v5833_v39 = vld [vmem:[#allocation3 + $0x8] sm:$0xff] }
 0x307   : > { %v4937_v50 = vadd.f32 %v4882_v18, %v4643_v8  ;;  %v8381_v16 = vpop.f32.mrb[106].mxu1  ;;  %v5030_v55 = vld [vmem:[#allocation3 + $0xa0] sm:$0xff] }
 0x308   : > { %4971 = vst.msk [vmem:[#allocation3 + $0xd0] sm:$0xff] %vm1381_vm1, %v4939_v10  ;;  %v4940_v54 = vadd.f32 %v8381_v16, %v4646_v56  ;;  %v4885_v62 = vpop.f32.mrb[107].mxu1  ;;  %v5033_v22 = vld [vmem:[#allocation3 + $0xb8] sm:$0xff] }
 0x309   : > { %v8410_v43 = vpop.f32.mrb[100].mxu0  ;;  %4969 = vst.msk [vmem:[#allocation3 + $0xc0] sm:$0xff] %vm1381_vm1, %v4937_v50  ;;  %v4938_v31 = vadd.f32 %v4885_v62, %v4644_v30  ;;  %v5031_v52 = vld [vmem:[#allocation3 + $0xa8] sm:$0xff] }
 0x30a   : > { %v5289_v42 = vpop.f32.mrb[101].mxu0  ;;  %v5358_v7 = vadd.f32 %v8410_v43, %v5032_v46  ;;  %4972 = vst.msk [vmem:[#allocation3 + $0xd8] sm:$0xff] %vm1381_vm1, %v4940_v54 }
 0x30b   : > { %v8411_v29 = vpop.f32.mrb[102].mxu0  ;;  %v5356_v1 = vadd.f32 %v5289_v42, %v5030_v55  ;;  %4970 = vst.msk [vmem:[#allocation3 + $0xc8] sm:$0xff] %vm1381_vm1, %v4938_v31  ;;  %v5838_v42 = vld [vmem:[#allocation3 + $0x30] sm:$0xff]  ;;  %v5836_v55 = vld [vmem:[#allocation3 + $0x20] sm:$0xff] }
 0x30c   : > { %v5292_v35 = vpop.f32.mrb[103].mxu0  ;;  %5390 = vst.msk [vmem:[#allocation3 + $0xb0] sm:$0xff] %vm1381_vm1, %v5358_v7  ;;  %v5359_v6 = vadd.f32 %v8411_v29, %v5033_v22 }
 0x30d   : > { %5388 = vst.msk [vmem:[#allocation3 + $0xa0] sm:$0xff] %vm1381_vm1, %v5356_v1  ;;  %v5357_v40 = vadd.f32 %v5292_v35, %v5031_v52  ;;  %v5839_v1 = vld [vmem:[#allocation3 + $0x38] sm:$0xff] }
 0x30e   : > { %5391 = vst.msk [vmem:[#allocation3 + $0xb8] sm:$0xff] %vm1381_vm1, %v5359_v6  ;;  %v8384_v49 = vpop.f32.mrb[108].mxu1 }
 0x30f   : > { %5389 = vst.msk [vmem:[#allocation3 + $0xa8] sm:$0xff] %vm1381_vm1, %v5357_v40  ;;  %v4943_v2 = vadd.f32 %v8384_v49, %v4649_v19  ;;  %v4898_v63 = vpop.f32.mrb[109].mxu1  ;;  %v5036_v48 = vld [vmem:[#allocation3 + $0xd0] sm:$0xff]  ;;  %v5837_v40 = vld [vmem:[#allocation3 + $0x28] sm:$0xff] }
 0x310   : > { %v4941_v45 = vadd.f32 %v4898_v63, %v4647_v36  ;;  %v8385_v21 = vpop.f32.mrb[110].mxu1  ;;  %v5034_v15 = vld [vmem:[#allocation3 + $0xc0] sm:$0xff] }
 0x311   : > { %4975 = vst.msk [vmem:[#allocation3 + $0xf0] sm:$0xff] %vm1381_vm1, %v4943_v2  ;;  %v4944_v60 = vadd.f32 %v8385_v21, %v4650_v53  ;;  %v4901_v0 = vpop.f32.mrb[111].mxu1  ;;  %v5037_v28 = vld [vmem:[#allocation3 + $0xd8] sm:$0xff] }
 0x312   : > { %v8414_v33 = vpop.f32.mrb[104].mxu0  ;;  %4973 = vst.msk [vmem:[#allocation3 + $0xe0] sm:$0xff] %vm1381_vm1, %v4941_v45  ;;  %v4942_v4 = vadd.f32 %v4901_v0, %v4648_v61  ;;  %v5035_v24 = vld [vmem:[#allocation3 + $0xc8] sm:$0xff] }
 0x313   : > { %v5305_v41 = vpop.f32.mrb[105].mxu0  ;;  %v5362_v57 = vadd.f32 %v8414_v33, %v5036_v48  ;;  %4976 = vst.msk [vmem:[#allocation3 + $0xf8] sm:$0xff] %vm1381_vm1, %v4944_v60 }
 0x314   : > { %v8415_v51 = vpop.f32.mrb[106].mxu0  ;;  %v5360_v9 = vadd.f32 %v5305_v41, %v5034_v15  ;;  %4974 = vst.msk [vmem:[#allocation3 + $0xe8] sm:$0xff] %vm1381_vm1, %v4942_v4  ;;  %v5842_v41 = vld [vmem:[#allocation3 + $0x50] sm:$0xff]  ;;  %v5840_v15 = vld [vmem:[#allocation3 + $0x40] sm:$0xff] }
 0x315   : > { %v5308_v34 = vpop.f32.mrb[107].mxu0  ;;  %5394 = vst.msk [vmem:[#allocation3 + $0xd0] sm:$0xff] %vm1381_vm1, %v5362_v57  ;;  %v5363_v13 = vadd.f32 %v8415_v51, %v5037_v28  ;;  %v10771_v51 = vld [vmem:[#allocation9] ss:$0 sm:$0xff]  ;;  %v5843_v28 = vld [vmem:[#allocation3 + $0x58] sm:$0xff] }
 0x316   : > { %5392 = vst.msk [vmem:[#allocation3 + $0xc0] sm:$0xff] %vm1381_vm1, %v5360_v9  ;;  %v5361_v59 = vadd.f32 %v5308_v34, %v5035_v24  ;;  %v8424_v38 = vpop.f32.mrb[112].mxu1 }
 0x317   : > { %5395 = vst.msk [vmem:[#allocation3 + $0xd8] sm:$0xff] %vm1381_vm1, %v5363_v13  ;;  %v6128_v14 = vadd.f32 %v8424_v38, %v5834_v47  ;;  %v5999_v20 = vpop.f32.mrb[113].mxu1  ;;  %v5841_v47 = vld [vmem:[#allocation3 + $0x48] sm:$0xff] }
 0x318   : > { %5393 = vst.msk [vmem:[#allocation3 + $0xc8] sm:$0xff] %vm1381_vm1, %v5361_v59  ;;  %v5040_v26 = vld [vmem:[#allocation3 + $0xf0] sm:$0xff]  ;;  %v6126_v3 = vadd.f32 %v5999_v20, %v5832_v44  ;;  %v8425_v25 = vpop.f32.mrb[114].mxu1 }
 0x319   : > { %6160 = vst.msk [vmem:[#allocation3 + $0x10] sm:$0xff] %vm1381_vm1, %v6128_v14  ;;  %v5038_v58 = vld [vmem:[#allocation3 + $0xe0] sm:$0xff]  ;;  %v6129_v17 = vadd.f32 %v8425_v25, %v5835_v32  ;;  %v6002_v12 = vpop.f32.mrb[115].mxu1  ;;  %v10774_v14 = vld [vmem:[#allocation10] ss:$0 sm:$0xff] }
 0x31a   : > { %v8418_v23 = vpop.f32.mrb[108].mxu0  ;;  %6158 = vst.msk [vmem:[#allocation3] sm:$0xff] %vm1381_vm1, %v6126_v3  ;;  %v5041_v10 = vld [vmem:[#allocation3 + $0xf8] sm:$0xff]  ;;  %v6127_v8 = vadd.f32 %v6002_v12, %v5833_v39 }
 0x31b   : > { %v5321_v5 = vpop.f32.mrb[109].mxu0  ;;  %v5366_v37 = vadd.f32 %v8418_v23, %v5040_v26  ;;  %6161 = vst.msk [vmem:[#allocation3 + $0x18] sm:$0xff] %vm1381_vm1, %v6129_v17  ;;  %v5039_v46 = vld [vmem:[#allocation3 + $0xe8] sm:$0xff] }
 0x31c   : > { %v8419_v11 = vpop.f32.mrb[110].mxu0  ;;  %v5364_v27 = vadd.f32 %v5321_v5, %v5038_v58  ;;  %6159 = vst.msk [vmem:[#allocation3 + $0x8] sm:$0xff] %vm1381_vm1, %v6127_v8  ;;  %v5846_v8 = vld [vmem:[#allocation3 + $0x70] sm:$0xff] }
 0x31d   : > { %v5324_v43 = vpop.f32.mrb[111].mxu0  ;;  %5398 = vst.msk [vmem:[#allocation3 + $0xf0] sm:$0xff] %vm1381_vm1, %v5366_v37  ;;  %v5367_v18 = vadd.f32 %v8419_v11, %v5041_v10 }
 0x31e   : > { %5396 = vst.msk [vmem:[#allocation3 + $0xe0] sm:$0xff] %vm1381_vm1, %v5364_v27  ;;  %v5365_v50 = vadd.f32 %v5324_v43, %v5039_v46  ;;  %v8428_v56 = vpop.f32.mrb[116].mxu1 }
 0x31f   : > { %5399 = vst.msk [vmem:[#allocation3 + $0xf8] sm:$0xff] %vm1381_vm1, %v5367_v18  ;;  %v6132_v16 = vadd.f32 %v8428_v56, %v5838_v42  ;;  %v6015_v54 = vpop.f32.mrb[117].mxu1 }
 0x320   : > { %5397 = vst.msk [vmem:[#allocation3 + $0xe8] sm:$0xff] %vm1381_vm1, %v5365_v50  ;;  %v6400_v29 = vld [vmem:[#allocation3 + $0x10] sm:$0xff]  ;;  %v6130_v30 = vadd.f32 %v6015_v54, %v5836_v55  ;;  %v8429_v22 = vpop.f32.mrb[118].mxu1 }
 0x321   : > { %6164 = vst.msk [vmem:[#allocation3 + $0x30] sm:$0xff] %vm1381_vm1, %v6132_v16  ;;  %v6398_v35 = vld [vmem:[#allocation3] sm:$0xff]  ;;  %v6133_v6 = vadd.f32 %v8429_v22, %v5839_v1  ;;  %v6018_v19 = vpop.f32.mrb[119].mxu1  ;;  %v5847_v1 = vld [vmem:[#allocation3 + $0x78] sm:$0xff] }
 0x322   : > { %v8458_v7 = vpop.f32.mrb[112].mxu0  ;;  %6162 = vst.msk [vmem:[#allocation3 + $0x20] sm:$0xff] %vm1381_vm1, %v6130_v30  ;;  %v6401_v2 = vld [vmem:[#allocation3 + $0x18] sm:$0xff]  ;;  %v6131_v33 = vadd.f32 %v6018_v19, %v5837_v40  ;;  %v5844_v16 = vld [vmem:[#allocation3 + $0x60] sm:$0xff] }
 0x323   : > { %v6565_v62 = vpop.f32.mrb[113].mxu0  ;;  %v6694_v31 = vadd.f32 %v8458_v7, %v6400_v29  ;;  %6165 = vst.msk [vmem:[#allocation3 + $0x38] sm:$0xff] %vm1381_vm1, %v6133_v6  ;;  %v6399_v48 = vld [vmem:[#allocation3 + $0x8] sm:$0xff] }
 0x324   : > { %v8459_v52 = vpop.f32.mrb[114].mxu0  ;;  %v6692_v49 = vadd.f32 %v6565_v62, %v6398_v35  ;;  %6163 = vst.msk [vmem:[#allocation3 + $0x28] sm:$0xff] %vm1381_vm1, %v6131_v33 }
 0x325   : > { %v6568_v36 = vpop.f32.mrb[115].mxu0  ;;  %6726 = vst.msk [vmem:[#allocation3 + $0x10] sm:$0xff] %vm1381_vm1, %v6694_v31  ;;  %v6695_v63 = vadd.f32 %v8459_v52, %v6401_v2 }
 0x326   : > { %6724 = vst.msk [vmem:[#allocation3] sm:$0xff] %vm1381_vm1, %v6692_v49  ;;  %v6693_v45 = vadd.f32 %v6568_v36, %v6399_v48  ;;  %v8432_v53 = vpop.f32.mrb[120].mxu1  ;;  %v5845_v49 = vld [vmem:[#allocation3 + $0x68] sm:$0xff] }
 0x327   : > { %6727 = vst.msk [vmem:[#allocation3 + $0x18] sm:$0xff] %vm1381_vm1, %v6695_v63  ;;  %v6136_v21 = vadd.f32 %v8432_v53, %v5842_v41  ;;  %v6031_v60 = vpop.f32.mrb[121].mxu1 }
 0x328   : > { %6725 = vst.msk [vmem:[#allocation3 + $0x8] sm:$0xff] %vm1381_vm1, %v6693_v45  ;;  %v6404_v61 = vld [vmem:[#allocation3 + $0x30] sm:$0xff]  ;;  %v6134_v0 = vadd.f32 %v6031_v60, %v5840_v15  ;;  %v8433_v4 = vpop.f32.mrb[122].mxu1 }
 0x329   : > { %6168 = vst.msk [vmem:[#allocation3 + $0x50] sm:$0xff] %vm1381_vm1, %v6136_v21  ;;  %v6402_v13 = vld [vmem:[#allocation3 + $0x20] sm:$0xff]  ;;  %v6137_v24 = vadd.f32 %v8433_v4, %v5843_v28  ;;  %v6034_v38 = vpop.f32.mrb[123].mxu1 }
 0x32a   : > { %v8462_v57 = vpop.f32.mrb[116].mxu0  ;;  %6166 = vst.msk [vmem:[#allocation3 + $0x40] sm:$0xff] %vm1381_vm1, %v6134_v0  ;;  %v6405_v20 = vld [vmem:[#allocation3 + $0x38] sm:$0xff]  ;;  %v6135_v26 = vadd.f32 %v6034_v38, %v5841_v47 }
 0x32b   : > { %v6581_v9 = vpop.f32.mrb[117].mxu0  ;;  %v6698_v34 = vadd.f32 %v8462_v57, %v6404_v61  ;;  %6169 = vst.msk [vmem:[#allocation3 + $0x58] sm:$0xff] %vm1381_vm1, %v6137_v24  ;;  %v6403_v37 = vld [vmem:[#allocation3 + $0x28] sm:$0xff]  ;;  %v7362_v61 = vld [vmem:[#allocation2 + $0x18] sm:$0xf] }
 0x32c   : > { %v8463_v59 = vpop.f32.mrb[118].mxu0  ;;  %v6758_v23 = vld [vmem:[#allocation3 + $0x10] sm:$0xff]  ;;  %v6696_v44 = vadd.f32 %v6581_v9, %v6402_v13  ;;  %6167 = vst.msk [vmem:[#allocation3 + $0x48] sm:$0xff] %vm1381_vm1, %v6135_v26 }
 0x32d   : > { %v6584_v5 = vpop.f32.mrb[119].mxu0  ;;  %v6797_v3 = vmul.f32 %v10771_v51, %v6758_v23  ;;  %v6756_v32 = vld [vmem:[#allocation3] sm:$0xff]  ;;  %6730 = vst.msk [vmem:[#allocation3 + $0x30] sm:$0xff] %vm1381_vm1, %v6698_v34  ;;  %v6699_v25 = vadd.f32 %v8463_v59, %v6405_v20  ;;  %v7352_v13 = vld [vmem:[#allocation2 + $0xc] sm:$0xf] }
 0x32e   : > { %v6795_v58 = vmul.f32 %v10771_v51, %v6756_v32  ;;  %v6759_v11 = vld [vmem:[#allocation3 + $0x18] sm:$0xff]  ;;  %6728 = vst.msk [vmem:[#allocation3 + $0x20] sm:$0xff] %vm1381_vm1, %v6696_v44  ;;  %v6697_v17 = vadd.f32 %v6584_v5, %v6403_v37  ;;  %v7366_v44 = vld [vmem:[#allocation2 + $0x20] sm:$0x1] }
 0x32f   : > { %v6836_v39 = vadd.f32 %v10774_v14, %v6797_v3  ;;  %v6798_v12 = vmul.f32 %v10771_v51, %v6759_v11  ;;  %v6757_v27 = vld [vmem:[#allocation3 + $0x8] sm:$0xff]  ;;  %6731 = vst.msk [vmem:[#allocation3 + $0x38] sm:$0xff] %vm1381_vm1, %v6699_v25  ;;  %v8436_v18 = vpop.f32.mrb[124].mxu1 }
 0x330   : > { %v6834_v10 = vadd.f32 %v10774_v14, %v6795_v58  ;;  %v6796_v43 = vmul.f32 %v10771_v51, %v6757_v27  ;;  %6729 = vst.msk [vmem:[#allocation3 + $0x28] sm:$0xff] %vm1381_vm1, %v6697_v17  ;;  %v6140_v42 = vadd.f32 %v8436_v18, %v5846_v8  ;;  %v6047_v7 = vpop.f32.mrb[125].mxu1  ;;  %v6408_v29 = vld [vmem:[#allocation3 + $0x50] sm:$0xff] }
 0x331   : > { %v6868_v46 = vmax.f32 %v6836_v39, 0.0  ;;  %v6837_v50 = vadd.f32 %v10774_v14, %v6798_v12  ;;  %v6138_v30 = vadd.f32 %v6047_v7, %v5844_v16  ;;  %v8437_v22 = vpop.f32.mrb[126].mxu1  ;;  %v6406_v52 = vld [vmem:[#allocation3 + $0x40] sm:$0xff]  ;;  %v7359_v16 = vld [vmem:[#allocation2 + $0x14] sm:$0x1] }
 0x332   : > { %v8466_v56 = vpop.f32.mrb[120].mxu0  ;;  %v6866_v55 = vmax.f32 %v6834_v10, 0.0  ;;  %v6835_v54 = vadd.f32 %v10774_v14, %v6796_v43  ;;  %6172 = vst.msk [vmem:[#allocation3 + $0x70] sm:$0xff] %vm1381_vm1, %v6140_v42  ;;  %v6141_v40 = vadd.f32 %v8437_v22, %v5847_v1  ;;  %v6050_v2 = vpop.f32.mrb[127].mxu1 }
 0x333   : > { %v6597_v62 = vpop.f32.mrb[121].mxu0  ;;  %6900 = vst.msk [vmem:[%s9178_s29 + $0x10] sm:$0xff] %vm1381_vm1, %v6868_v46  ;;  %v7999_v31 = vpack.c.bf16 %v6868_v46, %v6868_v46  ;;  %v6869_v35 = vmax.f32 %v6837_v50, 0.0  ;;  %v6702_v6 = vadd.f32 %v8466_v56, %v6408_v29  ;;  %6170 = vst.msk [vmem:[#allocation3 + $0x60] sm:$0xff] %vm1381_vm1, %v6138_v30  ;;  %v6139_v45 = vadd.f32 %v6050_v2, %v5845_v49 }
 0x334   : > { %v10794_v19 = vpop.f32.mrb[122].mxu0  ;;  %6898 = vst.msk [vmem:[%s9178_s29] sm:$0xff] %vm1381_vm1, %v6866_v55  ;;  %v7997_v33 = vpack.c.bf16 %v6866_v55, %v6866_v55  ;;  %v6867_v36 = vmax.f32 %v6835_v54, 0.0  ;;  %v6762_v63 = vld [vmem:[#allocation3 + $0x30] sm:$0xff]  ;;  %v6700_v48 = vadd.f32 %v6597_v62, %v6406_v52  ;;  %6173 = vst.msk [vmem:[#allocation3 + $0x78] sm:$0xff] %vm1381_vm1, %v6141_v40 }
 0x335   : > { %v10799_v41 = vpop.f32.mrb[123].mxu0  ;;  %v7047_v53 = vshrl.u32 %v7999_v31, 16  ;;  %v7050_v21 = vshll.u32 %v7999_v31, 16  ;;  %6901 = vst.msk [vmem:[%s9178_s29 + $0x18] sm:$0xff] %vm1381_vm1, %v6869_v35  ;;  %v8000_v57 = vpack.c.bf16 %v6869_v35, %v6869_v35  ;;  %v6801_v15 = vmul.f32 %v10771_v51, %v6762_v63  ;;  %v6760_v60 = vld [vmem:[#allocation3 + $0x20] sm:$0xff]  ;;  %6734 = vst.msk [vmem:[#allocation3 + $0x50] sm:$0xff] %vm1381_vm1, %v6702_v6 }
 0x336   : > { %v7030_v0 = vshrl.u32 %v7997_v33, 16  ;;  %v7033_v9 = vshll.u32 %v7997_v33, 16  ;;  %6899 = vst.msk [vmem:[%s9178_s29 + $0x8] sm:$0xff] %vm1381_vm1, %v6867_v36  ;;  %v7998_v28 = vpack.c.bf16 %v6867_v36, %v6867_v36  ;;  %v6799_v4 = vmul.f32 %v10771_v51, %v6760_v60  ;;  %6732 = vst.msk [vmem:[#allocation3 + $0x40] sm:$0xff] %vm1381_vm1, %v6700_v48  ;;  %v6763_v22 = vld [vmem:[#allocation3 + $0x38] sm:$0xff]  ;;  %v6407_v63 = vld [vmem:[#allocation3 + $0x48] sm:$0xff] }
 0x337   : > { %6171 = vst.msk [vmem:[#allocation3 + $0x68] sm:$0xff] %vm1381_vm1, %v6139_v45  ;;  %v7049_v34 = vrot.slane %v7047_v53, 7  ;;  %v7055_v24 = vshrl.u32 %v8000_v57, 16  ;;  %v7058_v59 = vshll.u32 %v8000_v57, 16  ;;  %v6840_v47 = vadd.f32 %v10774_v14, %v6801_v15  ;;  %v6761_v31 = vld [vmem:[#allocation3 + $0x28] sm:$0xff]  ;;  %v6409_v36 = vld [vmem:[#allocation3 + $0x58] sm:$0xff] }
 0x338   : > { %v7032_v23 = vrot.slane %v7030_v0, 7  ;;  %v7038_v20 = vshrl.u32 %v7998_v28, 16  ;;  %v7041_v26 = vshll.u32 %v7998_v28, 16  ;;  %v6838_v5 = vadd.f32 %v10774_v14, %v6799_v4  ;;  %v7376_v0 = vld [vmem:[#allocation2 + $0x30] sm:$0xf] }
 0x339   : > { %v7052_v32 = vor.u32 %v7050_v21, %v7049_v34  ;;  %v7053_v25 = vrot.slane %v7049_v34, 4  ;;  %v7057_v58 = vrot.slane %v7055_v24, 7  ;;  %v6872_v11 = vmax.f32 %v6840_v47, 0.0 }
 0x33a   : > { %v7035_v12 = vor.u32 %v7033_v9, %v7032_v23  ;;  %v7036_v27 = vrot.slane %v7032_v23, 4  ;;  %v7040_v43 = vrot.slane %v7038_v20, 7  ;;  %v6870_v8 = vmax.f32 %v6838_v5, 0.0 }
 0x33b   : > { %v7363_v50 = vsel %vm10814_vm13, %v7052_v32, %v7362_v61  ;;  %v7060_v42 = vor.u32 %v7058_v59, %v7057_v58  ;;  %v7062_v56 = vrot.slane %v7057_v58, 4  ;;  %6904 = vst.msk [vmem:[%s9178_s29 + $0x30] sm:$0xff] %vm1381_vm1, %v6872_v11  ;;  %v8003_v7 = vpack.c.bf16 %v6872_v11, %v6872_v11  ;;  %v7369_v59 = vld [vmem:[#allocation2 + $0x24] sm:$0xf]  ;;  %v6410_v32 = vld [vmem:[#allocation3 + $0x60] sm:$0xff] }
 0x33c   : > { %7364 = vst [vmem:[#allocation2 + $0x18] sm:$0xf] %v7363_v50  ;;  %v7353_v29 = vsel %vm10814_vm13, %v7035_v12, %v7352_v13  ;;  %v7043_v30 = vor.u32 %v7041_v26, %v7040_v43  ;;  %v7045_v62 = vrot.slane %v7040_v43, 4  ;;  %6902 = vst.msk [vmem:[%s9178_s29 + $0x20] sm:$0xff] %vm1381_vm1, %v6870_v8  ;;  %v8001_v1 = vpack.c.bf16 %v6870_v8, %v6870_v8  ;;  %v6766_v35 = vld [vmem:[#allocation3 + $0x50] sm:$0xff] }
 0x33d   : > { %v10827_v17 = vpop.f32.mrb[124].mxu0  ;;  %7354 = vst [vmem:[#allocation2 + $0xc] sm:$0xf] %v7353_v29  ;;  %v7061_v52 = vsel %vm10823_vm14, %v7053_v25, %v7060_v42  ;;  %v7367_v40 = vsel %vm10833_vm15, %v7062_v56, %v7366_v44  ;;  %v7081_v49 = vshrl.u32 %v8003_v7, 16  ;;  %v7084_v2 = vshll.u32 %v8003_v7, 16  ;;  %v6764_v33 = vld [vmem:[#allocation3 + $0x40] sm:$0xff] }
 0x33e   : > { %v10819_v3 = vpop.f32.mrb[128].mxu1  ;;  %v10837_v18 = vpop.f32.mrb[125].mxu0  ;;  %7365 = vst.msk [vmem:[#allocation2 + $0x1c] sm:$0xf] %vm7349_vm8, %v7061_v52  ;;  %7368 = vst [vmem:[#allocation2 + $0x20] sm:$0x1] %v7367_v40  ;;  %v7044_v48 = vsel %vm10823_vm14, %v7036_v27, %v7043_v30  ;;  %v7360_v45 = vsel %vm10833_vm15, %v7045_v62, %v7359_v16  ;;  %v6802_v15 = vmul.f32 %v10771_v51, %v6763_v22 }
 0x33f   : > { %v10829_v39 = vpop.f32.mrb[129].mxu1  ;;  %v10845_v55 = vpop.f32.mrb[126].mxu0  ;;  %v7064_v53 = vshrl.u32 %v8001_v1, 16  ;;  %v7067_v21 = vshll.u32 %v8001_v1, 16  ;;  %7356 = vst.msk [vmem:[#allocation2 + $0x10] sm:$0xf] %vm7349_vm8, %v7044_v48  ;;  %v6800_v60 = vmul.f32 %v10771_v51, %v6761_v31  ;;  %v6805_v61 = vmul.f32 %v10771_v51, %v6766_v35 }
 0x340   : > { %v10839_v46 = vpop.f32.mrb[130].mxu1  ;;  %v10853_v6 = vpop.f32.mrb[127].mxu0  ;;  %7361 = vst [vmem:[#allocation2 + $0x14] sm:$0x1] %v7360_v45  ;;  %v10865_v57 = vrot.slane %v7081_v49, 7  ;;  %v6803_v28 = vmul.f32 %v10771_v51, %v6764_v33  ;;  %v6703_v4 = vadd.f32 %v10794_v19, %v6409_v36  ;;  %v6701_v34 = vadd.f32 %v10799_v41, %v6407_v63  ;;  %v6412_v44 = vld [vmem:[#allocation3 + $0x70] sm:$0xff] }
 0x341   : > { %v10847_v54 = vpop.f32.mrb[131].mxu1  ;;  %v10870_v9 = vrot.slane %v7064_v53, 7  ;;  %v6841_v47 = vadd.f32 %v10774_v14, %v6802_v15  ;;  %v6839_v23 = vadd.f32 %v10774_v14, %v6800_v60  ;;  %v6844_v5 = vadd.f32 %v10774_v14, %v6805_v61  ;;  %v5850_v41 = vld [vmem:[#allocation3 + $0x90] sm:$0xff]  ;;  %v6413_v27 = vld [vmem:[#allocation3 + $0x78] sm:$0xff]  ;;  %v5848_v16 = vld [vmem:[#allocation3 + $0x80] sm:$0xff] }
 0x342   : > { %v7086_v13 = vor.u32 %v7084_v2, %v10865_v57  ;;  %v7087_v24 = vrot.slane %v10865_v57, 4  ;;  %v6842_v19 = vadd.f32 %v10774_v14, %v6803_v28  ;;  %6735 = vst.msk [vmem:[#allocation3 + $0x58] sm:$0xff] %vm1381_vm1, %v6703_v4  ;;  %6733 = vst.msk [vmem:[#allocation3 + $0x48] sm:$0xff] %vm1381_vm1, %v6701_v34  ;;  %v6144_v12 = vadd.f32 %v10819_v3, %v5850_v41 }
 0x343   : > { %v7069_v20 = vor.u32 %v7067_v21, %v10870_v9  ;;  %v7070_v26 = vrot.slane %v10870_v9, 4  ;;  %v6873_v58 = vmax.f32 %v6841_v47, 0.0  ;;  %v6871_v11 = vmax.f32 %v6839_v23, 0.0 }
 0x344   : > { %v7377_v25 = vsel %vm10814_vm13, %v7086_v13, %v7376_v0  ;;  %v6876_v50 = vmax.f32 %v6844_v5, 0.0  ;;  %v6874_v42 = vmax.f32 %v6842_v19, 0.0  ;;  %v6706_v56 = vadd.f32 %v10827_v17, %v6412_v44  ;;  %6176 = vst.msk [vmem:[#allocation3 + $0x90] sm:$0xff] %vm1381_vm1, %v6144_v12  ;;  %v5851_v17 = vld [vmem:[#allocation3 + $0x98] sm:$0xff]  ;;  %v7380_v13 = vld [vmem:[#allocation2 + $0x38] sm:$0x1] }
 0x345   : > { %7378 = vst [vmem:[#allocation2 + $0x30] sm:$0xf] %v7377_v25  ;;  %v7370_v8 = vsel %vm10814_vm13, %v7069_v20, %v7369_v59  ;;  %6905 = vst.msk [vmem:[%s9178_s29 + $0x38] sm:$0xff] %vm1381_vm1, %v6873_v58  ;;  %v8004_v3 = vpack.c.bf16 %v6873_v58, %v6873_v58  ;;  %v8002_v30 = vpack.c.bf16 %v6871_v11, %v6871_v11  ;;  %v7373_v59 = vld [vmem:[#allocation2 + $0x2c] sm:$0x1] }
 0x346   : > { %7371 = vst [vmem:[#allocation2 + $0x24] sm:$0xf] %v7370_v8  ;;  %6903 = vst.msk [vmem:[%s9178_s29 + $0x28] sm:$0xff] %vm1381_vm1, %v6871_v11  ;;  %v6142_v62 = vadd.f32 %v10829_v39, %v5848_v16  ;;  %v6704_v1 = vadd.f32 %v10837_v18, %v6410_v32  ;;  %v8007_v35 = vpack.c.bf16 %v6876_v50, %v6876_v50  ;;  %v6411_v39 = vld [vmem:[#allocation3 + $0x68] sm:$0xff]  ;;  %v7390_v25 = vld [vmem:[#allocation2 + $0x48] sm:$0xf] }
 0x347   : > { %6908 = vst.msk [vmem:[%s9178_s29 + $0x50] sm:$0xff] %vm1381_vm1, %v6876_v50  ;;  %6906 = vst.msk [vmem:[%s9178_s29 + $0x40] sm:$0xff] %vm1381_vm1, %v6874_v42  ;;  %v8005_v52 = vpack.c.bf16 %v6874_v42, %v6874_v42  ;;  %v6145_v40 = vadd.f32 %v10839_v46, %v5851_v17  ;;  %v6707_v49 = vadd.f32 %v10845_v55, %v6413_v27  ;;  %v7089_v33 = vshrl.u32 %v8004_v3, 16  ;;  %v5849_v55 = vld [vmem:[#allocation3 + $0x88] sm:$0xff]  ;;  %v7383_v58 = vld [vmem:[#allocation2 + $0x3c] sm:$0xf] }
 0x348   : > { %6738 = vst.msk [vmem:[#allocation3 + $0x70] sm:$0xff] %vm1381_vm1, %v6706_v56  ;;  %v7092_v36 = vshll.u32 %v8004_v3, 16  ;;  %v7072_v63 = vshrl.u32 %v8002_v30, 16  ;;  %v7075_v48 = vshll.u32 %v8002_v30, 16  ;;  %6174 = vst.msk [vmem:[#allocation3 + $0x80] sm:$0xff] %vm1381_vm1, %v6142_v62  ;;  %v7115_v53 = vshrl.u32 %v8007_v35, 16 }
 0x349   : > { %6736 = vst.msk [vmem:[#allocation3 + $0x60] sm:$0xff] %vm1381_vm1, %v6704_v1  ;;  %v7118_v21 = vshll.u32 %v8007_v35, 16  ;;  %v7098_v46 = vshrl.u32 %v8005_v52, 16  ;;  %v7101_v15 = vshll.u32 %v8005_v52, 16  ;;  %6177 = vst.msk [vmem:[#allocation3 + $0x98] sm:$0xff] %vm1381_vm1, %v6145_v40  ;;  %v7091_v60 = vrot.slane %v7089_v33, 7 }
 0x34a   : > { %6739 = vst.msk [vmem:[#allocation3 + $0x78] sm:$0xff] %vm1381_vm1, %v6707_v49  ;;  %v7074_v61 = vrot.slane %v7072_v63, 7  ;;  %v6767_v0 = vld [vmem:[#allocation3 + $0x58] sm:$0xff]  ;;  %v6765_v28 = vld [vmem:[#allocation3 + $0x48] sm:$0xff]  ;;  %v6143_v4 = vadd.f32 %v10847_v54, %v5849_v55  ;;  %v6705_v34 = vadd.f32 %v10853_v6, %v6411_v39  ;;  %v10927_v47 = vrot.slane %v7115_v53, 7  ;;  %v5854_v30 = vld [vmem:[#allocation3 + $0xb0] sm:$0xff] }
 0x34b   : > { %v10888_v43 = vpop.f32.mrb[128].mxu0  ;;  %v10893_v7 = vpop.f32.mrb[132].mxu1  ;;  %v10929_v23 = vrot.slane %v7098_v46, 7  ;;  %v6806_v44 = vmul.f32 %v10771_v51, %v6767_v0  ;;  %v6804_v20 = vmul.f32 %v10771_v51, %v6765_v28  ;;  %v7094_v5 = vor.u32 %v7092_v36, %v7091_v60  ;;  %v6416_v27 = vld [vmem:[#allocation3 + $0x90] sm:$0xff]  ;;  %v5852_v49 = vld [vmem:[#allocation3 + $0xa0] sm:$0xff]  ;;  %v5855_v53 = vld [vmem:[#allocation3 + $0xb8] sm:$0xff] }
 0x34c   : > { %v10895_v29 = vpop.f32.mrb[129].mxu0  ;;  %v10904_v22 = vpop.f32.mrb[133].mxu1  ;;  %v7096_v19 = vrot.slane %v7091_v60, 4  ;;  %v7077_v41 = vor.u32 %v7075_v48, %v7074_v61  ;;  %v7079_v32 = vrot.slane %v7074_v61, 4  ;;  %6175 = vst.msk [vmem:[#allocation3 + $0x88] sm:$0xff] %vm1381_vm1, %v6143_v4  ;;  %6737 = vst.msk [vmem:[#allocation3 + $0x68] sm:$0xff] %vm1381_vm1, %v6705_v34  ;;  %v7120_v54 = vor.u32 %v7118_v21, %v10927_v47 }
 0x34d   : > { %v10906_v31 = vpop.f32.mrb[130].mxu0  ;;  %v10915_v2 = vpop.f32.mrb[134].mxu1  ;;  %v7121_v6 = vrot.slane %v10927_v47, 4  ;;  %v7103_v11 = vor.u32 %v7101_v15, %v10929_v23  ;;  %v7104_v12 = vrot.slane %v10929_v23, 4  ;;  %v7095_v8 = vsel %vm10823_vm14, %v7087_v24, %v7094_v5  ;;  %v5853_v28 = vld [vmem:[#allocation3 + $0xa8] sm:$0xff] }
 0x34e   : > { %v10917_v18 = vpop.f32.mrb[131].mxu0  ;;  %v10921_v45 = vpop.f32.mrb[135].mxu1  ;;  %v7381_v50 = vsel %vm10833_vm15, %v7096_v19, %v7380_v13  ;;  %v7078_v42 = vsel %vm10823_vm14, %v7070_v26, %v7077_v41  ;;  %v7374_v56 = vsel %vm10833_vm15, %v7079_v32, %v7373_v59  ;;  %7379 = vst.msk [vmem:[#allocation2 + $0x34] sm:$0xf] %vm7349_vm8, %v7095_v8  ;;  %v7391_v57 = vsel %vm10814_vm13, %v7120_v54, %v7390_v25  ;;  %v5858_v8 = vld [vmem:[#allocation3 + $0xd0] sm:$0xff] }
 0x34f   : > { %v6770_v16 = vld [vmem:[#allocation3 + $0x70] sm:$0xff]  ;;  %7382 = vst [vmem:[#allocation2 + $0x38] sm:$0x1] %v7381_v50  ;;  %7372 = vst.msk [vmem:[#allocation2 + $0x28] sm:$0xf] %vm7349_vm8, %v7078_v42  ;;  %v7384_v24 = vsel %vm10814_vm13, %v7103_v11, %v7383_v58  ;;  %v6845_v9 = vadd.f32 %v10774_v14, %v6806_v44  ;;  %v6843_v26 = vadd.f32 %v10774_v14, %v6804_v20  ;;  %v6414_v62 = vld [vmem:[#allocation3 + $0x80] sm:$0xff] }
 0x350   : > { %7375 = vst [vmem:[#allocation2 + $0x2c] sm:$0x1] %v7374_v56  ;;  %v6768_v3 = vld [vmem:[#allocation3 + $0x60] sm:$0xff]  ;;  %7392 = vst [vmem:[#allocation2 + $0x48] sm:$0xf] %v7391_v57  ;;  %v6809_v1 = vmul.f32 %v10771_v51, %v6770_v16  ;;  %v6148_v52 = vadd.f32 %v10893_v7, %v5854_v30  ;;  %v6710_v40 = vadd.f32 %v10888_v43, %v6416_v27  ;;  %v6417_v39 = vld [vmem:[#allocation3 + $0x98] sm:$0xff] }
 0x351   : > { %7385 = vst [vmem:[#allocation2 + $0x3c] sm:$0xf] %v7384_v24  ;;  %v6807_v17 = vmul.f32 %v10771_v51, %v6768_v3  ;;  %v6771_v35 = vld [vmem:[#allocation3 + $0x78] sm:$0xff]  ;;  %v6877_v33 = vmax.f32 %v6845_v9, 0.0  ;;  %v6875_v36 = vmax.f32 %v6843_v26, 0.0  ;;  %v6146_v48 = vadd.f32 %v10904_v22, %v5852_v49 }
 0x352   : > { %v6810_v63 = vmul.f32 %v10771_v51, %v6771_v35  ;;  %v6848_v21 = vadd.f32 %v10774_v14, %v6809_v1  ;;  %6180 = vst.msk [vmem:[#allocation3 + $0xb0] sm:$0xff] %vm1381_vm1, %v6148_v52  ;;  %6742 = vst.msk [vmem:[#allocation3 + $0x90] sm:$0xff] %vm1381_vm1, %v6710_v40  ;;  %v6708_v43 = vadd.f32 %v10895_v29, %v6414_v62  ;;  %v7394_v56 = vld [vmem:[#allocation2 + $0x50] sm:$0x1]  ;;  %v7387_v9 = vld [vmem:[#allocation2 + $0x44] sm:$0x1] }
 0x353   : > { %v6846_v46 = vadd.f32 %v10774_v14, %v6807_v17  ;;  %v6149_v7 = vadd.f32 %v10915_v2, %v5855_v53  ;;  %6909 = vst.msk [vmem:[%s9178_s29 + $0x58] sm:$0xff] %vm1381_vm1, %v6877_v33  ;;  %v8008_v55 = vpack.c.bf16 %v6877_v33, %v6877_v33  ;;  %6907 = vst.msk [vmem:[%s9178_s29 + $0x48] sm:$0xff] %vm1381_vm1, %v6875_v36  ;;  %v6769_v61 = vld [vmem:[#allocation3 + $0x68] sm:$0xff] }
 0x354   : > { %v8006_v22 = vpack.c.bf16 %v6875_v36, %v6875_v36  ;;  %v6849_v60 = vadd.f32 %v10774_v14, %v6810_v63  ;;  %6178 = vst.msk [vmem:[#allocation3 + $0xa0] sm:$0xff] %vm1381_vm1, %v6146_v48  ;;  %v6711_v0 = vadd.f32 %v10906_v31, %v6417_v39  ;;  %v6880_v2 = vmax.f32 %v6848_v21, 0.0  ;;  %6740 = vst.msk [vmem:[#allocation3 + $0x80] sm:$0xff] %vm1381_vm1, %v6708_v43  ;;  %v6415_v44 = vld [vmem:[#allocation3 + $0x88] sm:$0xff] }
 0x355   : > { %v6878_v34 = vmax.f32 %v6846_v46, 0.0  ;;  %v6808_v13 = vmul.f32 %v10771_v51, %v6769_v61  ;;  %6181 = vst.msk [vmem:[#allocation3 + $0xb8] sm:$0xff] %vm1381_vm1, %v6149_v7  ;;  %v6147_v59 = vadd.f32 %v10921_v45, %v5853_v28  ;;  %v7123_v5 = vshrl.u32 %v8008_v55, 16  ;;  %v7404_v21 = vld [vmem:[#allocation2 + $0x60] sm:$0xf] }
 0x356   : > { %v7126_v19 = vshll.u32 %v8008_v55, 16  ;;  %v7106_v41 = vshrl.u32 %v8006_v22, 16  ;;  %v7109_v32 = vshll.u32 %v8006_v22, 16  ;;  %6743 = vst.msk [vmem:[#allocation3 + $0x98] sm:$0xff] %vm1381_vm1, %v6711_v0  ;;  %6912 = vst.msk [vmem:[%s9178_s29 + $0x70] sm:$0xff] %vm1381_vm1, %v6880_v2  ;;  %v8011_v54 = vpack.c.bf16 %v6880_v2, %v6880_v2 }
 0x357   : > { %6910 = vst.msk [vmem:[%s9178_s29 + $0x60] sm:$0xff] %vm1381_vm1, %v6878_v34  ;;  %v8009_v45 = vpack.c.bf16 %v6878_v34, %v6878_v34  ;;  %v6881_v11 = vmax.f32 %v6849_v60, 0.0  ;;  %v6847_v27 = vadd.f32 %v10774_v14, %v6808_v13  ;;  %6179 = vst.msk [vmem:[#allocation3 + $0xa8] sm:$0xff] %vm1381_vm1, %v6147_v59  ;;  %v7125_v42 = vrot.slane %v7123_v5, 7  ;;  %v7397_v46 = vld [vmem:[#allocation2 + $0x54] sm:$0xf] }
 0x358   : > { %v7108_v16 = vrot.slane %v7106_v41, 7  ;;  %v6709_v57 = vadd.f32 %v10917_v18, %v6415_v44  ;;  %v7149_v26 = vshrl.u32 %v8011_v54, 16  ;;  %v7152_v3 = vshll.u32 %v8011_v54, 16  ;;  %v7401_v54 = vld [vmem:[#allocation2 + $0x5c] sm:$0x1] }
 0x359   : > { %v10971_v15 = vpop.f32.mrb[132].mxu0  ;;  %v8448_v4 = vpop.f32.mrb[136].mxu1  ;;  %v7132_v30 = vshrl.u32 %v8009_v45, 16  ;;  %v7135_v62 = vshll.u32 %v8009_v45, 16  ;;  %6913 = vst.msk [vmem:[%s9178_s29 + $0x78] sm:$0xff] %vm1381_vm1, %v6881_v11  ;;  %v7128_v1 = vor.u32 %v7126_v19, %v7125_v42  ;;  %v7130_v17 = vrot.slane %v7125_v42, 4 }
 0x35a   : > { %v10980_v29 = vpop.f32.mrb[133].mxu0  ;;  %v10986_v20 = vpop.f32.mrb[137].mxu1  ;;  %v6152_v24 = vadd.f32 %v8448_v4, %v5858_v8  ;;  %v7111_v35 = vor.u32 %v7109_v32, %v7108_v16  ;;  %v7113_v52 = vrot.slane %v7108_v16, 4  ;;  %6741 = vst.msk [vmem:[#allocation3 + $0x88] sm:$0xff] %vm1381_vm1, %v6709_v57  ;;  %v11008_v40 = vrot.slane %v7149_v26, 7  ;;  %v6774_v33 = vld [vmem:[#allocation3 + $0x90] sm:$0xff] }
 0x35b   : > { %v10988_v31 = vpop.f32.mrb[134].mxu0  ;;  %v10991_v25 = vpop.f32.mrb[138].mxu1  ;;  %v11010_v49 = vrot.slane %v7132_v30, 7  ;;  %v8012_v18 = vpack.c.bf16 %v6881_v11, %v6881_v11  ;;  %v6879_v39 = vmax.f32 %v6847_v27, 0.0  ;;  %v7129_v36 = vsel %vm10823_vm14, %v7121_v6, %v7128_v1  ;;  %v6772_v43 = vld [vmem:[#allocation3 + $0x80] sm:$0xff]  ;;  %v6420_v0 = vld [vmem:[#allocation3 + $0xb0] sm:$0xff] }
 0x35c   : > { %v10993_v58 = vpop.f32.mrb[135].mxu0  ;;  %v11001_v50 = vpop.f32.mrb[139].mxu1  ;;  %6184 = vst.msk [vmem:[#allocation3 + $0xd0] sm:$0xff] %vm1381_vm1, %v6152_v24  ;;  %v7395_v63 = vsel %vm10833_vm15, %v7130_v17, %v7394_v56  ;;  %v7112_v48 = vsel %vm10823_vm14, %v7104_v12, %v7111_v35  ;;  %v7388_v53 = vsel %vm10833_vm15, %v7113_v52, %v7387_v9  ;;  %v7154_v47 = vor.u32 %v7152_v3, %v11008_v40  ;;  %v5856_v19 = vld [vmem:[#allocation3 + $0xc0] sm:$0xff]  ;;  %v7408_v32 = vld [vmem:[#allocation2 + $0x68] sm:$0x1] }
 0x35d   : > { %7393 = vst.msk [vmem:[#allocation2 + $0x4c] sm:$0xf] %vm7349_vm8, %v7129_v36  ;;  %7396 = vst [vmem:[#allocation2 + $0x50] sm:$0x1] %v7395_v63  ;;  %v7155_v6 = vrot.slane %v11008_v40, 4  ;;  %v7137_v23 = vor.u32 %v7135_v62, %v11010_v49  ;;  %v7138_v12 = vrot.slane %v11010_v49, 4  ;;  %v8010_v60 = vpack.c.bf16 %v6879_v39, %v6879_v39 }
 0x35e   : > { %7386 = vst.msk [vmem:[#allocation2 + $0x40] sm:$0xf] %vm7349_vm8, %v7112_v48  ;;  %7389 = vst [vmem:[#allocation2 + $0x44] sm:$0x1] %v7388_v53  ;;  %v6775_v7 = vld [vmem:[#allocation3 + $0x98] sm:$0xff]  ;;  %v7157_v55 = vshrl.u32 %v8012_v18, 16  ;;  %v6813_v61 = vmul.f32 %v10771_v51, %v6774_v33  ;;  %v7405_v28 = vsel %vm10814_vm13, %v7154_v47, %v7404_v21  ;;  %v6811_v2 = vmul.f32 %v10771_v51, %v6772_v43 }
 0x35f   : > { %6911 = vst.msk [vmem:[%s9178_s29 + $0x68] sm:$0xff] %vm1381_vm1, %v6879_v39  ;;  %v7160_v22 = vshll.u32 %v8012_v18, 16  ;;  %v7398_v4 = vsel %vm10814_vm13, %v7137_v23, %v7397_v46  ;;  %v6814_v34 = vmul.f32 %v10771_v51, %v6775_v7  ;;  %7406 = vst [vmem:[#allocation2 + $0x60] sm:$0xf] %v7405_v28  ;;  %v7140_v59 = vshrl.u32 %v8010_v60, 16  ;;  %v6418_v41 = vld [vmem:[#allocation3 + $0xa0] sm:$0xff] }
 0x360   : > { %7399 = vst [vmem:[#allocation2 + $0x54] sm:$0xf] %v7398_v4  ;;  %v7159_v13 = vrot.slane %v7157_v55, 7  ;;  %v7143_v44 = vshll.u32 %v8010_v60, 16  ;;  %v6852_v5 = vadd.f32 %v10774_v14, %v6813_v61  ;;  %v6850_v45 = vadd.f32 %v10774_v14, %v6811_v2  ;;  %v5859_v53 = vld [vmem:[#allocation3 + $0xd8] sm:$0xff]  ;;  %v6419_v23 = vld [vmem:[#allocation3 + $0xa8] sm:$0xff] }
 0x361   : > { %v6853_v11 = vadd.f32 %v10774_v14, %v6814_v34  ;;  %v6773_v27 = vld [vmem:[#allocation3 + $0x88] sm:$0xff]  ;;  %v6714_v8 = vadd.f32 %v10971_v15, %v6420_v0  ;;  %v6150_v42 = vadd.f32 %v10986_v20, %v5856_v19  ;;  %v7142_v24 = vrot.slane %v7140_v59, 7  ;;  %v6421_v20 = vld [vmem:[#allocation3 + $0xb8] sm:$0xff]  ;;  %v7418_v34 = vld [vmem:[#allocation2 + $0x78] sm:$0xf] }
 0x362   : > { %v7162_v16 = vor.u32 %v7160_v22, %v7159_v13  ;;  %v7164_v57 = vrot.slane %v7159_v13, 4  ;;  %v6884_v9 = vmax.f32 %v6852_v5, 0.0  ;;  %v6882_v30 = vmax.f32 %v6850_v45, 0.0  ;;  %v5857_v61 = vld [vmem:[#allocation3 + $0xc8] sm:$0xff]  ;;  %v5860_v5 = vld [vmem:[#allocation3 + $0xe0] sm:$0xff] }
 0x363   : > { %v6885_v62 = vmax.f32 %v6853_v11, 0.0  ;;  %v6812_v1 = vmul.f32 %v10771_v51, %v6773_v27  ;;  %6746 = vst.msk [vmem:[#allocation3 + $0xb0] sm:$0xff] %vm1381_vm1, %v6714_v8  ;;  %6182 = vst.msk [vmem:[#allocation3 + $0xc0] sm:$0xff] %vm1381_vm1, %v6150_v42  ;;  %v6712_v15 = vadd.f32 %v10980_v29, %v6418_v41  ;;  %v7145_v49 = vor.u32 %v7143_v44, %v7142_v24  ;;  %v6424_v0 = vld [vmem:[#allocation3 + $0xd0] sm:$0xff] }
 0x364   : > { %v7163_v52 = vsel %vm10823_vm14, %v7155_v6, %v7162_v16  ;;  %v7409_v40 = vsel %vm10833_vm15, %v7164_v57, %v7408_v32  ;;  %v7147_v18 = vrot.slane %v7142_v24, 4  ;;  %6916 = vst.msk [vmem:[%s9178_s29 + $0x90] sm:$0xff] %vm1381_vm1, %v6884_v9  ;;  %v8015_v29 = vpack.c.bf16 %v6884_v9, %v6884_v9  ;;  %6914 = vst.msk [vmem:[%s9178_s29 + $0x80] sm:$0xff] %vm1381_vm1, %v6882_v30  ;;  %v7411_v41 = vld [vmem:[#allocation2 + $0x6c] sm:$0xf] }
 0x365   : > { %7407 = vst.msk [vmem:[#allocation2 + $0x64] sm:$0xf] %vm7349_vm8, %v7163_v52  ;;  %7410 = vst [vmem:[#allocation2 + $0x68] sm:$0x1] %v7409_v40  ;;  %v8013_v36 = vpack.c.bf16 %v6882_v30, %v6882_v30  ;;  %v8016_v63 = vpack.c.bf16 %v6885_v62, %v6885_v62  ;;  %v6851_v48 = vadd.f32 %v10774_v14, %v6812_v1  ;;  %v7422_v57 = vld [vmem:[#allocation2 + $0x80] sm:$0x1] }
 0x366   : > { %6917 = vst.msk [vmem:[%s9178_s29 + $0x98] sm:$0xff] %vm1381_vm1, %v6885_v62  ;;  %6744 = vst.msk [vmem:[#allocation3 + $0xa0] sm:$0xff] %vm1381_vm1, %v6712_v15  ;;  %v7146_v46 = vsel %vm10823_vm14, %v7138_v12, %v7145_v49  ;;  %v7402_v43 = vsel %vm10833_vm15, %v7147_v18, %v7401_v54  ;;  %v6153_v47 = vadd.f32 %v10991_v25, %v5859_v53  ;;  %v7183_v7 = vshrl.u32 %v8015_v29, 16  ;;  %v5862_v25 = vld [vmem:[#allocation3 + $0xf0] sm:$0xff]  ;;  %v7415_v53 = vld [vmem:[#allocation2 + $0x74] sm:$0x1] }
 0x367   : > { %v11044_v56 = vpop.f32.mrb[136].mxu0  ;;  %v8452_v26 = vpop.f32.mrb[140].mxu1  ;;  %v6715_v6 = vadd.f32 %v10988_v31, %v6421_v20  ;;  %7400 = vst.msk [vmem:[#allocation2 + $0x58] sm:$0xf] %vm7349_vm8, %v7146_v46  ;;  %7403 = vst [vmem:[#allocation2 + $0x5c] sm:$0x1] %v7402_v43  ;;  %v6151_v31 = vadd.f32 %v11001_v50, %v5857_v61  ;;  %v6713_v59 = vadd.f32 %v10993_v58, %v6419_v23 }
 0x368   : > { %v11046_v3 = vpop.f32.mrb[137].mxu0  ;;  %v6111_v17 = vpop.f32.mrb[141].mxu1  ;;  %v7186_v55 = vshll.u32 %v8015_v29, 16  ;;  %v7166_v22 = vshrl.u32 %v8013_v36, 16  ;;  %v7169_v60 = vshll.u32 %v8013_v36, 16  ;;  %v7191_v28 = vshrl.u32 %v8016_v63, 16 }
 0x369   : > { %v11052_v35 = vpop.f32.mrb[138].mxu0  ;;  %v11060_v39 = vpop.f32.mrb[142].mxu1  ;;  %v7194_v12 = vshll.u32 %v8016_v63, 16  ;;  %v6883_v4 = vmax.f32 %v6851_v48, 0.0  ;;  %6185 = vst.msk [vmem:[#allocation3 + $0xd8] sm:$0xff] %vm1381_vm1, %v6153_v47  ;;  %6747 = vst.msk [vmem:[#allocation3 + $0xb8] sm:$0xff] %vm1381_vm1, %v6715_v6  ;;  %v6156_v44 = vadd.f32 %v8452_v26, %v5862_v25  ;;  %v6718_v50 = vadd.f32 %v11044_v56, %v6424_v0 }
 0x36a   : > { %v11062_v33 = vpop.f32.mrb[139].mxu0  ;;  %v11071_v21 = vpop.f32.mrb[143].mxu1  ;;  %v7185_v2 = vrot.slane %v7183_v7, 7  ;;  %v11083_v13 = vrot.slane %v7166_v22, 7  ;;  %v7193_v32 = vrot.slane %v7191_v28, 7  ;;  %v6778_v45 = vld [vmem:[#allocation3 + $0xb0] sm:$0xff]  ;;  %v6154_v11 = vadd.f32 %v6111_v17, %v5860_v5 }
 0x36b   : > { %6915 = vst.msk [vmem:[%s9178_s29 + $0x88] sm:$0xff] %vm1381_vm1, %v6883_v4  ;;  %v8014_v54 = vpack.c.bf16 %v6883_v4, %v6883_v4  ;;  %6183 = vst.msk [vmem:[#allocation3 + $0xc8] sm:$0xff] %vm1381_vm1, %v6151_v31  ;;  %v6422_v24 = vld [vmem:[#allocation3 + $0xc0] sm:$0xff]  ;;  %v6817_v52 = vmul.f32 %v10771_v51, %v6778_v45  ;;  %v5863_v63 = vld [vmem:[#allocation3 + $0xf8] sm:$0xff] }
 0x36c   : > { %v7188_v8 = vor.u32 %v7186_v55, %v7185_v2  ;;  %v7189_v42 = vrot.slane %v7185_v2, 4  ;;  %v7171_v58 = vor.u32 %v7169_v60, %v11083_v13  ;;  %v7172_v16 = vrot.slane %v11083_v13, 4  ;;  %6745 = vst.msk [vmem:[#allocation3 + $0xa8] sm:$0xff] %vm1381_vm1, %v6713_v59  ;;  %6188 = vst.msk [vmem:[#allocation3 + $0xf0] sm:$0xff] %vm1381_vm1, %v6156_v44  ;;  %v5861_v48 = vld [vmem:[#allocation3 + $0xe8] sm:$0xff] }
 0x36d   : > { %v7196_v26 = vor.u32 %v7194_v12, %v7193_v32  ;;  %v7198_v30 = vrot.slane %v7193_v32, 4  ;;  %v7174_v56 = vshrl.u32 %v8014_v54, 16  ;;  %v7177_v62 = vshll.u32 %v8014_v54, 16  ;;  %v6776_v1 = vld [vmem:[#allocation3 + $0xa0] sm:$0xff]  ;;  %6750 = vst.msk [vmem:[#allocation3 + $0xd0] sm:$0xff] %vm1381_vm1, %v6718_v50  ;;  %6186 = vst.msk [vmem:[#allocation3 + $0xe0] sm:$0xff] %vm1381_vm1, %v6154_v11 }
 0x36e   : > { %v7419_v20 = vsel %vm10814_vm13, %v7188_v8, %v7418_v34  ;;  %v7412_v17 = vsel %vm10814_vm13, %v7171_v58, %v7411_v41  ;;  %v6815_v40 = vmul.f32 %v10771_v51, %v6776_v1  ;;  %v6716_v36 = vadd.f32 %v11046_v3, %v6422_v24  ;;  %v11137_v2 = vld [vmem:[#allocation9] ss:$0 sm:$0xff]  ;;  %v7432_v54 = vld [vmem:[#allocation2 + $0x90] sm:$0xf]  ;;  %v7425_v45 = vld [vmem:[#allocation2 + $0x84] sm:$0xf] }
 0x36f   : > { %v11086_v19 = vpop.f32.mrb[140].mxu0  ;;  %7420 = vst [vmem:[#allocation2 + $0x78] sm:$0xf] %v7419_v20  ;;  %7413 = vst [vmem:[#allocation2 + $0x6c] sm:$0xf] %v7412_v17  ;;  %v7197_v49 = vsel %vm10823_vm14, %v7189_v42, %v7196_v26  ;;  %v7423_v18 = vsel %vm10833_vm15, %v7198_v30, %v7422_v57  ;;  %v7176_v29 = vrot.slane %v7174_v56, 7  ;;  %v6856_v46 = vadd.f32 %v10774_v14, %v6817_v52 }
 0x370   : > { %v11092_v27 = vpop.f32.mrb[141].mxu0  ;;  %7421 = vst.msk [vmem:[#allocation2 + $0x7c] sm:$0xf] %vm7349_vm8, %v7197_v49  ;;  %7424 = vst [vmem:[#allocation2 + $0x80] sm:$0x1] %v7423_v18  ;;  %v6854_v43 = vadd.f32 %v10774_v14, %v6815_v40  ;;  %v6779_v47 = vld [vmem:[#allocation3 + $0xb8] sm:$0xff]  ;;  %v6157_v6 = vadd.f32 %v11060_v39, %v5863_v63  ;;  %v6155_v7 = vadd.f32 %v11071_v21, %v5861_v48 }
 0x371   : > { %v11098_v9 = vpop.f32.mrb[142].mxu0  ;;  %v6425_v23 = vld [vmem:[#allocation3 + $0xd8] sm:$0xff]  ;;  %v7179_v55 = vor.u32 %v7177_v62, %v7176_v29  ;;  %v7181_v22 = vrot.slane %v7176_v29, 4  ;;  %v6818_v3 = vmul.f32 %v10771_v51, %v6779_v47  ;;  %6748 = vst.msk [vmem:[#allocation3 + $0xc0] sm:$0xff] %vm1381_vm1, %v6716_v36  ;;  %v6888_v61 = vmax.f32 %v6856_v46, 0.0 }
 0x372   : > { %v11102_v15 = vpop.f32.mrb[143].mxu0  ;;  %v6719_v60 = vadd.f32 %v11052_v35, %v6425_v23  ;;  %v6886_v0 = vmax.f32 %v6854_v43, 0.0  ;;  %6189 = vst.msk [vmem:[#allocation3 + $0xf8] sm:$0xff] %vm1381_vm1, %v6157_v6  ;;  %6187 = vst.msk [vmem:[#allocation3 + $0xe8] sm:$0xff] %vm1381_vm1, %v6155_v7  ;;  %v6423_v39 = vld [vmem:[#allocation3 + $0xc8] sm:$0xff] }
 0x373   : > { %v7180_v21 = vsel %vm10823_vm14, %v7172_v16, %v7179_v55  ;;  %v7416_v28 = vsel %vm10833_vm15, %v7181_v22, %v7415_v53  ;;  %v6857_v51 = vadd.f32 %v10774_v14, %v6818_v3  ;;  %v6777_v12 = vld [vmem:[#allocation3 + $0xa8] sm:$0xff]  ;;  %v6717_v35 = vadd.f32 %v11062_v33, %v6423_v39  ;;  %v6428_v4 = vld [vmem:[#allocation3 + $0xf0] sm:$0xff]  ;;  %6920 = vst.msk [vmem:[%s9178_s29 + $0xb0] sm:$0xff] %vm1381_vm1, %v6888_v61  ;;  %v7436_v53 = vld [vmem:[#allocation2 + $0x98] sm:$0x1] }
 0x374   : > { %6751 = vst.msk [vmem:[#allocation3 + $0xd8] sm:$0xff] %vm1381_vm1, %v6719_v60  ;;  %7417 = vst [vmem:[#allocation2 + $0x74] sm:$0x1] %v7416_v28  ;;  %v8019_v31 = vpack.c.bf16 %v6888_v61, %v6888_v61  ;;  %v8017_v25 = vpack.c.bf16 %v6886_v0, %v6886_v0  ;;  %v6816_v14 = vmul.f32 %v11137_v2, %v6777_v12  ;;  %v6782_v34 = vld [vmem:[#allocation3 + $0xd0] sm:$0xff]  ;;  %v6426_v59 = vld [vmem:[#allocation3 + $0xe0] sm:$0xff] }
 0x375   : > { %7414 = vst.msk [vmem:[#allocation2 + $0x70] sm:$0xf] %vm7349_vm8, %v7180_v21  ;;  %v6722_v13 = vadd.f32 %v11086_v19, %v6428_v4  ;;  %v6889_v33 = vmax.f32 %v6857_v51, 0.0  ;;  %v6821_v44 = vmul.f32 %v11137_v2, %v6782_v34  ;;  %v6720_v5 = vadd.f32 %v11092_v27, %v6426_v59  ;;  %v11147_v11 = vld [vmem:[#allocation10] ss:$0 sm:$0xff] }
 0x376   : > { %6918 = vst.msk [vmem:[%s9178_s29 + $0xa0] sm:$0xff] %vm1381_vm1, %v6886_v0  ;;  %6749 = vst.msk [vmem:[#allocation3 + $0xc8] sm:$0xff] %vm1381_vm1, %v6717_v35  ;;  %v7217_v41 = vshrl.u32 %v8019_v31, 16  ;;  %v7200_v32 = vshrl.u32 %v8017_v25, 16  ;;  %v6855_v19 = vadd.f32 %v11147_v11, %v6816_v14  ;;  %v7220_v27 = vshll.u32 %v8019_v31, 16 }
 0x377   : > { %6754 = vst.msk [vmem:[#allocation3 + $0xf0] sm:$0xff] %vm1381_vm1, %v6722_v13  ;;  %6921 = vst.msk [vmem:[%s9178_s29 + $0xb8] sm:$0xff] %vm1381_vm1, %v6889_v33  ;;  %v8020_v50 = vpack.c.bf16 %v6889_v33, %v6889_v33  ;;  %v6860_v8 = vadd.f32 %v11147_v11, %v6821_v44  ;;  %v7203_v16 = vshll.u32 %v8017_v25, 16  ;;  %v7429_v12 = vld [vmem:[#allocation2 + $0x8c] sm:$0x1] }
 0x378   : > { %6752 = vst.msk [vmem:[#allocation3 + $0xe0] sm:$0xff] %vm1381_vm1, %v6720_v5  ;;  %v7219_v42 = vrot.slane %v7217_v41, 7  ;;  %v7202_v58 = vrot.slane %v7200_v32, 7  ;;  %v6780_v57 = vld [vmem:[#allocation3 + $0xc0] sm:$0xff]  ;;  %v6887_v30 = vmax.f32 %v6855_v19, 0.0 }
 0x379   : > { %v7225_v24 = vshrl.u32 %v8020_v50, 16  ;;  %v7228_v26 = vshll.u32 %v8020_v50, 16  ;;  %v6892_v56 = vmax.f32 %v6860_v8, 0.0  ;;  %v6429_v62 = vld [vmem:[#allocation3 + $0xf8] sm:$0xff]  ;;  %v6819_v36 = vmul.f32 %v11137_v2, %v6780_v57  ;;  %v7446_v13 = vld [vmem:[#allocation2 + $0xa8] sm:$0xf] }
 0x37a   : > { %v7222_v1 = vor.u32 %v7220_v27, %v7219_v42  ;;  %v7223_v20 = vrot.slane %v7219_v42, 4  ;;  %v7205_v17 = vor.u32 %v7203_v16, %v7202_v58  ;;  %v7206_v52 = vrot.slane %v7202_v58, 4  ;;  %6919 = vst.msk [vmem:[%s9178_s29 + $0xa8] sm:$0xff] %vm1381_vm1, %v6887_v30  ;;  %v6427_v8 = vld [vmem:[#allocation3 + $0xe8] sm:$0xff] }
 0x37b   : > { %v6783_v40 = vld [vmem:[#allocation3 + $0xd8] sm:$0xff]  ;;  %v7227_v49 = vrot.slane %v7225_v24, 7  ;;  %v8018_v18 = vpack.c.bf16 %v6887_v30, %v6887_v30  ;;  %6924 = vst.msk [vmem:[%s9178_s29 + $0xd0] sm:$0xff] %vm1381_vm1, %v6892_v56  ;;  %v8023_v29 = vpack.c.bf16 %v6892_v56, %v6892_v56  ;;  %v6723_v47 = vadd.f32 %v11098_v9, %v6429_v62 }
 0x37c   : > { %v7433_v63 = vsel %vm10814_vm13, %v7222_v1, %v7432_v54  ;;  %v7426_v48 = vsel %vm10814_vm13, %v7205_v17, %v7425_v45  ;;  %v6822_v46 = vmul.f32 %v11137_v2, %v6783_v40  ;;  %v6858_v61 = vadd.f32 %v11147_v11, %v6819_v36  ;;  %v7439_v1 = vld [vmem:[#allocation2 + $0x9c] sm:$0xf]  ;;  %v7450_v40 = vld [vmem:[#allocation2 + $0xb0] sm:$0x1] }
 0x37d   : > { %v6781_v43 = vld [vmem:[#allocation3 + $0xc8] sm:$0xff]  ;;  %7434 = vst [vmem:[#allocation2 + $0x90] sm:$0xf] %v7433_v63  ;;  %7427 = vst [vmem:[#allocation2 + $0x84] sm:$0xf] %v7426_v48  ;;  %v7230_v6 = vor.u32 %v7228_v26, %v7227_v49  ;;  %v7232_v23 = vrot.slane %v7227_v49, 4 }
 0x37e   : > { %v7208_v7 = vshrl.u32 %v8018_v18, 16  ;;  %v7211_v55 = vshll.u32 %v8018_v18, 16  ;;  %v6786_v22 = vld [vmem:[#allocation3 + $0xf0] sm:$0xff]  ;;  %v7251_v3 = vshrl.u32 %v8023_v29, 16  ;;  %v7254_v60 = vshll.u32 %v8023_v29, 16  ;;  %6755 = vst.msk [vmem:[#allocation3 + $0xf8] sm:$0xff] %vm1381_vm1, %v6723_v47 }
 0x37f   : > { %v6861_v0 = vadd.f32 %v11147_v11, %v6822_v46  ;;  %v6784_v39 = vld [vmem:[#allocation3 + $0xe0] sm:$0xff]  ;;  %v7231_v21 = vsel %vm10823_vm14, %v7223_v20, %v7230_v6  ;;  %v7437_v9 = vsel %vm10833_vm15, %v7232_v23, %v7436_v53  ;;  %v6820_v51 = vmul.f32 %v11137_v2, %v6781_v43 }
 0x380   : > { %v7210_v28 = vrot.slane %v7208_v7, 7  ;;  %7435 = vst.msk [vmem:[#allocation2 + $0x94] sm:$0xf] %vm7349_vm8, %v7231_v21  ;;  %7438 = vst [vmem:[#allocation2 + $0x98] sm:$0x1] %v7437_v9  ;;  %v7253_v35 = vrot.slane %v7251_v3, 7  ;;  %v6825_v25 = vmul.f32 %v11137_v2, %v6786_v22  ;;  %v6823_v33 = vmul.f32 %v11137_v2, %v6784_v39 }
 0x381   : > { %v6890_v4 = vmax.f32 %v6858_v61, 0.0  ;;  %v6893_v31 = vmax.f32 %v6861_v0, 0.0  ;;  %v6859_v59 = vadd.f32 %v11147_v11, %v6820_v51  ;;  %v7443_v22 = vld [vmem:[#allocation2 + $0xa4] sm:$0x1]  ;;  %v7460_v21 = vld [vmem:[#allocation2 + $0xc0] sm:$0xf] }
 0x382   : > { %v7213_v14 = vor.u32 %v7211_v55, %v7210_v28  ;;  %v7215_v34 = vrot.slane %v7210_v28, 4  ;;  %v7256_v44 = vor.u32 %v7254_v60, %v7253_v35  ;;  %v7257_v5 = vrot.slane %v7253_v35, 4 }
 0x383   : > { %6922 = vst.msk [vmem:[%s9178_s29 + $0xc0] sm:$0xff] %vm1381_vm1, %v6890_v4  ;;  %v8021_v41 = vpack.c.bf16 %v6890_v4, %v6890_v4  ;;  %6925 = vst.msk [vmem:[%s9178_s29 + $0xd8] sm:$0xff] %vm1381_vm1, %v6893_v31  ;;  %v8024_v32 = vpack.c.bf16 %v6893_v31, %v6893_v31  ;;  %v6891_v50 = vmax.f32 %v6859_v59, 0.0  ;;  %v6864_v19 = vadd.f32 %v11147_v11, %v6825_v25 }
 0x384   : > { %v7214_v54 = vsel %vm10823_vm14, %v7206_v52, %v7213_v14  ;;  %v7430_v45 = vsel %vm10833_vm15, %v7215_v34, %v7429_v12  ;;  %v7447_v42 = vsel %vm10814_vm13, %v7256_v44, %v7446_v13  ;;  %v6862_v30 = vadd.f32 %v11147_v11, %v6823_v33  ;;  %v7453_v14 = vld [vmem:[#allocation2 + $0xb4] sm:$0xf] }
 0x385   : > { %7428 = vst.msk [vmem:[#allocation2 + $0x88] sm:$0xf] %vm7349_vm8, %v7214_v54  ;;  %7431 = vst [vmem:[#allocation2 + $0x8c] sm:$0x1] %v7430_v45  ;;  %v7234_v27 = vshrl.u32 %v8021_v41, 16  ;;  %v7237_v58 = vshll.u32 %v8021_v41, 16  ;;  %v8022_v24 = vpack.c.bf16 %v6891_v50, %v6891_v50  ;;  %v6721_v52 = vadd.f32 %v11102_v15, %v6427_v8 }
 0x386   : > { %v7259_v16 = vshrl.u32 %v8024_v32, 16  ;;  %7448 = vst [vmem:[#allocation2 + $0xa8] sm:$0xf] %v7447_v42  ;;  %v7262_v57 = vshll.u32 %v8024_v32, 16  ;;  %6923 = vst.msk [vmem:[%s9178_s29 + $0xc8] sm:$0xff] %vm1381_vm1, %v6891_v50  ;;  %v6896_v26 = vmax.f32 %v6864_v19, 0.0 }
 0x387   : > { %v6787_v56 = vld [vmem:[#allocation3 + $0xf8] sm:$0xff]  ;;  %v7236_v62 = vrot.slane %v7234_v27, 7  ;;  %v7242_v49 = vshrl.u32 %v8022_v24, 16  ;;  %v7245_v18 = vshll.u32 %v8022_v24, 16  ;;  %v6894_v36 = vmax.f32 %v6862_v30, 0.0  ;;  %6753 = vst.msk [vmem:[#allocation3 + $0xe8] sm:$0xff] %vm1381_vm1, %v6721_v52 }
 0x388   : > { %v7261_v20 = vrot.slane %v7259_v16, 7  ;;  %v6826_v17 = vmul.f32 %v11137_v2, %v6787_v56  ;;  %6928 = vst.msk [vmem:[%s9178_s29 + $0xf0] sm:$0xff] %vm1381_vm1, %v6896_v26  ;;  %v8027_v29 = vpack.c.bf16 %v6896_v26, %v6896_v26  ;;  %v7464_v32 = vld [vmem:[#allocation2 + $0xc8] sm:$0x1] }
 0x389   : > { %v7239_v63 = vor.u32 %v7237_v58, %v7236_v62  ;;  %v7240_v48 = vrot.slane %v7236_v62, 4  ;;  %v7244_v43 = vrot.slane %v7242_v49, 7  ;;  %6926 = vst.msk [vmem:[%s9178_s29 + $0xe0] sm:$0xff] %vm1381_vm1, %v6894_v36  ;;  %v8025_v15 = vpack.c.bf16 %v6894_v36, %v6894_v36 }
 0x38a   : > { %v7264_v53 = vor.u32 %v7262_v57, %v7261_v20  ;;  %v7266_v46 = vrot.slane %v7261_v20, 4  ;;  %v7285_v47 = vshrl.u32 %v8027_v29, 16  ;;  %v7288_v6 = vshll.u32 %v8027_v29, 16 }
 0x38b   : > { %v7440_v23 = vsel %vm10814_vm13, %v7239_v63, %v7439_v1  ;;  %v6865_v3 = vadd.f32 %v11147_v11, %v6826_v17  ;;  %v7247_v60 = vor.u32 %v7245_v18, %v7244_v43  ;;  %v7249_v61 = vrot.slane %v7244_v43, 4 }
 0x38c   : > { %v7265_v7 = vsel %vm10823_vm14, %v7257_v5, %v7264_v53  ;;  %v7451_v55 = vsel %vm10833_vm15, %v7266_v46, %v7450_v40  ;;  %7441 = vst [vmem:[#allocation2 + $0x9c] sm:$0xf] %v7440_v23  ;;  %v7287_v0 = vrot.slane %v7285_v47, 7  ;;  %v7268_v39 = vshrl.u32 %v8025_v15, 16 }
 0x38d   : > { %7449 = vst.msk [vmem:[#allocation2 + $0xac] sm:$0xf] %vm7349_vm8, %v7265_v7  ;;  %7452 = vst [vmem:[#allocation2 + $0xb0] sm:$0x1] %v7451_v55  ;;  %v6897_v9 = vmax.f32 %v6865_v3, 0.0  ;;  %v7248_v28 = vsel %vm10823_vm14, %v7240_v48, %v7247_v60  ;;  %v7444_v51 = vsel %vm10833_vm15, %v7249_v61, %v7443_v22  ;;  %v7271_v4 = vshll.u32 %v8025_v15, 16 }
 0x38e   : > { %v7290_v12 = vor.u32 %v7288_v6, %v7287_v0  ;;  %7442 = vst.msk [vmem:[#allocation2 + $0xa0] sm:$0xf] %vm7349_vm8, %v7248_v28  ;;  %7445 = vst [vmem:[#allocation2 + $0xa4] sm:$0x1] %v7444_v51  ;;  %v11212_v35 = vrot.slane %v7268_v39, 7  ;;  %v6785_v34 = vld [vmem:[#allocation3 + $0xe8] sm:$0xff] }
 0x38f   : > { %6929 = vst.msk [vmem:[%s9178_s29 + $0xf8] sm:$0xff] %vm1381_vm1, %v6897_v9  ;;  %v8028_v31 = vpack.c.bf16 %v6897_v9, %v6897_v9  ;;  %v6824_v33 = vmul.f32 %v11137_v2, %v6785_v34  ;;  %v7291_v45 = vrot.slane %v7287_v0, 4 }
 0x390   : > { %v7461_v25 = vsel %vm10814_vm13, %v7290_v12, %v7460_v21  ;;  %v7273_v13 = vor.u32 %v7271_v4, %v11212_v35 }
 0x391   : > { %7462 = vst [vmem:[#allocation2 + $0xc0] sm:$0xf] %v7461_v25  ;;  %v7293_v59 = vshrl.u32 %v8028_v31, 16  ;;  %v7296_v41 = vshll.u32 %v8028_v31, 16  ;;  %v6863_v54 = vadd.f32 %v11147_v11, %v6824_v33 }
 0x392   : > { %v7454_v44 = vsel %vm10814_vm13, %v7273_v13, %v7453_v14 }
 0x393   : > { %v7295_v5 = vrot.slane %v7293_v59, 7  ;;  %7455 = vst [vmem:[#allocation2 + $0xb4] sm:$0xf] %v7454_v44  ;;  %v6895_v38 = vmax.f32 %v6863_v54, 0.0 }
 0x395   : > { %v7298_v50 = vor.u32 %v7296_v41, %v7295_v5  ;;  %v7300_v19 = vrot.slane %v7295_v5, 4  ;;  %6927 = vst.msk [vmem:[%s9178_s29 + $0xe8] sm:$0xff] %vm1381_vm1, %v6895_v38  ;;  %v8026_v8 = vpack.c.bf16 %v6895_v38, %v6895_v38 }
 0x397   : > { %v7299_v2 = vsel %vm10823_vm14, %v7291_v45, %v7298_v50  ;;  %v7465_v11 = vsel %vm10833_vm15, %v7300_v19, %v7464_v32 }
 0x398   : > { %7463 = vst.msk [vmem:[#allocation2 + $0xc4] sm:$0xf] %vm7349_vm8, %v7299_v2  ;;  %7466 = vst [vmem:[#allocation2 + $0xc8] sm:$0x1] %v7465_v11 }
 0x399   : > { %8794 = shalt.err (!%p8791_p8)
}
 0x39a   : > { %s8795_s15 = scalar_lea.hbm %s11227_s23, 4096  ;;  %s8799_s3 = scalar_lea.hbm %s11353_s14, 24576 }
 0x39b   : > { %p8796_p12 = scmp.ne.s32.totalorder %s11227_s23, %s8795_s15  ;;  %p8800_p9 = scmp.lt.u32.totalorder %s11227_s23, %s11353_s14 }
 0x39c   : > { %p8801_p6 = scmp.lt.u32.totalorder %s8799_s3, %s8795_s15  ;;  %p8803_p10 = scmp.lt.u32.totalorder %s8795_s15, %s11227_s23 }
 0x39d   : > { %p8797_p13 = pnand %p8796_p12, %p9094_p3 }
 0x39e   : > { %p8802_p0 = por %p8801_p6, %p8800_p9 }
 0x39f   : > { %p8798_p4 = pneg %p8797_p13 }
 0x3a0   : > { %p8804_p5 = por %p8803_p10, %p8802_p0 }
 0x3a2   : > { %p8805_p7 = pnand %p8804_p5, %p8798_p4 }
 0x3a4   : > { %8808 = shalt.err (!%p8805_p7)
}
 0x3a5   : > { %s8900_s25 = smov 128   ;;  %s8901_s27 = smov 8   ;;  %v7276_v42 = vshrl.u32 %v8026_v8, 16  ;;  %v7279_v58 = vshll.u32 %v8026_v8, 16  ;;  %v7457_v16 = vld [vmem:[#allocation2 + $0xbc] sm:$0x1] }
 0x3a6   : > { %8514 = dma.vmem_to_hbm [thread:$0]  (%p9094_p3), %s11229_s9, 4096, %s11227_s23, %s7468_s12, %s8900_s25, %s8900_s25, %s8901_s27   ;;  %v7274_v57 = vrot.slane %v11212_v35, 4 }
 0x3a7   : > { %v7278_v27 = vrot.slane %v7276_v42, 7 }
 0x3a9   : > { %v7281_v24 = vor.u32 %v7279_v58, %v7278_v27  ;;  %v7283_v26 = vrot.slane %v7278_v27, 4 }
 0x3ab   : > { %v7282_v30 = vsel %vm10823_vm14, %v7274_v57, %v7281_v24  ;;  %v7458_v56 = vsel %vm10833_vm15, %v7283_v26, %v7457_v16 }
 0x3ac   : > { %7456 = vst.msk [vmem:[#allocation2 + $0xb8] sm:$0xf] %vm7349_vm8, %v7282_v30  ;;  %7459 = vst [vmem:[#allocation2 + $0xbc] sm:$0x1] %v7458_v56 }
 0x3ad PF: > { %s11354_s11 = sld [smem:[#allocation17_spill]]  ;;  %s11355_s13 = sld [smem:[#allocation18_spill]] }
 0x3ae   : > { %p8541_p3 = scmp.ge.s32.totalorder %s8887_s22, 2 }
 0x3b3   : > { %s7498_s18 = sand.u32 1, %s11354_s11   ;;  %p11356_p11 = scmp.ne.s32.totalorder %s11355_s13, 0 }
 0x3b4   : > { %s7499_s19 = scalar_lea.sflag [#allocation6], %s7498_s18 }
 0x3b5   : > { %p8531_p1 = pnand %p8541_p3, %p11356_p11 }
 0x3b7   : > { %8854 = dma.done.wait (!%p8531_p1), %s7499_s19, 4096  }
 0x3b8   : > { %8856 = vsyncadd (!%p8531_p1), %s7499_s19, 4294963200  ;;  %s22_s22 = sadd.s32 1, %s8887_s22   ;;  %s11357_s15 = smov %s8863_s16 }
 0x3b9   : > { %p19_p2 = scmp.ge.s32.totalorder %s22_s22, 8   ;;  %s11358_s16 = smov %s8867_s17 }
 0x3ba   : > { %s11359_s17 = smov %s9111_s8  ;;  %s11360_s18 = smov %s8879_s20 }
 0x3bb   : > { %s11361_s19 = smov %s8883_s21  ;;  %s11362_s20 = smov %s11365_s24 }
 0x3bc   : > { %s11363_s21 = smov %s11369_s6  ;;  %21 = sbr.rel (!%p19_p2) target bundleno = 14 (0xe), region = 113 }
 0x3c3   :  { %7504 = vsyncpa [#allocation5], 1 }
 0x3c4   :  { %7506 = vsyncpa [#allocation5 + $0x1], 1 }
 0x3c5   :  { %7507 = vsyncpa [#allocation8], 1 }
 0x3c6   :  { %7508 = vsyncpa [#allocation11], 1 }
 0x3c7   :  { %7509 = vsyncpa [#allocation6], 1 }
 0x3c8   :  { %7511 = vsyncpa [#allocation6 + $0x1], 1 }

</bundles_post_ra>
